<compile_context>
chip_gen: v7x
topology: tpu7x:2x2x1
jax: 0.10.0
libtpu: 0.0.40
codegen_flags: <defaults>
</compile_context>

<pallas_src>
import functools

import jax
import jax.numpy as jnp
from jax.experimental import pallas as pl
from jax.experimental.pallas import tpu as pltpu


# ---------------------------------------------------------------------------
# Fused SPPF kernel: one image per grid step, everything resident in VMEM.
# ---------------------------------------------------------------------------
def _sppf_fused_kernel(x_ref, w1_ref, b1_ref, w2_ref, b2_ref, o_ref,
                       pad_ref, acc_ref, *, H, W, c_mid, K, LEFT, Wp):
    # x_ref   : (1, H, W, C1)        input image (NHWC, f32)
    # w1_ref  : (C1, c_mid)          folded cv1 weight (bf16)
    # b1_ref  : (1, c_mid)           folded cv1 bias   (f32)
    # w2_ref  : (4*c_mid, c2)        folded cv2 weight (bf16)
    # b2_ref  : (1, c2)              folded cv2 bias   (f32)
    # o_ref   : (1, H, W, c2)        output image (NHWC, f32)
    # pad_ref : (H+2p, Wp, c_mid)    VMEM scratch: -inf padded pool buffer,
    #                                interior at rows [p, p+H), cols [LEFT, LEFT+W)
    # acc_ref : (H*W, c2)            VMEM scratch: cv2 f32 accumulator
    p = K // 2
    Hp = H + 2 * p
    c1 = x_ref.shape[-1]
    c2 = o_ref.shape[-1]

    # ---- refresh the -inf border of the pool scratch (interior is always
    # ---- overwritten below; border is cheap and core-split-safe) ----------
    pad_ref[0:p, :, :] = jnp.full((p, Wp, c_mid), -jnp.inf, dtype=jnp.float32)
    pad_ref[p + H:Hp, :, :] = jnp.full((Hp - p - H, Wp, c_mid), -jnp.inf,
                                       dtype=jnp.float32)
    pad_ref[:, 0:LEFT, :] = jnp.full((Hp, LEFT, c_mid), -jnp.inf,
                                     dtype=jnp.float32)
    pad_ref[:, LEFT + W:Wp, :] = jnp.full((Hp, Wp - LEFT - W, c_mid), -jnp.inf,
                                          dtype=jnp.float32)

    # ---- cv1: 1x1 conv = bf16 MXU matmul (f32 accum) + folded-BN + SiLU ----
    x2d = x_ref[0].reshape(H * W, c1).astype(jnp.bfloat16)
    y = jnp.dot(x2d, w1_ref[...], preferred_element_type=jnp.float32)
    y = y + b1_ref[...]
    y0 = y * jax.nn.sigmoid(y)                          # (H*W, c_mid), f32

    # ---- cv2 accumulation, stage 0 (the y0 slice of the channel concat) ---
    acc_ref[...] = jnp.dot(y0.astype(jnp.bfloat16), w2_ref[0:c_mid, :],
                           preferred_element_type=jnp.float32)

    # ---- seed the pool buffer interior with y0 (border stays -inf) ---------
    pad_ref[p:p + H, LEFT:LEFT + W, :] = y0.reshape(H, W, c_mid)

    # ---- three successive 5x5 / stride-1 'same' max pools, fused with cv2 -
    for s in range(1, 4):
        # Separable max. Rows (axis 0): shifted whole-plane reads (no sublane
        # offset). Columns (sublane axis): pltpu.roll over the -inf-padded W
        # axis; the >=2-wide halos on both sides make circular wrap harmless.
        rmax = pad_ref[0:H, :, :]
        for di in range(1, K):
            rmax = jnp.maximum(rmax, pad_ref[di:di + H, :, :])
        wmax = rmax
        for dj in range(1, p + 1):
            wmax = jnp.maximum(wmax, pltpu.roll(rmax, dj, axis=1))
            wmax = jnp.maximum(wmax, pltpu.roll(rmax, Wp - dj, axis=1))
        pooled = wmax[:, LEFT:LEFT + W, :]              # (H, W, c_mid)

        # accumulate this pool stage's contribution to cv2 (bf16 MXU, f32 acc)
        acc_ref[...] += jnp.dot(
            pooled.reshape(H * W, c_mid).astype(jnp.bfloat16),
            w2_ref[s * c_mid:(s + 1) * c_mid, :],
            preferred_element_type=jnp.float32)

        if s < 3:                                       # feed next pool stage
            pad_ref[p:p + H, LEFT:LEFT + W, :] = pooled

    # ---- cv2 epilogue: folded-BN bias + SiLU -------------------------------
    z = acc_ref[...] + b2_ref[...]
    o_ref[0] = (z * jax.nn.sigmoid(z)).reshape(H, W, c2)


def sppf_forward(x_nchw, params, k=5):
    """SPPF forward.  x: (N, C1, H, W) NCHW -> (N, c2, H, W) NCHW."""
    (w1, b1), (w2, b2) = params
    N, C1, H, W = x_nchw.shape
    c_mid = w1.shape[1]
    c2 = w2.shape[1]
    p = k // 2

    LEFT = 8                                      # 8-aligned interior column offset
    Wp = ((LEFT + W + p + 7) // 8) * 8            # padded W, multiple of 8
    Hp = H + 2 * p

    x_nhwc = jnp.transpose(x_nchw, (0, 2, 3, 1)).astype(jnp.float32)
    w1b = w1.astype(jnp.bfloat16)
    w2b = w2.astype(jnp.bfloat16)
    b1r = b1.reshape(1, c_mid).astype(jnp.float32)
    b2r = b2.reshape(1, c2).astype(jnp.float32)

    kern = functools.partial(_sppf_fused_kernel, H=H, W=W, c_mid=c_mid, K=k,
                             LEFT=LEFT, Wp=Wp)
    out_nhwc = pl.pallas_call(
        kern,
        out_shape=jax.ShapeDtypeStruct((N, H, W, c2), jnp.float32),
        grid=(N,),
        in_specs=[
            pl.BlockSpec((1, H, W, C1), lambda n: (n, 0, 0, 0)),
            pl.BlockSpec((C1, c_mid), lambda n: (0, 0)),
            pl.BlockSpec((1, c_mid), lambda n: (0, 0)),
            pl.BlockSpec((4 * c_mid, c2), lambda n: (0, 0)),
            pl.BlockSpec((1, c2), lambda n: (0, 0)),
        ],
        out_specs=pl.BlockSpec((1, H, W, c2), lambda n: (n, 0, 0, 0)),
        scratch_shapes=[
            pltpu.VMEM((Hp, Wp, c_mid), jnp.float32),   # -inf padded pool buf
            pltpu.VMEM((H * W, c2), jnp.float32),       # cv2 accumulator
        ],
        compiler_params=pltpu.CompilerParams(
            dimension_semantics=("parallel",),
            vmem_limit_bytes=32 * 1024 * 1024),
    )(x_nhwc, w1b, b1r, w2b, b2r)

    return jnp.transpose(out_nhwc, (0, 3, 1, 2))  # back to NCHW


# ---------------------------------------------------------------------------
# Parameter construction: CBS = Conv2d(1x1, no bias) + BatchNorm2d + SiLU.
# BN (eval mode) is folded into the 1x1 conv weight/bias.
# ---------------------------------------------------------------------------
def make_cbs_params(key, cin, cout, eps=1e-5):
    kw, kg, kb, km, kv = jax.random.split(key, 5)
    w = 0.1 * jax.random.normal(kw, (cout, cin), dtype=jnp.float32)  # torch (Cout,Cin,1,1) squeezed
    gamma = 1.0 + 0.1 * jax.random.normal(kg, (cout,), dtype=jnp.float32)
    beta = 0.1 * jax.random.normal(kb, (cout,), dtype=jnp.float32)
    mean = 0.1 * jax.random.normal(km, (cout,), dtype=jnp.float32)
    var = jnp.abs(jax.random.normal(kv, (cout,), dtype=jnp.float32)) + 0.5
    scale = gamma / jnp.sqrt(var + eps)            # (Cout,)
    w_eff = (w * scale[:, None]).T                 # (Cin, Cout) for x @ w
    b_eff = beta - mean * scale                    # (Cout,)
    return w_eff, b_eff


# ---------------------------------------------------------------------------
# Pure-JAX reference (correctness check, full f32)
# ---------------------------------------------------------------------------
def sppf_reference(x_nchw, params, k=5):
    (w1, b1), (w2, b2) = params

    def cbs_ref(x_nhwc, w, b):
        y = jnp.einsum("nhwc,cd->nhwd", x_nhwc, w) + b
        return y * jax.nn.sigmoid(y)

    def pool_ref(x_nhwc):
        p = k // 2
        return jax.lax.reduce_window(
            x_nhwc, -jnp.inf, jax.lax.max,
            window_dimensions=(1, k, k, 1),
            window_strides=(1, 1, 1, 1),
            padding=((0, 0), (p, p), (p, p), (0, 0)),
        )

    x_nhwc = jnp.transpose(x_nchw, (0, 2, 3, 1)).astype(jnp.float32)
    y0 = cbs_ref(x_nhwc, w1, b1)
    y1 = pool_ref(y0)
    y2 = pool_ref(y1)
    y3 = pool_ref(y2)
    cat = jnp.concatenate([y0, y1, y2, y3], axis=-1)
    out = cbs_ref(cat, w2, b2)
    return jnp.transpose(out, (0, 3, 1, 2))


if __name__ == "__main__":
    # SPPF(c1=4, c2=8, k=5) on x of shape (2, 4, 16, 16), NCHW like PyTorch.
    c1, c2, k = 4, 8, 5
    c_ = c1 // 2

    key = jax.random.PRNGKey(0)
    kx, k1, k2 = jax.random.split(key, 3)
    x = jax.random.normal(kx, (2, c1, 16, 16), dtype=jnp.float32)

    cv1 = make_cbs_params(k1, c1, c_)
    cv2 = make_cbs_params(k2, 4 * c_, c2)
    params = (cv1, cv2)

    out = jax.block_until_ready(sppf_forward(x, params, k))
    ref = jax.block_until_ready(sppf_reference(x, params, k))

    assert out.shape == (2, c2, 16, 16)
    # bf16 MXU operands (f32 accumulation) -> tolerance loosened vs. pure f32.
    max_err = float(jnp.max(jnp.abs(out - ref)))
    assert jnp.allclose(out, ref, atol=5e-2, rtol=5e-2), max_err

    print("KERNEL_OK")
</pallas_src>

<mosaic_0001>
module attributes {stable_mosaic.version = 11 : i64} {
  func.func @_sppf_fused_kernel(%arg0: i32, %arg1: memref<1x16x16x4xf32, #tpu.memory_space<vmem>>, %arg2: memref<4x2xbf16, #tpu.memory_space<vmem>>, %arg3: memref<1x2xf32, #tpu.memory_space<vmem>>, %arg4: memref<8x8xbf16, #tpu.memory_space<vmem>>, %arg5: memref<1x8xf32, #tpu.memory_space<vmem>>, %arg6: memref<1x16x16x8xf32, #tpu.memory_space<vmem>>, %arg7: memref<20x32x2xf32, #tpu.memory_space<vmem>>, %arg8: memref<256x8xf32, #tpu.memory_space<vmem>>) attributes {dimension_semantics = [#tpu.dimension_semantics<parallel>], iteration_bounds = array<i64: 2>, scalar_prefetch = 0 : i64, scratch_operands = 2 : i64, tpu.core_type = #tpu.core_type<tc>, window_params = [{transform_indices = @transform_0, window_bounds = array<i64: 1, 16, 16, 4>}, {pipeline_mode = #tpu.pipeline_mode<synchronous>, transform_indices = @transform_1, window_bounds = array<i64: 4, 2>}, {pipeline_mode = #tpu.pipeline_mode<synchronous>, transform_indices = @transform_2, window_bounds = array<i64: 1, 2>}, {pipeline_mode = #tpu.pipeline_mode<synchronous>, transform_indices = @transform_3, window_bounds = array<i64: 8, 8>}, {pipeline_mode = #tpu.pipeline_mode<synchronous>, transform_indices = @transform_4, window_bounds = array<i64: 1, 8>}, {transform_indices = @transform_5, window_bounds = array<i64: 1, 16, 16, 8>}]} {
    %cst = arith.constant 0xFF800000 : f32
    %0 = vector.broadcast %cst : f32 to vector<2x32x2xf32>
    %c0 = arith.constant 0 : index
    %c0_0 = arith.constant 0 : index
    %c0_1 = arith.constant 0 : index
    %1 = vector.load %arg7[%c0, %c0_0, %c0_1] : memref<20x32x2xf32, #tpu.memory_space<vmem>>, vector<2x32x2xf32>
    tpu.vector_store %arg7[%c0, %c0_0, %c0_1], %0 {strides = array<i32>} : memref<20x32x2xf32, #tpu.memory_space<vmem>>, vector<2x32x2xf32>,
    %cst_2 = arith.constant 0xFF800000 : f32
    %2 = vector.broadcast %cst_2 : f32 to vector<2x32x2xf32>
    %c18 = arith.constant 18 : index
    %c0_3 = arith.constant 0 : index
    %c0_4 = arith.constant 0 : index
    %3 = vector.load %arg7[%c18, %c0_3, %c0_4] : memref<20x32x2xf32, #tpu.memory_space<vmem>>, vector<2x32x2xf32>
    tpu.vector_store %arg7[%c18, %c0_3, %c0_4], %2 {strides = array<i32>} : memref<20x32x2xf32, #tpu.memory_space<vmem>>, vector<2x32x2xf32>,
    %cst_5 = arith.constant 0xFF800000 : f32
    %4 = vector.broadcast %cst_5 : f32 to vector<20x8x2xf32>
    %c0_6 = arith.constant 0 : index
    %c0_7 = arith.constant 0 : index
    %c0_8 = arith.constant 0 : index
    %5 = vector.load %arg7[%c0_6, %c0_7, %c0_8] : memref<20x32x2xf32, #tpu.memory_space<vmem>>, vector<20x8x2xf32>
    tpu.vector_store %arg7[%c0_6, %c0_7, %c0_8], %4 {strides = array<i32>} : memref<20x32x2xf32, #tpu.memory_space<vmem>>, vector<20x8x2xf32>,
    %cst_9 = arith.constant 0xFF800000 : f32
    %6 = vector.broadcast %cst_9 : f32 to vector<20x8x2xf32>
    %c0_10 = arith.constant 0 : index
    %c24 = arith.constant 24 : index
    %c0_11 = arith.constant 0 : index
    %7 = vector.load %arg7[%c0_10, %c24, %c0_11] : memref<20x32x2xf32, #tpu.memory_space<vmem>>, vector<20x8x2xf32>
    tpu.vector_store %arg7[%c0_10, %c24, %c0_11], %6 {strides = array<i32>} : memref<20x32x2xf32, #tpu.memory_space<vmem>>, vector<20x8x2xf32>,
    %c0_12 = arith.constant 0 : index
    %c0_13 = arith.constant 0 : index
    %c0_14 = arith.constant 0 : index
    %c0_15 = arith.constant 0 : index
    %8 = vector.load %arg1[%c0_12, %c0_13, %c0_14, %c0_15] : memref<1x16x16x4xf32, #tpu.memory_space<vmem>>, vector<1x16x16x4xf32>
    %9 = vector.shape_cast %8 : vector<1x16x16x4xf32> to vector<16x16x4xf32>
    %10 = vector.shape_cast %9 : vector<16x16x4xf32> to vector<256x4xf32>
    %11 = arith.truncf %10 : vector<256x4xf32> to vector<256x4xbf16>
    %c0_16 = arith.constant 0 : index
    %c0_17 = arith.constant 0 : index
    %12 = vector.load %arg2[%c0_16, %c0_17] : memref<4x2xbf16, #tpu.memory_space<vmem>>, vector<4x2xbf16>
    %cst_18 = arith.constant dense<0.000000e+00> : vector<256x2xf32>
    %13 = tpu.matmul %11, %12, %cst_18 {dimension_numbers = #tpu.dot_dimension_numbers<[1], [0], [0], [1], [0, 0, 1, 1], [], []>} : vector<256x4xbf16>, vector<4x2xbf16>, vector<256x2xf32> -> vector<256x2xf32>
    %c0_19 = arith.constant 0 : index
    %c0_20 = arith.constant 0 : index
    %14 = vector.load %arg3[%c0_19, %c0_20] : memref<1x2xf32, #tpu.memory_space<vmem>>, vector<1x2xf32>
    %15 = vector.broadcast %14 : vector<1x2xf32> to vector<256x2xf32>
    %16 = arith.addf %13, %15 : vector<256x2xf32>
    %17 = arith.negf %16 : vector<256x2xf32>
    %18 = math.exp %17 : vector<256x2xf32>
    %cst_21 = arith.constant 1.000000e+00 : f32
    %19 = vector.broadcast %cst_21 : f32 to vector<256x2xf32>
    %20 = arith.addf %19, %18 : vector<256x2xf32>
    %21 = arith.divf %19, %20 : vector<256x2xf32>
    %22 = arith.mulf %16, %21 : vector<256x2xf32>
    %23 = arith.truncf %22 : vector<256x2xf32> to vector<256x2xbf16>
    %c0_22 = arith.constant 0 : index
    %c0_23 = arith.constant 0 : index
    %24 = vector.load %arg4[%c0_22, %c0_23] : memref<8x8xbf16, #tpu.memory_space<vmem>>, vector<2x8xbf16>
    %cst_24 = arith.constant dense<0.000000e+00> : vector<256x8xf32>
    %25 = tpu.matmul %23, %24, %cst_24 {dimension_numbers = #tpu.dot_dimension_numbers<[1], [0], [0], [1], [0, 0, 1, 1], [], []>} : vector<256x2xbf16>, vector<2x8xbf16>, vector<256x8xf32> -> vector<256x8xf32>
    %c0_25 = arith.constant 0 : index
    %c0_26 = arith.constant 0 : index
    %26 = vector.load %arg8[%c0_25, %c0_26] : memref<256x8xf32, #tpu.memory_space<vmem>>, vector<256x8xf32>
    tpu.vector_store %arg8[%c0_25, %c0_26], %25 {strides = array<i32>} : memref<256x8xf32, #tpu.memory_space<vmem>>, vector<256x8xf32>,
    %27 = vector.shape_cast %22 : vector<256x2xf32> to vector<16x16x2xf32>
    %c2 = arith.constant 2 : index
    %c8 = arith.constant 8 : index
    %c0_27 = arith.constant 0 : index
    %28 = vector.load %arg7[%c2, %c8, %c0_27] : memref<20x32x2xf32, #tpu.memory_space<vmem>>, vector<16x16x2xf32>
    tpu.vector_store %arg7[%c2, %c8, %c0_27], %27 {strides = array<i32>} : memref<20x32x2xf32, #tpu.memory_space<vmem>>, vector<16x16x2xf32>,
    %c0_28 = arith.constant 0 : index
    %c0_29 = arith.constant 0 : index
    %c0_30 = arith.constant 0 : index
    %29 = vector.load %arg7[%c0_28, %c0_29, %c0_30] : memref<20x32x2xf32, #tpu.memory_space<vmem>>, vector<16x32x2xf32>
    %c1 = arith.constant 1 : index
    %c0_31 = arith.constant 0 : index
    %c0_32 = arith.constant 0 : index
    %30 = vector.load %arg7[%c1, %c0_31, %c0_32] : memref<20x32x2xf32, #tpu.memory_space<vmem>>, vector<16x32x2xf32>
    %31 = arith.maximumf %29, %30 : vector<16x32x2xf32>
    %c2_33 = arith.constant 2 : index
    %c0_34 = arith.constant 0 : index
    %c0_35 = arith.constant 0 : index
    %32 = vector.load %arg7[%c2_33, %c0_34, %c0_35] : memref<20x32x2xf32, #tpu.memory_space<vmem>>, vector<16x32x2xf32>
    %33 = arith.maximumf %31, %32 : vector<16x32x2xf32>
    %c3 = arith.constant 3 : index
    %c0_36 = arith.constant 0 : index
    %c0_37 = arith.constant 0 : index
    %34 = vector.load %arg7[%c3, %c0_36, %c0_37] : memref<20x32x2xf32, #tpu.memory_space<vmem>>, vector<16x32x2xf32>
    %35 = arith.maximumf %33, %34 : vector<16x32x2xf32>
    %c4 = arith.constant 4 : index
    %c0_38 = arith.constant 0 : index
    %c0_39 = arith.constant 0 : index
    %36 = vector.load %arg7[%c4, %c0_38, %c0_39] : memref<20x32x2xf32, #tpu.memory_space<vmem>>, vector<16x32x2xf32>
    %37 = arith.maximumf %35, %36 : vector<16x32x2xf32>
    %c1_i32 = arith.constant 1 : i32
    %38 = tpu.dynamic_rotate %37 by %c1_i32 dim 1 : vector<16x32x2xf32>, i32 -> vector<16x32x2xf32>
    %39 = arith.maximumf %37, %38 : vector<16x32x2xf32>
    %c31_i32 = arith.constant 31 : i32
    %40 = tpu.dynamic_rotate %37 by %c31_i32 dim 1 : vector<16x32x2xf32>, i32 -> vector<16x32x2xf32>
    %41 = arith.maximumf %39, %40 : vector<16x32x2xf32>
    %c2_i32 = arith.constant 2 : i32
    %42 = tpu.dynamic_rotate %37 by %c2_i32 dim 1 : vector<16x32x2xf32>, i32 -> vector<16x32x2xf32>
    %43 = arith.maximumf %41, %42 : vector<16x32x2xf32>
    %c30_i32 = arith.constant 30 : i32
    %44 = tpu.dynamic_rotate %37 by %c30_i32 dim 1 : vector<16x32x2xf32>, i32 -> vector<16x32x2xf32>
    %45 = arith.maximumf %43, %44 : vector<16x32x2xf32>
    %46 = vector.extract_strided_slice %45 {offsets = [0, 8, 0], sizes = [16, 16, 2], strides = [1, 1, 1]} : vector<16x32x2xf32> to vector<16x16x2xf32>
    %c0_40 = arith.constant 0 : index
    %c0_41 = arith.constant 0 : index
    %47 = vector.load %arg8[%c0_40, %c0_41] : memref<256x8xf32, #tpu.memory_space<vmem>>, vector<256x8xf32>
    %48 = vector.shape_cast %46 : vector<16x16x2xf32> to vector<256x2xf32>
    %49 = arith.truncf %48 : vector<256x2xf32> to vector<256x2xbf16>
    %c2_42 = arith.constant 2 : index
    %c0_43 = arith.constant 0 : index
    %50 = vector.load %arg4[%c2_42, %c0_43] : memref<8x8xbf16, #tpu.memory_space<vmem>>, vector<2x8xbf16>
    %cst_44 = arith.constant dense<0.000000e+00> : vector<256x8xf32>
    %51 = tpu.matmul %49, %50, %cst_44 {dimension_numbers = #tpu.dot_dimension_numbers<[1], [0], [0], [1], [0, 0, 1, 1], [], []>} : vector<256x2xbf16>, vector<2x8xbf16>, vector<256x8xf32> -> vector<256x8xf32>
    %52 = arith.addf %47, %51 : vector<256x8xf32>
    %c0_45 = arith.constant 0 : index
    %c0_46 = arith.constant 0 : index
    %53 = vector.load %arg8[%c0_45, %c0_46] : memref<256x8xf32, #tpu.memory_space<vmem>>, vector<256x8xf32>
    tpu.vector_store %arg8[%c0_45, %c0_46], %52 {strides = array<i32>} : memref<256x8xf32, #tpu.memory_space<vmem>>, vector<256x8xf32>,
    %c2_47 = arith.constant 2 : index
    %c8_48 = arith.constant 8 : index
    %c0_49 = arith.constant 0 : index
    %54 = vector.load %arg7[%c2_47, %c8_48, %c0_49] : memref<20x32x2xf32, #tpu.memory_space<vmem>>, vector<16x16x2xf32>
    tpu.vector_store %arg7[%c2_47, %c8_48, %c0_49], %46 {strides = array<i32>} : memref<20x32x2xf32, #tpu.memory_space<vmem>>, vector<16x16x2xf32>,
    %c0_50 = arith.constant 0 : index
    %c0_51 = arith.constant 0 : index
    %c0_52 = arith.constant 0 : index
    %55 = vector.load %arg7[%c0_50, %c0_51, %c0_52] : memref<20x32x2xf32, #tpu.memory_space<vmem>>, vector<16x32x2xf32>
    %c1_53 = arith.constant 1 : index
    %c0_54 = arith.constant 0 : index
    %c0_55 = arith.constant 0 : index
    %56 = vector.load %arg7[%c1_53, %c0_54, %c0_55] : memref<20x32x2xf32, #tpu.memory_space<vmem>>, vector<16x32x2xf32>
    %57 = arith.maximumf %55, %56 : vector<16x32x2xf32>
    %c2_56 = arith.constant 2 : index
    %c0_57 = arith.constant 0 : index
    %c0_58 = arith.constant 0 : index
    %58 = vector.load %arg7[%c2_56, %c0_57, %c0_58] : memref<20x32x2xf32, #tpu.memory_space<vmem>>, vector<16x32x2xf32>
    %59 = arith.maximumf %57, %58 : vector<16x32x2xf32>
    %c3_59 = arith.constant 3 : index
    %c0_60 = arith.constant 0 : index
    %c0_61 = arith.constant 0 : index
    %60 = vector.load %arg7[%c3_59, %c0_60, %c0_61] : memref<20x32x2xf32, #tpu.memory_space<vmem>>, vector<16x32x2xf32>
    %61 = arith.maximumf %59, %60 : vector<16x32x2xf32>
    %c4_62 = arith.constant 4 : index
    %c0_63 = arith.constant 0 : index
    %c0_64 = arith.constant 0 : index
    %62 = vector.load %arg7[%c4_62, %c0_63, %c0_64] : memref<20x32x2xf32, #tpu.memory_space<vmem>>, vector<16x32x2xf32>
    %63 = arith.maximumf %61, %62 : vector<16x32x2xf32>
    %c1_i32_65 = arith.constant 1 : i32
    %64 = tpu.dynamic_rotate %63 by %c1_i32_65 dim 1 : vector<16x32x2xf32>, i32 -> vector<16x32x2xf32>
    %65 = arith.maximumf %63, %64 : vector<16x32x2xf32>
    %c31_i32_66 = arith.constant 31 : i32
    %66 = tpu.dynamic_rotate %63 by %c31_i32_66 dim 1 : vector<16x32x2xf32>, i32 -> vector<16x32x2xf32>
    %67 = arith.maximumf %65, %66 : vector<16x32x2xf32>
    %c2_i32_67 = arith.constant 2 : i32
    %68 = tpu.dynamic_rotate %63 by %c2_i32_67 dim 1 : vector<16x32x2xf32>, i32 -> vector<16x32x2xf32>
    %69 = arith.maximumf %67, %68 : vector<16x32x2xf32>
    %c30_i32_68 = arith.constant 30 : i32
    %70 = tpu.dynamic_rotate %63 by %c30_i32_68 dim 1 : vector<16x32x2xf32>, i32 -> vector<16x32x2xf32>
    %71 = arith.maximumf %69, %70 : vector<16x32x2xf32>
    %72 = vector.extract_strided_slice %71 {offsets = [0, 8, 0], sizes = [16, 16, 2], strides = [1, 1, 1]} : vector<16x32x2xf32> to vector<16x16x2xf32>
    %c0_69 = arith.constant 0 : index
    %c0_70 = arith.constant 0 : index
    %73 = vector.load %arg8[%c0_69, %c0_70] : memref<256x8xf32, #tpu.memory_space<vmem>>, vector<256x8xf32>
    %74 = vector.shape_cast %72 : vector<16x16x2xf32> to vector<256x2xf32>
    %75 = arith.truncf %74 : vector<256x2xf32> to vector<256x2xbf16>
    %c4_71 = arith.constant 4 : index
    %c0_72 = arith.constant 0 : index
    %76 = vector.load %arg4[%c4_71, %c0_72] : memref<8x8xbf16, #tpu.memory_space<vmem>>, vector<2x8xbf16>
    %cst_73 = arith.constant dense<0.000000e+00> : vector<256x8xf32>
    %77 = tpu.matmul %75, %76, %cst_73 {dimension_numbers = #tpu.dot_dimension_numbers<[1], [0], [0], [1], [0, 0, 1, 1], [], []>} : vector<256x2xbf16>, vector<2x8xbf16>, vector<256x8xf32> -> vector<256x8xf32>
    %78 = arith.addf %73, %77 : vector<256x8xf32>
    %c0_74 = arith.constant 0 : index
    %c0_75 = arith.constant 0 : index
    %79 = vector.load %arg8[%c0_74, %c0_75] : memref<256x8xf32, #tpu.memory_space<vmem>>, vector<256x8xf32>
    tpu.vector_store %arg8[%c0_74, %c0_75], %78 {strides = array<i32>} : memref<256x8xf32, #tpu.memory_space<vmem>>, vector<256x8xf32>,
    %c2_76 = arith.constant 2 : index
    %c8_77 = arith.constant 8 : index
    %c0_78 = arith.constant 0 : index
    %80 = vector.load %arg7[%c2_76, %c8_77, %c0_78] : memref<20x32x2xf32, #tpu.memory_space<vmem>>, vector<16x16x2xf32>
    tpu.vector_store %arg7[%c2_76, %c8_77, %c0_78], %72 {strides = array<i32>} : memref<20x32x2xf32, #tpu.memory_space<vmem>>, vector<16x16x2xf32>,
    %c0_79 = arith.constant 0 : index
    %c0_80 = arith.constant 0 : index
    %c0_81 = arith.constant 0 : index
    %81 = vector.load %arg7[%c0_79, %c0_80, %c0_81] : memref<20x32x2xf32, #tpu.memory_space<vmem>>, vector<16x32x2xf32>
    %c1_82 = arith.constant 1 : index
    %c0_83 = arith.constant 0 : index
    %c0_84 = arith.constant 0 : index
    %82 = vector.load %arg7[%c1_82, %c0_83, %c0_84] : memref<20x32x2xf32, #tpu.memory_space<vmem>>, vector<16x32x2xf32>
    %83 = arith.maximumf %81, %82 : vector<16x32x2xf32>
    %c2_85 = arith.constant 2 : index
    %c0_86 = arith.constant 0 : index
    %c0_87 = arith.constant 0 : index
    %84 = vector.load %arg7[%c2_85, %c0_86, %c0_87] : memref<20x32x2xf32, #tpu.memory_space<vmem>>, vector<16x32x2xf32>
    %85 = arith.maximumf %83, %84 : vector<16x32x2xf32>
    %c3_88 = arith.constant 3 : index
    %c0_89 = arith.constant 0 : index
    %c0_90 = arith.constant 0 : index
    %86 = vector.load %arg7[%c3_88, %c0_89, %c0_90] : memref<20x32x2xf32, #tpu.memory_space<vmem>>, vector<16x32x2xf32>
    %87 = arith.maximumf %85, %86 : vector<16x32x2xf32>
    %c4_91 = arith.constant 4 : index
    %c0_92 = arith.constant 0 : index
    %c0_93 = arith.constant 0 : index
    %88 = vector.load %arg7[%c4_91, %c0_92, %c0_93] : memref<20x32x2xf32, #tpu.memory_space<vmem>>, vector<16x32x2xf32>
    %89 = arith.maximumf %87, %88 : vector<16x32x2xf32>
    %c1_i32_94 = arith.constant 1 : i32
    %90 = tpu.dynamic_rotate %89 by %c1_i32_94 dim 1 : vector<16x32x2xf32>, i32 -> vector<16x32x2xf32>
    %91 = arith.maximumf %89, %90 : vector<16x32x2xf32>
    %c31_i32_95 = arith.constant 31 : i32
    %92 = tpu.dynamic_rotate %89 by %c31_i32_95 dim 1 : vector<16x32x2xf32>, i32 -> vector<16x32x2xf32>
    %93 = arith.maximumf %91, %92 : vector<16x32x2xf32>
    %c2_i32_96 = arith.constant 2 : i32
    %94 = tpu.dynamic_rotate %89 by %c2_i32_96 dim 1 : vector<16x32x2xf32>, i32 -> vector<16x32x2xf32>
    %95 = arith.maximumf %93, %94 : vector<16x32x2xf32>
    %c30_i32_97 = arith.constant 30 : i32
    %96 = tpu.dynamic_rotate %89 by %c30_i32_97 dim 1 : vector<16x32x2xf32>, i32 -> vector<16x32x2xf32>
    %97 = arith.maximumf %95, %96 : vector<16x32x2xf32>
    %98 = vector.extract_strided_slice %97 {offsets = [0, 8, 0], sizes = [16, 16, 2], strides = [1, 1, 1]} : vector<16x32x2xf32> to vector<16x16x2xf32>
    %c0_98 = arith.constant 0 : index
    %c0_99 = arith.constant 0 : index
    %99 = vector.load %arg8[%c0_98, %c0_99] : memref<256x8xf32, #tpu.memory_space<vmem>>, vector<256x8xf32>
    %100 = vector.shape_cast %98 : vector<16x16x2xf32> to vector<256x2xf32>
    %101 = arith.truncf %100 : vector<256x2xf32> to vector<256x2xbf16>
    %c6 = arith.constant 6 : index
    %c0_100 = arith.constant 0 : index
    %102 = vector.load %arg4[%c6, %c0_100] : memref<8x8xbf16, #tpu.memory_space<vmem>>, vector<2x8xbf16>
    %cst_101 = arith.constant dense<0.000000e+00> : vector<256x8xf32>
    %103 = tpu.matmul %101, %102, %cst_101 {dimension_numbers = #tpu.dot_dimension_numbers<[1], [0], [0], [1], [0, 0, 1, 1], [], []>} : vector<256x2xbf16>, vector<2x8xbf16>, vector<256x8xf32> -> vector<256x8xf32>
    %104 = arith.addf %99, %103 : vector<256x8xf32>
    %c0_102 = arith.constant 0 : index
    %c0_103 = arith.constant 0 : index
    %105 = vector.load %arg8[%c0_102, %c0_103] : memref<256x8xf32, #tpu.memory_space<vmem>>, vector<256x8xf32>
    tpu.vector_store %arg8[%c0_102, %c0_103], %104 {strides = array<i32>} : memref<256x8xf32, #tpu.memory_space<vmem>>, vector<256x8xf32>,
    %c0_104 = arith.constant 0 : index
    %c0_105 = arith.constant 0 : index
    %106 = vector.load %arg8[%c0_104, %c0_105] : memref<256x8xf32, #tpu.memory_space<vmem>>, vector<256x8xf32>
    %c0_106 = arith.constant 0 : index
    %c0_107 = arith.constant 0 : index
    %107 = vector.load %arg5[%c0_106, %c0_107] : memref<1x8xf32, #tpu.memory_space<vmem>>, vector<1x8xf32>
    %108 = vector.broadcast %107 : vector<1x8xf32> to vector<256x8xf32>
    %109 = arith.addf %106, %108 : vector<256x8xf32>
    %110 = arith.negf %109 : vector<256x8xf32>
    %111 = math.exp %110 : vector<256x8xf32>
    %cst_108 = arith.constant 1.000000e+00 : f32
    %112 = vector.broadcast %cst_108 : f32 to vector<256x8xf32>
    %113 = arith.addf %112, %111 : vector<256x8xf32>
    %114 = arith.divf %112, %113 : vector<256x8xf32>
    %115 = arith.mulf %109, %114 : vector<256x8xf32>
    %116 = vector.shape_cast %115 : vector<256x8xf32> to vector<16x16x8xf32>
    %c0_109 = arith.constant 0 : index
    %c0_110 = arith.constant 0 : index
    %c0_111 = arith.constant 0 : index
    %c0_112 = arith.constant 0 : index
    %117 = vector.load %arg6[%c0_109, %c0_110, %c0_111, %c0_112] : memref<1x16x16x8xf32, #tpu.memory_space<vmem>>, vector<1x16x16x8xf32>
    %118 = vector.shape_cast %117 : vector<1x16x16x8xf32> to vector<16x16x8xf32>
    %119 = vector.shape_cast %116 : vector<16x16x8xf32> to vector<1x16x16x8xf32>
    tpu.vector_store %arg6[%c0_109, %c0_110, %c0_111, %c0_112], %119 {strides = array<i32>} : memref<1x16x16x8xf32, #tpu.memory_space<vmem>>, vector<1x16x16x8xf32>,
    return
  }
  func.func @transform_0(%arg0: i32) -> (i32, i32, i32, i32) {
    %c0_i32 = arith.constant 0 : i32
    %c0_i32_0 = arith.constant 0 : i32
    %c0_i32_1 = arith.constant 0 : i32
    %c0_i32_2 = arith.constant 0 : i32
    return %arg0, %c0_i32, %c0_i32_0, %c0_i32_1 : i32, i32, i32, i32
  }
  func.func @transform_1(%arg0: i32) -> (i32, i32) {
    %c0_i32 = arith.constant 0 : i32
    %c0_i32_0 = arith.constant 0 : i32
    %c0_i32_1 = arith.constant 0 : i32
    return %c0_i32, %c0_i32_0 : i32, i32
  }
  func.func @transform_2(%arg0: i32) -> (i32, i32) {
    %c0_i32 = arith.constant 0 : i32
    %c0_i32_0 = arith.constant 0 : i32
    %c0_i32_1 = arith.constant 0 : i32
    return %c0_i32, %c0_i32_0 : i32, i32
  }
  func.func @transform_3(%arg0: i32) -> (i32, i32) {
    %c0_i32 = arith.constant 0 : i32
    %c0_i32_0 = arith.constant 0 : i32
    %c0_i32_1 = arith.constant 0 : i32
    return %c0_i32, %c0_i32_0 : i32, i32
  }
  func.func @transform_4(%arg0: i32) -> (i32, i32) {
    %c0_i32 = arith.constant 0 : i32
    %c0_i32_0 = arith.constant 0 : i32
    %c0_i32_1 = arith.constant 0 : i32
    return %c0_i32, %c0_i32_0 : i32, i32
  }
  func.func @transform_5(%arg0: i32) -> (i32, i32, i32, i32) {
    %c0_i32 = arith.constant 0 : i32
    %c0_i32_0 = arith.constant 0 : i32
    %c0_i32_1 = arith.constant 0 : i32
    %c0_i32_2 = arith.constant 0 : i32
    return %arg0, %c0_i32, %c0_i32_0, %c0_i32_1 : i32, i32, i32, i32
  }
}

</mosaic_0001>

<bundles_post_ra>
// kernel: tpu_custom_call.1
= control target key start
LH: loop header
LB: loop body
LE: loop exit
PB: predicated region body
PF: predicated region fallthrough
CT: control target
= control target key end

     0   :  { %s6334_s18 = smov 0   ;;  %s10023_s0 = inlined_call_operand.vmem [shape: f32[2,16,16,4], index: 0, kind: input, shape index: {}]   ;;  %s10024_s1 = inlined_call_operand.vmem [shape: bf16[4,2], index: 1, kind: input, shape index: {}]   ;;  %s10025_s2 = inlined_call_operand.vmem [shape: f32[1,2], index: 2, kind: input, shape index: {}]   ;;  %s10026_s3 = inlined_call_operand.vmem [shape: bf16[8,8], index: 3, kind: input, shape index: {}]   ;;  %s10027_s4 = inlined_call_operand.vmem [shape: f32[1,8], index: 4, kind: input, shape index: {}]   ;;  %s10028_s5 = inlined_call_operand.vmem [shape: f32[2,16,16,8], index: 5, kind: output, shape index: {}]  }
   0x1 LB: > { %s5588_s19 = sadd.s32 4294967295, %s6301_s18   ;;  %p5592_p0 = scmp.ge.s32.totalorder %s6301_s18, 1  ;;  %s6301_s18 = sphi %s6334_s18, %s15_s18  }
   0x2   : > { %p187_p1 = scmp.lt.s32.totalorder %s6301_s18, 3 }
   0x4   : > { %p188_p2 = pnand %p5592_p0, %p187_p1 }
   0x6   : > { %191 = sbr.rel (%p188_p2) target bundleno = 1083 (0x43b), region = 40 }
   0xd   : > { %v332_v0 = vld [vmem:[%s10024_s1] sm:$0x3]  ;;  %vm389_vm0 = vcmask 1041408   ;;  %p215_p3 = scmp.lt.s32.totalorder %s5588_s19, 1  ;;  %vm340_vm1 = vcmask 31744   ;;  %vm843_vm2 = vcmask 1040384  }
   0xe   : > { %6007 = vmatprep.subr.msk.bf16.mxu0 %vm389_vm0, %v332_v0  ;;  %6008 = vmatprep.subr.msk.bf16.mxu1 %vm389_vm0, %v332_v0  ;;  %v391_v1 = vsel %vm389_vm0, %v332_v0, 0  ;;  %v794_v50 = vld [vmem:[%s10026_s3] sm:$0x1]  ;;  %vm226_vm3 = vcmask 15360   ;;  %v6303_v51 = vmov -inf   ;;  %vm1008_vm8 = vcmask 64512  }
   0xf   : > { %5836 = vmatpush3.bf16.msra.mxu0 %v391_v1  ;;  %6006 = vmatpush3.bf16.msra.mxu1 %v391_v1  ;;  %s10392_s19 = smov (!%p215_p3, %s5588_s19), 1  ;;  %227 = vst.msk [vmem:[#allocation2] sm:$0xff] %vm226_vm3, %v6303_v51  ;;  %228 = vst.msk [vmem:[#allocation2 + $0x8] sm:$0xff] %vm226_vm3, %v6303_v51  ;;  %v845_v52 = vsel %vm843_vm2, %v794_v50, 0 }
  0x10   : > { %s5748_s22 = sshll.u32 %s10392_s19, 8  ;;  %6009 = vmatprep.subr.msk.bf16.mxu1 %vm843_vm2, %v794_v50  ;;  %229 = vst.msk [vmem:[#allocation2 + $0x10] sm:$0xff] %vm226_vm3, %v6303_v51  ;;  %230 = vst.msk [vmem:[#allocation2 + $0x18] sm:$0xff] %vm226_vm3, %v6303_v51  ;;  %v6022_v53 = vld [vmem:[%s10026_s3] ss:$0 sps:$4 sm:$0x22]  }
  0x11   : > { %s6353_s25 = scalar_lea.vmem %s10023_s0, %s5748_s22  ;;  %231 = vst.msk [vmem:[#allocation2 + $0x20] sm:$0xff] %vm226_vm3, %v6303_v51  ;;  %232 = vst.msk [vmem:[#allocation2 + $0x28] sm:$0xff] %vm226_vm3, %v6303_v51  ;;  %v2159_v54 = vrot.slane %v6022_v53, 1  ;;  %v6023_v60 = vld [vmem:[%s10026_s3] ss:$0 sps:$4 sm:$0x44]   ;;  %s9858_s15 = scalar_lea.vmem %s10028_s5, %s5748_s22 }
  0x12   : > { %v284_v2 = vld [vmem:[%s6353_s25] sm:$0xff]  ;;  %v285_v3 = vld [vmem:[%s6353_s25 + $0x8] sm:$0xff]  ;;  %v286_v7 = vld [vmem:[%s6353_s25 + $0x10] sm:$0xff]  ;;  %233 = vst.msk [vmem:[#allocation2 + $0x30] sm:$0xff] %vm226_vm3, %v6303_v51  ;;  %v3544_v0 = vrot.slane %v6023_v60, 2 }
  0x13   : > { %v300_v4 = vld [vmem:[%s6353_s25 + $0x80] sm:$0xff]  ;;  %v316_v5 = vpack.c.bf16 %v285_v3, %v284_v2  ;;  %v301_v6 = vld [vmem:[%s6353_s25 + $0x88] sm:$0xff]  ;;  %v287_v8 = vld [vmem:[%s6353_s25 + $0x18] sm:$0xff]  ;;  %234 = vst.msk [vmem:[#allocation2 + $0x38] sm:$0xff] %vm226_vm3, %v6303_v51  ;;  %6010 = vmatprep.subr.msk.bf16.mxu0 %vm843_vm2, %v2159_v54  ;;  %v2209_v57 = vsel %vm843_vm2, %v2159_v54, 0 }
  0x14   : > { %v324_v9 = vpack.c.bf16 %v301_v6, %v300_v4  ;;  %v317_v10 = vpack.c.bf16 %v287_v8, %v286_v7  ;;  %v302_v11 = vld [vmem:[%s6353_s25 + $0x90] sm:$0xff]  ;;  %v303_v12 = vld [vmem:[%s6353_s25 + $0x98] sm:$0xff]  ;;  %v288_v13 = vld [vmem:[%s6353_s25 + $0x20] sm:$0xff]  ;;  %246 = vst.msk [vmem:[#allocation2 + $0x40] sm:$0xff] %vm226_vm3, %v6303_v51  ;;  %v6477_v4 = vsel %vm843_vm2, %v3544_v0, 0 }
  0x15   : > { %5837 = vmatprep.mubr.msk.bf16.mxu0 %vm340_vm1, %v316_v5  ;;  %v325_v14 = vpack.c.bf16 %v303_v12, %v302_v11  ;;  %v289_v15 = vld [vmem:[%s6353_s25 + $0x28] sm:$0xff]  ;;  %v304_v16 = vld [vmem:[%s6353_s25 + $0xa0] sm:$0xff]  ;;  %v290_v20 = vld [vmem:[%s6353_s25 + $0x30] sm:$0xff]  ;;  %247 = vst.msk [vmem:[#allocation2 + $0x60] sm:$0xff] %vm226_vm3, %v6303_v51 }
  0x16   : > { %v305_v17 = vld [vmem:[%s6353_s25 + $0xa8] sm:$0xff]  ;;  %5853 = vmatprep.mubr.msk.bf16.mxu1 %vm340_vm1, %v324_v9  ;;  %5838 = vmatmul.mubr.msk.bf16.vlgmr.msra.gmra.mrb[0].mxu0 %vm340_vm1, %v317_v10  ;;  %v318_v18 = vpack.c.bf16 %v289_v15, %v288_v13  ;;  %v291_v21 = vld [vmem:[%s6353_s25 + $0x38] sm:$0xff]  ;;  %v306_v22 = vld [vmem:[%s6353_s25 + $0xb0] sm:$0xff]  ;;  %248 = vst.msk [vmem:[#allocation2 + $0x80] sm:$0xff] %vm226_vm3, %v6303_v51 }
  0x17   : > { %v326_v19 = vpack.c.bf16 %v305_v17, %v304_v16  ;;  %5854 = vmatmul.mubr.msk.bf16.vlgmr.msra.gmra.mrb[0].mxu1 %vm340_vm1, %v325_v14  ;;  %v307_v23 = vld [vmem:[%s6353_s25 + $0xb8] sm:$0xff]  ;;  %v292_v24 = vld [vmem:[%s6353_s25 + $0x40] sm:$0xff]  ;;  %v293_v25 = vld [vmem:[%s6353_s25 + $0x48] sm:$0xff]  ;;  %v319_v28 = vpack.c.bf16 %v291_v21, %v290_v20  ;;  %266 = vst.msk [vmem:[#allocation2 + $0x58] sm:$0xff] %vm226_vm3, %v6303_v51  ;;  %5904 = vmatpush3.bf16.msra.mxu0 %v2209_v57  ;;  %v1701_v21 = vlaneseq }
  0x18   : > { %5841 = vmatprep.mubr.msk.bf16.mxu0 %vm340_vm1, %v318_v18  ;;  %v308_v26 = vld [vmem:[%s6353_s25 + $0xc0] sm:$0xff]  ;;  %v309_v27 = vld [vmem:[%s6353_s25 + $0xc8] sm:$0xff]  ;;  %v327_v29 = vpack.c.bf16 %v307_v23, %v306_v22  ;;  %v320_v30 = vpack.c.bf16 %v293_v25, %v292_v24  ;;  %v294_v32 = vld [vmem:[%s6353_s25 + $0x50] sm:$0xff]  ;;  %267 = vst.msk [vmem:[#allocation2 + $0x78] sm:$0xff] %vm226_vm3, %v6303_v51  ;;  %5870 = vmatpush3.bf16.msra.mxu1 %v845_v52 }
  0x19   : > { %5857 = vmatprep.mubr.msk.bf16.mxu1 %vm340_vm1, %v326_v19  ;;  %v328_v31 = vpack.c.bf16 %v309_v27, %v308_v26  ;;  %v295_v33 = vld [vmem:[%s6353_s25 + $0x58] sm:$0xff]  ;;  %v310_v34 = vld [vmem:[%s6353_s25 + $0xd0] sm:$0xff]  ;;  %v296_v36 = vld [vmem:[%s6353_s25 + $0x60] sm:$0xff]  ;;  %268 = vst.msk [vmem:[#allocation2 + $0x98] sm:$0xff] %vm226_vm3, %v6303_v51  ;;  %6011 = vmatprep.subr.msk.bf16.mxu1 %vm843_vm2, %v3544_v0 }
  0x1a   : > { %v311_v35 = vld [vmem:[%s6353_s25 + $0xd8] sm:$0xff]  ;;  %v297_v37 = vld [vmem:[%s6353_s25 + $0x68] sm:$0xff]  ;;  %v312_v38 = vld [vmem:[%s6353_s25 + $0xe0] sm:$0xff]  ;;  %v321_v40 = vpack.c.bf16 %v295_v33, %v294_v32  ;;  %236 = vst.msk [vmem:[#allocation2 + $0x240] sm:$0xff] %vm226_vm3, %v6303_v51 }
  0x1b   : > { %v313_v39 = vld [vmem:[%s6353_s25 + $0xe8] sm:$0xff]  ;;  %v329_v41 = vpack.c.bf16 %v311_v35, %v310_v34  ;;  %v322_v42 = vpack.c.bf16 %v297_v37, %v296_v36  ;;  %v298_v44 = vld [vmem:[%s6353_s25 + $0x70] sm:$0xff]  ;;  %v299_v45 = vld [vmem:[%s6353_s25 + $0x78] sm:$0xff]  ;;  %237 = vst.msk [vmem:[#allocation2 + $0x248] sm:$0xff] %vm226_vm3, %v6303_v51  ;;  %v6499_v34 = vshrl.u32 %v1701_v21, 7 }
  0x1c   : > { %v330_v43 = vpack.c.bf16 %v313_v39, %v312_v38  ;;  %v314_v46 = vld [vmem:[%s6353_s25 + $0xf0] sm:$0xff]  ;;  %v315_v47 = vld [vmem:[%s6353_s25 + $0xf8] sm:$0xff]  ;;  %v323_v48 = vpack.c.bf16 %v299_v45, %v298_v44  ;;  %238 = vst.msk [vmem:[#allocation2 + $0x250] sm:$0xff] %vm226_vm3, %v6303_v51  ;;  %239 = vst.msk [vmem:[#allocation2 + $0x258] sm:$0xff] %vm226_vm3, %v6303_v51 }
  0x1d   : > { %v331_v49 = vpack.c.bf16 %v315_v47, %v314_v46  ;;  %240 = vst.msk [vmem:[#allocation2 + $0x260] sm:$0xff] %vm226_vm3, %v6303_v51  ;;  %241 = vst.msk [vmem:[#allocation2 + $0x268] sm:$0xff] %vm226_vm3, %v6303_v51  ;;  %v6024_v62 = vld [vmem:[%s10026_s3] ss:$0 sps:$4 sm:$0x88]   ;;  %v6483_v14 = vld [vmem:[#allocation2 + $0x8] sm:$0xff] }
  0x1e   : > { %5842 = vmatmul.mubr.msk.bf16.gmra.mrb[4].mxu0 %vm340_vm1, %v319_v28  ;;  %242 = vst.msk [vmem:[#allocation2 + $0x270] sm:$0xff] %vm226_vm3, %v6303_v51  ;;  %243 = vst.msk [vmem:[#allocation2 + $0x278] sm:$0xff] %vm226_vm3, %v6303_v51  ;;  %v1267_v63 = vld [vmem:[#allocation2 + $0x40] sm:$0xff]  ;;  %v4929_v2 = vrot.slane %v6024_v62, 3  ;;  %v1270_v3 = vld [vmem:[#allocation2 + $0x58] sm:$0xff]  ;;  %vm1703_vm4 = vcmp.lt.s32.totalorder %v6499_v34, 1 }
  0x1f   : > { %5858 = vmatmul.mubr.msk.bf16.gmra.mrb[4].mxu1 %vm340_vm1, %v327_v29  ;;  %5845 = vmatprep.mubr.msk.bf16.mxu0 %vm340_vm1, %v320_v30  ;;  %249 = vst.msk [vmem:[#allocation2 + $0xa0] sm:$0xff] %vm226_vm3, %v6303_v51  ;;  %250 = vst.msk [vmem:[#allocation2 + $0xc0] sm:$0xff] %vm226_vm3, %v6303_v51  ;;  %v1396_v7 = vld [vmem:[#allocation2 + $0x60] sm:$0xff]  ;;  %v1399_v10 = vld [vmem:[#allocation2 + $0x78] sm:$0xff]  ;;  %vm1929_vm5 = vcmp.lt.s32.totalorder %v6499_v34, 2  ;;  %vm1816_vm6 = vcmp.lt.s32.totalorder %v6499_v34, 7 }
  0x20   : > { %5861 = vmatprep.mubr.msk.bf16.mxu1 %vm340_vm1, %v328_v31  ;;  %251 = vst.msk [vmem:[#allocation2 + $0xe0] sm:$0xff] %vm226_vm3, %v6303_v51  ;;  %252 = vst.msk [vmem:[#allocation2 + $0x100] sm:$0xff] %vm226_vm3, %v6303_v51  ;;  %6012 = vmatprep.subr.msk.bf16.mxu0 %vm843_vm2, %v4929_v2  ;;  %v6481_v6 = vsel %vm843_vm2, %v4929_v2, 0  ;;  %v1211_v13 = vmax.f32 %v1267_v63, %v1396_v7  ;;  %v1525_v15 = vld [vmem:[#allocation2 + $0x80] sm:$0xff]  ;;  %v1214_v16 = vmax.f32 %v1270_v3, %v1399_v10  ;;  %v6485_v17 = vld [vmem:[#allocation2 + $0x10] sm:$0xff] }
  0x21   : > { %253 = vst.msk [vmem:[#allocation2 + $0x120] sm:$0xff] %vm226_vm3, %v6303_v51  ;;  %254 = vst.msk [vmem:[#allocation2 + $0x140] sm:$0xff] %vm226_vm3, %v6303_v51  ;;  %v6487_v18 = vld [vmem:[#allocation2 + $0x28] sm:$0xff]  ;;  %v6489_v19 = vld [vmem:[#allocation2 + $0x30] sm:$0xff]  ;;  %v1215_v25 = vmax.f32 %v1396_v7, %v1525_v15  ;;  %vm2042_vm7 = vcmp.lt.s32.totalorder %v6499_v34, 6 }
  0x22   : > { %255 = vst.msk [vmem:[#allocation2 + $0x160] sm:$0xff] %vm226_vm3, %v6303_v51  ;;  %256 = vst.msk [vmem:[#allocation2 + $0x180] sm:$0xff] %vm226_vm3, %v6303_v51  ;;  %v1528_v23 = vld [vmem:[#allocation2 + $0x98] sm:$0xff]  ;;  %v1339_v27 = vmax.f32 %v1211_v13, %v1525_v15  ;;  %v6679_v28 = vld [vmem:[#allocation2 + $0x30] sm:$0xff] }
  0x23   : > { %257 = vst.msk [vmem:[#allocation2 + $0x1a0] sm:$0xff] %vm226_vm3, %v6303_v51  ;;  %258 = vst.msk [vmem:[#allocation2 + $0x1c0] sm:$0xff] %vm226_vm3, %v6303_v51  ;;  %v1342_v31 = vmax.f32 %v1214_v16, %v1528_v23  ;;  %v1218_v32 = vmax.f32 %v1399_v10, %v1528_v23 }
  0x24   : > { %259 = vst.msk [vmem:[#allocation2 + $0x1e0] sm:$0xff] %vm226_vm3, %v6303_v51  ;;  %260 = vst.msk [vmem:[#allocation2 + $0x200] sm:$0xff] %vm226_vm3, %v6303_v51 }
  0x25   : > { %261 = vst.msk [vmem:[#allocation2 + $0x220] sm:$0xff] %vm226_vm3, %v6303_v51  ;;  %269 = vst.msk [vmem:[#allocation2 + $0xb8] sm:$0xff] %vm226_vm3, %v6303_v51 }
  0x26   : > { %5846 = vmatmul.mubr.msk.bf16.gmra.mrb[8].mxu0 %vm340_vm1, %v321_v40  ;;  %270 = vst.msk [vmem:[#allocation2 + $0xd8] sm:$0xff] %vm226_vm3, %v6303_v51  ;;  %271 = vst.msk [vmem:[#allocation2 + $0xf8] sm:$0xff] %vm226_vm3, %v6303_v51  ;;  %v1529_v30 = vld [vmem:[#allocation2 + $0xa0] sm:$0xff] }
  0x27   : > { %5862 = vmatmul.mubr.msk.bf16.gmra.mrb[8].mxu1 %vm340_vm1, %v329_v41  ;;  %5849 = vmatprep.mubr.msk.bf16.mxu0 %vm340_vm1, %v322_v42  ;;  %272 = vst.msk [vmem:[#allocation2 + $0x118] sm:$0xff] %vm226_vm3, %v6303_v51  ;;  %273 = vst.msk [vmem:[#allocation2 + $0x138] sm:$0xff] %vm226_vm3, %v6303_v51  ;;  %v1533_v37 = vld [vmem:[#allocation2 + $0xc0] sm:$0xff]  ;;  %v1219_v38 = vmax.f32 %v1525_v15, %v1529_v30  ;;  %v1343_v41 = vmax.f32 %v1215_v25, %v1529_v30 }
  0x28   : > { %5865 = vmatprep.mubr.msk.bf16.mxu1 %vm340_vm1, %v330_v43  ;;  %274 = vst.msk [vmem:[#allocation2 + $0x158] sm:$0xff] %vm226_vm3, %v6303_v51  ;;  %275 = vst.msk [vmem:[#allocation2 + $0x178] sm:$0xff] %vm226_vm3, %v6303_v51  ;;  %v1541_v43 = vld [vmem:[#allocation2 + $0x100] sm:$0xff]  ;;  %v1223_v44 = vmax.f32 %v1529_v30, %v1533_v37  ;;  %v1468_v47 = vmax.f32 %v1339_v27, %v1529_v30 }
  0x29   : > { %276 = vst.msk [vmem:[#allocation2 + $0x198] sm:$0xff] %vm226_vm3, %v6303_v51  ;;  %277 = vst.msk [vmem:[#allocation2 + $0x1b8] sm:$0xff] %vm226_vm3, %v6303_v51 }
  0x2a   : > { %278 = vst.msk [vmem:[#allocation2 + $0x1d8] sm:$0xff] %vm226_vm3, %v6303_v51  ;;  %279 = vst.msk [vmem:[#allocation2 + $0x1f8] sm:$0xff] %vm226_vm3, %v6303_v51 }
  0x2b   : > { %280 = vst.msk [vmem:[#allocation2 + $0x218] sm:$0xff] %vm226_vm3, %v6303_v51  ;;  %281 = vst.msk [vmem:[#allocation2 + $0x238] sm:$0xff] %vm226_vm3, %v6303_v51 }
  0x2c   : > { %244 = vst.msk [vmem:[#allocation2] sm:$0xff] %vm226_vm3, %v6303_v51  ;;  %245 = vst.msk [vmem:[#allocation2 + $0x20] sm:$0xff] %vm226_vm3, %v6303_v51  ;;  %v1532_v36 = vld [vmem:[#allocation2 + $0xb8] sm:$0xff] }
  0x2d   : > { %264 = vst.msk [vmem:[#allocation2 + $0x18] sm:$0xff] %vm226_vm3, %v6303_v51  ;;  %265 = vst.msk [vmem:[#allocation2 + $0x38] sm:$0xff] %vm226_vm3, %v6303_v51  ;;  %v1536_v40 = vld [vmem:[#allocation2 + $0xd8] sm:$0xff]  ;;  %v1222_v42 = vmax.f32 %v1528_v23, %v1532_v36  ;;  %v1346_v52 = vmax.f32 %v1218_v32, %v1532_v36 }
  0x2e   : > { %5850 = vmatmul.mubr.msk.bf16.gmra.mrb[12].mxu0 %vm340_vm1, %v323_v48  ;;  %262 = vst.msk [vmem:[#allocation2 + $0x240] sm:$0xff] %vm226_vm3, %v6303_v51  ;;  %263 = vst.msk [vmem:[#allocation2 + $0x260] sm:$0xff] %vm226_vm3, %v6303_v51  ;;  %v1537_v48 = vld [vmem:[#allocation2 + $0xe0] sm:$0xff]  ;;  %v1226_v50 = vmax.f32 %v1532_v36, %v1536_v40  ;;  %v6503_v53 = vld [vmem:[#allocation2 + $0x118] sm:$0xff] }
  0x2f   : > { %5866 = vmatmul.mubr.msk.bf16.gmra.mrb[12].mxu1 %vm340_vm1, %v331_v49  ;;  %282 = vst.msk [vmem:[#allocation2 + $0x258] sm:$0xff] %vm226_vm3, %v6303_v51  ;;  %283 = vst.msk [vmem:[#allocation2 + $0x278] sm:$0xff] %vm226_vm3, %v6303_v51  ;;  %v1540_v49 = vld [vmem:[#allocation2 + $0xf8] sm:$0xff]  ;;  %v1471_v51 = vmax.f32 %v1342_v31, %v1532_v36  ;;  %v1227_v54 = vmax.f32 %v1533_v37, %v1537_v48  ;;  %v1350_v62 = vmax.f32 %v1222_v42, %v1536_v40 }
  0x30   : > { %10099 = vst [vmem:[#allocation4_spill] sm:$0xff] %v6481_v6  ;;  %v1354_v2 = vmax.f32 %v1226_v50, %v1540_v49  ;;  %10122 = vst [vmem:[#allocation27_spill] sm:$0xff] %v6679_v28  ;;  %v6714_v28 = vld [vmem:[#allocation2 + $0x60] sm:$0xff] }
  0x31   : > { %v1479_v21 = vmax.f32 %v1350_v62, %v1540_v49 }
  0x32   : > { %v1483_v27 = vmax.f32 %v1354_v2, %v6503_v53  ;;  %v6573_v2 = vld [vmem:[#allocation2 + $0x178] sm:$0xff] }
  0x33   : > { %v1074_v55 = vld [vmem:[#allocation2] sm:$0xff] }
  0x34   : > { %v1139_v56 = vld [vmem:[#allocation2 + $0x20] sm:$0xff]  ;;  %v1077_v58 = vld [vmem:[#allocation2 + $0x18] sm:$0xff] }
  0x35   : > { %v1142_v59 = vld [vmem:[#allocation2 + $0x38] sm:$0xff]  ;;  %v1203_v61 = vmax.f32 %v1074_v55, %v1139_v56  ;;  %v1207_v9 = vmax.f32 %v1139_v56, %v1267_v63  ;;  %v1230_v55 = vmax.f32 %v1536_v40, %v1540_v49  ;;  %v2468_v31 = vld [vmem:[#allocation2] sm:$0xff] }
  0x36   : > { %v1206_v1 = vmax.f32 %v1077_v58, %v1142_v59  ;;  %v1210_v11 = vmax.f32 %v1142_v59, %v1270_v3  ;;  %v1347_v58 = vmax.f32 %v1219_v38, %v1533_v37  ;;  %v1231_v59 = vmax.f32 %v1537_v48, %v1541_v43  ;;  %v6647_v25 = vld [vmem:[#allocation2 + $0x20] sm:$0xff]  ;;  %v6651_v16 = vld [vmem:[#allocation2 + $0x38] sm:$0xff] }
  0x37   : > { %v1331_v5 = vmax.f32 %v1203_v61, %v1267_v63  ;;  %v1335_v22 = vmax.f32 %v1207_v9, %v1396_v7  ;;  %v1472_v61 = vmax.f32 %v1343_v41, %v1533_v37  ;;  %v1351_v63 = vmax.f32 %v1223_v44, %v1537_v48  ;;  %v6633_v44 = vld [vmem:[#allocation2 + $0x28] sm:$0xff]  ;;  %10119 = vst [vmem:[#allocation24_spill] sm:$0xff] %v6647_v25 }
  0x38   : > { %v1334_v8 = vmax.f32 %v1206_v1, %v1270_v3  ;;  %v1338_v24 = vmax.f32 %v1210_v11, %v1399_v10  ;;  %v6511_v1 = vmax.f32 %v1468_v47, %v1533_v37  ;;  %v1234_v3 = vmax.f32 %v1540_v49, %v6503_v53  ;;  %v6536_v37 = vld [vmem:[#allocation2 + $0x140] sm:$0xff]  ;;  %10117 = vst [vmem:[#allocation22_spill] sm:$0xff] %v6633_v44 }
  0x39   : > { %v1460_v12 = vmax.f32 %v1331_v5, %v1396_v7  ;;  %v1464_v35 = vmax.f32 %v1335_v22, %v1525_v15  ;;  %v6514_v5 = vmax.f32 %v1471_v51, %v1536_v40  ;;  %v1475_v7 = vmax.f32 %v1346_v52, %v1536_v40  ;;  %10120 = vst [vmem:[#allocation25_spill] sm:$0xff] %v6651_v16 }
  0x3a   : > { %v1463_v20 = vmax.f32 %v1334_v8, %v1399_v10  ;;  %v1467_v39 = vmax.f32 %v1338_v24, %v1528_v23  ;;  %10103 = vst [vmem:[#allocation8_spill] sm:$0xff] %v6511_v1  ;;  %v6516_v8 = vld [vmem:[#allocation2 + $0x120] sm:$0xff]  ;;  %v1355_v9 = vmax.f32 %v1227_v54, %v1541_v43  ;;  %v1358_v10 = vmax.f32 %v1230_v55, %v6503_v53  ;;  %v6631_v55 = vld [vmem:[#allocation2 + $0x8] sm:$0xff] }
  0x3b   : > { %v6491_v26 = vmax.f32 %v1460_v12, %v1525_v15  ;;  %v6506_v57 = vmax.f32 %v1464_v35, %v1529_v30  ;;  %10104 = vst [vmem:[#allocation9_spill] sm:$0xff] %v6514_v5  ;;  %v1476_v13 = vmax.f32 %v1347_v58, %v1537_v48  ;;  %v1359_v15 = vmax.f32 %v1231_v59, %v6516_v8 }
  0x3c   : > { %v6497_v33 = vmax.f32 %v1463_v20, %v1528_v23  ;;  %v6508_v60 = vmax.f32 %v1467_v39, %v1532_v36  ;;  %v6523_v20 = vmax.f32 %v1472_v61, %v1537_v48  ;;  %v1480_v22 = vmax.f32 %v1351_v63, %v1541_v43  ;;  %v6525_v23 = vld [vmem:[#allocation2 + $0x138] sm:$0xff]  ;;  %v6568_v61 = vld [vmem:[#allocation2 + $0x160] sm:$0xff]  ;;  %10116 = vst [vmem:[#allocation21_spill] sm:$0xff] %v6631_v55 }
  0x3d   : > { %10101 = vst [vmem:[#allocation6_spill] sm:$0xff] %v6506_v57  ;;  %v1362_v30 = vmax.f32 %v1234_v3, %v6525_v23  ;;  %v6532_v32 = vmax.f32 %v1475_v7, %v1540_v49  ;;  %v1484_v35 = vmax.f32 %v1355_v9, %v6516_v8  ;;  %v1487_v36 = vmax.f32 %v1358_v10, %v6525_v23  ;;  %v6551_v49 = vld [vmem:[#allocation2 + $0x158] sm:$0xff]  ;;  %v6581_v7 = vld [vmem:[%s10025_s2] ss:$0 sm:$0xff] }
  0x3e   : > { %10100 = vst [vmem:[#allocation5_spill] sm:$0xff] %v6497_v33  ;;  %10102 = vst [vmem:[#allocation7_spill] sm:$0xff] %v6508_v60  ;;  %v6539_v39 = vmax.f32 %v1476_v13, %v1541_v43  ;;  %v1488_v40 = vmax.f32 %v1359_v15, %v6536_v37  ;;  %v1235_v41 = vmax.f32 %v1541_v43, %v6516_v8 }
  0x3f   : > { %10105 = vst [vmem:[#allocation10_spill] sm:$0xff] %v6523_v20  ;;  %10106 = vst [vmem:[#allocation11_spill] sm:$0xff] %v6532_v32  ;;  %v6546_v47 = vmax.f32 %v1479_v21, %v6503_v53  ;;  %v6549_v48 = vmax.f32 %v1480_v22, %v6516_v8  ;;  %v6554_v50 = vmax.f32 %v1483_v27, %v6525_v23 }
  0x40   : > { %10107 = vst [vmem:[#allocation12_spill] sm:$0xff] %v6539_v39  ;;  %v1491_v51 = vmax.f32 %v1362_v30, %v6551_v49  ;;  %v1238_v43 = vmax.f32 %v6503_v53, %v6525_v23  ;;  %v1363_v52 = vmax.f32 %v1235_v41, %v6536_v37  ;;  %v6563_v58 = vmax.f32 %v1484_v35, %v6536_v37  ;;  %v6611_v53 = vld [vmem:[#allocation2 + $0x180] sm:$0xff] }
  0x41   : > { %10108 = vst [vmem:[#allocation13_spill] sm:$0xff] %v6546_v47  ;;  %10109 = vst [vmem:[#allocation14_spill] sm:$0xff] %v6549_v48  ;;  %v6566_v59 = vmax.f32 %v1487_v36, %v6551_v49  ;;  %v6576_v3 = vmax.f32 %v1488_v40, %v6568_v61  ;;  %v2596_v29 = vmax.f32 %v2468_v31, %v6647_v25  ;;  %v6724_v48 = vld [vmem:[#allocation2 + $0x78] sm:$0xff] }
  0x42   : > { %10110 = vst [vmem:[#allocation15_spill] sm:$0xff] %v6554_v50  ;;  %10111 = vst [vmem:[#allocation16_spill] sm:$0xff] %v6563_v58  ;;  %v6586_v13 = vmax.f32 %v1491_v51, %v6573_v2  ;;  %v1366_v15 = vmax.f32 %v1238_v43, %v6551_v49  ;;  %v1492_v30 = vmax.f32 %v1363_v52, %v6568_v61 }
  0x43   : > { %10112 = vst [vmem:[#allocation17_spill] sm:$0xff] %v6566_v59  ;;  %10113 = vst [vmem:[#allocation18_spill] sm:$0xff] %v6576_v3 }
  0x44   : > { %10114 = vst [vmem:[#allocation19_spill] sm:$0xff] %v6586_v13 }
  0xe9   : > { %v5839_v35 = vpop.f32.mrb[0].mxu0 }
  0xea   : > { %v6598_v10 = vadd.f32 %v5839_v35, %v6581_v7  ;;  %v427_v43 = vpop.f32.mrb[1].mxu0  ;;  %v5855_v21 = vpop.f32.mrb[0].mxu1  ;;  %v1495_v35 = vmax.f32 %v1366_v15, %v6573_v2 }
  0xeb   : > { %v6604_v9 = vadd.f32 %v6581_v7, %v427_v43  ;;  %v5840_v36 = vpop.f32.mrb[2].mxu0  ;;  %v6607_v40 = vadd.f32 %v5855_v21, %v6581_v7  ;;  %v491_v41 = vpop.f32.mrb[1].mxu1  ;;  %v6621_v21 = vmax.f32 %v1492_v30, %v6611_v53 }
  0xec   : > { %v5616_v22 = vmul.f32 -1.442695, %v6598_v10  ;;  %v6615_v27 = vadd.f32 %v5840_v36, %v6581_v7  ;;  %v430_v52 = vpop.f32.mrb[3].mxu0  ;;  %v6618_v43 = vadd.f32 %v6581_v7, %v491_v41  ;;  %v5856_v63 = vpop.f32.mrb[2].mxu1 }
  0xed   : > { %10115 = vst [vmem:[#allocation20_spill] sm:$0xff] %v6621_v21  ;;  %v5614_v62 = vmul.f32 -1.442695, %v6604_v9  ;;  %v6625_v51 = vadd.f32 %v6581_v7, %v430_v52  ;;  %v6628_v15 = vadd.f32 %v5856_v63, %v6581_v7  ;;  %v494_v54 = vpop.f32.mrb[3].mxu1  ;;  %v5632_v30 = vmul.f32 -1.442695, %v6607_v40 }
  0xee   : > { %6025 = vpow2.f32 %v5616_v22  ;;  %v5617_v41 = vmul.f32 -1.442695, %v6615_v27  ;;  %v6638_v42 = vadd.f32 %v6581_v7, %v494_v54  ;;  %v6640_v52 = vld [vmem:[#allocation2 + $0x198] sm:$0xff]  ;;  %v5630_v38 = vmul.f32 -1.442695, %v6618_v43 }
  0xef   : > { %6027 = vpow2.f32 %v5614_v62  ;;  %v5615_v63 = vmul.f32 -1.442695, %v6625_v51  ;;  %v6645_v36 = vmax.f32 %v1495_v35, %v6640_v52  ;;  %v5633_v22 = vmul.f32 -1.442695, %v6628_v15  ;;  %v2471_v54 = vld [vmem:[#allocation2 + $0x18] sm:$0xff] }
  0xf0   : > { %6029 = vpow2.f32 %v5617_v41  ;;  %v5631_v24 = vmul.f32 -1.442695, %v6638_v42  ;;  %v6693_v21 = vld [vmem:[#allocation2 + $0x58] sm:$0xff] }
  0xf1   : > { %10118 = vst [vmem:[#allocation23_spill] sm:$0xff] %v6645_v36  ;;  %6031 = vpow2.f32 %v5615_v63  ;;  %v5843_v0 = vpop.f32.mrb[4].mxu0  ;;  %10126 = vst [vmem:[#allocation31_spill] sm:$0xff] %v6693_v21 }
  0xf2   : > { %6033 = vpow2.f32 %v5632_v30  ;;  %v6659_v41 = vadd.f32 %v5843_v0, %v6581_v7  ;;  %v5859_v11 = vpop.f32.mrb[4].mxu1  ;;  %v443_v46 = vpop.f32.mrb[5].mxu0  ;;  %v2599_v30 = vmax.f32 %v2471_v54, %v6651_v16 }
  0xf3   : > { %6035 = vpow2.f32 %v5630_v38  ;;  %v6664_v63 = vadd.f32 %v5859_v11, %v6581_v7  ;;  %v6667_v62 = vadd.f32 %v6581_v7, %v443_v46  ;;  %v507_v35 = vpop.f32.mrb[5].mxu1  ;;  %v5844_v56 = vpop.f32.mrb[6].mxu0  ;;  %v6677_v11 = vld [vmem:[#allocation2 + $0x10] sm:$0xff] }
  0xf4   : > { %6037 = vpow2.f32 %v5633_v22  ;;  %v5620_v0 = vmul.f32 -1.442695, %v6659_v41  ;;  %v6672_v12 = vadd.f32 %v6581_v7, %v507_v35  ;;  %v6675_v45 = vadd.f32 %v5844_v56, %v6581_v7  ;;  %v5860_v31 = vpop.f32.mrb[6].mxu1  ;;  %v446_v38 = vpop.f32.mrb[7].mxu0  ;;  %10121 = vst [vmem:[#allocation26_spill] sm:$0xff] %v6677_v11  ;;  %v6686_v35 = vld [vmem:[#allocation2 + $0x40] sm:$0xff] }
  0xf5   : > { %6039 = vpow2.f32 %v5631_v24  ;;  %v5636_v46 = vmul.f32 -1.442695, %v6664_v63  ;;  %v5618_v54 = vmul.f32 -1.442695, %v6667_v62  ;;  %v6684_v22 = vadd.f32 %v5860_v31, %v6581_v7  ;;  %v510_v44 = vpop.f32.mrb[7].mxu1  ;;  %10124 = vst [vmem:[#allocation29_spill] sm:$0xff] %v6686_v35 }
  0xf6   : > { %6041 = vpow2.f32 %v5620_v0  ;;  %v5634_v56 = vmul.f32 -1.442695, %v6672_v12  ;;  %v5621_v55 = vmul.f32 -1.442695, %v6675_v45  ;;  %v6691_v36 = vadd.f32 %v6581_v7, %v446_v38 }
  0xf7   : > { %10123 = vst [vmem:[#allocation28_spill] sm:$0xff] %v6684_v22  ;;  %6043 = vpow2.f32 %v5636_v46  ;;  %v6696_v24 = vadd.f32 %v6581_v7, %v510_v44  ;;  %v6703_v3 = vmul.f32 -1.442695, %v6684_v22  ;;  %v6709_v59 = vmax.f32 %v2596_v29, %v6686_v35 }
  0xf8   : > { %10125 = vst [vmem:[#allocation30_spill] sm:$0xff] %v6691_v36  ;;  %v6026_v0 = vpop.eup %6025  ;;  %6045 = vpow2.f32 %v5618_v54  ;;  %v6706_v38 = vmul.f32 -1.442695, %v6691_v36  ;;  %v6712_v31 = vmax.f32 %v2599_v30, %v6693_v21 }
  0xf9   : > { %10127 = vst [vmem:[#allocation32_spill] sm:$0xff] %v6696_v24  ;;  %v6028_v46 = vpop.eup %6027  ;;  %v652_v44 = vadd.f32 1.0, %v6026_v0  ;;  %6047 = vpow2.f32 %v5634_v56  ;;  %v5847_v58 = vpop.f32.mrb[8].mxu0  ;;  %v6719_v50 = vmul.f32 -1.442695, %v6696_v24 }
  0xfa   : > { %v6030_v13 = vpop.eup %6029  ;;  %v650_v11 = vadd.f32 1.0, %v6028_v46  ;;  %6049 = vpow2.f32 %v5621_v55  ;;  %v6722_v29 = vadd.f32 %v5847_v58, %v6581_v7  ;;  %v5863_v0 = vpop.f32.mrb[8].mxu1 }
  0xfb   : > { %v459_v56 = vpop.f32.mrb[9].mxu0  ;;  %v6032_v30 = vpop.eup %6031  ;;  %6051 = vrcp.f32 %v652_v44  ;;  %v653_v47 = vadd.f32 1.0, %v6030_v13  ;;  %v6727_v39 = vadd.f32 %v5863_v0, %v6581_v7 }
  0xfc   : > { %10128 = vst [vmem:[#allocation33_spill] sm:$0xff] %v6722_v29  ;;  %v6730_v54 = vadd.f32 %v6581_v7, %v459_v56  ;;  %v523_v55 = vpop.f32.mrb[9].mxu1  ;;  %v5848_v46 = vpop.f32.mrb[10].mxu0  ;;  %6053 = vrcp.f32 %v650_v11  ;;  %v651_v20 = vadd.f32 1.0, %v6032_v30  ;;  %v6738_v1 = vmul.f32 -1.442695, %v6722_v29 }
  0xfd   : > { %10129 = vst [vmem:[#allocation34_spill] sm:$0xff] %v6727_v39  ;;  %v6034_v32 = vpop.eup %6033  ;;  %v6733_v58 = vadd.f32 %v6581_v7, %v523_v55  ;;  %v5864_v6 = vpop.f32.mrb[10].mxu1  ;;  %6055 = vrcp.f32 %v653_v47  ;;  %v6743_v55 = vmul.f32 -1.442695, %v6727_v39  ;;  %v6746_v33 = vadd.f32 %v5848_v46, %v6581_v7 }
  0xfe   : > { %10130 = vst [vmem:[#allocation35_spill] sm:$0xff] %v6730_v54  ;;  %v462_v5 = vpop.f32.mrb[11].mxu0  ;;  %v6036_v13 = vpop.eup %6035  ;;  %v668_v0 = vadd.f32 1.0, %v6034_v32  ;;  %6057 = vrcp.f32 %v651_v20  ;;  %v6749_v32 = vmul.f32 -1.442695, %v6730_v54  ;;  %v6752_v16 = vadd.f32 %v5864_v6, %v6581_v7 }
  0xff   : > { %10131 = vst [vmem:[#allocation36_spill] sm:$0xff] %v6733_v58  ;;  %v526_v56 = vpop.f32.mrb[11].mxu1  ;;  %v6038_v11 = vpop.eup %6037  ;;  %v666_v30 = vadd.f32 1.0, %v6036_v13  ;;  %10132 = vst [vmem:[#allocation37_spill] sm:$0xff] %v6746_v33  ;;  %v6755_v20 = vmul.f32 -1.442695, %v6733_v58  ;;  %v6758_v13 = vadd.f32 %v6581_v7, %v462_v5 }
 0x100   : > { %v6040_v44 = vpop.eup %6039  ;;  %6059 = vrcp.f32 %v668_v0  ;;  %v669_v47 = vadd.f32 1.0, %v6038_v11  ;;  %10133 = vst [vmem:[#allocation38_spill] sm:$0xff] %v6752_v16  ;;  %v6761_v0 = vmul.f32 -1.442695, %v6746_v33  ;;  %v6764_v11 = vadd.f32 %v6581_v7, %v526_v56 }
 0x101   : > { %v6042_v21 = vpop.eup %6041  ;;  %6061 = vrcp.f32 %v666_v30  ;;  %v667_v60 = vadd.f32 1.0, %v6040_v44  ;;  %10134 = vst [vmem:[#allocation39_spill] sm:$0xff] %v6758_v13  ;;  %v5851_v6 = vpop.f32.mrb[12].mxu0  ;;  %v6767_v44 = vmul.f32 -1.442695, %v6752_v16 }
 0x102   : > { %v6044_v46 = vpop.eup %6043  ;;  %6063 = vrcp.f32 %v669_v47  ;;  %v656_v25 = vadd.f32 1.0, %v6042_v21  ;;  %10135 = vst [vmem:[#allocation40_spill] sm:$0xff] %v6764_v11  ;;  %v6770_v58 = vadd.f32 %v5851_v6, %v6581_v7  ;;  %v5867_v5 = vpop.f32.mrb[12].mxu1  ;;  %v6779_v29 = vmul.f32 -1.442695, %v6758_v13 }
 0x103   : > { %v6046_v35 = vpop.eup %6045  ;;  %6065 = vrcp.f32 %v667_v60  ;;  %v672_v30 = vadd.f32 1.0, %v6044_v46  ;;  %v475_v54 = vpop.f32.mrb[13].mxu0  ;;  %v6773_v33 = vadd.f32 %v5867_v5, %v6581_v7  ;;  %v6785_v24 = vmul.f32 -1.442695, %v6764_v11 }
 0x104   : > { %10136 = vst [vmem:[#allocation41_spill] sm:$0xff] %v6770_v58  ;;  %v6048_v47 = vpop.eup %6047  ;;  %6067 = vrcp.f32 %v656_v25  ;;  %v654_v21 = vadd.f32 1.0, %v6046_v35  ;;  %v6776_v56 = vadd.f32 %v6581_v7, %v475_v54  ;;  %v539_v39 = vpop.f32.mrb[13].mxu1  ;;  %v6788_v54 = vmul.f32 -1.442695, %v6770_v58 }
 0x105   : > { %v5852_v60 = vpop.f32.mrb[14].mxu0  ;;  %v6050_v46 = vpop.eup %6049  ;;  %6069 = vrcp.f32 %v672_v30  ;;  %v670_v16 = vadd.f32 1.0, %v6048_v47  ;;  %v6782_v6 = vadd.f32 %v6581_v7, %v539_v39  ;;  %v6792_v13 = vmul.f32 -1.442695, %v6773_v33 }
 0x106   : > { %v5868_v57 = vpop.f32.mrb[14].mxu1  ;;  %v478_v25 = vpop.f32.mrb[15].mxu0  ;;  %6071 = vrcp.f32 %v654_v21  ;;  %v657_v5 = vadd.f32 1.0, %v6050_v46  ;;  %v6795_v39 = vadd.f32 %v5852_v60, %v6581_v7  ;;  %v6799_v46 = vmul.f32 -1.442695, %v6776_v56 }
 0x107   : > { %v6052_v35 = vpop.eup %6051  ;;  %v542_v36 = vpop.f32.mrb[15].mxu1  ;;  %6073 = vrcp.f32 %v670_v16  ;;  %v6802_v58 = vadd.f32 %v5868_v57, %v6581_v7  ;;  %v6811_v60 = vadd.f32 %v6581_v7, %v478_v25 }
 0x108   : > { %v6054_v30 = vpop.eup %6053  ;;  %v748_v47 = vmul.f32 %v6052_v35, %v6598_v10  ;;  %6075 = vrcp.f32 %v657_v5  ;;  %v6808_v10 = vmul.f32 -1.442695, %v6782_v6  ;;  %v6817_v5 = vmul.f32 -1.442695, %v6795_v39 }
 0x109   : > { %v6056_v22 = vpop.eup %6055  ;;  %v746_v21 = vmul.f32 %v6054_v30, %v6604_v9  ;;  %6077 = vpow2.f32 %v6703_v3  ;;  %v2916_v9 = vld [vmem:[#allocation2 + $0x80] sm:$0xff]  ;;  %v2919_v3 = vld [vmem:[#allocation2 + $0x98] sm:$0xff] }
 0x10a   : > { %v6058_v11 = vpop.eup %6057  ;;  %1044 = vst.msk [vmem:[#allocation2 + $0x68] sm:$0xff] %vm226_vm3, %v748_v47  ;;  %v749_v16 = vmul.f32 %v6056_v22, %v6615_v27  ;;  %6079 = vpow2.f32 %v6706_v38  ;;  %v6820_v27 = vadd.f32 %v6581_v7, %v542_v36  ;;  %v10137_v36 = vmax.f32 %v6709_v59, %v6714_v28 }
 0x10b   : > { %v6060_v35 = vpop.eup %6059  ;;  %1042 = vst.msk [vmem:[#allocation2 + $0x48] sm:$0xff] %vm226_vm3, %v746_v21  ;;  %v747_v57 = vmul.f32 %v6058_v11, %v6625_v51  ;;  %6081 = vpow2.f32 %v6719_v50  ;;  %v6828_v51 = vmul.f32 -1.442695, %v6802_v58 }
 0x10c   : > { %v6062_v22 = vpop.eup %6061  ;;  %v779_v30 = vpack.c.bf16 %v749_v16, %v748_v47  ;;  %1045 = vst.msk [vmem:[#allocation2 + $0x70] sm:$0xff] %vm226_vm3, %v749_v16  ;;  %v6824_v25 = vmul.f32 %v6060_v35, %v6607_v40  ;;  %6083 = vpow2.f32 %v6738_v1  ;;  %v6838_v47 = vmax.f32 %v10137_v36, %v2916_v9 }
 0x10d   : > { %v6064_v38 = vpop.eup %6063  ;;  %v778_v11 = vpack.c.bf16 %v747_v57, %v746_v21  ;;  %1043 = vst.msk [vmem:[#allocation2 + $0x50] sm:$0xff] %vm226_vm3, %v747_v57  ;;  %v6832_v7 = vmul.f32 %v6062_v22, %v6618_v43  ;;  %6085 = vpow2.f32 %v6743_v55  ;;  %v6847_v21 = vmul.f32 -1.442695, %v6811_v60 }
 0x10e   : > { %10138 = vst [vmem:[#allocation42_spill] sm:$0xff] %v6838_v47  ;;  %v6066_v40 = vpop.eup %6065  ;;  %1060 = vst.msk [vmem:[#allocation2 + $0x168] sm:$0xff] %vm226_vm3, %v6824_v25  ;;  %v6843_v50 = vmul.f32 %v6064_v38, %v6628_v15  ;;  %v10139_v1 = vmax.f32 %v6712_v31, %v6724_v48  ;;  %6087 = vpow2.f32 %v6749_v32  ;;  %v6861_v15 = vmul.f32 -1.442695, %v6820_v27 }
 0x10f   : > { %v6068_v28 = vpop.eup %6067  ;;  %1058 = vst.msk [vmem:[#allocation2 + $0x148] sm:$0xff] %vm226_vm3, %v6832_v7  ;;  %v6857_v59 = vmul.f32 %v6066_v40, %v6638_v42  ;;  %5871 = vmatprep.mubr.msk.bf16.mxu1 %vm226_vm3, %v778_v11  ;;  %v10141_v48 = vmax.f32 %v6516_v8, %v6536_v37  ;;  %6089 = vpow2.f32 %v6755_v20 }
 0x110   : > { %v6852_v43 = vmax.f32 %v10139_v1, %v2919_v3  ;;  %v6070_v55 = vpop.eup %6069  ;;  %1061 = vst.msk [vmem:[#allocation2 + $0x170] sm:$0xff] %vm226_vm3, %v6843_v50  ;;  %v6875_v42 = vmul.f32 %v6068_v28, %v6659_v41  ;;  %5872 = vmatmul.mubr.msk.bf16.vlgmr.msra.gmra.mrb[16].mxu1 %vm226_vm3, %v779_v30  ;;  %6091 = vpow2.f32 %v6761_v0  ;;  %v10142_v0 = vmax.f32 %v6525_v23, %v6551_v49 }
 0x111   : > { %v6868_v31 = vmax.f32 %v10141_v48, %v6568_v61  ;;  %v6072_v9 = vpop.eup %6071  ;;  %1059 = vst.msk [vmem:[#allocation2 + $0x150] sm:$0xff] %vm226_vm3, %v6857_v59  ;;  %v6885_v35 = vmul.f32 %v6070_v55, %v6664_v63  ;;  %5938 = vmatpush3.bf16.msra.mxu1 %v6477_v4  ;;  %6093 = vpow2.f32 %v6767_v44  ;;  %v6912_v11 = vld [vmem:[#allocation2 + $0x68] sm:$0xff] }
 0x112   : > { %10140 = vst [vmem:[#allocation43_spill] sm:$0xff] %v6852_v43  ;;  %v6074_v20 = vpop.eup %6073  ;;  %1048 = vst.msk [vmem:[#allocation2 + $0xa8] sm:$0xff] %vm226_vm3, %v6875_v42  ;;  %v6893_v57 = vmul.f32 %v6072_v9, %v6667_v62  ;;  %v6896_v3 = vld [vmem:[#allocation2 + $0x48] sm:$0xff]  ;;  %v1370_v4 = vmax.f32 %v10142_v0, %v6573_v2  ;;  %6095 = vpow2.f32 %v6779_v29  ;;  %v10143_v29 = vmax.f32 %v6483_v14, %v6487_v18 }
 0x113   : > { %v6076_v22 = vpop.eup %6075  ;;  %1064 = vst.msk [vmem:[#allocation2 + $0x1a8] sm:$0xff] %vm226_vm3, %v6885_v35  ;;  %v6906_v30 = vmul.f32 %v6074_v20, %v6672_v12  ;;  %v1208_v62 = vmax.f32 %v6487_v18, %v6896_v3  ;;  %6097 = vpow2.f32 %v6785_v24  ;;  %v1496_v40 = vmax.f32 %v6868_v31, %v6611_v53  ;;  %v6946_v9 = vld [vmem:[#allocation2 + $0x70] sm:$0xff] }
 0x114   : > { %v6078_v38 = vpop.eup %6077  ;;  %1046 = vst.msk [vmem:[#allocation2 + $0x88] sm:$0xff] %vm226_vm3, %v6893_v57  ;;  %v6917_v23 = vmul.f32 %v6076_v22, %v6675_v45  ;;  %v6920_v12 = vld [vmem:[#allocation2 + $0x50] sm:$0xff]  ;;  %v1332_v36 = vmax.f32 %v10143_v29, %v6896_v3  ;;  %6099 = vpow2.f32 %v6788_v54  ;;  %v1499_v24 = vmax.f32 %v1370_v4, %v6640_v52  ;;  %v6951_v22 = vld [vmem:[#allocation2 + $0x1a0] sm:$0xff] }
 0x115   : > { %v6080_v1 = vpop.eup %6079  ;;  %1062 = vst.msk [vmem:[#allocation2 + $0x188] sm:$0xff] %vm226_vm3, %v6906_v30  ;;  %v673_v28 = vadd.f32 1.0, %v6078_v38  ;;  %v1209_v45 = vmax.f32 %v6489_v19, %v6920_v12  ;;  %6101 = vpow2.f32 %v6792_v13  ;;  %v10144_v54 = vmax.f32 %v6485_v17, %v6489_v19  ;;  %10145 = vst [vmem:[#allocation44_spill] sm:$0xff] %v6951_v22 }
 0x116   : > { %v6082_v48 = vpop.eup %6081  ;;  %1049 = vst.msk [vmem:[#allocation2 + $0xb0] sm:$0xff] %vm226_vm3, %v6917_v23  ;;  %v655_v18 = vadd.f32 1.0, %v6080_v1  ;;  %v1336_v0 = vmax.f32 %v1208_v62, %v6912_v11  ;;  %v1212_v4 = vmax.f32 %v6896_v3, %v6912_v11  ;;  %v1461_v17 = vmax.f32 %v1332_v36, %v6912_v11  ;;  %v6958_v19 = vld [vmem:[#allocation2 + $0x148] sm:$0xff]  ;;  %v1564_v62 = vld [vmem:[#allocation2 + $0x1b8] sm:$0xff] }
 0x117   : > { %v6944_v31 = vmax.f32 %v10144_v54, %v6920_v12  ;;  %v6084_v55 = vpop.eup %6083  ;;  %6103 = vrcp.f32 %v673_v28  ;;  %v671_v20 = vadd.f32 1.0, %v6082_v48  ;;  %v6954_v29 = vmax.f32 %v1209_v45, %v6946_v9  ;;  %v6960_v1 = vld [vmem:[#allocation2 + $0x168] sm:$0xff]  ;;  %v10155_v11 = vld [vmem:[#allocation35_spill] sm:$0xff] }
 0x118   : > { %v6086_v38 = vpop.eup %6085  ;;  %6105 = vrcp.f32 %v655_v18  ;;  %v660_v13 = vadd.f32 1.0, %v6084_v55  ;;  %v6963_v48 = vmax.f32 %v1496_v40, %v6951_v22  ;;  %v6965_v18 = vmax.f32 %v1499_v24, %v1564_v62  ;;  %v10177_v22 = vld [vmem:[#allocation5_spill] sm:$0xff] }
 0x119   : > { %v6088_v28 = vpop.eup %6087  ;;  %6107 = vrcp.f32 %v671_v20  ;;  %v676_v3 = vadd.f32 1.0, %v6086_v38  ;;  %v6989_v36 = vld [vmem:[#allocation2 + $0xa8] sm:$0xff] }
 0x11a   : > { %v6090_v54 = vpop.eup %6089  ;;  %6109 = vrcp.f32 %v660_v13  ;;  %v658_v45 = vadd.f32 1.0, %v6088_v28 }
 0x11b   : > { %v6092_v55 = vpop.eup %6091  ;;  %v6971_v44 = vld [vmem:[#allocation2 + $0x88] sm:$0xff]  ;;  %6111 = vrcp.f32 %v676_v3  ;;  %v674_v20 = vadd.f32 1.0, %v6090_v54 }
 0x11c   : > { %v6094_v38 = vpop.eup %6093  ;;  %6113 = vrcp.f32 %v658_v45  ;;  %v661_v13 = vadd.f32 1.0, %v6092_v55  ;;  %v6978_v62 = vmax.f32 %v1461_v17, %v6971_v44  ;;  %v1465_v28 = vmax.f32 %v1336_v0, %v6971_v44  ;;  %v6987_v55 = vld [vmem:[#allocation2 + $0x68] sm:$0xff] }
 0x11d   : > { %v6096_v41 = vpop.eup %6095  ;;  %6115 = vrcp.f32 %v674_v20  ;;  %v677_v63 = vadd.f32 1.0, %v6094_v38  ;;  %v6985_v45 = vmax.f32 %v1212_v4, %v6971_v44  ;;  %v1216_v38 = vmax.f32 %v6987_v55, %v6971_v44  ;;  %v10147_v55 = vld [vmem:[#allocation28_spill] sm:$0xff] }
 0x11e   : > { %v6098_v32 = vpop.eup %6097  ;;  %6117 = vrcp.f32 %v661_v13  ;;  %v659_v16 = vadd.f32 1.0, %v6096_v41  ;;  %v10087_v8 = vrot.slane %v6978_v62, 7  ;;  %v10088_v20 = vrot.slane %v6978_v62, 6  ;;  %v10150_v44 = vld [vmem:[#allocation32_spill] sm:$0xff] }
 0x11f   : > { %v6100_v17 = vpop.eup %6099  ;;  %6119 = vrcp.f32 %v677_v63  ;;  %v675_v0 = vadd.f32 1.0, %v6098_v32  ;;  %v10146_v4 = vrot.slane %v6491_v26, 7  ;;  %v7003_v3 = vmax.f32 %v1465_v28, %v6989_v36  ;;  %v10148_v28 = vld [vmem:[#allocation30_spill] sm:$0xff] }
 0x120   : > { %v6102_v54 = vpop.eup %6101  ;;  %6121 = vrcp.f32 %v659_v16  ;;  %v664_v41 = vadd.f32 1.0, %v6100_v17 }
 0x121   : > { %v7000_v13 = vsel %vm1703_vm4, %v10146_v4, %v10087_v8  ;;  %v6104_v32 = vpop.eup %6103  ;;  %6123 = vrcp.f32 %v675_v0  ;;  %v680_v63 = vadd.f32 1.0, %v6102_v54  ;;  %v10089_v4 = vrot.slane %v7003_v3, 7 }
 0x122   : > { %v6106_v16 = vpop.eup %6105  ;;  %v7008_v17 = vmul.f32 %v6104_v32, %v10147_v55  ;;  %6125 = vrcp.f32 %v664_v41  ;;  %v10149_v54 = vrot.slane %v6491_v26, 6  ;;  %v10090_v32 = vrot.slane %v7003_v3, 6  ;;  %v10151_v26 = vld [vmem:[#allocation6_spill] sm:$0xff]  ;;  %v10153_v55 = vld [vmem:[#allocation33_spill] sm:$0xff] }
 0x123   : > { %v6108_v8 = vpop.eup %6107  ;;  %v751_v40 = vmul.f32 %v6106_v16, %v10148_v28  ;;  %6127 = vrcp.f32 %v680_v63  ;;  %v10152_v63 = vrot.slane %v10151_v26, 7 }
 0x124   : > { %v7020_v0 = vsel %vm1929_vm5, %v10149_v54, %v10088_v20  ;;  %v6110_v41 = vpop.eup %6109  ;;  %1065 = vst.msk [vmem:[#allocation2 + $0x1b0] sm:$0xff] %vm226_vm3, %v7008_v17  ;;  %v7028_v16 = vmul.f32 %v6108_v8, %v10150_v44  ;;  %6129 = vpow2.f32 %v6799_v46  ;;  %v7046_v8 = vld [vmem:[#allocation2 + $0x170] sm:$0xff] }
 0x125   : > { %v7037_v28 = vsel %vm1703_vm4, %v10152_v63, %v10089_v4  ;;  %v6112_v54 = vpop.eup %6111  ;;  %v780_v20 = vpack.c.bf16 %v751_v40, %v6893_v57  ;;  %1047 = vst.msk [vmem:[#allocation2 + $0x90] sm:$0xff] %vm226_vm3, %v751_v40  ;;  %v7042_v24 = vmul.f32 %v6110_v41, %v10153_v55  ;;  %6131 = vpow2.f32 %v6808_v10  ;;  %v10154_v63 = vld [vmem:[#allocation34_spill] sm:$0xff]  ;;  %v7058_v40 = vld [vmem:[#allocation2 + $0x88] sm:$0xff] }
 0x126   : > { %v6114_v44 = vpop.eup %6113  ;;  %1063 = vst.msk [vmem:[#allocation2 + $0x190] sm:$0xff] %vm226_vm3, %v7028_v16  ;;  %v7053_v57 = vmul.f32 %v6112_v54, %v10154_v63  ;;  %6133 = vpow2.f32 %v6817_v5  ;;  %v7060_v41 = vld [vmem:[#allocation2 + $0xa8] sm:$0xff]  ;;  %v7062_v55 = vld [vmem:[#allocation2 + $0x150] sm:$0xff]  ;;  %v10156_v54 = vrot.slane %v10151_v26, 6 }
 0x127   : > { %v6116_v46 = vpop.eup %6115  ;;  %1052 = vst.msk [vmem:[#allocation2 + $0xe8] sm:$0xff] %vm226_vm3, %v7042_v24  ;;  %v754_v4 = vmul.f32 %v6114_v44, %v10155_v11  ;;  %6135 = vpow2.f32 %v6828_v51  ;;  %5875 = vmatprep.mubr.msk.bf16.mxu1 %vm226_vm3, %v780_v20  ;;  %v7079_v10 = vld [vmem:[#allocation2 + $0x188] sm:$0xff]  ;;  %v10158_v51 = vld [vmem:[#allocation36_spill] sm:$0xff]  ;;  %v10159_v20 = vpack.c.bf16 %v6917_v23, %v6875_v42  ;;  %v7094_v44 = vmax.f32 %v1216_v38, %v6989_v36  ;;  %v10161_v38 = vld [vmem:[#allocation38_spill] sm:$0xff] }
 0x128   : > { %v7077_v63 = vsel %vm1929_vm5, %v10156_v54, %v10090_v32  ;;  %10157 = vst [vmem:[#allocation28_spill] sm:$0xff] %v7079_v10  ;;  %v6118_v14 = vpop.eup %6117  ;;  %1068 = vst.msk [vmem:[#allocation2 + $0x1e8] sm:$0xff] %vm226_vm3, %v7053_v57  ;;  %v7084_v11 = vmul.f32 %v6116_v46, %v10158_v51  ;;  %6137 = vpow2.f32 %v6847_v21  ;;  %v10160_v32 = vld [vmem:[#allocation37_spill] sm:$0xff]  ;;  %v10164_v51 = vmax.f32 %v6958_v19, %v6960_v1 }
 0x129   : > { %5876 = vmatmul.mubr.msk.bf16.gmra.mrb[20].mxu1 %vm226_vm3, %v10159_v20  ;;  %v6120_v54 = vpop.eup %6119  ;;  %1050 = vst.msk [vmem:[#allocation2 + $0xc8] sm:$0xff] %vm226_vm3, %v754_v4  ;;  %v757_v5 = vmul.f32 %v6118_v14, %v10160_v32  ;;  %6139 = vpow2.f32 %v6861_v15  ;;  %v1246_v14 = vmax.f32 %v6551_v49, %v6573_v2  ;;  %v10162_v15 = vmax.f32 %v6536_v37, %v6568_v61  ;;  %v10173_v26 = vld [vmem:[#allocation41_spill] sm:$0xff] }
 0x12a   : > { %v6122_v23 = vpop.eup %6121  ;;  %1066 = vst.msk [vmem:[#allocation2 + $0x1c8] sm:$0xff] %vm226_vm3, %v7084_v11  ;;  %v7107_v46 = vmul.f32 %v6120_v54, %v10161_v38  ;;  %v7121_v20 = vmax.f32 %v10164_v51, %v7079_v10  ;;  %v10166_v54 = vld [vmem:[#allocation39_spill] sm:$0xff]  ;;  %v10174_v51 = vmax.f32 %v6944_v31, %v6946_v9  ;;  %v10175_v31 = vmax.f32 %v6920_v12, %v6946_v9 }
 0x12b   : > { %v7115_v32 = vmax.f32 %v10162_v15, %v6611_v53  ;;  %v6124_v42 = vpop.eup %6123  ;;  %v783_v21 = vpack.c.bf16 %v757_v5, %v7042_v24  ;;  %1053 = vst.msk [vmem:[#allocation2 + $0xf0] sm:$0xff] %vm226_vm3, %v757_v5  ;;  %v755_v38 = vmul.f32 %v6122_v23, %v10166_v54  ;;  %v10171_v24 = vld [vmem:[#allocation40_spill] sm:$0xff]  ;;  %v7140_v5 = vmax.f32 %v1246_v14, %v6640_v52  ;;  %v7154_v52 = vld [vmem:[#allocation2 + $0x70] sm:$0xff] }
 0x12c   : > { %10165 = vst [vmem:[#allocation32_spill] sm:$0xff] %v7121_v20  ;;  %v6126_v53 = vpop.eup %6125  ;;  %v7130_v15 = vld [vmem:[#allocation2 + $0x90] sm:$0xff]  ;;  %1069 = vst.msk [vmem:[#allocation2 + $0x1f0] sm:$0xff] %vm226_vm3, %v7107_v46  ;;  %v7137_v47 = vmul.f32 %v6124_v42, %v10171_v24  ;;  %v10179_v20 = vrot.slane %v6978_v62, 1  ;;  %v10181_v10 = vrot.slane %v6978_v62, 6 }
 0x12d   : > { %10163 = vst [vmem:[#allocation30_spill] sm:$0xff] %v7115_v32  ;;  %10172 = vst [vmem:[#allocation6_spill] sm:$0xff] %v7140_v5  ;;  %v6128_v54 = vpop.eup %6127  ;;  %v782_v61 = vpack.c.bf16 %v755_v38, %v754_v4  ;;  %v7146_v43 = vmul.f32 %v6126_v53, %v10173_v26  ;;  %v1591_v37 = vmax.f32 %v10174_v51, %v7130_v15  ;;  %v7171_v53 = vld [vmem:[#allocation2 + $0xb0] sm:$0xff]  ;;  %v10178_v32 = vrot.slane %v10177_v22, 1 }
 0x12e   : > { %1051 = vst.msk [vmem:[#allocation2 + $0xd0] sm:$0xff] %vm226_vm3, %v755_v38  ;;  %v1466_v42 = vmax.f32 %v6954_v29, %v7130_v15  ;;  %v6130_v14 = vpop.eup %6129  ;;  %1067 = vst.msk [vmem:[#allocation2 + $0x1d0] sm:$0xff] %vm226_vm3, %v7137_v47  ;;  %v7161_v4 = vmul.f32 %v6128_v54, %v6773_v33  ;;  %v7167_v26 = vmax.f32 %v10175_v31, %v7130_v15 }
 0x12f   : > { %v6132_v38 = vpop.eup %6131  ;;  %1056 = vst.msk [vmem:[#allocation2 + $0x128] sm:$0xff] %vm226_vm3, %v7146_v43  ;;  %v662_v51 = vadd.f32 1.0, %v6130_v14  ;;  %5879 = vmatprep.mubr.msk.bf16.mxu1 %vm226_vm3, %v782_v61  ;;  %v1685_v33 = vrot.slane %v1591_v37, 7  ;;  %v1784_v54 = vrot.slane %v1591_v37, 1  ;;  %v1913_v23 = vrot.slane %v1591_v37, 6 }
 0x130   : > { %v6134_v24 = vpop.eup %6133  ;;  %1072 = vst.msk [vmem:[#allocation2 + $0x228] sm:$0xff] %vm226_vm3, %v7161_v4  ;;  %v678_v12 = vadd.f32 1.0, %v6132_v38  ;;  %v2010_v9 = vrot.slane %v1591_v37, 2  ;;  %v1595_v31 = vmax.f32 %v1466_v42, %v7171_v53  ;;  %v1470_v29 = vmax.f32 %v7167_v26, %v7171_v53 }
 0x131   : > { %5880 = vmatmul.mubr.msk.bf16.gmra.mrb[24].mxu1 %vm226_vm3, %v783_v21  ;;  %v6136_v49 = vpop.eup %6135  ;;  %6141 = vrcp.f32 %v662_v51  ;;  %v665_v14 = vadd.f32 1.0, %v6134_v24  ;;  %v10176_v61 = vrot.slane %v6978_v62, 7  ;;  %v1817_v38 = vsel %vm1816_vm6, %v1784_v54, %v10178_v32 }
 0x132   : > { %v6138_v21 = vpop.eup %6137  ;;  %6143 = vrcp.f32 %v678_v12  ;;  %v681_v5 = vadd.f32 1.0, %v6136_v49  ;;  %v1833_v26 = vsel %vm1816_vm6, %v10179_v20, %v1784_v54  ;;  %v1930_v32 = vsel %vm1929_vm5, %v10181_v10, %v1913_v23  ;;  %v7205_v54 = vld [vmem:[#allocation2 + $0xc8] sm:$0xff] }
 0x133   : > { %v1704_v2 = vsel %vm1703_vm4, %v10176_v61, %v1685_v33  ;;  %v6140_v24 = vpop.eup %6139  ;;  %6145 = vrcp.f32 %v665_v14  ;;  %v663_v51 = vadd.f32 1.0, %v6138_v21  ;;  %v10180_v33 = vmax.f32 %v6978_v62, %v7000_v13 }
 0x134   : > { %v1737_v42 = vmax.f32 %v1591_v37, %v1704_v2  ;;  %6147 = vrcp.f32 %v681_v5  ;;  %v679_v49 = vadd.f32 1.0, %v6140_v24  ;;  %v10182_v37 = vrot.slane %v10177_v22, 2 }
 0x135   : > { %v1849_v61 = vmax.f32 %v10180_v33, %v1833_v26  ;;  %6149 = vrcp.f32 %v663_v51  ;;  %v10183_v13 = vrot.slane %v6978_v62, 2  ;;  %v1686_v21 = vrot.slane %v1595_v31, 7  ;;  %v7216_v24 = vld [vmem:[#allocation2 + $0xd0] sm:$0xff]  ;;  %v10186_v33 = vld [vmem:[#allocation7_spill] sm:$0xff] }
 0x136   : > { %v1850_v2 = vmax.f32 %v1737_v42, %v1817_v38  ;;  %v2043_v20 = vsel %vm2042_vm7, %v2010_v9, %v10182_v37  ;;  %6151 = vrcp.f32 %v679_v49  ;;  %v1785_v5 = vrot.slane %v1595_v31, 1 }
 0x137   : > { %v1962_v12 = vmax.f32 %v1849_v61, %v7020_v0  ;;  %v2059_v14 = vsel %vm2042_vm7, %v10183_v13, %v2010_v9  ;;  %v1914_v23 = vrot.slane %v1595_v31, 6  ;;  %v10184_v22 = vrot.slane %v7003_v3, 7 }
 0x138   : > { %v1963_v10 = vmax.f32 %v1850_v2, %v1930_v32  ;;  %v2011_v26 = vrot.slane %v1595_v31, 2  ;;  %v10185_v62 = vmax.f32 %v6985_v45, %v6989_v36  ;;  %v10187_v61 = vrot.slane %v10186_v33, 1 }
 0x139   : > { %v2075_v38 = vmax.f32 %v1962_v12, %v2059_v14  ;;  %v1705_v42 = vsel %vm1703_vm4, %v10184_v22, %v1686_v21  ;;  %v10188_v49 = vrot.slane %v7003_v3, 1  ;;  %v10189_v37 = vmax.f32 %v7003_v3, %v7037_v28 }
 0x13a   : > { %v7222_v0 = vmax.f32 %v10185_v62, %v7205_v54  ;;  %v2076_v9 = vmax.f32 %v1963_v10, %v2043_v20  ;;  %v1739_v51 = vmax.f32 %v1595_v31, %v1705_v42  ;;  %v1818_v32 = vsel %vm1816_vm6, %v1785_v5, %v10187_v61 }
 0x13b   : > { %v1834_v2 = vsel %vm1816_vm6, %v10188_v49, %v1785_v5  ;;  %2436 = vst.msk [vmem:[#allocation2 + $0x48] sm:$0xff] %vm226_vm3, %v2075_v38  ;;  %v10190_v45 = vrot.slane %v7003_v3, 6  ;;  %v10191_v20 = vrot.slane %v10186_v33, 2  ;;  %v10192_v13 = vrot.slane %v7003_v3, 2  ;;  %v6142_v22 = vpop.eup %6141 }
 0x13c   : > { %v1851_v36 = vmax.f32 %v10189_v37, %v1834_v2  ;;  %v2139_v21 = vpack.c.bf16 %v2076_v9, %v2075_v38  ;;  %2437 = vst.msk [vmem:[#allocation2 + $0x50] sm:$0xff] %vm226_vm3, %v2076_v9  ;;  %v1852_v28 = vmax.f32 %v1739_v51, %v1818_v32  ;;  %v1599_v10 = vmax.f32 %v1470_v29, %v7216_v24  ;;  %v6144_v33 = vpop.eup %6143  ;;  %v10193_v51 = vld [vmem:[#allocation8_spill] sm:$0xff] }
 0x13d   : > { %v1931_v31 = vsel %vm1929_vm5, %v10190_v45, %v1914_v23  ;;  %v2044_v12 = vsel %vm2042_vm7, %v2011_v26, %v10191_v20  ;;  %v2060_v14 = vsel %vm2042_vm7, %v10192_v13, %v2011_v26  ;;  %v1671_v5 = vrot.slane %v7222_v0, 7  ;;  %v6146_v32 = vpop.eup %6145 }
 0x13e   : > { %v1964_v23 = vmax.f32 %v1851_v36, %v7077_v63  ;;  %v1770_v42 = vrot.slane %v7222_v0, 1  ;;  %v1899_v62 = vrot.slane %v7222_v0, 6  ;;  %v1996_v3 = vrot.slane %v7222_v0, 2  ;;  %5905 = vmatprep.mubr.msk.bf16.mxu0 %vm226_vm3, %v2139_v21  ;;  %v6148_v36 = vpop.eup %6147 }
 0x13f   : > { %v758_v26 = vmul.f32 %v6142_v22, %v6776_v56  ;;  %v1965_v38 = vmax.f32 %v1852_v28, %v1931_v31  ;;  %v1687_v9 = vrot.slane %v1599_v10, 7  ;;  %v10194_v29 = vrot.slane %v10193_v51, 7  ;;  %v6150_v13 = vpop.eup %6149 }
 0x140   : > { %v7262_v63 = vmul.f32 %v6144_v33, %v6782_v6  ;;  %v2077_v49 = vmax.f32 %v1964_v23, %v2060_v14  ;;  %v1786_v37 = vrot.slane %v1599_v10, 1  ;;  %v761_v56 = vmul.f32 %v6146_v32, %v6795_v39 }
 0x141   : > { %v1722_v61 = vsel %vm1703_vm4, %v10194_v29, %v1671_v5  ;;  %1054 = vst.msk [vmem:[#allocation2 + $0x108] sm:$0xff] %vm226_vm3, %v758_v26  ;;  %v2078_v45 = vmax.f32 %v1965_v38, %v2044_v12  ;;  %v1706_v31 = vsel %vm1703_vm4, %v1671_v5, %v1687_v9  ;;  %v1915_v20 = vrot.slane %v1599_v10, 6  ;;  %v6152_v12 = vpop.eup %6151  ;;  %v1092_v9 = vld [vmem:[#allocation2 + $0x90] sm:$0xff] }
 0x142   : > { %v1740_v2 = vmax.f32 %v7222_v0, %v1722_v61  ;;  %1070 = vst.msk [vmem:[#allocation2 + $0x208] sm:$0xff] %vm226_vm3, %v7262_v63  ;;  %v7272_v6 = vmul.f32 %v6148_v36, %v6802_v58  ;;  %v1741_v14 = vmax.f32 %v1599_v10, %v1706_v31  ;;  %v10195_v0 = vld [vmem:[#allocation9_spill] sm:$0xff]  ;;  %v1835_v39 = vsel %vm1816_vm6, %v1770_v42, %v1786_v37  ;;  %v1157_v29 = vld [vmem:[#allocation2 + $0xb0] sm:$0xff] }
 0x143   : > { %v10196_v21 = vrot.slane %v10195_v0, 1  ;;  %2438 = vst.msk [vmem:[#allocation2 + $0x68] sm:$0xff] %vm226_vm3, %v2077_v49  ;;  %v785_v5 = vpack.c.bf16 %v761_v56, %v7146_v43  ;;  %1057 = vst.msk [vmem:[#allocation2 + $0x130] sm:$0xff] %vm226_vm3, %v761_v56  ;;  %v759_v22 = vmul.f32 %v6150_v13, %v6811_v60  ;;  %v2140_v58 = vpack.c.bf16 %v2078_v45, %v2077_v49 }
 0x144   : > { %v1853_v23 = vmax.f32 %v1740_v2, %v1835_v39  ;;  %2439 = vst.msk [vmem:[#allocation2 + $0x70] sm:$0xff] %vm226_vm3, %v2078_v45  ;;  %v793_v33 = vpack.c.bf16 %v7272_v6, %v7161_v4  ;;  %1073 = vst.msk [vmem:[#allocation2 + $0x230] sm:$0xff] %vm226_vm3, %v7272_v6  ;;  %v7290_v42 = vmul.f32 %v6152_v12, %v6820_v27  ;;  %v10197_v61 = vrot.slane %v10193_v51, 6  ;;  %v10232_v4 = vld [vmem:[#allocation18_spill] sm:$0xff] }
 0x145   : > { %v1819_v28 = vsel %vm1816_vm6, %v1786_v37, %v10196_v21  ;;  %v1932_v43 = vsel %vm1929_vm5, %v1899_v62, %v1915_v20  ;;  %v784_v60 = vpack.c.bf16 %v759_v22, %v758_v26  ;;  %1055 = vst.msk [vmem:[#allocation2 + $0x110] sm:$0xff] %vm226_vm3, %v759_v22  ;;  %5906 = vmatmul.mubr.msk.bf16.vlgmr.msra.gmra.mrb[16].mxu0 %vm226_vm3, %v2140_v58  ;;  %v2012_v49 = vrot.slane %v1599_v10, 2  ;;  %v10199_v26 = vld [vmem:[#allocation4_spill] sm:$0xff] }
 0x146   : > { %v1854_v38 = vmax.f32 %v1741_v14, %v1819_v28  ;;  %v1948_v32 = vsel %vm1929_vm5, %v10197_v61, %v1899_v62  ;;  %v10198_v27 = vmax.f32 %v7154_v52, %v7130_v15  ;;  %v792_v37 = vpack.c.bf16 %v7290_v42, %v7262_v63  ;;  %1071 = vst.msk [vmem:[#allocation2 + $0x210] sm:$0xff] %vm226_vm3, %v7290_v42  ;;  %v7319_v62 = vld [vmem:[#allocation2 + $0xe8] sm:$0xff] }
 0x147   : > { %5972 = vmatpush3.bf16.msra.mxu0 %v10199_v26  ;;  %v1966_v36 = vmax.f32 %v1853_v23, %v1948_v32  ;;  %v1473_v51 = vmax.f32 %v7094_v44, %v7205_v54  ;;  %5883 = vmatprep.mubr.msk.bf16.mxu1 %vm226_vm3, %v784_v60  ;;  %v10200_v10 = vrot.slane %v10195_v0, 2  ;;  %v2061_v52 = vsel %vm2042_vm7, %v1996_v3, %v2012_v49  ;;  %v7322_v44 = vld [vmem:[#allocation2 + $0xf0] sm:$0xff]  ;;  %v10206_v26 = vld [vmem:[#allocation11_spill] sm:$0xff] }
 0x148   : > { %v1345_v2 = vmax.f32 %v10198_v27, %v7171_v53  ;;  %v1967_v56 = vmax.f32 %v1854_v38, %v1932_v43  ;;  %v1221_v45 = vmax.f32 %v1092_v9, %v1157_v29  ;;  %5884 = vmatmul.mubr.msk.bf16.gmra.mrb[28].mxu1 %vm226_vm3, %v785_v5  ;;  %v10201_v14 = vmax.f32 %v7058_v40, %v7060_v41  ;;  %v10203_v43 = vld [vmem:[#allocation10_spill] sm:$0xff] }
 0x149   : > { %v2045_v15 = vsel %vm2042_vm7, %v2012_v49, %v10200_v10  ;;  %v2079_v31 = vmax.f32 %v1966_v36, %v2061_v52  ;;  %v1602_v13 = vmax.f32 %v1473_v51, %v7319_v62  ;;  %v10202_v3 = vpack.c.bf16 %v6857_v59, %v6832_v7  ;;  %v7350_v49 = vld [vmem:[#allocation2 + $0x108] sm:$0xff] }
 0x14a   : > { %v1474_v53 = vmax.f32 %v1345_v2, %v7216_v24  ;;  %v2080_v20 = vmax.f32 %v1967_v56, %v2045_v15  ;;  %v1348_v0 = vmax.f32 %v10201_v14, %v7205_v54  ;;  %v1349_v28 = vmax.f32 %v1221_v45, %v7216_v24 }
 0x14b   : > { %5887 = vmatprep.mubr.msk.bf16.mxu1 %vm226_vm3, %v10202_v3  ;;  %v1224_v39 = vmax.f32 %v7060_v41, %v7205_v54  ;;  %v1225_v12 = vmax.f32 %v1157_v29, %v7216_v24  ;;  %v1672_v22 = vrot.slane %v1602_v13, 7  ;;  %v1771_v58 = vrot.slane %v1602_v13, 1  ;;  %2440 = vst.msk [vmem:[#allocation2 + $0x88] sm:$0xff] %vm226_vm3, %v2079_v31 }
 0x14c   : > { %v1603_v21 = vmax.f32 %v1474_v53, %v7322_v44  ;;  %v2141_v5 = vpack.c.bf16 %v2080_v20, %v2079_v31  ;;  %v1900_v23 = vrot.slane %v1602_v13, 6  ;;  %2441 = vst.msk [vmem:[#allocation2 + $0x90] sm:$0xff] %vm226_vm3, %v2080_v20  ;;  %v1997_v38 = vrot.slane %v1602_v13, 2  ;;  %v7360_v10 = vld [vmem:[#allocation2 + $0x110] sm:$0xff] }
 0x14d   : > { %v10204_v9 = vrot.slane %v10203_v43, 7  ;;  %v10205_v29 = vrot.slane %v10203_v43, 6  ;;  %v1477_v32 = vmax.f32 %v1348_v0, %v7319_v62  ;;  %v10207_v36 = vrot.slane %v10206_v26, 1  ;;  %v10211_v43 = vld [vmem:[#allocation12_spill] sm:$0xff] }
 0x14e   : > { %v1688_v7 = vrot.slane %v1603_v21, 7  ;;  %v1787_v59 = vrot.slane %v1603_v21, 1  ;;  %v1916_v40 = vrot.slane %v1603_v21, 6  ;;  %5909 = vmatprep.mubr.msk.bf16.mxu0 %vm226_vm3, %v2141_v5  ;;  %v2013_v61 = vrot.slane %v1603_v21, 2 }
 0x14f   : > { %v1723_v41 = vsel %vm1703_vm4, %v10204_v9, %v1672_v22  ;;  %v1949_v60 = vsel %vm1929_vm5, %v10205_v29, %v1900_v23  ;;  %v10208_v53 = vrot.slane %v10206_v26, 2  ;;  %v1606_v14 = vmax.f32 %v1477_v32, %v7350_v49 }
 0x150   : > { %v1707_v27 = vsel %vm1703_vm4, %v1672_v22, %v1688_v7  ;;  %v1742_v2 = vmax.f32 %v1602_v13, %v1723_v41  ;;  %v1820_v56 = vsel %vm1816_vm6, %v1787_v59, %v10207_v36  ;;  %v1836_v51 = vsel %vm1816_vm6, %v1771_v58, %v1787_v59 }
 0x151   : > { %v1743_v15 = vmax.f32 %v1603_v21, %v1707_v27  ;;  %v1933_v52 = vsel %vm1929_vm5, %v1900_v23, %v1916_v40  ;;  %v2046_v45 = vsel %vm2042_vm7, %v2013_v61, %v10208_v53  ;;  %v2062_v31 = vsel %vm2042_vm7, %v1997_v38, %v2013_v61  ;;  %v10214_v27 = vld [vmem:[#allocation13_spill] sm:$0xff] }
 0x152   : > { %v1855_v20 = vmax.f32 %v1742_v2, %v1836_v51  ;;  %v1478_v13 = vmax.f32 %v1349_v28, %v7322_v44  ;;  %v1352_v0 = vmax.f32 %v1224_v39, %v7319_v62  ;;  %v10209_v3 = vpack.c.bf16 %v6843_v50, %v6824_v25 }
 0x153   : > { %v1856_v21 = vmax.f32 %v1743_v15, %v1820_v56  ;;  %v1353_v5 = vmax.f32 %v1225_v12, %v7322_v44  ;;  %v1228_v22 = vmax.f32 %v7205_v54, %v7319_v62  ;;  %v1229_v58 = vmax.f32 %v7216_v24, %v7322_v44 }
 0x154   : > { %5888 = vmatmul.mubr.msk.bf16.gmra.mrb[32].mxu1 %vm226_vm3, %v10209_v3  ;;  %v10210_v28 = vpack.c.bf16 %v7028_v16, %v6906_v30  ;;  %v1968_v39 = vmax.f32 %v1855_v20, %v1949_v60  ;;  %v1607_v23 = vmax.f32 %v1478_v13, %v7360_v10  ;;  %v1673_v25 = vrot.slane %v1606_v14, 7  ;;  %v1293_v3 = vld [vmem:[#allocation2 + $0x110] sm:$0xff] }
 0x155   : > { %v1772_v50 = vrot.slane %v1606_v14, 1  ;;  %v1969_v7 = vmax.f32 %v1856_v21, %v1933_v52  ;;  %v1901_v59 = vrot.slane %v1606_v14, 6  ;;  %v1998_v40 = vrot.slane %v1606_v14, 2 }
 0x156   : > { %5891 = vmatprep.mubr.msk.bf16.mxu1 %vm226_vm3, %v10210_v28  ;;  %v1481_v12 = vmax.f32 %v1352_v0, %v7350_v49  ;;  %v2081_v38 = vmax.f32 %v1968_v39, %v2062_v31  ;;  %v1689_v54 = vrot.slane %v1607_v23, 7  ;;  %v10212_v9 = vrot.slane %v10211_v43, 7 }
 0x157   : > { %v1788_v30 = vrot.slane %v1607_v23, 1  ;;  %v2082_v16 = vmax.f32 %v1969_v7, %v2046_v45  ;;  %v1917_v29 = vrot.slane %v1607_v23, 6  ;;  %v10213_v60 = vrot.slane %v10211_v43, 6  ;;  %v7407_v45 = vld [vmem:[#allocation2 + $0x128] sm:$0xff] }
 0x158   : > { %v1724_v24 = vsel %vm1703_vm4, %v10212_v9, %v1673_v25  ;;  %v1708_v32 = vsel %vm1703_vm4, %v1673_v25, %v1689_v54  ;;  %v10215_v2 = vrot.slane %v10214_v27, 1  ;;  %v2014_v56 = vrot.slane %v1607_v23, 2  ;;  %2442 = vst.msk [vmem:[#allocation2 + $0xa8] sm:$0xff] %vm226_vm3, %v2081_v38  ;;  %v10219_v9 = vld [vmem:[#allocation14_spill] sm:$0xff] }
 0x159   : > { %v1744_v41 = vmax.f32 %v1606_v14, %v1724_v24  ;;  %v1950_v61 = vsel %vm1929_vm5, %v10213_v60, %v1901_v59  ;;  %v1837_v36 = vsel %vm1816_vm6, %v1772_v50, %v1788_v30  ;;  %v2142_v51 = vpack.c.bf16 %v2082_v16, %v2081_v38  ;;  %2443 = vst.msk [vmem:[#allocation2 + $0xb0] sm:$0xff] %vm226_vm3, %v2082_v16 }
 0x15a   : > { %v1821_v26 = vsel %vm1816_vm6, %v1788_v30, %v10215_v2  ;;  %v1745_v15 = vmax.f32 %v1607_v23, %v1708_v32  ;;  %v1934_v53 = vsel %vm1929_vm5, %v1901_v59, %v1917_v29  ;;  %v10216_v31 = vrot.slane %v10214_v27, 2  ;;  %v7423_v23 = vld [vmem:[#allocation2 + $0x130] sm:$0xff] }
 0x15b   : > { %v1857_v52 = vmax.f32 %v1744_v41, %v1837_v36  ;;  %v2063_v13 = vsel %vm2042_vm7, %v1998_v40, %v2014_v56  ;;  %v1482_v14 = vmax.f32 %v1353_v5, %v7360_v10  ;;  %v1610_v0 = vmax.f32 %v1481_v12, %v7407_v45  ;;  %5910 = vmatmul.mubr.msk.bf16.gmra.mrb[20].mxu0 %vm226_vm3, %v2142_v51 }
 0x15c   : > { %v2047_v20 = vsel %vm2042_vm7, %v2014_v56, %v10216_v31  ;;  %v10217_v21 = vpack.c.bf16 %v7008_v17, %v6885_v35  ;;  %v1858_v28 = vmax.f32 %v1745_v15, %v1821_v26  ;;  %v1356_v25 = vmax.f32 %v1228_v22, %v7350_v49 }
 0x15d   : > { %v1970_v39 = vmax.f32 %v1857_v52, %v1950_v61  ;;  %v1890_v50 = vrot.slane %v6963_v48, 6  ;;  %v10218_v5 = vpack.c.bf16 %v7137_v47, %v7084_v11  ;;  %v1611_v7 = vmax.f32 %v1482_v14, %v7423_v23  ;;  %v10222_v61 = vld [vmem:[#allocation15_spill] sm:$0xff] }
 0x15e   : > { %5892 = vmatmul.mubr.msk.bf16.gmra.mrb[36].mxu1 %vm226_vm3, %v10217_v21  ;;  %v1674_v59 = vrot.slane %v1610_v0, 7  ;;  %v1773_v40 = vrot.slane %v1610_v0, 1  ;;  %v1902_v35 = vrot.slane %v1610_v0, 6  ;;  %v1971_v17 = vmax.f32 %v1858_v28, %v1934_v53 }
 0x15f   : > { %5895 = vmatprep.mubr.msk.bf16.mxu1 %vm226_vm3, %v10218_v5  ;;  %v2083_v12 = vmax.f32 %v1970_v39, %v2063_v13  ;;  %v1999_v38 = vrot.slane %v1610_v0, 2  ;;  %v1357_v54 = vmax.f32 %v1229_v58, %v1293_v3  ;;  %v1690_v43 = vrot.slane %v1611_v7, 7 }
 0x160   : > { %v10220_v24 = vrot.slane %v10219_v9, 7  ;;  %v1789_v30 = vrot.slane %v1611_v7, 1  ;;  %v1918_v16 = vrot.slane %v1611_v7, 6  ;;  %v2084_v47 = vmax.f32 %v1971_v17, %v2047_v20 }
 0x161   : > { %v10221_v41 = vrot.slane %v10219_v9, 6  ;;  %v2015_v60 = vrot.slane %v1611_v7, 2  ;;  %2444 = vst.msk [vmem:[#allocation2 + $0xc8] sm:$0xff] %vm226_vm3, %v2083_v12  ;;  %v1709_v58 = vsel %vm1703_vm4, %v1674_v59, %v1690_v43  ;;  %v10223_v32 = vrot.slane %v10222_v61, 1  ;;  %v10228_v9 = vld [vmem:[#allocation17_spill] sm:$0xff] }
 0x162   : > { %v1725_v22 = vsel %vm1703_vm4, %v10220_v24, %v1674_v59  ;;  %v1838_v2 = vsel %vm1816_vm6, %v1773_v40, %v1789_v30  ;;  %v1935_v26 = vsel %vm1929_vm5, %v1902_v35, %v1918_v16  ;;  %v2143_v36 = vpack.c.bf16 %v2084_v47, %v2083_v12  ;;  %2445 = vst.msk [vmem:[#allocation2 + $0xd0] sm:$0xff] %vm226_vm3, %v2084_v47 }
 0x163   : > { %v1746_v11 = vmax.f32 %v1610_v0, %v1725_v22  ;;  %v1951_v29 = vsel %vm1929_vm5, %v10221_v41, %v1902_v35  ;;  %v1822_v27 = vsel %vm1816_vm6, %v1789_v30, %v10223_v32  ;;  %v1747_v56 = vmax.f32 %v1611_v7, %v1709_v58 }
 0x164   : > { %v10224_v15 = vrot.slane %v10222_v61, 2  ;;  %v2064_v53 = vsel %vm2042_vm7, %v1999_v38, %v2015_v60  ;;  %v1485_v31 = vmax.f32 %v1356_v25, %v7407_v45  ;;  %v1486_v20 = vmax.f32 %v1357_v54, %v7423_v23  ;;  %5913 = vmatprep.mubr.msk.bf16.mxu0 %vm226_vm3, %v2143_v36  ;;  %v10226_v38 = vld [vmem:[#allocation16_spill] sm:$0xff] }
 0x165   : > { %v1859_v51 = vmax.f32 %v1746_v11, %v1838_v2  ;;  %v1232_v13 = vmax.f32 %v7319_v62, %v7350_v49  ;;  %v1860_v14 = vmax.f32 %v1747_v56, %v1822_v27  ;;  %v10225_v3 = vpack.c.bf16 %v7107_v46, %v7053_v57 }
 0x166   : > { %v2048_v52 = vsel %vm2042_vm7, %v2015_v60, %v10224_v15  ;;  %v1233_v21 = vmax.f32 %v7322_v44, %v7360_v10  ;;  %v2035_v28 = vrot.slane %v6965_v18, 2  ;;  %v1614_v39 = vmax.f32 %v1485_v31, %v6958_v19 }
 0x167   : > { %v1972_v0 = vmax.f32 %v1859_v51, %v1951_v29  ;;  %5896 = vmatmul.mubr.msk.bf16.gmra.mrb[40].mxu1 %vm226_vm3, %v10225_v3  ;;  %v1615_v25 = vmax.f32 %v1486_v20, %v7062_v55  ;;  %v1360_v62 = vmax.f32 %v1232_v13, %v7407_v45  ;;  %v1236_v57 = vmax.f32 %v7350_v49, %v7407_v45 }
 0x168   : > { %5899 = vmatprep.mubr.msk.bf16.mxu1 %vm226_vm3, %v792_v37  ;;  %v1973_v46 = vmax.f32 %v1860_v14, %v1935_v26  ;;  %v1361_v44 = vmax.f32 %v1233_v21, %v7423_v23  ;;  %v1237_v7 = vmax.f32 %v7360_v10, %v7423_v23  ;;  %v1675_v59 = vrot.slane %v1614_v39, 7 }
 0x169   : > { %v2085_v5 = vmax.f32 %v1972_v0, %v2064_v53  ;;  %v1691_v40 = vrot.slane %v1615_v25, 7  ;;  %v1774_v35 = vrot.slane %v1614_v39, 1  ;;  %v1790_v17 = vrot.slane %v1615_v25, 1 }
 0x16a   : > { %v2086_v12 = vmax.f32 %v1973_v46, %v2048_v52  ;;  %v1903_v63 = vrot.slane %v1614_v39, 6  ;;  %v1919_v42 = vrot.slane %v1615_v25, 6  ;;  %v2000_v37 = vrot.slane %v1614_v39, 2 }
 0x16b   : > { %2446 = vst.msk [vmem:[#allocation2 + $0xe8] sm:$0xff] %vm226_vm3, %v2085_v5  ;;  %v1710_v49 = vsel %vm1703_vm4, %v1675_v59, %v1691_v40  ;;  %v10227_v54 = vrot.slane %v10226_v38, 7  ;;  %v10229_v10 = vrot.slane %v10228_v9, 1  ;;  %v1839_v22 = vsel %vm1816_vm6, %v1774_v35, %v1790_v17  ;;  %v7533_v40 = vld [vmem:[#allocation2 + $0x48] sm:$0xff] }
 0x16c   : > { %v2144_v30 = vpack.c.bf16 %v2086_v12, %v2085_v5  ;;  %v1749_v47 = vmax.f32 %v1615_v25, %v1710_v49  ;;  %v1936_v11 = vsel %vm1929_vm5, %v1903_v63, %v1919_v42  ;;  %2447 = vst.msk [vmem:[#allocation2 + $0xf0] sm:$0xff] %vm226_vm3, %v2086_v12  ;;  %v10230_v41 = vrot.slane %v10226_v38, 6  ;;  %v10234_v5 = vld [vmem:[#allocation19_spill] sm:$0xff] }
 0x16d   : > { %v1726_v43 = vsel %vm1703_vm4, %v10227_v54, %v1675_v59  ;;  %v1823_v24 = vsel %vm1816_vm6, %v1790_v17, %v10229_v10  ;;  %v2016_v60 = vrot.slane %v1615_v25, 2  ;;  %v1489_v58 = vmax.f32 %v1360_v62, %v6958_v19  ;;  %v7543_v54 = vld [vmem:[#allocation2 + $0x190] sm:$0xff] }
 0x16e   : > { %v1748_v16 = vmax.f32 %v1614_v39, %v1726_v43  ;;  %v1952_v29 = vsel %vm1929_vm5, %v10230_v41, %v1903_v63  ;;  %v1490_v61 = vmax.f32 %v1361_v44, %v7062_v55  ;;  %5914 = vmatmul.mubr.msk.bf16.gmra.mrb[24].mxu0 %vm226_vm3, %v2144_v30  ;;  %v1862_v27 = vmax.f32 %v1749_v47, %v1823_v24  ;;  %v10237_v43 = vld [vmem:[#allocation28_spill] sm:$0xff]  ;;  %v6281_v30 = vld [vmem:[#allocation2 + $0x28] sm:$0xff] }
 0x16f   : > { %v1364_v2 = vmax.f32 %v1236_v57, %v6958_v19  ;;  %v1365_v26 = vmax.f32 %v1237_v7, %v7062_v55  ;;  %v10231_v36 = vrot.slane %v10228_v9, 2  ;;  %v2065_v51 = vsel %vm2042_vm7, %v2000_v37, %v2016_v60  ;;  %5900 = vmatmul.mubr.msk.bf16.gmra.mrb[44].mxu1 %vm226_vm3, %v793_v33 }
 0x170   : > { %v1861_v32 = vmax.f32 %v1748_v16, %v1839_v22  ;;  %v1618_v15 = vmax.f32 %v1489_v58, %v6960_v1  ;;  %v1619_v52 = vmax.f32 %v1490_v61, %v7046_v8  ;;  %v1975_v31 = vmax.f32 %v1862_v27, %v1936_v11 }
 0x171   : > { %v2049_v56 = vsel %vm2042_vm7, %v2016_v60, %v10231_v36  ;;  %v1493_v20 = vmax.f32 %v1364_v2, %v6960_v1  ;;  %v1494_v13 = vmax.f32 %v1365_v26, %v7046_v8  ;;  %v10233_v6 = vrot.slane %v10232_v4, 7  ;;  %v10239_v2 = vld [vmem:[#allocation20_spill] sm:$0xff] }
 0x172   : > { %v1974_v53 = vmax.f32 %v1861_v32, %v1952_v29  ;;  %v1676_v14 = vrot.slane %v1618_v15, 7  ;;  %v1692_v0 = vrot.slane %v1619_v52, 7  ;;  %v1775_v3 = vrot.slane %v1618_v15, 1 }
 0x173   : > { %v1791_v21 = vrot.slane %v1619_v52, 1  ;;  %v2088_v25 = vmax.f32 %v1975_v31, %v2049_v56  ;;  %v1904_v62 = vrot.slane %v1618_v15, 6  ;;  %v1920_v57 = vrot.slane %v1619_v52, 6 }
 0x174   : > { %v2087_v39 = vmax.f32 %v1974_v53, %v2065_v51  ;;  %v1711_v46 = vsel %vm1703_vm4, %v1676_v14, %v1692_v0  ;;  %v1727_v33 = vsel %vm1703_vm4, %v10233_v6, %v1676_v14  ;;  %v10235_v44 = vrot.slane %v10234_v5, 1  ;;  %v10241_v0 = vld [vmem:[#allocation23_spill] sm:$0xff] }
 0x175   : > { %v1840_v59 = vsel %vm1816_vm6, %v1775_v3, %v1791_v21  ;;  %2449 = vst.msk [vmem:[#allocation2 + $0x110] sm:$0xff] %vm226_vm3, %v2088_v25  ;;  %v1750_v17 = vmax.f32 %v1618_v15, %v1727_v33  ;;  %v1751_v12 = vmax.f32 %v1619_v52, %v1711_v46  ;;  %v1937_v63 = vsel %vm1929_vm5, %v1904_v62, %v1920_v57 }
 0x176   : > { %v1824_v7 = vsel %vm1816_vm6, %v1791_v21, %v10235_v44  ;;  %v2145_v35 = vpack.c.bf16 %v2088_v25, %v2087_v39  ;;  %2448 = vst.msk [vmem:[#allocation2 + $0x108] sm:$0xff] %vm226_vm3, %v2087_v39  ;;  %v10236_v42 = vrot.slane %v10232_v4, 6  ;;  %v2001_v49 = vrot.slane %v1618_v15, 2 }
 0x177   : > { %v2017_v38 = vrot.slane %v1619_v52, 2  ;;  %v1622_v9 = vmax.f32 %v1493_v20, %v10237_v43  ;;  %v1863_v10 = vmax.f32 %v1750_v17, %v1840_v59  ;;  %v1864_v24 = vmax.f32 %v1751_v12, %v1824_v7  ;;  %v6282_v7 = vld [vmem:[#allocation2 + $0x30] sm:$0xff] }
 0x178   : > { %v1953_v37 = vsel %vm1929_vm5, %v10236_v42, %v1904_v62  ;;  %5917 = vmatprep.mubr.msk.bf16.mxu0 %vm226_vm3, %v2145_v35  ;;  %v1623_v22 = vmax.f32 %v1494_v13, %v7543_v54  ;;  %v2601_v16 = vmax.f32 %v6281_v30, %v7533_v40  ;;  %v10238_v47 = vrot.slane %v10234_v5, 2  ;;  %v7561_v13 = vld [vmem:[#allocation2 + $0x50] sm:$0xff]  ;;  %v7571_v62 = vld [vmem:[#allocation2 + $0x68] sm:$0xff] }
 0x179   : > { %v2066_v41 = vsel %vm2042_vm7, %v2001_v49, %v2017_v38  ;;  %v1677_v29 = vrot.slane %v1622_v9, 7  ;;  %v1776_v60 = vrot.slane %v1622_v9, 1  ;;  %v1976_v58 = vmax.f32 %v1863_v10, %v1953_v37  ;;  %v7577_v5 = vld [vmem:[#allocation2 + $0x70] sm:$0xff]  ;;  %v10244_v35 = vld [vmem:[#allocation21_spill] sm:$0xff]  ;;  %v10248_v37 = vld [vmem:[#allocation27_spill] sm:$0xff] }
 0x17a   : > { %v2050_v11 = vsel %vm2042_vm7, %v2017_v38, %v10238_v47  ;;  %v1977_v61 = vmax.f32 %v1864_v24, %v1937_v63  ;;  %v1693_v32 = vrot.slane %v1623_v22, 7  ;;  %v1792_v27 = vrot.slane %v1623_v22, 1  ;;  %v10245_v17 = vld [vmem:[#allocation22_spill] sm:$0xff]  ;;  %v7600_v47 = vld [vmem:[#allocation2 + $0x88] sm:$0xff] }
 0x17b   : > { %v10240_v26 = vrot.slane %v10239_v2, 7  ;;  %v1905_v56 = vrot.slane %v1622_v9, 6  ;;  %v1921_v51 = vrot.slane %v1623_v22, 6  ;;  %v2002_v15 = vrot.slane %v1622_v9, 2  ;;  %v10247_v42 = vld [vmem:[#allocation26_spill] sm:$0xff] }
 0x17c   : > { %v2089_v52 = vmax.f32 %v1976_v58, %v2066_v41  ;;  %v2090_v53 = vmax.f32 %v1977_v61, %v2050_v11  ;;  %v1712_v31 = vsel %vm1703_vm4, %v1677_v29, %v1693_v32  ;;  %v10242_v3 = vrot.slane %v10241_v0, 1  ;;  %v7602_v11 = vld [vmem:[#allocation2 + $0x90] sm:$0xff]  ;;  %v7604_v41 = vld [vmem:[#allocation2 + $0x1a8] sm:$0xff] }
 0x17d   : > { %v1728_v36 = vsel %vm1703_vm4, %v10240_v26, %v1677_v29  ;;  %v1753_v14 = vmax.f32 %v1623_v22, %v1712_v31  ;;  %v1841_v39 = vsel %vm1816_vm6, %v1776_v60, %v1792_v27  ;;  %v1938_v25 = vsel %vm1929_vm5, %v1905_v56, %v1921_v51  ;;  %v7611_v32 = vld [vmem:[#allocation2 + $0x1b0] sm:$0xff] }
 0x17e   : > { %v1752_v20 = vmax.f32 %v1622_v9, %v1728_v36  ;;  %v1825_v21 = vsel %vm1816_vm6, %v1792_v27, %v10242_v3  ;;  %v2146_v57 = vpack.c.bf16 %v2090_v53, %v2089_v52  ;;  %v10243_v4 = vrot.slane %v10239_v2, 6  ;;  %2450 = vst.msk [vmem:[#allocation2 + $0x128] sm:$0xff] %vm226_vm3, %v2089_v52  ;;  %2451 = vst.msk [vmem:[#allocation2 + $0x130] sm:$0xff] %vm226_vm3, %v2090_v53  ;;  %v10252_v52 = vld [vmem:[#allocation32_spill] sm:$0xff] }
 0x17f   : > { %v2018_v33 = vrot.slane %v1623_v22, 2  ;;  %v1866_v44 = vmax.f32 %v1753_v14, %v1825_v21  ;;  %v2602_v59 = vmax.f32 %v6282_v7, %v7561_v13  ;;  %v10246_v12 = vmax.f32 %v10244_v35, %v10245_v17  ;;  %v7642_v35 = vld [vmem:[#allocation2 + $0x1c0] sm:$0xff] }
 0x180   : > { %v1865_v46 = vmax.f32 %v1752_v20, %v1841_v39  ;;  %v1954_v6 = vsel %vm1929_vm5, %v10243_v4, %v1905_v56  ;;  %v10249_v49 = vmax.f32 %v10247_v42, %v10248_v37  ;;  %5918 = vmatmul.mubr.msk.bf16.gmra.mrb[28].mxu0 %vm226_vm3, %v2146_v57  ;;  %v10250_v10 = vrot.slane %v10241_v0, 2  ;;  %v10253_v20 = vld [vmem:[#allocation6_spill] sm:$0xff] }
 0x181   : > { %v2725_v63 = vmax.f32 %v10246_v12, %v7533_v40  ;;  %v2067_v22 = vsel %vm2042_vm7, %v2002_v15, %v2018_v33  ;;  %v7598_v30 = vmax.f32 %v2601_v16, %v7571_v62  ;;  %v1979_v29 = vmax.f32 %v1866_v44, %v1938_v25 }
 0x182   : > { %v2726_v38 = vmax.f32 %v10249_v49, %v7561_v13  ;;  %v1978_v9 = vmax.f32 %v1865_v46, %v1954_v6  ;;  %v2051_v24 = vsel %vm2042_vm7, %v2018_v33, %v10250_v10  ;;  %v7607_v60 = vmax.f32 %v2602_v59, %v7577_v5  ;;  %v10254_v6 = vld [vmem:[#allocation42_spill] sm:$0xff]  ;;  %v7654_v10 = vld [vmem:[#allocation2 + $0x1d8] sm:$0xff] }
 0x183   : > { %v2853_v58 = vmax.f32 %v2725_v63, %v7571_v62  ;;  %v1240_v16 = vmax.f32 %v7407_v45, %v6958_v19  ;;  %v1241_v2 = vmax.f32 %v7423_v23, %v7062_v55  ;;  %v10251_v26 = vmax.f32 %v7062_v55, %v7046_v8  ;;  %v7628_v23 = vld [vmem:[#allocation2 + $0x1b8] sm:$0xff] }
 0x184   : > { %v2854_v61 = vmax.f32 %v2726_v38, %v7577_v5  ;;  %v2091_v27 = vmax.f32 %v1978_v9, %v2067_v22  ;;  %v2092_v56 = vmax.f32 %v1979_v29, %v2051_v24  ;;  %v1501_v53 = vmax.f32 %v10252_v52, %v7604_v41  ;;  %v10256_v63 = vld [vmem:[#allocation43_spill] sm:$0xff]  ;;  %v7650_v38 = vld [vmem:[#allocation2 + $0x1c8] sm:$0xff]  ;;  %v7652_v9 = vld [vmem:[#allocation2 + $0x1d0] sm:$0xff] }
 0x185   : > { %v1373_v36 = vmax.f32 %v10251_v26, %v7543_v54  ;;  %v2981_v51 = vmax.f32 %v2853_v58, %v7600_v47  ;;  %v1368_v31 = vmax.f32 %v1240_v16, %v6960_v1  ;;  %v1369_v19 = vmax.f32 %v1241_v2, %v7046_v8 }
 0x186   : > { %v2982_v15 = vmax.f32 %v2854_v61, %v7602_v11  ;;  %v1503_v55 = vmax.f32 %v10253_v20, %v7628_v23  ;;  %2452 = vst.msk [vmem:[#allocation2 + $0x148] sm:$0xff] %vm226_vm3, %v2091_v27  ;;  %v2147_v14 = vpack.c.bf16 %v2092_v56, %v2091_v27  ;;  %2453 = vst.msk [vmem:[#allocation2 + $0x150] sm:$0xff] %vm226_vm3, %v2092_v56  ;;  %v10255_v33 = vrot.slane %v10254_v6, 7  ;;  %v10260_v56 = vld [vmem:[#allocation30_spill] sm:$0xff] }
 0x187   : > { %v1502_v45 = vmax.f32 %v1373_v36, %v7611_v32  ;;  %v3060_v0 = vrot.slane %v2981_v51, 7  ;;  %v3156_v21 = vrot.slane %v2981_v51, 1  ;;  %v3284_v25 = vrot.slane %v2981_v51, 6 }
 0x188   : > { %v3076_v3 = vrot.slane %v2982_v15, 7  ;;  %v3172_v39 = vrot.slane %v2982_v15, 1  ;;  %v3300_v57 = vrot.slane %v2982_v15, 6  ;;  %v3380_v46 = vrot.slane %v2981_v51, 2  ;;  %5921 = vmatprep.mubr.msk.bf16.mxu0 %vm226_vm3, %v2147_v14 }
 0x189   : > { %v3108_v44 = vsel %vm1703_vm4, %v10255_v33, %v3060_v0  ;;  %v3396_v7 = vrot.slane %v2982_v15, 2  ;;  %v1497_v59 = vmax.f32 %v1368_v31, %v10237_v43  ;;  %v10257_v42 = vrot.slane %v10256_v63, 1 }
 0x18a   : > { %v3092_v4 = vsel %vm1703_vm4, %v3060_v0, %v3076_v3  ;;  %v3124_v17 = vmax.f32 %v2981_v51, %v3108_v44  ;;  %v3220_v49 = vsel %vm1816_vm6, %v3156_v21, %v3172_v39  ;;  %v3316_v24 = vsel %vm1929_vm5, %v3284_v25, %v3300_v57  ;;  %v10261_v51 = vld [vmem:[#allocation44_spill] sm:$0xff] }
 0x18b   : > { %v3125_v12 = vmax.f32 %v2982_v15, %v3092_v4  ;;  %v3204_v37 = vsel %vm1816_vm6, %v3172_v39, %v10257_v42  ;;  %v10258_v22 = vrot.slane %v10254_v6, 6  ;;  %v10259_v58 = vrot.slane %v10256_v63, 2 }
 0x18c   : > { %v3444_v27 = vsel %vm2042_vm7, %v3380_v46, %v3396_v7  ;;  %v3236_v16 = vmax.f32 %v3124_v17, %v3220_v49  ;;  %v1498_v26 = vmax.f32 %v1369_v19, %v7543_v54  ;;  %v1626_v36 = vmax.f32 %v1497_v59, %v7604_v41 }
 0x18d   : > { %v3332_v29 = vsel %vm1929_vm5, %v10258_v22, %v3284_v25  ;;  %v3428_v61 = vsel %vm2042_vm7, %v3396_v7, %v10259_v58  ;;  %v3237_v2 = vmax.f32 %v3125_v12, %v3204_v37  ;;  %v10262_v15 = vmax.f32 %v10260_v56, %v10261_v51 }
 0x18e   : > { %v7675_v31 = vmax.f32 %v1501_v53, %v7650_v38  ;;  %v7678_v20 = vmax.f32 %v1502_v45, %v7652_v9  ;;  %v7681_v14 = vmax.f32 %v1503_v55, %v7654_v10  ;;  %v3348_v0 = vmax.f32 %v3236_v16, %v3332_v29 }
 0x18f   : > { %v1629_v52 = vmax.f32 %v10262_v15, %v7642_v35  ;;  %v3349_v3 = vmax.f32 %v3237_v2, %v3316_v24  ;;  %v1627_v19 = vmax.f32 %v1498_v26, %v7611_v32  ;;  %v1678_v21 = vrot.slane %v1626_v36, 7 }
 0x190   : > { %v1777_v39 = vrot.slane %v1626_v36, 1  ;;  %v1906_v25 = vrot.slane %v1626_v36, 6  ;;  %v2003_v57 = vrot.slane %v1626_v36, 2  ;;  %v3460_v4 = vmax.f32 %v3348_v0, %v3444_v27 }
 0x191   : > { %v1663_v46 = vrot.slane %v1629_v52, 7  ;;  %v3461_v6 = vmax.f32 %v3349_v3, %v3428_v61  ;;  %v1694_v33 = vrot.slane %v1627_v19, 7  ;;  %v10263_v53 = vrot.slane %v6963_v48, 7 }
 0x192   : > { %v1793_v55 = vrot.slane %v1627_v19, 1  ;;  %v1922_v7 = vrot.slane %v1627_v19, 6  ;;  %v1955_v59 = vsel %vm1929_vm5, %v1890_v50, %v1906_v25  ;;  %3821 = vst.msk [vmem:[#allocation2 + $0x48] sm:$0xff] %vm226_vm3, %v3460_v4  ;;  %v2019_v63 = vrot.slane %v1627_v19, 2 }
 0x193   : > { %v1729_v45 = vsel %vm1703_vm4, %v10263_v53, %v1678_v21  ;;  %v3524_v17 = vpack.c.bf16 %v3461_v6, %v3460_v4  ;;  %3822 = vst.msk [vmem:[#allocation2 + $0x50] sm:$0xff] %vm226_vm3, %v3461_v6  ;;  %v1713_v12 = vsel %vm1703_vm4, %v1678_v21, %v1694_v33  ;;  %v1679_v42 = vrot.slane %v7675_v31, 7 }
 0x194   : > { %v1754_v44 = vmax.f32 %v1626_v36, %v1729_v45  ;;  %v1755_v37 = vmax.f32 %v1627_v19, %v1713_v12  ;;  %v10264_v49 = vrot.slane %v6965_v18, 1  ;;  %v1842_v50 = vsel %vm1816_vm6, %v1777_v39, %v1793_v55  ;;  %v7733_v45 = vld [vmem:[#allocation2 + $0x60] sm:$0xff] }
 0x195   : > { %v1939_v24 = vsel %vm1929_vm5, %v1906_v25, %v1922_v7  ;;  %5939 = vmatprep.mubr.msk.bf16.mxu1 %vm226_vm3, %v3524_v17  ;;  %v2052_v29 = vsel %vm2042_vm7, %v2019_v63, %v2035_v28  ;;  %v2068_v58 = vsel %vm2042_vm7, %v2003_v57, %v2019_v63  ;;  %v1695_v61 = vrot.slane %v7678_v20, 7  ;;  %v7742_v63 = vld [vmem:[#allocation2 + $0x78] sm:$0xff] }
 0x196   : > { %v1826_v48 = vsel %vm1816_vm6, %v1793_v55, %v10264_v49  ;;  %v1867_v22 = vmax.f32 %v1754_v44, %v1842_v50  ;;  %v1730_v16 = vsel %vm1703_vm4, %v1663_v46, %v1679_v42  ;;  %v1778_v2 = vrot.slane %v7675_v31, 1  ;;  %v10265_v44 = vld [vmem:[#allocation24_spill] sm:$0xff]  ;;  %v10266_v55 = vld [vmem:[#allocation29_spill] sm:$0xff] }
 0x197   : > { %v1868_v27 = vmax.f32 %v1755_v37, %v1826_v48  ;;  %v1794_v26 = vrot.slane %v7678_v20, 1  ;;  %v1714_v18 = vsel %vm1703_vm4, %v1679_v42, %v1695_v61  ;;  %v1756_v56 = vmax.f32 %v7675_v31, %v1730_v16  ;;  %v10269_v42 = vld [vmem:[#allocation31_spill] sm:$0xff]  ;;  %v7748_v49 = vld [vmem:[#allocation2 + $0xa0] sm:$0xff]  ;;  %v7760_v61 = vld [vmem:[#allocation2 + $0xb0] sm:$0xff] }
 0x198   : > { %v1980_v36 = vmax.f32 %v1867_v22, %v1955_v59  ;;  %v1810_v28 = vrot.slane %v7681_v14, 1  ;;  %v1757_v15 = vmax.f32 %v7678_v20, %v1714_v18  ;;  %v1891_v3 = vrot.slane %v1629_v52, 6  ;;  %v7755_v22 = vld [vmem:[#allocation2 + $0x80] sm:$0xff] }
 0x199   : > { %v1981_v51 = vmax.f32 %v1868_v27, %v1939_v24  ;;  %v1843_v0 = vsel %vm1816_vm6, %v1778_v2, %v1794_v26  ;;  %v1907_v25 = vrot.slane %v7675_v31, 6  ;;  %v1923_v4 = vrot.slane %v7678_v20, 6  ;;  %v7762_v27 = vld [vmem:[#allocation2 + $0xb8] sm:$0xff] }
 0x19a   : > { %v2093_v19 = vmax.f32 %v1980_v36, %v2068_v58  ;;  %v1827_v21 = vsel %vm1816_vm6, %v1794_v26, %v1810_v28  ;;  %v1869_v39 = vmax.f32 %v1756_v56, %v1843_v0  ;;  %v2004_v6 = vrot.slane %v7675_v31, 2  ;;  %v7758_v58 = vld [vmem:[#allocation2 + $0xa8] sm:$0xff]  ;;  %v7769_v36 = vld [vmem:[#allocation2 + $0x98] sm:$0xff] }
 0x19b   : > { %v2094_v57 = vmax.f32 %v1981_v51, %v2052_v29  ;;  %v1870_v46 = vmax.f32 %v1757_v15, %v1827_v21  ;;  %v1956_v33 = vsel %vm1929_vm5, %v1891_v3, %v1907_v25  ;;  %v2020_v53 = vrot.slane %v7678_v20, 2  ;;  %v10268_v20 = vld [vmem:[#allocation25_spill] sm:$0xff]  ;;  %v6288_v51 = vld [vmem:[#allocation2 + $0x40] sm:$0xff] }
 0x19c   : > { %v2036_v52 = vrot.slane %v7681_v14, 2  ;;  %v10267_v7 = vmax.f32 %v10265_v44, %v10266_v55  ;;  %2454 = vst.msk [vmem:[#allocation2 + $0x168] sm:$0xff] %vm226_vm3, %v2093_v19  ;;  %v1940_v31 = vsel %vm1929_vm5, %v1907_v25, %v1923_v4  ;;  %v1982_v12 = vmax.f32 %v1869_v39, %v1956_v33 }
 0x19d   : > { %v2148_v17 = vpack.c.bf16 %v2094_v57, %v2093_v19  ;;  %v10270_v14 = vmax.f32 %v10268_v20, %v10269_v42  ;;  %2455 = vst.msk [vmem:[#allocation2 + $0x170] sm:$0xff] %vm226_vm3, %v2094_v57  ;;  %v1983_v48 = vmax.f32 %v1870_v46, %v1940_v31  ;;  %v2069_v24 = vsel %vm2042_vm7, %v2004_v6, %v2020_v53 }
 0x19e   : > { %v2728_v59 = vmax.f32 %v10267_v7, %v7733_v45  ;;  %v2053_v50 = vsel %vm2042_vm7, %v2020_v53, %v2036_v52  ;;  %v2095_v16 = vmax.f32 %v1982_v12, %v2069_v24  ;;  %v2857_v2 = vmax.f32 %v7598_v30, %v7600_v47 }
 0x19f   : > { %v2731_v37 = vmax.f32 %v10270_v14, %v7742_v63  ;;  %5922 = vmatmul.mubr.msk.bf16.gmra.mrb[32].mxu0 %vm226_vm3, %v2148_v17  ;;  %v2858_v26 = vmax.f32 %v7607_v60, %v7602_v11  ;;  %v2096_v56 = vmax.f32 %v1983_v48, %v2053_v50  ;;  %v2604_v15 = vmax.f32 %v6288_v51, %v7733_v45  ;;  %v7808_v51 = vld [vmem:[#allocation2 + $0xc8] sm:$0xff] }
 0x1a0   : > { %v2856_v29 = vmax.f32 %v2728_v59, %v7755_v22  ;;  %v2985_v0 = vmax.f32 %v2857_v2, %v7758_v58  ;;  %v2605_v30 = vmax.f32 %v7533_v40, %v7571_v62  ;;  %2456 = vst.msk [vmem:[#allocation2 + $0x188] sm:$0xff] %vm226_vm3, %v2095_v16  ;;  %v2606_v25 = vmax.f32 %v7561_v13, %v7577_v5  ;;  %v6289_v40 = vld [vmem:[#allocation2 + $0x58] sm:$0xff]  ;;  %v7800_v2 = vld [vmem:[#allocation2 + $0xc0] sm:$0xff] }
 0x1a1   : > { %v2859_v18 = vmax.f32 %v2731_v37, %v7769_v36  ;;  %v2986_v3 = vmax.f32 %v2858_v26, %v7760_v61  ;;  %v2149_v60 = vpack.c.bf16 %v2096_v56, %v2095_v16  ;;  %2457 = vst.msk [vmem:[#allocation2 + $0x190] sm:$0xff] %vm226_vm3, %v2096_v56  ;;  %v2607_v44 = vmax.f32 %v6289_v40, %v7742_v63 }
 0x1a2   : > { %v2984_v28 = vmax.f32 %v2856_v29, %v7748_v49  ;;  %v3061_v57 = vrot.slane %v2985_v0, 7  ;;  %v3157_v4 = vrot.slane %v2985_v0, 1  ;;  %v3285_v53 = vrot.slane %v2985_v0, 6 }
 0x1a3   : > { %v2987_v19 = vmax.f32 %v2859_v18, %v7762_v27  ;;  %v3077_v46 = vrot.slane %v2986_v3, 7  ;;  %v3173_v6 = vrot.slane %v2986_v3, 1  ;;  %5925 = vmatprep.mubr.msk.bf16.mxu0 %vm226_vm3, %v2149_v60  ;;  %v3301_v52 = vrot.slane %v2986_v3, 6  ;;  %v7814_v60 = vld [vmem:[#allocation2 + $0xd8] sm:$0xff] }
 0x1a4   : > { %v3045_v21 = vrot.slane %v2984_v28, 7  ;;  %v3269_v39 = vrot.slane %v2984_v28, 6  ;;  %v3397_v59 = vrot.slane %v2986_v3, 2  ;;  %v3381_v20 = vrot.slane %v2985_v0, 2 }
 0x1a5   : > { %v3189_v33 = vrot.slane %v2987_v19, 1  ;;  %v3093_v55 = vsel %vm1703_vm4, %v3061_v57, %v3077_v46  ;;  %v3221_v7 = vsel %vm1816_vm6, %v3157_v4, %v3173_v6  ;;  %v3317_v42 = vsel %vm1929_vm5, %v3285_v53, %v3301_v52 }
 0x1a6   : > { %v3109_v13 = vsel %vm1703_vm4, %v3045_v21, %v3061_v57  ;;  %v3127_v31 = vmax.f32 %v2986_v3, %v3093_v55  ;;  %v3333_v14 = vsel %vm1929_vm5, %v3269_v39, %v3285_v53  ;;  %v3413_v37 = vrot.slane %v2987_v19, 2  ;;  %v7818_v57 = vld [vmem:[#allocation2 + $0x180] sm:$0xff] }
 0x1a7   : > { %v3126_v17 = vmax.f32 %v2985_v0, %v3109_v13  ;;  %v3205_v12 = vsel %vm1816_vm6, %v3173_v6, %v3189_v33  ;;  %v2732_v48 = vmax.f32 %v2604_v15, %v7755_v22  ;;  %v2733_v29 = vmax.f32 %v2605_v30, %v7600_v47  ;;  %v7810_v15 = vld [vmem:[#allocation2 + $0xd0] sm:$0xff] }
 0x1a8   : > { %v3239_v24 = vmax.f32 %v3127_v31, %v3205_v12  ;;  %v2734_v16 = vmax.f32 %v2606_v25, %v7602_v11  ;;  %v3429_v26 = vsel %vm2042_vm7, %v3397_v59, %v3413_v37  ;;  %v3445_v18 = vsel %vm2042_vm7, %v3381_v20, %v3397_v59  ;;  %v6290_v25 = vld [vmem:[#allocation2 + $0x160] sm:$0xff] }
 0x1a9   : > { %v3238_v50 = vmax.f32 %v3126_v17, %v3221_v7  ;;  %v2735_v56 = vmax.f32 %v2607_v44, %v7769_v36  ;;  %v2860_v28 = vmax.f32 %v2732_v48, %v7748_v49  ;;  %v2861_v19 = vmax.f32 %v2733_v29, %v7758_v58  ;;  %v6292_v48 = vld [vmem:[#allocation2 + $0x178] sm:$0xff] }
 0x1aa   : > { %v3351_v3 = vmax.f32 %v3239_v24, %v3317_v42  ;;  %v2862_v30 = vmax.f32 %v2734_v16, %v7760_v61  ;;  %v1247_v46 = vmax.f32 %v6290_v25, %v7818_v57  ;;  %v1248_v4 = vmax.f32 %v6960_v1, %v10237_v43 }
 0x1ab   : > { %v3350_v0 = vmax.f32 %v3238_v50, %v3333_v14  ;;  %v2863_v21 = vmax.f32 %v2735_v56, %v7762_v27  ;;  %v2988_v39 = vmax.f32 %v2860_v28, %v7800_v2  ;;  %v2989_v53 = vmax.f32 %v2861_v19, %v7808_v51  ;;  %v7835_v50 = vld [vmem:[#allocation2 + $0x198] sm:$0xff] }
 0x1ac   : > { %v3463_v33 = vmax.f32 %v3351_v3, %v3429_v26  ;;  %v2990_v52 = vmax.f32 %v2862_v30, %v7810_v15  ;;  %v1249_v13 = vmax.f32 %v7046_v8, %v7543_v54  ;;  %v1250_v24 = vmax.f32 %v6292_v48, %v7835_v50 }
 0x1ad   : > { %v3462_v6 = vmax.f32 %v3350_v0, %v3445_v18  ;;  %v2991_v40 = vmax.f32 %v2863_v21, %v7814_v60  ;;  %v3046_v44 = vrot.slane %v2988_v39, 7  ;;  %v3270_v55 = vrot.slane %v2988_v39, 6  ;;  %v7846_v21 = vld [vmem:[#allocation2 + $0x1a0] sm:$0xff] }
 0x1ae   : > { %v3062_v59 = vrot.slane %v2989_v53, 7  ;;  %v3078_v17 = vrot.slane %v2990_v52, 7  ;;  %v3158_v31 = vrot.slane %v2989_v53, 1  ;;  %3824 = vst.msk [vmem:[#allocation2 + $0x70] sm:$0xff] %vm226_vm3, %v3463_v33  ;;  %v3174_v1 = vrot.slane %v2990_v52, 1 }
 0x1af   : > { %v3525_v7 = vpack.c.bf16 %v3463_v33, %v3462_v6  ;;  %3823 = vst.msk [vmem:[#allocation2 + $0x68] sm:$0xff] %vm226_vm3, %v3462_v6  ;;  %v3190_v12 = vrot.slane %v2991_v40, 1  ;;  %v3286_v20 = vrot.slane %v2989_v53, 6  ;;  %v3302_v42 = vrot.slane %v2990_v52, 6 }
 0x1b0   : > { %v3094_v14 = vsel %vm1703_vm4, %v3062_v59, %v3078_v17  ;;  %v3110_v8 = vsel %vm1703_vm4, %v3046_v44, %v3062_v59  ;;  %v3398_v37 = vrot.slane %v2990_v52, 2  ;;  %v3222_v26 = vsel %vm1816_vm6, %v3158_v31, %v3174_v1  ;;  %v7856_v44 = vld [vmem:[#allocation2 + $0x1e8] sm:$0xff]  ;;  %v7862_v59 = vld [vmem:[#allocation2 + $0x1f0] sm:$0xff]  ;;  %v7864_v17 = vld [vmem:[#allocation2 + $0x1f8] sm:$0xff] }
 0x1b1   : > { %5940 = vmatmul.mubr.msk.bf16.vlgmr.msra.gmra.mrb[48].mxu1 %vm226_vm3, %v3525_v7  ;;  %v3128_v29 = vmax.f32 %v2989_v53, %v3110_v8  ;;  %v3129_v16 = vmax.f32 %v2990_v52, %v3094_v14  ;;  %v3382_v18 = vrot.slane %v2989_v53, 2  ;;  %v3206_v56 = vsel %vm1816_vm6, %v3174_v1, %v3190_v12  ;;  %v7854_v52 = vld [vmem:[#allocation2 + $0x1e0] sm:$0xff] }
 0x1b2   : > { %v3318_v28 = vsel %vm1929_vm5, %v3286_v20, %v3302_v42  ;;  %v3334_v0 = vsel %vm1929_vm5, %v3270_v55, %v3286_v20  ;;  %v3414_v3 = vrot.slane %v2991_v40, 2  ;;  %v1375_v39 = vmax.f32 %v1247_v46, %v7846_v21 }
 0x1b3   : > { %v3240_v19 = vmax.f32 %v3128_v29, %v3222_v26  ;;  %v3241_v30 = vmax.f32 %v3129_v16, %v3206_v56  ;;  %v1376_v25 = vmax.f32 %v1248_v4, %v7604_v41  ;;  %v3446_v6 = vsel %vm2042_vm7, %v3382_v18, %v3398_v37 }
 0x1b4   : > { %v1377_v33 = vmax.f32 %v1249_v13, %v7611_v32  ;;  %v1378_v53 = vmax.f32 %v1250_v24, %v7628_v23  ;;  %v1251_v40 = vmax.f32 %v7818_v57, %v7846_v21  ;;  %v1504_v46 = vmax.f32 %v1375_v39, %v7642_v35 }
 0x1b5   : > { %v3352_v55 = vmax.f32 %v3240_v19, %v3334_v0  ;;  %v3353_v7 = vmax.f32 %v3241_v30, %v3318_v28  ;;  %v1505_v4 = vmax.f32 %v1376_v25, %v7650_v38  ;;  %v3430_v13 = vsel %vm2042_vm7, %v3398_v37, %v3414_v3 }
 0x1b6   : > { %v1506_v31 = vmax.f32 %v1377_v33, %v7652_v9  ;;  %v1507_v1 = vmax.f32 %v1378_v53, %v7654_v10  ;;  %v1252_v57 = vmax.f32 %v10237_v43, %v7604_v41  ;;  %v1633_v42 = vmax.f32 %v1504_v46, %v7854_v52 }
 0x1b7   : > { %v3464_v12 = vmax.f32 %v3352_v55, %v3446_v6  ;;  %v3465_v20 = vmax.f32 %v3353_v7, %v3430_v13  ;;  %v1634_v14 = vmax.f32 %v1505_v4, %v7856_v44  ;;  %v1253_v37 = vmax.f32 %v7543_v54, %v7611_v32 }
 0x1b8   : > { %v1635_v8 = vmax.f32 %v1506_v31, %v7862_v59  ;;  %v1636_v48 = vmax.f32 %v1507_v1, %v7864_v17  ;;  %v1254_v24 = vmax.f32 %v7835_v50, %v7628_v23  ;;  %v1664_v16 = vrot.slane %v1633_v42, 7  ;;  %v7896_v31 = vld [vmem:[#allocation2 + $0x200] sm:$0xff] }
 0x1b9   : > { %v3526_v29 = vpack.c.bf16 %v3465_v20, %v3464_v12  ;;  %v1680_v26 = vrot.slane %v1634_v14, 7  ;;  %v1379_v43 = vmax.f32 %v1251_v40, %v7642_v35  ;;  %3825 = vst.msk [vmem:[#allocation2 + $0x88] sm:$0xff] %vm226_vm3, %v3464_v12  ;;  %3826 = vst.msk [vmem:[#allocation2 + $0x90] sm:$0xff] %vm226_vm3, %v3465_v20  ;;  %v1779_v56 = vrot.slane %v1634_v14, 1 }
 0x1ba   : > { %v1696_v18 = vrot.slane %v1635_v8, 7  ;;  %v1795_v28 = vrot.slane %v1635_v8, 1  ;;  %v1811_v0 = vrot.slane %v1636_v48, 1  ;;  %v1892_v3 = vrot.slane %v1633_v42, 6 }
 0x1bb   : > { %5943 = vmatprep.mubr.msk.bf16.mxu1 %vm226_vm3, %v3526_v29  ;;  %v1731_v54 = vsel %vm1703_vm4, %v1664_v16, %v1680_v26  ;;  %v1908_v50 = vrot.slane %v1634_v14, 6  ;;  %v1924_v19 = vrot.slane %v1635_v8, 6  ;;  %v2005_v6 = vrot.slane %v1634_v14, 2  ;;  %v7904_v29 = vld [vmem:[#allocation2 + $0x210] sm:$0xff]  ;;  %v7910_v16 = vld [vmem:[#allocation2 + $0x218] sm:$0xff] }
 0x1bc   : > { %v1715_v30 = vsel %vm1703_vm4, %v1680_v26, %v1696_v18  ;;  %v1758_v39 = vmax.f32 %v1634_v14, %v1731_v54  ;;  %v1844_v25 = vsel %vm1816_vm6, %v1779_v56, %v1795_v28  ;;  %v1828_v53 = vsel %vm1816_vm6, %v1795_v28, %v1811_v0  ;;  %v7902_v14 = vld [vmem:[#allocation2 + $0x208] sm:$0xff] }
 0x1bd   : > { %v1759_v33 = vmax.f32 %v1635_v8, %v1715_v30  ;;  %v1941_v40 = vsel %vm1929_vm5, %v1908_v50, %v1924_v19  ;;  %v2021_v55 = vrot.slane %v1635_v8, 2  ;;  %v2037_v46 = vrot.slane %v1636_v48, 2 }
 0x1be   : > { %v1871_v7 = vmax.f32 %v1758_v39, %v1844_v25  ;;  %v1380_v4 = vmax.f32 %v1252_v57, %v7650_v38  ;;  %v1381_v13 = vmax.f32 %v1253_v37, %v7652_v9  ;;  %v1957_v12 = vsel %vm1929_vm5, %v1892_v3, %v1908_v50 }
 0x1bf   : > { %v1872_v1 = vmax.f32 %v1759_v33, %v1828_v53  ;;  %v1382_v20 = vmax.f32 %v1254_v24, %v7654_v10  ;;  %v1508_v42 = vmax.f32 %v1379_v43, %v7854_v52  ;;  %v2070_v57 = vsel %vm2042_vm7, %v2005_v6, %v2021_v55 }
 0x1c0   : > { %v1984_v8 = vmax.f32 %v1871_v7, %v1957_v12  ;;  %v1509_v48 = vmax.f32 %v1380_v4, %v7856_v44  ;;  %v1510_v37 = vmax.f32 %v1381_v13, %v7862_v59  ;;  %v2054_v24 = vsel %vm2042_vm7, %v2021_v55, %v2037_v46 }
 0x1c1   : > { %v1985_v26 = vmax.f32 %v1872_v1, %v1941_v40  ;;  %v1511_v43 = vmax.f32 %v1382_v20, %v7864_v17  ;;  %v1637_v18 = vmax.f32 %v1508_v42, %v7896_v31  ;;  %v2608_v54 = vmax.f32 %v7733_v45, %v7755_v22 }
 0x1c2   : > { %v2097_v56 = vmax.f32 %v1984_v8, %v2070_v57  ;;  %v1638_v28 = vmax.f32 %v1509_v48, %v7902_v14  ;;  %v1639_v0 = vmax.f32 %v1510_v37, %v7904_v29  ;;  %v2609_v30 = vmax.f32 %v7571_v62, %v7600_v47 }
 0x1c3   : > { %v2098_v3 = vmax.f32 %v1985_v26, %v2054_v24  ;;  %v1640_v50 = vmax.f32 %v1511_v43, %v7910_v16  ;;  %v1665_v19 = vrot.slane %v1637_v18, 7  ;;  %v1893_v55 = vrot.slane %v1637_v18, 6 }
 0x1c4   : > { %v1681_v39 = vrot.slane %v1638_v28, 7  ;;  %v1697_v25 = vrot.slane %v1639_v0, 7  ;;  %v1780_v6 = vrot.slane %v1638_v28, 1  ;;  %v1796_v33 = vrot.slane %v1639_v0, 1  ;;  %2458 = vst.msk [vmem:[#allocation2 + $0x1a8] sm:$0xff] %vm226_vm3, %v2097_v56 }
 0x1c5   : > { %v2150_v53 = vpack.c.bf16 %v2098_v3, %v2097_v56  ;;  %v1812_v40 = vrot.slane %v1640_v50, 1  ;;  %v1925_v7 = vrot.slane %v1639_v0, 6  ;;  %2459 = vst.msk [vmem:[#allocation2 + $0x1b0] sm:$0xff] %vm226_vm3, %v2098_v3  ;;  %v1909_v4 = vrot.slane %v1638_v28, 6  ;;  %v7947_v3 = vld [vmem:[#allocation2 + $0xe0] sm:$0xff] }
 0x1c6   : > { %v1716_v45 = vsel %vm1703_vm4, %v1681_v39, %v1697_v25  ;;  %v1732_v46 = vsel %vm1703_vm4, %v1665_v19, %v1681_v39  ;;  %v1845_v62 = vsel %vm1816_vm6, %v1780_v6, %v1796_v33  ;;  %v2006_v20 = vrot.slane %v1638_v28, 2  ;;  %v7951_v39 = vld [vmem:[#allocation2 + $0xe8] sm:$0xff] }
 0x1c7   : > { %5926 = vmatmul.mubr.msk.bf16.gmra.mrb[36].mxu0 %vm226_vm3, %v2150_v53  ;;  %v1760_v13 = vmax.f32 %v1638_v28, %v1732_v46  ;;  %v1761_v1 = vmax.f32 %v1639_v0, %v1716_v45  ;;  %v1829_v12 = vsel %vm1816_vm6, %v1796_v33, %v1812_v40  ;;  %v1942_v42 = vsel %vm1929_vm5, %v1909_v4, %v1925_v7  ;;  %v7959_v33 = vld [vmem:[#allocation2 + $0xf8] sm:$0xff] }
 0x1c8   : > { %v2022_v8 = vrot.slane %v1639_v0, 2  ;;  %v2038_v57 = vrot.slane %v1640_v50, 2  ;;  %v2610_v48 = vmax.f32 %v7577_v5, %v7602_v11  ;;  %v2611_v24 = vmax.f32 %v7742_v63, %v7769_v36 }
 0x1c9   : > { %v1873_v37 = vmax.f32 %v1760_v13, %v1845_v62  ;;  %v1874_v26 = vmax.f32 %v1761_v1, %v1829_v12  ;;  %v2736_v43 = vmax.f32 %v2608_v54, %v7748_v49  ;;  %v1958_v18 = vsel %vm1929_vm5, %v1893_v55, %v1909_v4  ;;  %v7953_v54 = vld [vmem:[#allocation2 + $0xf0] sm:$0xff] }
 0x1ca   : > { %v2055_v56 = vsel %vm2042_vm7, %v2022_v8, %v2038_v57  ;;  %v2737_v28 = vmax.f32 %v2609_v30, %v7758_v58  ;;  %v2738_v0 = vmax.f32 %v2610_v48, %v7760_v61  ;;  %v2739_v19 = vmax.f32 %v2611_v24, %v7762_v27 }
 0x1cb   : > { %v1986_v5 = vmax.f32 %v1873_v37, %v1958_v18  ;;  %v1987_v50 = vmax.f32 %v1874_v26, %v1942_v42  ;;  %v2864_v63 = vmax.f32 %v2736_v43, %v7800_v2  ;;  %v2071_v25 = vsel %vm2042_vm7, %v2006_v20, %v2022_v8 }
 0x1cc   : > { %v2865_v6 = vmax.f32 %v2737_v28, %v7808_v51  ;;  %v2866_v30 = vmax.f32 %v2738_v0, %v7810_v15  ;;  %v2612_v53 = vmax.f32 %v7755_v22, %v7748_v49  ;;  %v2867_v7 = vmax.f32 %v2739_v19, %v7814_v60 }
 0x1cd   : > { %v2099_v40 = vmax.f32 %v1986_v5, %v2071_v25  ;;  %v2100_v55 = vmax.f32 %v1987_v50, %v2055_v56  ;;  %v2992_v45 = vmax.f32 %v2864_v63, %v7947_v3  ;;  %v2613_v4 = vmax.f32 %v7600_v47, %v7758_v58 }
 0x1ce   : > { %v2993_v46 = vmax.f32 %v2865_v6, %v7951_v39  ;;  %v2994_v62 = vmax.f32 %v2866_v30, %v7953_v54  ;;  %v2614_v13 = vmax.f32 %v7602_v11, %v7760_v61  ;;  %v2995_v12 = vmax.f32 %v2867_v7, %v7959_v33  ;;  %v7992_v7 = vld [vmem:[#allocation2 + $0x100] sm:$0xff] }
 0x1cf   : > { %v2151_v1 = vpack.c.bf16 %v2100_v55, %v2099_v40  ;;  %v3047_v22 = vrot.slane %v2992_v45, 7  ;;  %v3271_v20 = vrot.slane %v2992_v45, 6  ;;  %2460 = vst.msk [vmem:[#allocation2 + $0x1c8] sm:$0xff] %vm226_vm3, %v2099_v40  ;;  %2461 = vst.msk [vmem:[#allocation2 + $0x1d0] sm:$0xff] %vm226_vm3, %v2100_v55  ;;  %v2615_v11 = vmax.f32 %v7769_v36, %v7762_v27 }
 0x1d0   : > { %v3063_v42 = vrot.slane %v2993_v46, 7  ;;  %v3079_v8 = vrot.slane %v2994_v62, 7  ;;  %v3159_v57 = vrot.slane %v2993_v46, 1  ;;  %v3175_v48 = vrot.slane %v2994_v62, 1 }
 0x1d1   : > { %5929 = vmatprep.mubr.msk.bf16.mxu0 %vm226_vm3, %v2151_v1  ;;  %v3191_v37 = vrot.slane %v2995_v12, 1  ;;  %v3287_v47 = vrot.slane %v2993_v46, 6  ;;  %v3303_v26 = vrot.slane %v2994_v62, 6  ;;  %v3399_v56 = vrot.slane %v2994_v62, 2 }
 0x1d2   : > { %v3095_v24 = vsel %vm1703_vm4, %v3063_v42, %v3079_v8  ;;  %v3111_v43 = vsel %vm1703_vm4, %v3047_v22, %v3063_v42  ;;  %v3223_v18 = vsel %vm1816_vm6, %v3159_v57, %v3175_v48  ;;  %v3383_v50 = vrot.slane %v2993_v46, 2  ;;  %v8006_v42 = vld [vmem:[#allocation2 + $0x118] sm:$0xff] }
 0x1d3   : > { %v3130_v28 = vmax.f32 %v2993_v46, %v3111_v43  ;;  %v3131_v0 = vmax.f32 %v2994_v62, %v3095_v24  ;;  %v3207_v5 = vsel %vm1816_vm6, %v3175_v48, %v3191_v37  ;;  %v3319_v19 = vsel %vm1929_vm5, %v3287_v47, %v3303_v26 }
 0x1d4   : > { %v3335_v36 = vsel %vm1929_vm5, %v3271_v20, %v3287_v47  ;;  %v3415_v63 = vrot.slane %v2995_v12, 2  ;;  %v2740_v25 = vmax.f32 %v2612_v53, %v7800_v2  ;;  %v2741_v40 = vmax.f32 %v2613_v4, %v7808_v51  ;;  %v8000_v12 = vld [vmem:[#allocation2 + $0x108] sm:$0xff]  ;;  %v8002_v53 = vld [vmem:[#allocation2 + $0x110] sm:$0xff] }
 0x1d5   : > { %v3242_v6 = vmax.f32 %v3130_v28, %v3223_v18  ;;  %v3243_v30 = vmax.f32 %v3131_v0, %v3207_v5  ;;  %v2742_v55 = vmax.f32 %v2614_v13, %v7810_v15  ;;  %v3447_v46 = vsel %vm2042_vm7, %v3383_v50, %v3399_v56 }
 0x1d6   : > { %v3431_v45 = vsel %vm2042_vm7, %v3399_v56, %v3415_v63  ;;  %v2743_v62 = vmax.f32 %v2615_v11, %v7814_v60  ;;  %v2868_v1 = vmax.f32 %v2740_v25, %v7947_v3  ;;  %v2869_v13 = vmax.f32 %v2741_v40, %v7951_v39 }
 0x1d7   : > { %v3354_v22 = vmax.f32 %v3242_v6, %v3335_v36  ;;  %v3355_v4 = vmax.f32 %v3243_v30, %v3319_v19  ;;  %v2870_v20 = vmax.f32 %v2742_v55, %v7953_v54  ;;  %v1255_v48 = vmax.f32 %v7846_v21, %v7642_v35 }
 0x1d8   : > { %v2871_v8 = vmax.f32 %v2743_v62, %v7959_v33  ;;  %v2996_v57 = vmax.f32 %v2868_v1, %v7992_v7  ;;  %v1256_v37 = vmax.f32 %v7604_v41, %v7650_v38  ;;  %v2997_v11 = vmax.f32 %v2869_v13, %v8000_v12 }
 0x1d9   : > { %v3466_v47 = vmax.f32 %v3354_v22, %v3447_v46  ;;  %v3467_v26 = vmax.f32 %v3355_v4, %v3431_v45  ;;  %v2998_v24 = vmax.f32 %v2870_v20, %v8002_v53  ;;  %v1257_v28 = vmax.f32 %v7611_v32, %v7652_v9 }
 0x1da   : > { %v2999_v43 = vmax.f32 %v2871_v8, %v8006_v42  ;;  %v3048_v18 = vrot.slane %v2996_v57, 7  ;;  %v3272_v56 = vrot.slane %v2996_v57, 6  ;;  %v3064_v5 = vrot.slane %v2997_v11, 7 }
 0x1db   : > { %v3527_v0 = vpack.c.bf16 %v3467_v26, %v3466_v47  ;;  %v3080_v50 = vrot.slane %v2998_v24, 7  ;;  %v3160_v21 = vrot.slane %v2997_v11, 1  ;;  %3827 = vst.msk [vmem:[#allocation2 + $0xa8] sm:$0xff] %vm226_vm3, %v3466_v47  ;;  %3828 = vst.msk [vmem:[#allocation2 + $0xb0] sm:$0xff] %vm226_vm3, %v3467_v26  ;;  %v3176_v41 = vrot.slane %v2998_v24, 1 }
 0x1dc   : > { %v3192_v19 = vrot.slane %v2999_v43, 1  ;;  %v3288_v36 = vrot.slane %v2997_v11, 6  ;;  %v3304_v63 = vrot.slane %v2998_v24, 6  ;;  %v3112_v32 = vsel %vm1703_vm4, %v3048_v18, %v3064_v5 }
 0x1dd   : > { %5944 = vmatmul.mubr.msk.bf16.gmra.mrb[52].mxu1 %vm226_vm3, %v3527_v0  ;;  %v3096_v25 = vsel %vm1703_vm4, %v3064_v5, %v3080_v50  ;;  %v3400_v6 = vrot.slane %v2998_v24, 2  ;;  %v1258_v30 = vmax.f32 %v7628_v23, %v7654_v10  ;;  %v3132_v40 = vmax.f32 %v2997_v11, %v3112_v32  ;;  %v8050_v0 = vld [vmem:[#allocation2 + $0x230] sm:$0xff]  ;;  %v8052_v5 = vld [vmem:[#allocation2 + $0x238] sm:$0xff] }
 0x1de   : > { %v3133_v55 = vmax.f32 %v2998_v24, %v3096_v25  ;;  %v3224_v45 = vsel %vm1816_vm6, %v3160_v21, %v3176_v41  ;;  %v3384_v46 = vrot.slane %v2997_v11, 2  ;;  %v3208_v62 = vsel %vm1816_vm6, %v3176_v41, %v3192_v19  ;;  %v8042_v11 = vld [vmem:[#allocation2 + $0x220] sm:$0xff]  ;;  %v8044_v24 = vld [vmem:[#allocation2 + $0x228] sm:$0xff] }
 0x1df   : > { %v3320_v1 = vsel %vm1929_vm5, %v3288_v36, %v3304_v63  ;;  %v3336_v22 = vsel %vm1929_vm5, %v3272_v56, %v3288_v36  ;;  %v3416_v4 = vrot.slane %v2999_v43, 2  ;;  %v3244_v13 = vmax.f32 %v3132_v40, %v3224_v45  ;;  %v8070_v40 = vld [vmem:[#allocation2 + $0xd0] sm:$0xff] }
 0x1e0   : > { %v3245_v20 = vmax.f32 %v3133_v55, %v3208_v62  ;;  %v1383_v23 = vmax.f32 %v1255_v48, %v7854_v52  ;;  %v1384_v8 = vmax.f32 %v1256_v37, %v7856_v44  ;;  %v3448_v57 = vsel %vm2042_vm7, %v3384_v46, %v3400_v6 }
 0x1e1   : > { %v1385_v47 = vmax.f32 %v1257_v28, %v7862_v59  ;;  %v1386_v26 = vmax.f32 %v1258_v30, %v7864_v17  ;;  %v1259_v43 = vmax.f32 %v7642_v35, %v7854_v52  ;;  %v3356_v18 = vmax.f32 %v3244_v13, %v3336_v22  ;;  %v8068_v30 = vld [vmem:[#allocation2 + $0xc8] sm:$0xff] }
 0x1e2   : > { %v3357_v56 = vmax.f32 %v3245_v20, %v3320_v1  ;;  %v1512_v48 = vmax.f32 %v1383_v23, %v7896_v31  ;;  %v1513_v37 = vmax.f32 %v1384_v8, %v7902_v14  ;;  %v3432_v28 = vsel %vm2042_vm7, %v3400_v6, %v3416_v4 }
 0x1e3   : > { %v1514_v50 = vmax.f32 %v1385_v47, %v7904_v29  ;;  %v1515_v21 = vmax.f32 %v1386_v26, %v7910_v16  ;;  %v1260_v35 = vmax.f32 %v7650_v38, %v7856_v44  ;;  %v3468_v52 = vmax.f32 %v3356_v18, %v3448_v57 }
 0x1e4   : > { %v3469_v41 = vmax.f32 %v3357_v56, %v3432_v28  ;;  %v1641_v19 = vmax.f32 %v1512_v48, %v8042_v11  ;;  %v1642_v36 = vmax.f32 %v1513_v37, %v8044_v24  ;;  %v1261_v32 = vmax.f32 %v7652_v9, %v7862_v59  ;;  %v8088_v37 = vld [vmem:[#allocation2 + $0x240] sm:$0xff] }
 0x1e5   : > { %v1643_v63 = vmax.f32 %v1514_v50, %v8050_v0  ;;  %v1644_v25 = vmax.f32 %v1515_v21, %v8052_v5  ;;  %v1262_v6 = vmax.f32 %v7654_v10, %v7864_v17  ;;  %v1387_v45 = vmax.f32 %v1259_v43, %v7896_v31  ;;  %3829 = vst.msk [vmem:[#allocation2 + $0xc8] sm:$0xff] %vm226_vm3, %v3468_v52 }
 0x1e6   : > { %v3528_v38 = vpack.c.bf16 %v3469_v41, %v3468_v52  ;;  %v1666_v44 = vrot.slane %v1641_v19, 7  ;;  %v1682_v55 = vrot.slane %v1642_v36, 7  ;;  %3830 = vst.msk [vmem:[#allocation2 + $0xd0] sm:$0xff] %vm226_vm3, %v3469_v41  ;;  %v1781_v62 = vrot.slane %v1642_v36, 1  ;;  %v8094_v41 = vld [vmem:[#allocation2 + $0x248] sm:$0xff] }
 0x1e7   : > { %v1698_v46 = vrot.slane %v1643_v63, 7  ;;  %v1797_v1 = vrot.slane %v1643_v63, 1  ;;  %v1813_v9 = vrot.slane %v1644_v25, 1  ;;  %v1894_v59 = vrot.slane %v1641_v19, 6  ;;  %v8096_v19 = vld [vmem:[#allocation2 + $0x250] sm:$0xff] }
 0x1e8   : > { %5947 = vmatprep.mubr.msk.bf16.mxu1 %vm226_vm3, %v3528_v38  ;;  %v1733_v10 = vsel %vm1703_vm4, %v1666_v44, %v1682_v55  ;;  %v1910_v17 = vrot.slane %v1642_v36, 6  ;;  %v1926_v22 = vrot.slane %v1643_v63, 6  ;;  %v2007_v23 = vrot.slane %v1642_v36, 2 }
 0x1e9   : > { %v1717_v4 = vsel %vm1703_vm4, %v1682_v55, %v1698_v46  ;;  %v1762_v13 = vmax.f32 %v1642_v36, %v1733_v10  ;;  %v1846_v20 = vsel %vm1816_vm6, %v1781_v62, %v1797_v1  ;;  %v1830_v57 = vsel %vm1816_vm6, %v1797_v1, %v1813_v9 }
 0x1ea   : > { %v1763_v8 = vmax.f32 %v1643_v63, %v1717_v4  ;;  %v1943_v47 = vsel %vm1929_vm5, %v1910_v17, %v1926_v22  ;;  %v2023_v26 = vrot.slane %v1643_v63, 2  ;;  %v2039_v18 = vrot.slane %v1644_v25, 2  ;;  %v8102_v63 = vld [vmem:[#allocation2 + $0x258] sm:$0xff] }
 0x1eb   : > { %v1875_v43 = vmax.f32 %v1762_v13, %v1846_v20  ;;  %v1388_v56 = vmax.f32 %v1260_v35, %v7902_v14  ;;  %v1389_v48 = vmax.f32 %v1261_v32, %v7904_v29  ;;  %v1959_v50 = vsel %vm1929_vm5, %v1894_v59, %v1910_v17  ;;  %v8115_v59 = vld [vmem:[#allocation2 + $0x1e8] sm:$0xff]  ;;  %v8117_v20 = vld [vmem:[#allocation2 + $0x1f0] sm:$0xff] }
 0x1ec   : > { %v1876_v28 = vmax.f32 %v1763_v8, %v1830_v57  ;;  %v1390_v21 = vmax.f32 %v1262_v6, %v7910_v16  ;;  %v1516_v52 = vmax.f32 %v1387_v45, %v8042_v11  ;;  %v2072_v14 = vsel %vm2042_vm7, %v2007_v23, %v2023_v26 }
 0x1ed   : > { %v1988_v36 = vmax.f32 %v1875_v43, %v1959_v50  ;;  %v1517_v29 = vmax.f32 %v1388_v56, %v8044_v24  ;;  %v1518_v35 = vmax.f32 %v1389_v48, %v8050_v0  ;;  %v2056_v32 = vsel %vm2042_vm7, %v2023_v26, %v2039_v18 }
 0x1ee   : > { %v1989_v25 = vmax.f32 %v1876_v28, %v1943_v47  ;;  %v1519_v6 = vmax.f32 %v1390_v21, %v8052_v5  ;;  %v1645_v38 = vmax.f32 %v1516_v52, %v8088_v37  ;;  %v2616_v46 = vmax.f32 %v7748_v49, %v7800_v2 }
 0x1ef   : > { %v2101_v44 = vmax.f32 %v1988_v36, %v2072_v14  ;;  %v1646_v55 = vmax.f32 %v1517_v29, %v8094_v41  ;;  %v1647_v45 = vmax.f32 %v1518_v35, %v8096_v19  ;;  %v2617_v10 = vmax.f32 %v7758_v58, %v7808_v51  ;;  %v8137_v35 = vld [vmem:[#allocation2 + $0xc0] sm:$0xff] }
 0x1f0   : > { %v2102_v62 = vmax.f32 %v1989_v25, %v2056_v32  ;;  %v1648_v1 = vmax.f32 %v1519_v6, %v8102_v63  ;;  %v1667_v9 = vrot.slane %v1645_v38, 7  ;;  %v1895_v49 = vrot.slane %v1645_v38, 6 }
 0x1f1   : > { %v1683_v17 = vrot.slane %v1646_v55, 7  ;;  %v1699_v22 = vrot.slane %v1647_v45, 7  ;;  %v1782_v4 = vrot.slane %v1646_v55, 1  ;;  %v1798_v13 = vrot.slane %v1647_v45, 1  ;;  %2462 = vst.msk [vmem:[#allocation2 + $0x1e8] sm:$0xff] %vm226_vm3, %v2101_v44 }
 0x1f2   : > { %v2152_v23 = vpack.c.bf16 %v2102_v62, %v2101_v44  ;;  %v1814_v8 = vrot.slane %v1648_v1, 1  ;;  %v1927_v2 = vrot.slane %v1647_v45, 6  ;;  %2463 = vst.msk [vmem:[#allocation2 + $0x1f0] sm:$0xff] %vm226_vm3, %v2102_v62  ;;  %v1911_v47 = vrot.slane %v1646_v55, 6 }
 0x1f3   : > { %v1718_v57 = vsel %vm1703_vm4, %v1683_v17, %v1699_v22  ;;  %v1734_v58 = vsel %vm1703_vm4, %v1667_v9, %v1683_v17  ;;  %v1847_v51 = vsel %vm1816_vm6, %v1782_v4, %v1798_v13  ;;  %v2008_v56 = vrot.slane %v1646_v55, 2  ;;  %v8157_v9 = vld [vmem:[#allocation2 + $0x138] sm:$0xff] }
 0x1f4   : > { %5930 = vmatmul.mubr.msk.bf16.gmra.mrb[40].mxu0 %vm226_vm3, %v2152_v23  ;;  %v1764_v26 = vmax.f32 %v1646_v55, %v1734_v58  ;;  %v1765_v43 = vmax.f32 %v1647_v45, %v1718_v57  ;;  %v1831_v18 = vsel %vm1816_vm6, %v1798_v13, %v1814_v8  ;;  %v1944_v48 = vsel %vm1929_vm5, %v1911_v47, %v1927_v2  ;;  %v8149_v55 = vld [vmem:[#allocation2 + $0x128] sm:$0xff]  ;;  %v8165_v8 = vld [vmem:[#allocation2 + $0x210] sm:$0xff]  ;;  %v8169_v57 = vld [vmem:[#allocation2 + $0xd8] sm:$0xff] }
 0x1f5   : > { %v2024_v28 = vrot.slane %v1647_v45, 2  ;;  %v2040_v50 = vrot.slane %v1648_v1, 2  ;;  %v2618_v21 = vmax.f32 %v7760_v61, %v7810_v15  ;;  %v2619_v14 = vmax.f32 %v7762_v27, %v7814_v60  ;;  %v8145_v61 = vld [vmem:[#allocation2 + $0x120] sm:$0xff]  ;;  %v8151_v45 = vld [vmem:[#allocation2 + $0x130] sm:$0xff]  ;;  %v8163_v23 = vld [vmem:[#allocation2 + $0x208] sm:$0xff] }
 0x1f6   : > { %v1877_v52 = vmax.f32 %v1764_v26, %v1847_v51  ;;  %v1878_v36 = vmax.f32 %v1765_v43, %v1831_v18  ;;  %v2744_v29 = vmax.f32 %v2616_v46, %v7947_v3  ;;  %v1960_v25 = vsel %vm1929_vm5, %v1895_v49, %v1911_v47 }
 0x1f7   : > { %v2057_v32 = vsel %vm2042_vm7, %v2024_v28, %v2040_v50  ;;  %v2745_v6 = vmax.f32 %v2617_v10, %v7951_v39  ;;  %v2746_v38 = vmax.f32 %v2618_v21, %v7953_v54  ;;  %v2747_v27 = vmax.f32 %v2619_v14, %v7959_v33 }
 0x1f8   : > { %v1990_v15 = vmax.f32 %v1877_v52, %v1960_v25  ;;  %v1991_v44 = vmax.f32 %v1878_v36, %v1944_v48  ;;  %v2872_v60 = vmax.f32 %v2744_v29, %v7992_v7  ;;  %v2073_v46 = vsel %vm2042_vm7, %v2008_v56, %v2024_v28 }
 0x1f9   : > { %v2873_v62 = vmax.f32 %v2745_v6, %v8000_v12  ;;  %v2874_v1 = vmax.f32 %v2746_v38, %v8002_v53  ;;  %v2620_v10 = vmax.f32 %v8137_v35, %v7947_v3  ;;  %v2875_v4 = vmax.f32 %v2747_v27, %v8006_v42 }
 0x1fa   : > { %v2103_v17 = vmax.f32 %v1990_v15, %v2073_v46  ;;  %v2104_v22 = vmax.f32 %v1991_v44, %v2057_v32  ;;  %v3000_v13 = vmax.f32 %v2872_v60, %v8145_v61  ;;  %v2621_v58 = vmax.f32 %v8068_v30, %v7951_v39 }
 0x1fb   : > { %v3001_v49 = vmax.f32 %v2873_v62, %v8149_v55  ;;  %v3002_v2 = vmax.f32 %v2874_v1, %v8151_v45  ;;  %v2622_v3 = vmax.f32 %v8070_v40, %v7953_v54  ;;  %v3003_v47 = vmax.f32 %v2875_v4, %v8157_v9  ;;  %v1134_v62 = vld [vmem:[#allocation2 + $0x1e0] sm:$0xff] }
 0x1fc   : > { %v2153_v51 = vpack.c.bf16 %v2104_v22, %v2103_v17  ;;  %2464 = vst.msk [vmem:[#allocation2 + $0x208] sm:$0xff] %vm226_vm3, %v2103_v17  ;;  %2465 = vst.msk [vmem:[#allocation2 + $0x210] sm:$0xff] %vm226_vm3, %v2104_v22  ;;  %v3049_v26 = vrot.slane %v3000_v13, 7  ;;  %v3273_v43 = vrot.slane %v3000_v13, 6  ;;  %v2623_v54 = vmax.f32 %v8169_v57, %v7959_v33 }
 0x1fd   : > { %v3065_v18 = vrot.slane %v3001_v49, 7  ;;  %v3081_v56 = vrot.slane %v3002_v2, 7  ;;  %v3161_v48 = vrot.slane %v3001_v49, 1  ;;  %v3177_v28 = vrot.slane %v3002_v2, 1 }
 0x1fe   : > { %5933 = vmatprep.mubr.msk.bf16.mxu0 %vm226_vm3, %v2153_v51  ;;  %v3193_v50 = vrot.slane %v3003_v47, 1  ;;  %v3289_v39 = vrot.slane %v3001_v49, 6  ;;  %v3305_v30 = vrot.slane %v3002_v2, 6  ;;  %v3401_v36 = vrot.slane %v3002_v2, 2  ;;  %v8207_v51 = vld [vmem:[#allocation2 + $0x148] sm:$0xff] }
 0x1ff   : > { %v3097_v40 = vsel %vm1703_vm4, %v3065_v18, %v3081_v56  ;;  %v3113_v21 = vsel %vm1703_vm4, %v3049_v26, %v3065_v18  ;;  %v3225_v52 = vsel %vm1816_vm6, %v3161_v48, %v3177_v28  ;;  %v3385_v32 = vrot.slane %v3001_v49, 2 }
 0x200   : > { %v3134_v14 = vmax.f32 %v3001_v49, %v3113_v21  ;;  %v3135_v29 = vmax.f32 %v3002_v2, %v3097_v40  ;;  %v3209_v25 = vsel %vm1816_vm6, %v3177_v28, %v3193_v50  ;;  %v3321_v6 = vsel %vm1929_vm5, %v3289_v39, %v3305_v30  ;;  %v8215_v28 = vld [vmem:[#allocation2 + $0x158] sm:$0xff] }
 0x201   : > { %v3337_v33 = vsel %vm1929_vm5, %v3273_v43, %v3289_v39  ;;  %v3417_v38 = vrot.slane %v3003_v47, 2  ;;  %v2748_v15 = vmax.f32 %v2620_v10, %v7992_v7  ;;  %v2749_v60 = vmax.f32 %v2621_v58, %v8000_v12  ;;  %v8204_v58 = vld [vmem:[#allocation2 + $0x140] sm:$0xff]  ;;  %v8209_v47 = vld [vmem:[#allocation2 + $0x150] sm:$0xff]  ;;  %v1137_v21 = vld [vmem:[#allocation2 + $0x1f8] sm:$0xff] }
 0x202   : > { %v3246_v44 = vmax.f32 %v3134_v14, %v3225_v52  ;;  %v3247_v27 = vmax.f32 %v3135_v29, %v3209_v25  ;;  %v2750_v46 = vmax.f32 %v2622_v3, %v8002_v53  ;;  %v3449_v17 = vsel %vm2042_vm7, %v3385_v32, %v3401_v36 }
 0x203   : > { %v3433_v1 = vsel %vm2042_vm7, %v3401_v36, %v3417_v38  ;;  %v2751_v22 = vmax.f32 %v2623_v54, %v8006_v42  ;;  %v2876_v4 = vmax.f32 %v2748_v15, %v8145_v61  ;;  %v2877_v10 = vmax.f32 %v2749_v60, %v8149_v55  ;;  %v8224_v36 = vld [vmem:[#allocation2 + $0xf0] sm:$0xff] }
 0x204   : > { %v3358_v13 = vmax.f32 %v3246_v44, %v3337_v33  ;;  %v3359_v49 = vmax.f32 %v3247_v27, %v3321_v6  ;;  %v2878_v2 = vmax.f32 %v2750_v46, %v8151_v45  ;;  %v1263_v43 = vmax.f32 %v1134_v62, %v7896_v31  ;;  %v8222_v31 = vld [vmem:[#allocation2 + $0xe8] sm:$0xff]  ;;  %v3853_v62 = vld [vmem:[#allocation2] sm:$0xff] }
 0x205   : > { %v2879_v3 = vmax.f32 %v2751_v22, %v8157_v9  ;;  %v3004_v26 = vmax.f32 %v2876_v4, %v8204_v58  ;;  %v1264_v18 = vmax.f32 %v8115_v59, %v8163_v23  ;;  %v3005_v50 = vmax.f32 %v2877_v10, %v8207_v51 }
 0x206   : > { %v3470_v56 = vmax.f32 %v3358_v13, %v3449_v17  ;;  %v3471_v48 = vmax.f32 %v3359_v49, %v3433_v1  ;;  %v3006_v39 = vmax.f32 %v2878_v2, %v8209_v47  ;;  %v1265_v52 = vmax.f32 %v8117_v20, %v8165_v8  ;;  %v8236_v1 = vld [vmem:[#allocation2 + $0x20] sm:$0xff] }
 0x207   : > { %v3007_v30 = vmax.f32 %v2879_v3, %v8215_v28  ;;  %v3050_v54 = vrot.slane %v3004_v26, 7  ;;  %v3274_v40 = vrot.slane %v3004_v26, 6  ;;  %v3066_v23 = vrot.slane %v3005_v50, 7  ;;  %v1586_v26 = vld [vmem:[#allocation2 + $0x268] sm:$0xff] }
 0x208   : > { %v3529_v59 = vpack.c.bf16 %v3471_v48, %v3470_v56  ;;  %v3082_v14 = vrot.slane %v3006_v39, 7  ;;  %v3162_v29 = vrot.slane %v3005_v50, 1  ;;  %3831 = vst.msk [vmem:[#allocation2 + $0xe8] sm:$0xff] %vm226_vm3, %v3470_v56  ;;  %3832 = vst.msk [vmem:[#allocation2 + $0xf0] sm:$0xff] %vm226_vm3, %v3471_v48  ;;  %v3178_v25 = vrot.slane %v3006_v39, 1  ;;  %v8246_v56 = vld [vmem:[#allocation2 + $0x8] sm:$0xff] }
 0x209   : > { %v3194_v32 = vrot.slane %v3007_v30, 1  ;;  %v3290_v6 = vrot.slane %v3005_v50, 6  ;;  %v3306_v33 = vrot.slane %v3006_v39, 6  ;;  %v3114_v8 = vsel %vm1703_vm4, %v3050_v54, %v3066_v23  ;;  %v8248_v48 = vld [vmem:[#allocation2 + $0x28] sm:$0xff] }
 0x20a   : > { %5948 = vmatmul.mubr.msk.bf16.gmra.mrb[56].mxu1 %vm226_vm3, %v3529_v59  ;;  %v3098_v20 = vsel %vm1703_vm4, %v3066_v23, %v3082_v14  ;;  %v3402_v38 = vrot.slane %v3006_v39, 2  ;;  %v1266_v15 = vmax.f32 %v1137_v21, %v7910_v16  ;;  %v3136_v44 = vmax.f32 %v3005_v50, %v3114_v8  ;;  %v1585_v16 = vld [vmem:[#allocation2 + $0x260] sm:$0xff]  ;;  %v3855_v21 = vld [vmem:[#allocation2 + $0x10] sm:$0xff]  ;;  %v3856_v23 = vld [vmem:[#allocation2 + $0x18] sm:$0xff] }
 0x20b   : > { %v3137_v27 = vmax.f32 %v3006_v39, %v3098_v20  ;;  %v3226_v60 = vsel %vm1816_vm6, %v3162_v29, %v3178_v25  ;;  %v3386_v46 = vrot.slane %v3005_v50, 2  ;;  %v3210_v17 = vsel %vm1816_vm6, %v3178_v25, %v3194_v32  ;;  %v8257_v14 = vld [vmem:[#allocation2 + $0x30] sm:$0xff]  ;;  %v8259_v29 = vld [vmem:[#allocation2 + $0x38] sm:$0xff]  ;;  %v8267_v32 = vld [vmem:[#allocation2 + $0x40] sm:$0xff] }
 0x20c   : > { %v3322_v22 = vsel %vm1929_vm5, %v3290_v6, %v3306_v33  ;;  %v3338_v4 = vsel %vm1929_vm5, %v3274_v40, %v3290_v6  ;;  %v3418_v13 = vrot.slane %v3007_v30, 2  ;;  %v3248_v49 = vmax.f32 %v3136_v44, %v3226_v60  ;;  %v1587_v30 = vld [vmem:[#allocation2 + $0x270] sm:$0xff]  ;;  %v1588_v40 = vld [vmem:[#allocation2 + $0x278] sm:$0xff] }
 0x20d   : > { %v3249_v10 = vmax.f32 %v3137_v27, %v3210_v17  ;;  %v1391_v2 = vmax.f32 %v1263_v43, %v8042_v11  ;;  %v1392_v3 = vmax.f32 %v1264_v18, %v8044_v24  ;;  %v3450_v50 = vsel %vm2042_vm7, %v3386_v46, %v3402_v38 }
 0x20e   : > { %v1393_v39 = vmax.f32 %v1265_v52, %v8050_v0  ;;  %v1394_v54 = vmax.f32 %v1266_v15, %v8052_v5  ;;  %v3981_v59 = vmax.f32 %v3853_v62, %v8236_v1  ;;  %v3360_v11 = vmax.f32 %v3248_v49, %v3338_v4 }
 0x20f   : > { %v3361_v43 = vmax.f32 %v3249_v10, %v3322_v22  ;;  %v1520_v24 = vmax.f32 %v1391_v2, %v8088_v37  ;;  %v1521_v18 = vmax.f32 %v1392_v3, %v8094_v41  ;;  %v3434_v0 = vsel %vm2042_vm7, %v3402_v38, %v3418_v13  ;;  %v8271_v38 = vld [vmem:[#allocation2 + $0x108] sm:$0xff]  ;;  %v8283_v3 = vld [vmem:[#allocation2 + $0x50] sm:$0xff] }
 0x210   : > { %v1522_v5 = vmax.f32 %v1393_v39, %v8096_v19  ;;  %v1523_v52 = vmax.f32 %v1394_v54, %v8102_v63  ;;  %v3982_v25 = vmax.f32 %v8246_v56, %v8248_v48  ;;  %v3472_v37 = vmax.f32 %v3360_v11, %v3450_v50  ;;  %v8273_v19 = vld [vmem:[#allocation2 + $0x110] sm:$0xff]  ;;  %v8281_v2 = vld [vmem:[#allocation2 + $0x48] sm:$0xff]  ;;  %v8289_v54 = vld [vmem:[#allocation2 + $0x58] sm:$0xff] }
 0x211   : > { %v3473_v6 = vmax.f32 %v3361_v43, %v3434_v0  ;;  %v1649_v41 = vmax.f32 %v1520_v24, %v1585_v16  ;;  %v1650_v33 = vmax.f32 %v1521_v18, %v1586_v26  ;;  %v3983_v15 = vmax.f32 %v3855_v21, %v8257_v14  ;;  %v8297_v43 = vld [vmem:[#allocation2 + $0x68] sm:$0xff]  ;;  %v8299_v24 = vld [vmem:[#allocation2 + $0x70] sm:$0xff] }
 0x212   : > { %v1651_v20 = vmax.f32 %v1522_v5, %v1587_v30  ;;  %v1652_v8 = vmax.f32 %v1523_v52, %v1588_v40  ;;  %v3984_v44 = vmax.f32 %v3856_v23, %v8259_v29  ;;  %v4109_v46 = vmax.f32 %v3981_v59, %v8267_v32  ;;  %3833 = vst.msk [vmem:[#allocation2 + $0x108] sm:$0xff] %vm226_vm3, %v3472_v37  ;;  %v8291_v30 = vld [vmem:[#allocation2 + $0x60] sm:$0xff]  ;;  %v8303_v52 = vld [vmem:[#allocation2 + $0x78] sm:$0xff] }
 0x213   : > { %v3530_v63 = vpack.c.bf16 %v3473_v6, %v3472_v37  ;;  %v1668_v27 = vrot.slane %v1649_v41, 7  ;;  %v1684_v60 = vrot.slane %v1650_v33, 7  ;;  %3834 = vst.msk [vmem:[#allocation2 + $0x110] sm:$0xff] %vm226_vm3, %v3473_v6  ;;  %v1783_v17 = vrot.slane %v1650_v33, 1  ;;  %v8305_v37 = vld [vmem:[#allocation2 + $0x80] sm:$0xff] }
 0x214   : > { %v1700_v62 = vrot.slane %v1651_v20, 7  ;;  %v1799_v22 = vrot.slane %v1651_v20, 1  ;;  %v1815_v4 = vrot.slane %v1652_v8, 1  ;;  %v1896_v16 = vrot.slane %v1649_v41, 6 }
 0x215   : > { %5951 = vmatprep.mubr.msk.bf16.mxu1 %vm226_vm3, %v3530_v63  ;;  %v1735_v13 = vsel %vm1703_vm4, %v1668_v27, %v1684_v60  ;;  %v1912_v49 = vrot.slane %v1650_v33, 6  ;;  %v1928_v10 = vrot.slane %v1651_v20, 6  ;;  %v2009_v39 = vrot.slane %v1650_v33, 2  ;;  %v8311_v63 = vld [vmem:[#allocation2 + $0x88] sm:$0xff]  ;;  %v8313_v27 = vld [vmem:[#allocation2 + $0x90] sm:$0xff] }
 0x216   : > { %v1719_v26 = vsel %vm1703_vm4, %v1684_v60, %v1700_v62  ;;  %v1766_v56 = vmax.f32 %v1650_v33, %v1735_v13  ;;  %v1848_v50 = vsel %vm1816_vm6, %v1783_v17, %v1799_v22  ;;  %v1832_v21 = vsel %vm1816_vm6, %v1799_v22, %v1815_v4  ;;  %v8321_v17 = vld [vmem:[#allocation2 + $0x98] sm:$0xff] }
 0x217   : > { %v1767_v40 = vmax.f32 %v1651_v20, %v1719_v26  ;;  %v1945_v59 = vsel %vm1929_vm5, %v1912_v49, %v1928_v10  ;;  %v2025_v11 = vrot.slane %v1651_v20, 2  ;;  %v2041_v23 = vrot.slane %v1652_v8, 2  ;;  %v8315_v8 = vld [vmem:[#allocation2 + $0xe0] sm:$0xff] }
 0x218   : > { %v1879_v18 = vmax.f32 %v1766_v56, %v1848_v50  ;;  %v4110_v0 = vmax.f32 %v3982_v25, %v8281_v2  ;;  %v4111_v5 = vmax.f32 %v3983_v15, %v8283_v3  ;;  %v1961_v41 = vsel %vm1929_vm5, %v1896_v16, %v1912_v49 }
 0x219   : > { %v1880_v6 = vmax.f32 %v1767_v40, %v1832_v21  ;;  %v4112_v33 = vmax.f32 %v3984_v44, %v8289_v54  ;;  %v4237_v20 = vmax.f32 %v4109_v46, %v8291_v30  ;;  %v2074_v15 = vsel %vm2042_vm7, %v2009_v39, %v2025_v11 }
 0x21a   : > { %v1992_v25 = vmax.f32 %v1879_v18, %v1961_v41  ;;  %v4238_v60 = vmax.f32 %v4110_v0, %v8297_v43  ;;  %v4239_v62 = vmax.f32 %v4111_v5, %v8299_v24  ;;  %v2058_v44 = vsel %vm2042_vm7, %v2025_v11, %v2041_v23  ;;  %v8342_v41 = vld [vmem:[#allocation2 + $0xf8] sm:$0xff] }
 0x21b   : > { %v1993_v22 = vmax.f32 %v1880_v6, %v1945_v59  ;;  %v4240_v46 = vmax.f32 %v4112_v33, %v8303_v52  ;;  %v4365_v4 = vmax.f32 %v4237_v20, %v8305_v37  ;;  %v2624_v10 = vmax.f32 %v8315_v8, %v7992_v7 }
 0x21c   : > { %v2105_v13 = vmax.f32 %v1992_v25, %v2074_v15  ;;  %v4366_v16 = vmax.f32 %v4238_v60, %v8311_v63  ;;  %v4367_v49 = vmax.f32 %v4239_v62, %v8313_v27  ;;  %v2625_v39 = vmax.f32 %v8222_v31, %v8000_v12 }
 0x21d   : > { %v2106_v26 = vmax.f32 %v1993_v22, %v2058_v44  ;;  %v4368_v56 = vmax.f32 %v4240_v46, %v8321_v17  ;;  %v4429_v50 = vrot.slane %v4365_v4, 7  ;;  %v4653_v0 = vrot.slane %v4365_v4, 6 }
 0x21e   : > { %2466 = vst.msk [vmem:[#allocation2 + $0x228] sm:$0xff] %vm226_vm3, %v2105_v13  ;;  %v4445_v40 = vrot.slane %v4366_v16, 7  ;;  %v4461_v21 = vrot.slane %v4367_v49, 7  ;;  %v4541_v59 = vrot.slane %v4366_v16, 1  ;;  %v4557_v11 = vrot.slane %v4367_v49, 1 }
 0x21f   : > { %v2154_v18 = vpack.c.bf16 %v2106_v26, %v2105_v13  ;;  %2467 = vst.msk [vmem:[#allocation2 + $0x230] sm:$0xff] %vm226_vm3, %v2106_v26  ;;  %v4573_v23 = vrot.slane %v4368_v56, 1  ;;  %v4685_v5 = vrot.slane %v4367_v49, 6  ;;  %v4669_v31 = vrot.slane %v4366_v16, 6 }
 0x220   : > { %v4477_v7 = vsel %vm1703_vm4, %v4445_v40, %v4461_v21  ;;  %v4493_v6 = vsel %vm1703_vm4, %v4429_v50, %v4445_v40  ;;  %v4605_v12 = vsel %vm1816_vm6, %v4541_v59, %v4557_v11  ;;  %v4765_v15 = vrot.slane %v4366_v16, 2  ;;  %v8354_v50 = vld [vmem:[#allocation2 + $0x100] sm:$0xff] }
 0x221   : > { %5934 = vmatmul.mubr.msk.bf16.gmra.mrb[44].mxu0 %vm226_vm3, %v2154_v18  ;;  %v4509_v33 = vmax.f32 %v4366_v16, %v4493_v6  ;;  %v4510_v20 = vmax.f32 %v4367_v49, %v4477_v7  ;;  %v4589_v25 = vsel %vm1816_vm6, %v4557_v11, %v4573_v23  ;;  %v4701_v60 = vsel %vm1929_vm5, %v4669_v31, %v4685_v5  ;;  %v8368_v18 = vld [vmem:[#allocation2 + $0x160] sm:$0xff]  ;;  %v8373_v7 = vld [vmem:[#allocation2 + $0x168] sm:$0xff]  ;;  %v8375_v6 = vld [vmem:[#allocation2 + $0x170] sm:$0xff] }
 0x222   : > { %v4781_v62 = vrot.slane %v4367_v49, 2  ;;  %v4797_v22 = vrot.slane %v4368_v56, 2  ;;  %v2626_v44 = vmax.f32 %v8224_v36, %v8002_v53  ;;  %v2627_v13 = vmax.f32 %v8342_v41, %v8006_v42 }
 0x223   : > { %v4621_v46 = vmax.f32 %v4509_v33, %v4605_v12  ;;  %v4622_v4 = vmax.f32 %v4510_v20, %v4589_v25  ;;  %v2752_v26 = vmax.f32 %v2624_v10, %v8145_v61  ;;  %v4717_v16 = vsel %vm1929_vm5, %v4653_v0, %v4669_v31  ;;  %v8378_v31 = vld [vmem:[#allocation2 + $0x178] sm:$0xff] }
 0x224   : > { %v4813_v40 = vsel %vm2042_vm7, %v4781_v62, %v4797_v22  ;;  %v2753_v49 = vmax.f32 %v2625_v39, %v8149_v55  ;;  %v2754_v56 = vmax.f32 %v2626_v44, %v8151_v45  ;;  %v2755_v21 = vmax.f32 %v2627_v13, %v8157_v9  ;;  %v8382_v25 = vld [vmem:[#allocation2 + $0x118] sm:$0xff] }
 0x225   : > { %v4733_v53 = vmax.f32 %v4621_v46, %v4717_v16  ;;  %v4734_v36 = vmax.f32 %v4622_v4, %v4701_v60  ;;  %v2880_v42 = vmax.f32 %v2752_v26, %v8204_v58  ;;  %v4829_v10 = vsel %vm2042_vm7, %v4765_v15, %v4781_v62 }
 0x226   : > { %v2881_v59 = vmax.f32 %v2753_v49, %v8207_v51  ;;  %v2882_v11 = vmax.f32 %v2754_v56, %v8209_v47  ;;  %v2628_v39 = vmax.f32 %v8354_v50, %v8145_v61  ;;  %v2883_v5 = vmax.f32 %v2755_v21, %v8215_v28 }
 0x227   : > { %v4845_v23 = vmax.f32 %v4733_v53, %v4829_v10  ;;  %v4846_v0 = vmax.f32 %v4734_v36, %v4813_v40  ;;  %v3008_v12 = vmax.f32 %v2880_v42, %v8368_v18  ;;  %v2629_v15 = vmax.f32 %v8271_v38, %v8149_v55 }
 0x228   : > { %v3009_v33 = vmax.f32 %v2881_v59, %v8373_v7  ;;  %v3010_v20 = vmax.f32 %v2882_v11, %v8375_v6  ;;  %v2630_v60 = vmax.f32 %v8273_v19, %v8151_v45  ;;  %v3011_v22 = vmax.f32 %v2883_v5, %v8378_v31 }
 0x229   : > { %v4909_v62 = vpack.c.bf16 %v4846_v0, %v4845_v23  ;;  %v3051_v44 = vrot.slane %v3008_v12, 7  ;;  %v3275_v46 = vrot.slane %v3008_v12, 6  ;;  %v2631_v38 = vmax.f32 %v8382_v25, %v8157_v9 }
 0x22a   : > { %v3067_v4 = vrot.slane %v3009_v33, 7  ;;  %v3083_v13 = vrot.slane %v3010_v20, 7  ;;  %v3163_v26 = vrot.slane %v3009_v33, 1  ;;  %v3179_v16 = vrot.slane %v3010_v20, 1 }
 0x22b   : > { %5973 = vmatprep.mubr.msk.bf16.mxu0 %vm226_vm3, %v4909_v62  ;;  %v3195_v40 = vrot.slane %v3011_v22, 1  ;;  %v3291_v49 = vrot.slane %v3009_v33, 6  ;;  %v3307_v56 = vrot.slane %v3010_v20, 6  ;;  %v3403_v21 = vrot.slane %v3010_v20, 2 }
 0x22c   : > { %v3099_v19 = vsel %vm1703_vm4, %v3067_v4, %v3083_v13  ;;  %v3115_v53 = vsel %vm1703_vm4, %v3051_v44, %v3067_v4  ;;  %v3227_v36 = vsel %vm1816_vm6, %v3163_v26, %v3179_v16  ;;  %v3387_v11 = vrot.slane %v3009_v33, 2 }
 0x22d   : > { %v3138_v42 = vmax.f32 %v3009_v33, %v3115_v53  ;;  %v3139_v10 = vmax.f32 %v3010_v20, %v3099_v19  ;;  %v3211_v59 = vsel %vm1816_vm6, %v3179_v16, %v3195_v40  ;;  %v3323_v23 = vsel %vm1929_vm5, %v3291_v49, %v3307_v56  ;;  %v8420_v56 = vld [vmem:[#allocation2 + $0x190] sm:$0xff] }
 0x22e   : > { %v3339_v0 = vsel %vm1929_vm5, %v3275_v46, %v3291_v49  ;;  %v3419_v5 = vrot.slane %v3011_v22, 2  ;;  %v2756_v12 = vmax.f32 %v2628_v39, %v8204_v58  ;;  %v2757_v4 = vmax.f32 %v2629_v15, %v8207_v51  ;;  %v8415_v49 = vld [vmem:[#allocation2 + $0x180] sm:$0xff] }
 0x22f   : > { %v3250_v62 = vmax.f32 %v3138_v42, %v3227_v36  ;;  %v3251_v44 = vmax.f32 %v3139_v10, %v3211_v59  ;;  %v2758_v13 = vmax.f32 %v2630_v60, %v8209_v47  ;;  %v3451_v33 = vsel %vm2042_vm7, %v3387_v11, %v3403_v21  ;;  %v8418_v60 = vld [vmem:[#allocation2 + $0x188] sm:$0xff]  ;;  %v8427_v42 = vld [vmem:[#allocation2 + $0x198] sm:$0xff] }
 0x230   : > { %v3435_v20 = vsel %vm2042_vm7, %v3403_v21, %v3419_v5  ;;  %v2759_v26 = vmax.f32 %v2631_v38, %v8215_v28  ;;  %v2884_v16 = vmax.f32 %v2756_v12, %v8368_v18  ;;  %v2885_v39 = vmax.f32 %v2757_v4, %v8373_v7 }
 0x231   : > { %v3362_v46 = vmax.f32 %v3250_v62, %v3339_v0  ;;  %v3363_v22 = vmax.f32 %v3251_v44, %v3323_v23  ;;  %v2886_v40 = vmax.f32 %v2758_v13, %v8375_v6  ;;  %v3985_v38 = vmax.f32 %v8236_v1, %v8267_v32 }
 0x232   : > { %v2887_v15 = vmax.f32 %v2759_v26, %v8378_v31  ;;  %v3012_v19 = vmax.f32 %v2884_v16, %v8415_v49  ;;  %v3986_v53 = vmax.f32 %v8248_v48, %v8281_v2  ;;  %v3013_v10 = vmax.f32 %v2885_v39, %v8418_v60 }
 0x233   : > { %v3474_v36 = vmax.f32 %v3362_v46, %v3451_v33  ;;  %v3475_v21 = vmax.f32 %v3363_v22, %v3435_v20  ;;  %v3014_v59 = vmax.f32 %v2886_v40, %v8420_v56  ;;  %v3987_v5 = vmax.f32 %v8257_v14, %v8283_v3 }
 0x234   : > { %v3015_v11 = vmax.f32 %v2887_v15, %v8427_v42  ;;  %v3052_v23 = vrot.slane %v3012_v19, 7  ;;  %v3276_v0 = vrot.slane %v3012_v19, 6  ;;  %v3068_v1 = vrot.slane %v3013_v10, 7 }
 0x235   : > { %v3531_v12 = vpack.c.bf16 %v3475_v21, %v3474_v36  ;;  %v3084_v62 = vrot.slane %v3014_v59, 7  ;;  %v3164_v44 = vrot.slane %v3013_v10, 1  ;;  %3835 = vst.msk [vmem:[#allocation2 + $0x128] sm:$0xff] %vm226_vm3, %v3474_v36  ;;  %3836 = vst.msk [vmem:[#allocation2 + $0x130] sm:$0xff] %vm226_vm3, %v3475_v21  ;;  %v3180_v48 = vrot.slane %v3014_v59, 1 }
 0x236   : > { %v3196_v4 = vrot.slane %v3015_v11, 1  ;;  %v3292_v13 = vrot.slane %v3013_v10, 6  ;;  %v3308_v20 = vrot.slane %v3014_v59, 6  ;;  %v3116_v14 = vsel %vm1703_vm4, %v3052_v23, %v3068_v1 }
 0x237   : > { %5952 = vmatmul.mubr.msk.bf16.gmra.mrb[60].mxu1 %vm226_vm3, %v3531_v12  ;;  %v3100_v33 = vsel %vm1703_vm4, %v3068_v1, %v3084_v62  ;;  %v3404_v26 = vrot.slane %v3014_v59, 2  ;;  %v3988_v16 = vmax.f32 %v8259_v29, %v8289_v54  ;;  %v3140_v46 = vmax.f32 %v3013_v10, %v3116_v14 }
 0x238   : > { %v3141_v22 = vmax.f32 %v3014_v59, %v3100_v33  ;;  %v3228_v39 = vsel %vm1816_vm6, %v3164_v44, %v3180_v48  ;;  %v3388_v40 = vrot.slane %v3013_v10, 2  ;;  %v3212_v15 = vsel %vm1816_vm6, %v3180_v48, %v3196_v4  ;;  %v8457_v44 = vld [vmem:[#allocation2 + $0xa0] sm:$0xff]  ;;  %v8459_v48 = vld [vmem:[#allocation2 + $0xa8] sm:$0xff] }
 0x239   : > { %v3324_v19 = vsel %vm1929_vm5, %v3292_v13, %v3308_v20  ;;  %v3340_v36 = vsel %vm1929_vm5, %v3276_v0, %v3292_v13  ;;  %v3420_v21 = vrot.slane %v3015_v11, 2  ;;  %v3252_v23 = vmax.f32 %v3140_v46, %v3228_v39  ;;  %v8465_v13 = vld [vmem:[#allocation2 + $0xb0] sm:$0xff]  ;;  %v8467_v20 = vld [vmem:[#allocation2 + $0xb8] sm:$0xff] }
 0x23a   : > { %v3253_v12 = vmax.f32 %v3141_v22, %v3212_v15  ;;  %v4113_v29 = vmax.f32 %v3985_v38, %v8291_v30  ;;  %v4114_v59 = vmax.f32 %v3986_v53, %v8297_v43  ;;  %v3452_v1 = vsel %vm2042_vm7, %v3388_v40, %v3404_v26 }
 0x23b   : > { %v4115_v10 = vmax.f32 %v3987_v5, %v8299_v24  ;;  %v4116_v62 = vmax.f32 %v3988_v16, %v8303_v52  ;;  %v3989_v11 = vmax.f32 %v8267_v32, %v8291_v30  ;;  %v3364_v0 = vmax.f32 %v3252_v23, %v3340_v36 }
 0x23c   : > { %v3365_v4 = vmax.f32 %v3253_v12, %v3324_v19  ;;  %v4241_v38 = vmax.f32 %v4113_v29, %v8305_v37  ;;  %v4242_v53 = vmax.f32 %v4114_v59, %v8311_v63  ;;  %v3436_v5 = vsel %vm2042_vm7, %v3404_v26, %v3420_v21 }
 0x23d   : > { %v4243_v33 = vmax.f32 %v4115_v10, %v8313_v27  ;;  %v4244_v14 = vmax.f32 %v4116_v62, %v8321_v17  ;;  %v3990_v32 = vmax.f32 %v8281_v2, %v8297_v43  ;;  %v3476_v16 = vmax.f32 %v3364_v0, %v3452_v1 }
 0x23e   : > { %v3477_v46 = vmax.f32 %v3365_v4, %v3436_v5  ;;  %v4369_v22 = vmax.f32 %v4241_v38, %v8457_v44  ;;  %v4370_v39 = vmax.f32 %v4242_v53, %v8459_v48  ;;  %v3991_v26 = vmax.f32 %v8283_v3, %v8299_v24 }
 0x23f   : > { %v4371_v40 = vmax.f32 %v4243_v33, %v8465_v13  ;;  %v4372_v15 = vmax.f32 %v4244_v14, %v8467_v20  ;;  %v3992_v19 = vmax.f32 %v8289_v54, %v8303_v52  ;;  %v4117_v2 = vmax.f32 %v3989_v11, %v8305_v37  ;;  %3837 = vst.msk [vmem:[#allocation2 + $0x148] sm:$0xff] %vm226_vm3, %v3476_v16 }
 0x240   : > { %v3532_v36 = vpack.c.bf16 %v3477_v46, %v3476_v16  ;;  %v4430_v21 = vrot.slane %v4369_v22, 7  ;;  %v4446_v23 = vrot.slane %v4370_v39, 7  ;;  %3838 = vst.msk [vmem:[#allocation2 + $0x150] sm:$0xff] %vm226_vm3, %v3477_v46  ;;  %v4542_v29 = vrot.slane %v4370_v39, 1 }
 0x241   : > { %v4462_v12 = vrot.slane %v4371_v40, 7  ;;  %v4558_v59 = vrot.slane %v4371_v40, 1  ;;  %v4574_v1 = vrot.slane %v4372_v15, 1  ;;  %v4654_v10 = vrot.slane %v4369_v22, 6 }
 0x242   : > { %5955 = vmatprep.mubr.msk.bf16.mxu1 %vm226_vm3, %v3532_v36  ;;  %v4494_v3 = vsel %vm1703_vm4, %v4430_v21, %v4446_v23  ;;  %v4670_v54 = vrot.slane %v4370_v39, 6  ;;  %v4686_v62 = vrot.slane %v4371_v40, 6  ;;  %v4766_v38 = vrot.slane %v4370_v39, 2 }
 0x243   : > { %v4478_v0 = vsel %vm1703_vm4, %v4446_v23, %v4462_v12  ;;  %v4511_v11 = vmax.f32 %v4370_v39, %v4494_v3  ;;  %v4606_v4 = vsel %vm1816_vm6, %v4542_v29, %v4558_v59  ;;  %v4590_v5 = vsel %vm1816_vm6, %v4558_v59, %v4574_v1  ;;  %v8503_v29 = vld [vmem:[#allocation2 + $0xc8] sm:$0xff]  ;;  %v8505_v59 = vld [vmem:[#allocation2 + $0xd0] sm:$0xff] }
 0x244   : > { %v4512_v53 = vmax.f32 %v4371_v40, %v4478_v0  ;;  %v4702_v33 = vsel %vm1929_vm5, %v4670_v54, %v4686_v62  ;;  %v4782_v14 = vrot.slane %v4371_v40, 2  ;;  %v4798_v46 = vrot.slane %v4372_v15, 2 }
 0x245   : > { %v4623_v16 = vmax.f32 %v4511_v11, %v4606_v4  ;;  %v4118_v22 = vmax.f32 %v3990_v32, %v8311_v63  ;;  %v4119_v36 = vmax.f32 %v3991_v26, %v8313_v27  ;;  %v4718_v23 = vsel %vm1929_vm5, %v4654_v10, %v4670_v54 }
 0x246   : > { %v4624_v21 = vmax.f32 %v4512_v53, %v4590_v5  ;;  %v4120_v39 = vmax.f32 %v3992_v19, %v8321_v17  ;;  %v4245_v12 = vmax.f32 %v4117_v2, %v8457_v44  ;;  %v4830_v40 = vsel %vm2042_vm7, %v4766_v38, %v4782_v14 }
 0x247   : > { %v4735_v1 = vmax.f32 %v4623_v16, %v4718_v23  ;;  %v4246_v32 = vmax.f32 %v4118_v22, %v8459_v48  ;;  %v4247_v15 = vmax.f32 %v4119_v36, %v8465_v13  ;;  %v4814_v3 = vsel %vm2042_vm7, %v4782_v14, %v4798_v46 }
 0x248   : > { %v4736_v26 = vmax.f32 %v4624_v21, %v4702_v33  ;;  %v4248_v19 = vmax.f32 %v4120_v39, %v8467_v20  ;;  %v4373_v2 = vmax.f32 %v4245_v12, %v8137_v35  ;;  %v2632_v0 = vmax.f32 %v8145_v61, %v8204_v58 }
 0x249   : > { %v4847_v10 = vmax.f32 %v4735_v1, %v4830_v40  ;;  %v4374_v54 = vmax.f32 %v4246_v32, %v8503_v29  ;;  %v4375_v62 = vmax.f32 %v4247_v15, %v8505_v59  ;;  %v2633_v53 = vmax.f32 %v8149_v55, %v8207_v51 }
 0x24a   : > { %v4848_v11 = vmax.f32 %v4736_v26, %v4814_v3  ;;  %v4376_v4 = vmax.f32 %v4248_v19, %v8169_v57  ;;  %v4431_v38 = vrot.slane %v4373_v2, 7  ;;  %v4655_v22 = vrot.slane %v4373_v2, 6 }
 0x24b   : > { %v4447_v5 = vrot.slane %v4374_v54, 7  ;;  %v4463_v33 = vrot.slane %v4375_v62, 7  ;;  %v4543_v14 = vrot.slane %v4374_v54, 1  ;;  %v4559_v16 = vrot.slane %v4375_v62, 1 }
 0x24c   : > { %v4910_v35 = vpack.c.bf16 %v4848_v11, %v4847_v10  ;;  %v4575_v46 = vrot.slane %v4376_v4, 1  ;;  %v4687_v36 = vrot.slane %v4375_v62, 6  ;;  %v4671_v23 = vrot.slane %v4374_v54, 6 }
 0x24d   : > { %v4479_v21 = vsel %vm1703_vm4, %v4447_v5, %v4463_v33  ;;  %v4495_v61 = vsel %vm1703_vm4, %v4431_v38, %v4447_v5  ;;  %v4607_v57 = vsel %vm1816_vm6, %v4543_v14, %v4559_v16  ;;  %v4767_v1 = vrot.slane %v4374_v54, 2 }
 0x24e   : > { %5974 = vmatmul.mubr.msk.bf16.vlgmr.msra.gmra.mrb[48].mxu0 %vm226_vm3, %v4910_v35  ;;  %v4513_v55 = vmax.f32 %v4374_v54, %v4495_v61  ;;  %v4514_v39 = vmax.f32 %v4375_v62, %v4479_v21  ;;  %v4591_v12 = vsel %vm1816_vm6, %v4559_v16, %v4575_v46  ;;  %v4703_v40 = vsel %vm1929_vm5, %v4671_v23, %v4687_v36  ;;  %v8550_v16 = vld [vmem:[#allocation2 + $0x1a0] sm:$0xff]  ;;  %v8555_v36 = vld [vmem:[#allocation2 + $0x1a8] sm:$0xff]  ;;  %v8557_v21 = vld [vmem:[#allocation2 + $0x1b0] sm:$0xff] }
 0x24f   : > { %v4783_v32 = vrot.slane %v4375_v62, 2  ;;  %v4799_v15 = vrot.slane %v4376_v4, 2  ;;  %v2634_v26 = vmax.f32 %v8151_v45, %v8209_v47  ;;  %v2635_v2 = vmax.f32 %v8157_v9, %v8215_v28 }
 0x250   : > { %v4625_v3 = vmax.f32 %v4513_v55, %v4607_v57  ;;  %v4626_v19 = vmax.f32 %v4514_v39, %v4591_v12  ;;  %v2760_v10 = vmax.f32 %v2632_v0, %v8368_v18  ;;  %v4719_v11 = vsel %vm1929_vm5, %v4655_v22, %v4671_v23  ;;  %v8560_v57 = vld [vmem:[#allocation2 + $0x1b8] sm:$0xff] }
 0x251   : > { %v4815_v54 = vsel %vm2042_vm7, %v4783_v32, %v4799_v15  ;;  %v2761_v38 = vmax.f32 %v2633_v53, %v8373_v7  ;;  %v2762_v62 = vmax.f32 %v2634_v26, %v8375_v6  ;;  %v2763_v45 = vmax.f32 %v2635_v2, %v8378_v31 }
 0x252   : > { %v4737_v4 = vmax.f32 %v4625_v3, %v4719_v11  ;;  %v4738_v5 = vmax.f32 %v4626_v19, %v4703_v40  ;;  %v2888_v33 = vmax.f32 %v2760_v10, %v8415_v49  ;;  %v4831_v9 = vsel %vm2042_vm7, %v4767_v1, %v4783_v32 }
 0x253   : > { %v2889_v0 = vmax.f32 %v2761_v38, %v8418_v60  ;;  %v2890_v14 = vmax.f32 %v2762_v62, %v8420_v56  ;;  %v2636_v53 = vmax.f32 %v8204_v58, %v8368_v18  ;;  %v2891_v22 = vmax.f32 %v2763_v45, %v8427_v42 }
 0x254   : > { %v4849_v35 = vmax.f32 %v4737_v4, %v4831_v9  ;;  %v4850_v46 = vmax.f32 %v4738_v5, %v4815_v54  ;;  %v3016_v61 = vmax.f32 %v2888_v33, %v8550_v16  ;;  %v2637_v39 = vmax.f32 %v8207_v51, %v8373_v7 }
 0x255   : > { %v3017_v23 = vmax.f32 %v2889_v0, %v8555_v36  ;;  %v3018_v55 = vmax.f32 %v2890_v14, %v8557_v21  ;;  %v2638_v58 = vmax.f32 %v8209_v47, %v8375_v6  ;;  %v3019_v1 = vmax.f32 %v2891_v22, %v8560_v57 }
 0x256   : > { %v4911_v12 = vpack.c.bf16 %v4850_v46, %v4849_v35  ;;  %v3053_v40 = vrot.slane %v3016_v61, 7  ;;  %v3277_v32 = vrot.slane %v3016_v61, 6  ;;  %v2639_v51 = vmax.f32 %v8215_v28, %v8378_v31 }
 0x257   : > { %v3069_v15 = vrot.slane %v3017_v23, 7  ;;  %v3085_v26 = vrot.slane %v3018_v55, 7  ;;  %v3165_v3 = vrot.slane %v3017_v23, 1  ;;  %v3181_v19 = vrot.slane %v3018_v55, 1 }
 0x258   : > { %5977 = vmatprep.mubr.msk.bf16.mxu0 %vm226_vm3, %v4911_v12  ;;  %v3197_v2 = vrot.slane %v3019_v1, 1  ;;  %v3293_v10 = vrot.slane %v3017_v23, 6  ;;  %v3309_v11 = vrot.slane %v3018_v55, 6  ;;  %v3405_v62 = vrot.slane %v3018_v55, 2 }
 0x259   : > { %v3101_v47 = vsel %vm1703_vm4, %v3069_v15, %v3085_v26  ;;  %v3117_v54 = vsel %vm1703_vm4, %v3053_v40, %v3069_v15  ;;  %v3229_v38 = vsel %vm1816_vm6, %v3165_v3, %v3181_v19  ;;  %v3389_v33 = vrot.slane %v3017_v23, 2  ;;  %v8595_v26 = vld [vmem:[#allocation2 + $0x1c0] sm:$0xff]  ;;  %v8600_v3 = vld [vmem:[#allocation2 + $0x1d0] sm:$0xff] }
 0x25a   : > { %v3142_v4 = vmax.f32 %v3017_v23, %v3117_v54  ;;  %v3143_v5 = vmax.f32 %v3018_v55, %v3101_v47  ;;  %v3213_v45 = vsel %vm1816_vm6, %v3181_v19, %v3197_v2  ;;  %v3325_v9 = vsel %vm1929_vm5, %v3293_v10, %v3309_v11  ;;  %v8607_v47 = vld [vmem:[#allocation2 + $0x1d8] sm:$0xff] }
 0x25b   : > { %v3341_v28 = vsel %vm1929_vm5, %v3277_v32, %v3293_v10  ;;  %v3421_v0 = vrot.slane %v3019_v1, 2  ;;  %v2764_v14 = vmax.f32 %v2636_v53, %v8415_v49  ;;  %v2765_v22 = vmax.f32 %v2637_v39, %v8418_v60 }
 0x25c   : > { %v3254_v35 = vmax.f32 %v3142_v4, %v3229_v38  ;;  %v3255_v46 = vmax.f32 %v3143_v5, %v3213_v45  ;;  %v2766_v61 = vmax.f32 %v2638_v58, %v8420_v56  ;;  %v3453_v23 = vsel %vm2042_vm7, %v3389_v33, %v3405_v62  ;;  %v8598_v58 = vld [vmem:[#allocation2 + $0x1c8] sm:$0xff] }
 0x25d   : > { %v3437_v55 = vsel %vm2042_vm7, %v3405_v62, %v3421_v0  ;;  %v2767_v12 = vmax.f32 %v2639_v51, %v8427_v42  ;;  %v2892_v40 = vmax.f32 %v2764_v14, %v8550_v16  ;;  %v2893_v53 = vmax.f32 %v2765_v22, %v8555_v36 }
 0x25e   : > { %v3366_v32 = vmax.f32 %v3254_v35, %v3341_v28  ;;  %v3367_v1 = vmax.f32 %v3255_v46, %v3325_v9  ;;  %v2894_v15 = vmax.f32 %v2766_v61, %v8557_v21  ;;  %v3993_v2 = vmax.f32 %v8291_v30, %v8305_v37 }
 0x25f   : > { %v2895_v39 = vmax.f32 %v2767_v12, %v8560_v57  ;;  %v3020_v19 = vmax.f32 %v2892_v40, %v8595_v26  ;;  %v3994_v10 = vmax.f32 %v8297_v43, %v8311_v63  ;;  %v3021_v54 = vmax.f32 %v2893_v53, %v8598_v58 }
 0x260   : > { %v3478_v11 = vmax.f32 %v3366_v32, %v3453_v23  ;;  %v3479_v51 = vmax.f32 %v3367_v1, %v3437_v55  ;;  %v3022_v38 = vmax.f32 %v2894_v15, %v8600_v3  ;;  %v3995_v45 = vmax.f32 %v8299_v24, %v8313_v27 }
 0x261   : > { %v3023_v62 = vmax.f32 %v2895_v39, %v8607_v47  ;;  %v3054_v4 = vrot.slane %v3020_v19, 7  ;;  %v3278_v5 = vrot.slane %v3020_v19, 6  ;;  %v3070_v30 = vrot.slane %v3021_v54, 7  ;;  %v8631_v39 = vld [vmem:[#allocation2 + $0xc0] sm:$0xff] }
 0x262   : > { %v3533_v33 = vpack.c.bf16 %v3479_v51, %v3478_v11  ;;  %v3086_v9 = vrot.slane %v3022_v38, 7  ;;  %v3166_v28 = vrot.slane %v3021_v54, 1  ;;  %3839 = vst.msk [vmem:[#allocation2 + $0x168] sm:$0xff] %vm226_vm3, %v3478_v11  ;;  %3840 = vst.msk [vmem:[#allocation2 + $0x170] sm:$0xff] %vm226_vm3, %v3479_v51  ;;  %v3182_v43 = vrot.slane %v3022_v38, 1 }
 0x263   : > { %v3198_v0 = vrot.slane %v3023_v62, 1  ;;  %v3294_v14 = vrot.slane %v3021_v54, 6  ;;  %v3310_v35 = vrot.slane %v3022_v38, 6  ;;  %v3118_v24 = vsel %vm1703_vm4, %v3054_v4, %v3070_v30 }
 0x264   : > { %5956 = vmatmul.mubr.msk.bf16.gmra.mrb[64].mxu1 %vm226_vm3, %v3533_v33  ;;  %v3102_v46 = vsel %vm1703_vm4, %v3070_v30, %v3086_v9  ;;  %v3406_v22 = vrot.slane %v3022_v38, 2  ;;  %v3996_v61 = vmax.f32 %v8303_v52, %v8321_v17  ;;  %v3144_v55 = vmax.f32 %v3021_v54, %v3118_v24  ;;  %v8641_v30 = vld [vmem:[#allocation2 + $0xe8] sm:$0xff] }
 0x265   : > { %v3145_v23 = vmax.f32 %v3022_v38, %v3102_v46  ;;  %v3230_v12 = vsel %vm1816_vm6, %v3166_v28, %v3182_v43  ;;  %v3390_v40 = vrot.slane %v3021_v54, 2  ;;  %v3214_v32 = vsel %vm1816_vm6, %v3182_v43, %v3198_v0  ;;  %v8635_v38 = vld [vmem:[#allocation2 + $0xd8] sm:$0xff]  ;;  %v8647_v28 = vld [vmem:[#allocation2 + $0xf0] sm:$0xff] }
 0x266   : > { %v3326_v1 = vsel %vm1929_vm5, %v3294_v14, %v3310_v35  ;;  %v3342_v53 = vsel %vm1929_vm5, %v3278_v5, %v3294_v14  ;;  %v3422_v15 = vrot.slane %v3023_v62, 2  ;;  %v3256_v19 = vmax.f32 %v3144_v55, %v3230_v12 }
 0x267   : > { %v3257_v52 = vmax.f32 %v3145_v23, %v3214_v32  ;;  %v4121_v11 = vmax.f32 %v3993_v2, %v8457_v44  ;;  %v4122_v51 = vmax.f32 %v3994_v10, %v8459_v48  ;;  %v3454_v54 = vsel %vm2042_vm7, %v3390_v40, %v3406_v22 }
 0x268   : > { %v4123_v4 = vmax.f32 %v3995_v45, %v8465_v13  ;;  %v4124_v33 = vmax.f32 %v3996_v61, %v8467_v20  ;;  %v3997_v62 = vmax.f32 %v8305_v37, %v8457_v44  ;;  %v3368_v5 = vmax.f32 %v3256_v19, %v3342_v53 }
 0x269   : > { %v3369_v9 = vmax.f32 %v3257_v52, %v3326_v1  ;;  %v4249_v2 = vmax.f32 %v4121_v11, %v8631_v39  ;;  %v4250_v10 = vmax.f32 %v4122_v51, %v8503_v29  ;;  %v3438_v43 = vsel %vm2042_vm7, %v3406_v22, %v3422_v15 }
 0x26a   : > { %v4251_v45 = vmax.f32 %v4123_v4, %v8505_v59  ;;  %v4252_v0 = vmax.f32 %v4124_v33, %v8635_v38  ;;  %v3998_v14 = vmax.f32 %v8311_v63, %v8459_v48  ;;  %v3480_v35 = vmax.f32 %v3368_v5, %v3454_v54 }
 0x26b   : > { %v3481_v37 = vmax.f32 %v3369_v9, %v3438_v43  ;;  %v4377_v46 = vmax.f32 %v4249_v2, %v8315_v8  ;;  %v4378_v24 = vmax.f32 %v4250_v10, %v8641_v30  ;;  %v3999_v22 = vmax.f32 %v8313_v27, %v8465_v13 }
 0x26c   : > { %v4379_v61 = vmax.f32 %v4251_v45, %v8647_v28  ;;  %v4380_v55 = vmax.f32 %v4252_v0, %v8342_v41  ;;  %v4000_v23 = vmax.f32 %v8321_v17, %v8467_v20  ;;  %v4125_v63 = vmax.f32 %v3997_v62, %v8631_v39  ;;  %3841 = vst.msk [vmem:[#allocation2 + $0x188] sm:$0xff] %vm226_vm3, %v3480_v35 }
 0x26d   : > { %v3534_v12 = vpack.c.bf16 %v3481_v37, %v3480_v35  ;;  %v4432_v40 = vrot.slane %v4377_v46, 7  ;;  %v4448_v32 = vrot.slane %v4378_v24, 7  ;;  %3842 = vst.msk [vmem:[#allocation2 + $0x190] sm:$0xff] %vm226_vm3, %v3481_v37  ;;  %v4544_v53 = vrot.slane %v4378_v24, 1 }
 0x26e   : > { %v4464_v1 = vrot.slane %v4379_v61, 7  ;;  %v4560_v15 = vrot.slane %v4379_v61, 1  ;;  %v4576_v19 = vrot.slane %v4380_v55, 1  ;;  %v4656_v52 = vrot.slane %v4377_v46, 6 }
 0x26f   : > { %5959 = vmatprep.mubr.msk.bf16.mxu1 %vm226_vm3, %v3534_v12  ;;  %v4496_v27 = vsel %vm1703_vm4, %v4432_v40, %v4448_v32  ;;  %v4672_v17 = vrot.slane %v4378_v24, 6  ;;  %v4688_v11 = vrot.slane %v4379_v61, 6  ;;  %v4768_v33 = vrot.slane %v4378_v24, 2  ;;  %v8683_v12 = vld [vmem:[#allocation2 + $0x108] sm:$0xff]  ;;  %v8685_v40 = vld [vmem:[#allocation2 + $0x110] sm:$0xff] }
 0x270   : > { %v4480_v51 = vsel %vm1703_vm4, %v4448_v32, %v4464_v1  ;;  %v4515_v54 = vmax.f32 %v4378_v24, %v4496_v27  ;;  %v4608_v4 = vsel %vm1816_vm6, %v4544_v53, %v4560_v15  ;;  %v4592_v5 = vsel %vm1816_vm6, %v4560_v15, %v4576_v19 }
 0x271   : > { %v4516_v62 = vmax.f32 %v4379_v61, %v4480_v51  ;;  %v4704_v9 = vsel %vm1929_vm5, %v4672_v17, %v4688_v11  ;;  %v4784_v2 = vrot.slane %v4379_v61, 2  ;;  %v4800_v43 = vrot.slane %v4380_v55, 2 }
 0x272   : > { %v4627_v10 = vmax.f32 %v4515_v54, %v4608_v4  ;;  %v4126_v45 = vmax.f32 %v3998_v14, %v8503_v29  ;;  %v4127_v0 = vmax.f32 %v3999_v22, %v8505_v59  ;;  %v4720_v37 = vsel %vm1929_vm5, %v4656_v52, %v4672_v17 }
 0x273   : > { %v4628_v35 = vmax.f32 %v4516_v62, %v4592_v5  ;;  %v4128_v46 = vmax.f32 %v4000_v23, %v8635_v38  ;;  %v4253_v24 = vmax.f32 %v4125_v63, %v8315_v8  ;;  %v4832_v61 = vsel %vm2042_vm7, %v4768_v33, %v4784_v2 }
 0x274   : > { %v4739_v32 = vmax.f32 %v4627_v10, %v4720_v37  ;;  %v4254_v14 = vmax.f32 %v4126_v45, %v8641_v30  ;;  %v4255_v55 = vmax.f32 %v4127_v0, %v8647_v28  ;;  %v4816_v1 = vsel %vm2042_vm7, %v4784_v2, %v4800_v43 }
 0x275   : > { %v4740_v22 = vmax.f32 %v4628_v35, %v4704_v9  ;;  %v4256_v23 = vmax.f32 %v4128_v46, %v8342_v41  ;;  %v4381_v8 = vmax.f32 %v4253_v24, %v8354_v50  ;;  %v2640_v19 = vmax.f32 %v8368_v18, %v8415_v49 }
 0x276   : > { %v4851_v63 = vmax.f32 %v4739_v32, %v4832_v61  ;;  %v4382_v53 = vmax.f32 %v4254_v14, %v8683_v12  ;;  %v4383_v15 = vmax.f32 %v4255_v55, %v8685_v40  ;;  %v2641_v11 = vmax.f32 %v8373_v7, %v8418_v60 }
 0x277   : > { %v4852_v27 = vmax.f32 %v4740_v22, %v4816_v1  ;;  %v4384_v52 = vmax.f32 %v4256_v23, %v8382_v25  ;;  %v4433_v17 = vrot.slane %v4381_v8, 7  ;;  %v4657_v62 = vrot.slane %v4381_v8, 6 }
 0x278   : > { %v4449_v51 = vrot.slane %v4382_v53, 7  ;;  %v4465_v54 = vrot.slane %v4383_v15, 7  ;;  %v4545_v41 = vrot.slane %v4382_v53, 1  ;;  %v4561_v4 = vrot.slane %v4383_v15, 1 }
 0x279   : > { %v4912_v50 = vpack.c.bf16 %v4852_v27, %v4851_v63  ;;  %v4577_v33 = vrot.slane %v4384_v52, 1  ;;  %v4689_v5 = vrot.slane %v4383_v15, 6  ;;  %v4673_v2 = vrot.slane %v4382_v53, 6  ;;  %v8730_v27 = vld [vmem:[#allocation2 + $0x1e0] sm:$0xff] }
 0x27a   : > { %v4481_v9 = vsel %vm1703_vm4, %v4449_v51, %v4465_v54  ;;  %v4497_v18 = vsel %vm1703_vm4, %v4433_v17, %v4449_v51  ;;  %v4609_v25 = vsel %vm1816_vm6, %v4545_v41, %v4561_v4  ;;  %v4769_v45 = vrot.slane %v4382_v53, 2  ;;  %v8735_v54 = vld [vmem:[#allocation2 + $0x1e8] sm:$0xff]  ;;  %v8737_v41 = vld [vmem:[#allocation2 + $0x1f0] sm:$0xff] }
 0x27b   : > { %5978 = vmatmul.mubr.msk.bf16.gmra.mrb[52].mxu0 %vm226_vm3, %v4912_v50  ;;  %v4517_v7 = vmax.f32 %v4382_v53, %v4497_v18  ;;  %v4518_v10 = vmax.f32 %v4383_v15, %v4481_v9  ;;  %v4593_v43 = vsel %vm1816_vm6, %v4561_v4, %v4577_v33  ;;  %v4705_v0 = vsel %vm1929_vm5, %v4673_v2, %v4689_v5  ;;  %v8740_v50 = vld [vmem:[#allocation2 + $0x1f8] sm:$0xff] }
 0x27c   : > { %v4785_v35 = vrot.slane %v4383_v15, 2  ;;  %v4801_v37 = vrot.slane %v4384_v52, 2  ;;  %v2642_v46 = vmax.f32 %v8375_v6, %v8420_v56  ;;  %v2643_v61 = vmax.f32 %v8378_v31, %v8427_v42 }
 0x27d   : > { %v4629_v24 = vmax.f32 %v4517_v7, %v4609_v25  ;;  %v4630_v32 = vmax.f32 %v4518_v10, %v4593_v43  ;;  %v2768_v14 = vmax.f32 %v2640_v19, %v8550_v16  ;;  %v4721_v55 = vsel %vm1929_vm5, %v4657_v62, %v4673_v2 }
 0x27e   : > { %v4817_v22 = vsel %vm2042_vm7, %v4785_v35, %v4801_v37  ;;  %v2769_v1 = vmax.f32 %v2641_v11, %v8555_v36  ;;  %v2770_v23 = vmax.f32 %v2642_v46, %v8557_v21  ;;  %v2771_v6 = vmax.f32 %v2643_v61, %v8560_v57 }
 0x27f   : > { %v4741_v8 = vmax.f32 %v4629_v24, %v4721_v55  ;;  %v4742_v63 = vmax.f32 %v4630_v32, %v4705_v0  ;;  %v2896_v53 = vmax.f32 %v2768_v14, %v8595_v26  ;;  %v4833_v31 = vsel %vm2042_vm7, %v4769_v45, %v4785_v35 }
 0x280   : > { %v2897_v15 = vmax.f32 %v2769_v1, %v8598_v58  ;;  %v2898_v19 = vmax.f32 %v2770_v23, %v8600_v3  ;;  %v2644_v52 = vmax.f32 %v8415_v49, %v8550_v16  ;;  %v2899_v51 = vmax.f32 %v2771_v6, %v8607_v47 }
 0x281   : > { %v4853_v17 = vmax.f32 %v4741_v8, %v4833_v31  ;;  %v4854_v11 = vmax.f32 %v4742_v63, %v4817_v22  ;;  %v3024_v4 = vmax.f32 %v2896_v53, %v8730_v27  ;;  %v2645_v5 = vmax.f32 %v8418_v60, %v8555_v36 }
 0x282   : > { %v3025_v33 = vmax.f32 %v2897_v15, %v8735_v54  ;;  %v3026_v62 = vmax.f32 %v2898_v19, %v8737_v41  ;;  %v2646_v49 = vmax.f32 %v8420_v56, %v8557_v21  ;;  %v3027_v18 = vmax.f32 %v2899_v51, %v8740_v50  ;;  %v8767_v15 = vld [vmem:[#allocation2 + $0x200] sm:$0xff] }
 0x283   : > { %v4913_v9 = vpack.c.bf16 %v4854_v11, %v4853_v17  ;;  %v3055_v25 = vrot.slane %v3024_v4, 7  ;;  %v3279_v2 = vrot.slane %v3024_v4, 6  ;;  %v2647_v60 = vmax.f32 %v8427_v42, %v8560_v57  ;;  %v8775_v4 = vld [vmem:[#allocation2 + $0x208] sm:$0xff] }
 0x284   : > { %v3071_v7 = vrot.slane %v3025_v33, 7  ;;  %v3087_v10 = vrot.slane %v3026_v62, 7  ;;  %v3167_v43 = vrot.slane %v3025_v33, 1  ;;  %v3183_v45 = vrot.slane %v3026_v62, 1 }
 0x285   : > { %5981 = vmatprep.mubr.msk.bf16.mxu0 %vm226_vm3, %v4913_v9  ;;  %v3199_v0 = vrot.slane %v3027_v18, 1  ;;  %v3295_v35 = vrot.slane %v3025_v33, 6  ;;  %v3311_v37 = vrot.slane %v3026_v62, 6  ;;  %v3407_v32 = vrot.slane %v3026_v62, 2  ;;  %v8781_v9 = vld [vmem:[#allocation2 + $0x218] sm:$0xff] }
 0x286   : > { %v3103_v56 = vsel %vm1703_vm4, %v3071_v7, %v3087_v10  ;;  %v3119_v46 = vsel %vm1703_vm4, %v3055_v25, %v3071_v7  ;;  %v3231_v24 = vsel %vm1816_vm6, %v3167_v43, %v3183_v45  ;;  %v3391_v22 = vrot.slane %v3025_v33, 2 }
 0x287   : > { %v3146_v61 = vmax.f32 %v3025_v33, %v3119_v46  ;;  %v3147_v14 = vmax.f32 %v3026_v62, %v3103_v56  ;;  %v3215_v55 = vsel %vm1816_vm6, %v3183_v45, %v3199_v0  ;;  %v3327_v1 = vsel %vm1929_vm5, %v3295_v35, %v3311_v37 }
 0x288   : > { %v3343_v42 = vsel %vm1929_vm5, %v3279_v2, %v3295_v35  ;;  %v3423_v23 = vrot.slane %v3027_v18, 2  ;;  %v2772_v8 = vmax.f32 %v2644_v52, %v8595_v26  ;;  %v2773_v53 = vmax.f32 %v2645_v5, %v8598_v58  ;;  %v8777_v52 = vld [vmem:[#allocation2 + $0x210] sm:$0xff] }
 0x289   : > { %v3258_v63 = vmax.f32 %v3146_v61, %v3231_v24  ;;  %v3259_v6 = vmax.f32 %v3147_v14, %v3215_v55  ;;  %v2774_v31 = vmax.f32 %v2646_v49, %v8600_v3  ;;  %v3455_v17 = vsel %vm2042_vm7, %v3391_v22, %v3407_v32 }
 0x28a   : > { %v3439_v19 = vsel %vm2042_vm7, %v3407_v32, %v3423_v23  ;;  %v2775_v11 = vmax.f32 %v2647_v60, %v8607_v47  ;;  %v2900_v51 = vmax.f32 %v2772_v8, %v8730_v27  ;;  %v2901_v5 = vmax.f32 %v2773_v53, %v8735_v54  ;;  %v8803_v23 = vld [vmem:[#allocation2 + $0xe0] sm:$0xff] }
 0x28b   : > { %v3370_v33 = vmax.f32 %v3258_v63, %v3343_v42  ;;  %v3371_v62 = vmax.f32 %v3259_v6, %v3327_v1  ;;  %v2902_v49 = vmax.f32 %v2774_v31, %v8737_v41  ;;  %v4001_v2 = vmax.f32 %v8457_v44, %v8631_v39  ;;  %v8807_v31 = vld [vmem:[#allocation2 + $0xf8] sm:$0xff] }
 0x28c   : > { %v2903_v18 = vmax.f32 %v2775_v11, %v8740_v50  ;;  %v3028_v25 = vmax.f32 %v2900_v51, %v8767_v15  ;;  %v4002_v7 = vmax.f32 %v8459_v48, %v8503_v29  ;;  %v3029_v45 = vmax.f32 %v2901_v5, %v8775_v4  ;;  %v8815_v51 = vld [vmem:[#allocation2 + $0x100] sm:$0xff] }
 0x28d   : > { %v3482_v10 = vmax.f32 %v3370_v33, %v3455_v17  ;;  %v3483_v43 = vmax.f32 %v3371_v62, %v3439_v19  ;;  %v3030_v0 = vmax.f32 %v2902_v49, %v8777_v52  ;;  %v4003_v56 = vmax.f32 %v8465_v13, %v8505_v59 }
 0x28e   : > { %v3031_v35 = vmax.f32 %v2903_v18, %v8781_v9  ;;  %v3056_v37 = vrot.slane %v3028_v25, 7  ;;  %v3280_v60 = vrot.slane %v3028_v25, 6  ;;  %v3072_v24 = vrot.slane %v3029_v45, 7  ;;  %v8819_v18 = vld [vmem:[#allocation2 + $0x118] sm:$0xff] }
 0x28f   : > { %v3535_v46 = vpack.c.bf16 %v3483_v43, %v3482_v10  ;;  %v3088_v32 = vrot.slane %v3030_v0, 7  ;;  %v3168_v44 = vrot.slane %v3029_v45, 1  ;;  %3843 = vst.msk [vmem:[#allocation2 + $0x1a8] sm:$0xff] %vm226_vm3, %v3482_v10  ;;  %3844 = vst.msk [vmem:[#allocation2 + $0x1b0] sm:$0xff] %vm226_vm3, %v3483_v43  ;;  %v3184_v48 = vrot.slane %v3030_v0, 1 }
 0x290   : > { %v3200_v61 = vrot.slane %v3031_v35, 1  ;;  %v3296_v14 = vrot.slane %v3029_v45, 6  ;;  %v3312_v55 = vrot.slane %v3030_v0, 6  ;;  %v3120_v13 = vsel %vm1703_vm4, %v3056_v37, %v3072_v24 }
 0x291   : > { %5960 = vmatmul.mubr.msk.bf16.gmra.mrb[68].mxu1 %vm226_vm3, %v3535_v46  ;;  %v3104_v22 = vsel %vm1703_vm4, %v3072_v24, %v3088_v32  ;;  %v3408_v1 = vrot.slane %v3030_v0, 2  ;;  %v4004_v42 = vmax.f32 %v8467_v20, %v8635_v38  ;;  %v3148_v8 = vmax.f32 %v3029_v45, %v3120_v13  ;;  %v8833_v46 = vld [vmem:[#allocation2 + $0x130] sm:$0xff]  ;;  %v8835_v24 = vld [vmem:[#allocation2 + $0x138] sm:$0xff] }
 0x292   : > { %v3149_v63 = vmax.f32 %v3030_v0, %v3104_v22  ;;  %v3232_v6 = vsel %vm1816_vm6, %v3168_v44, %v3184_v48  ;;  %v3392_v53 = vrot.slane %v3029_v45, 2  ;;  %v3216_v19 = vsel %vm1816_vm6, %v3184_v48, %v3200_v61  ;;  %v8825_v45 = vld [vmem:[#allocation2 + $0x120] sm:$0xff]  ;;  %v8827_v0 = vld [vmem:[#allocation2 + $0x128] sm:$0xff] }
 0x293   : > { %v3328_v17 = vsel %vm1929_vm5, %v3296_v14, %v3312_v55  ;;  %v3344_v11 = vsel %vm1929_vm5, %v3280_v60, %v3296_v14  ;;  %v3424_v20 = vrot.slane %v3031_v35, 2  ;;  %v3260_v33 = vmax.f32 %v3148_v8, %v3232_v6 }
 0x294   : > { %v3261_v62 = vmax.f32 %v3149_v63, %v3216_v19  ;;  %v4129_v5 = vmax.f32 %v4001_v2, %v8803_v23  ;;  %v4130_v49 = vmax.f32 %v4002_v7, %v8641_v30  ;;  %v3456_v25 = vsel %vm2042_vm7, %v3392_v53, %v3408_v1 }
 0x295   : > { %v4131_v10 = vmax.f32 %v4003_v56, %v8647_v28  ;;  %v4132_v43 = vmax.f32 %v4004_v42, %v8807_v31  ;;  %v4005_v35 = vmax.f32 %v8631_v39, %v8803_v23  ;;  %v3372_v37 = vmax.f32 %v3260_v33, %v3344_v11 }
 0x296   : > { %v3373_v2 = vmax.f32 %v3261_v62, %v3328_v17  ;;  %v4257_v7 = vmax.f32 %v4129_v5, %v8815_v51  ;;  %v4258_v60 = vmax.f32 %v4130_v49, %v8683_v12  ;;  %v3440_v56 = vsel %vm2042_vm7, %v3408_v1, %v3424_v20 }
 0x297   : > { %v4259_v32 = vmax.f32 %v4131_v10, %v8685_v40  ;;  %v4260_v44 = vmax.f32 %v4132_v43, %v8819_v18  ;;  %v4006_v39 = vmax.f32 %v8503_v29, %v8641_v30  ;;  %v3484_v48 = vmax.f32 %v3372_v37, %v3456_v25 }
 0x298   : > { %v3485_v61 = vmax.f32 %v3373_v2, %v3440_v56  ;;  %v4385_v14 = vmax.f32 %v4257_v7, %v8825_v45  ;;  %v4386_v55 = vmax.f32 %v4258_v60, %v8827_v0  ;;  %v4007_v1 = vmax.f32 %v8505_v59, %v8647_v28 }
 0x299   : > { %v4387_v22 = vmax.f32 %v4259_v32, %v8833_v46  ;;  %v4388_v13 = vmax.f32 %v4260_v44, %v8835_v24  ;;  %v4008_v42 = vmax.f32 %v8635_v38, %v8807_v31  ;;  %v4133_v29 = vmax.f32 %v4005_v35, %v8815_v51  ;;  %3845 = vst.msk [vmem:[#allocation2 + $0x1c8] sm:$0xff] %vm226_vm3, %v3484_v48  ;;  %v8867_v32 = vld [vmem:[#allocation2 + $0x140] sm:$0xff] }
 0x29a   : > { %v3536_v8 = vpack.c.bf16 %v3485_v61, %v3484_v48  ;;  %v4434_v63 = vrot.slane %v4385_v14, 7  ;;  %v4450_v6 = vrot.slane %v4386_v55, 7  ;;  %3846 = vst.msk [vmem:[#allocation2 + $0x1d0] sm:$0xff] %vm226_vm3, %v3485_v61  ;;  %v4546_v19 = vrot.slane %v4386_v55, 1 }
 0x29b   : > { %v4466_v53 = vrot.slane %v4387_v22, 7  ;;  %v4562_v17 = vrot.slane %v4387_v22, 1  ;;  %v4578_v11 = vrot.slane %v4388_v13, 1  ;;  %v4658_v20 = vrot.slane %v4385_v14, 6 }
 0x29c   : > { %5963 = vmatprep.mubr.msk.bf16.mxu1 %vm226_vm3, %v3536_v8  ;;  %v4498_v59 = vsel %vm1703_vm4, %v4434_v63, %v4450_v6  ;;  %v4674_v38 = vrot.slane %v4386_v55, 6  ;;  %v4690_v33 = vrot.slane %v4387_v22, 6  ;;  %v4770_v25 = vrot.slane %v4386_v55, 2  ;;  %v8875_v8 = vld [vmem:[#allocation2 + $0x150] sm:$0xff]  ;;  %v8881_v63 = vld [vmem:[#allocation2 + $0x158] sm:$0xff] }
 0x29d   : > { %v4482_v62 = vsel %vm1703_vm4, %v4450_v6, %v4466_v53  ;;  %v4519_v5 = vmax.f32 %v4386_v55, %v4498_v59  ;;  %v4610_v49 = vsel %vm1816_vm6, %v4546_v19, %v4562_v17  ;;  %v4594_v43 = vsel %vm1816_vm6, %v4562_v17, %v4578_v11  ;;  %v8873_v55 = vld [vmem:[#allocation2 + $0x148] sm:$0xff] }
 0x29e   : > { %v4520_v10 = vmax.f32 %v4387_v22, %v4482_v62  ;;  %v4706_v35 = vsel %vm1929_vm5, %v4674_v38, %v4690_v33  ;;  %v4786_v37 = vrot.slane %v4387_v22, 2  ;;  %v4802_v7 = vrot.slane %v4388_v13, 2 }
 0x29f   : > { %v4631_v2 = vmax.f32 %v4519_v5, %v4610_v49  ;;  %v4134_v60 = vmax.f32 %v4006_v39, %v8683_v12  ;;  %v4135_v56 = vmax.f32 %v4007_v1, %v8685_v40  ;;  %v4722_v48 = vsel %vm1929_vm5, %v4658_v20, %v4674_v38 }
 0x2a0   : > { %v4632_v44 = vmax.f32 %v4520_v10, %v4594_v43  ;;  %v4136_v61 = vmax.f32 %v4008_v42, %v8819_v18  ;;  %v4261_v14 = vmax.f32 %v4133_v29, %v8825_v45  ;;  %v4834_v39 = vsel %vm2042_vm7, %v4770_v25, %v4786_v37 }
 0x2a1   : > { %v4743_v22 = vmax.f32 %v4631_v2, %v4722_v48  ;;  %v4262_v13 = vmax.f32 %v4134_v60, %v8827_v0  ;;  %v4263_v1 = vmax.f32 %v4135_v56, %v8833_v46  ;;  %v4818_v42 = vsel %vm2042_vm7, %v4786_v37, %v4802_v7 }
 0x2a2   : > { %v4744_v6 = vmax.f32 %v4632_v44, %v4706_v35  ;;  %v4264_v29 = vmax.f32 %v4136_v61, %v8835_v24  ;;  %v4389_v53 = vmax.f32 %v4261_v14, %v8867_v32  ;;  %v2648_v59 = vmax.f32 %v8550_v16, %v8595_v26 }
 0x2a3   : > { %v4855_v19 = vmax.f32 %v4743_v22, %v4834_v39  ;;  %v4390_v17 = vmax.f32 %v4262_v13, %v8873_v55  ;;  %v4391_v11 = vmax.f32 %v4263_v1, %v8875_v8  ;;  %v2649_v62 = vmax.f32 %v8555_v36, %v8598_v58 }
 0x2a4   : > { %v4856_v20 = vmax.f32 %v4744_v6, %v4818_v42  ;;  %v4392_v38 = vmax.f32 %v4264_v29, %v8881_v63  ;;  %v4435_v33 = vrot.slane %v4389_v53, 7  ;;  %v4659_v37 = vrot.slane %v4389_v53, 6 }
 0x2a5   : > { %v4451_v5 = vrot.slane %v4390_v17, 7  ;;  %v4467_v49 = vrot.slane %v4391_v11, 7  ;;  %v4547_v25 = vrot.slane %v4390_v17, 1  ;;  %v4563_v10 = vrot.slane %v4391_v11, 1 }
 0x2a6   : > { %v4914_v43 = vpack.c.bf16 %v4856_v20, %v4855_v19  ;;  %v4579_v35 = vrot.slane %v4392_v38, 1  ;;  %v4691_v2 = vrot.slane %v4391_v11, 6  ;;  %v4675_v56 = vrot.slane %v4390_v17, 6  ;;  %v8916_v20 = vld [vmem:[#allocation2 + $0x220] sm:$0xff] }
 0x2a7   : > { %v4483_v7 = vsel %vm1703_vm4, %v4451_v5, %v4467_v49  ;;  %v4499_v16 = vsel %vm1703_vm4, %v4435_v33, %v4451_v5  ;;  %v4611_v60 = vsel %vm1816_vm6, %v4547_v25, %v4563_v10  ;;  %v4771_v61 = vrot.slane %v4390_v17, 2  ;;  %v8920_v5 = vld [vmem:[#allocation2 + $0x228] sm:$0xff] }
 0x2a8   : > { %5982 = vmatmul.mubr.msk.bf16.gmra.mrb[56].mxu0 %vm226_vm3, %v4914_v43  ;;  %v4521_v36 = vmax.f32 %v4390_v17, %v4499_v16  ;;  %v4522_v44 = vmax.f32 %v4391_v11, %v4483_v7  ;;  %v4595_v48 = vsel %vm1816_vm6, %v4563_v10, %v4579_v35  ;;  %v4707_v14 = vsel %vm1929_vm5, %v4675_v56, %v4691_v2  ;;  %v8928_v10 = vld [vmem:[#allocation2 + $0x238] sm:$0xff] }
 0x2a9   : > { %v4787_v22 = vrot.slane %v4391_v11, 2  ;;  %v4803_v39 = vrot.slane %v4392_v38, 2  ;;  %v2650_v13 = vmax.f32 %v8557_v21, %v8600_v3  ;;  %v2651_v42 = vmax.f32 %v8560_v57, %v8607_v47 }
 0x2aa   : > { %v4633_v1 = vmax.f32 %v4521_v36, %v4611_v60  ;;  %v4634_v6 = vmax.f32 %v4522_v44, %v4595_v48  ;;  %v2776_v29 = vmax.f32 %v2648_v59, %v8730_v27  ;;  %v4723_v53 = vsel %vm1929_vm5, %v4659_v37, %v4675_v56  ;;  %v8922_v59 = vld [vmem:[#allocation2 + $0x230] sm:$0xff] }
 0x2ab   : > { %v4819_v19 = vsel %vm2042_vm7, %v4787_v22, %v4803_v39  ;;  %v2777_v17 = vmax.f32 %v2649_v62, %v8735_v54  ;;  %v2778_v11 = vmax.f32 %v2650_v13, %v8737_v41  ;;  %v2779_v33 = vmax.f32 %v2651_v42, %v8740_v50 }
 0x2ac   : > { %v4745_v21 = vmax.f32 %v4633_v1, %v4723_v53  ;;  %v4746_v38 = vmax.f32 %v4634_v6, %v4707_v14  ;;  %v2904_v57 = vmax.f32 %v2776_v29, %v8767_v15  ;;  %v4835_v49 = vsel %vm2042_vm7, %v4771_v61, %v4787_v22 }
 0x2ad   : > { %v2905_v25 = vmax.f32 %v2777_v17, %v8775_v4  ;;  %v2906_v62 = vmax.f32 %v2778_v11, %v8777_v52  ;;  %v2652_v43 = vmax.f32 %v8595_v26, %v8730_v27  ;;  %v2907_v2 = vmax.f32 %v2779_v33, %v8781_v9 }
 0x2ae   : > { %v4857_v35 = vmax.f32 %v4745_v21, %v4835_v49  ;;  %v4858_v37 = vmax.f32 %v4746_v38, %v4819_v19  ;;  %v3032_v7 = vmax.f32 %v2904_v57, %v8916_v20  ;;  %v2653_v56 = vmax.f32 %v8598_v58, %v8735_v54 }
 0x2af   : > { %v3033_v16 = vmax.f32 %v2905_v25, %v8920_v5  ;;  %v3034_v60 = vmax.f32 %v2906_v62, %v8922_v59  ;;  %v2654_v36 = vmax.f32 %v8600_v3, %v8737_v41  ;;  %v3035_v48 = vmax.f32 %v2907_v2, %v8928_v10  ;;  %v8959_v2 = vld [vmem:[#allocation2 + $0x240] sm:$0xff] }
 0x2b0   : > { %v4915_v44 = vpack.c.bf16 %v4858_v37, %v4857_v35  ;;  %v3057_v26 = vrot.slane %v3032_v7, 7  ;;  %v3281_v61 = vrot.slane %v3032_v7, 6  ;;  %v2655_v58 = vmax.f32 %v8607_v47, %v8740_v50 }
 0x2b1   : > { %v3073_v14 = vrot.slane %v3033_v16, 7  ;;  %v3089_v22 = vrot.slane %v3034_v60, 7  ;;  %v3169_v39 = vrot.slane %v3033_v16, 1  ;;  %v3185_v13 = vrot.slane %v3034_v60, 1 }
 0x2b2   : > { %5985 = vmatprep.mubr.msk.bf16.mxu0 %vm226_vm3, %v4915_v44  ;;  %v3201_v1 = vrot.slane %v3035_v48, 1  ;;  %v3297_v6 = vrot.slane %v3033_v16, 6  ;;  %v3313_v42 = vrot.slane %v3034_v60, 6  ;;  %v3409_v19 = vrot.slane %v3034_v60, 2 }
 0x2b3   : > { %v3105_v3 = vsel %vm1703_vm4, %v3073_v14, %v3089_v22  ;;  %v3121_v29 = vsel %vm1703_vm4, %v3057_v26, %v3073_v14  ;;  %v3233_v53 = vsel %vm1816_vm6, %v3169_v39, %v3185_v13  ;;  %v3393_v38 = vrot.slane %v3033_v16, 2  ;;  %v8973_v14 = vld [vmem:[#allocation2 + $0x258] sm:$0xff] }
 0x2b4   : > { %v3150_v17 = vmax.f32 %v3033_v16, %v3121_v29  ;;  %v3151_v11 = vmax.f32 %v3034_v60, %v3105_v3  ;;  %v3217_v21 = vsel %vm1816_vm6, %v3185_v13, %v3201_v1  ;;  %v3329_v33 = vsel %vm1929_vm5, %v3297_v6, %v3313_v42  ;;  %v8983_v42 = vpop.f32.mrb[16].mxu0 }
 0x2b5   : > { %v3345_v47 = vsel %vm1929_vm5, %v3281_v61, %v3297_v6  ;;  %v3425_v57 = vrot.slane %v3035_v48, 2  ;;  %v2780_v49 = vmax.f32 %v2652_v43, %v8767_v15  ;;  %v2781_v35 = vmax.f32 %v2653_v56, %v8775_v4  ;;  %v8967_v48 = vld [vmem:[#allocation2 + $0x248] sm:$0xff]  ;;  %v8969_v43 = vld [vmem:[#allocation2 + $0x250] sm:$0xff]  ;;  %v8981_v6 = vpop.f32.mrb[16].mxu1  ;;  %10271 = vst [vmem:[#allocation33_spill] sm:$0xff] %v8983_v42 }
 0x2b6   : > { %v3262_v25 = vmax.f32 %v3150_v17, %v3233_v53  ;;  %v3263_v62 = vmax.f32 %v3151_v11, %v3217_v21  ;;  %v2782_v37 = vmax.f32 %v2654_v36, %v8777_v52  ;;  %v3457_v16 = vsel %vm2042_vm7, %v3393_v38, %v3409_v19  ;;  %v8989_v17 = vpop.f32.mrb[17].mxu0  ;;  %1011 = vst.msk [vmem:[#allocation3 + $0x10] sm:$0xff] %vm1008_vm8, %v8981_v6 }
 0x2b7   : > { %v3441_v7 = vsel %vm2042_vm7, %v3409_v19, %v3425_v57  ;;  %v2783_v60 = vmax.f32 %v2655_v58, %v8781_v9  ;;  %v2908_v44 = vmax.f32 %v2780_v49, %v8916_v20  ;;  %v2909_v36 = vmax.f32 %v2781_v35, %v8920_v5  ;;  %v8987_v19 = vpop.f32.mrb[17].mxu1  ;;  %10272 = vst [vmem:[#allocation34_spill] sm:$0xff] %v8989_v17 }
 0x2b8   : > { %v3374_v26 = vmax.f32 %v3262_v25, %v3345_v47  ;;  %v3375_v56 = vmax.f32 %v3263_v62, %v3329_v33  ;;  %v2910_v61 = vmax.f32 %v2782_v37, %v8922_v59  ;;  %v4009_v13 = vmax.f32 %v8803_v23, %v8815_v51  ;;  %v8994_v38 = vpop.f32.mrb[18].mxu1  ;;  %v8996_v33 = vpop.f32.mrb[18].mxu0  ;;  %1009 = vst.msk [vmem:[#allocation3] sm:$0xff] %vm1008_vm8, %v8987_v19 }
 0x2b9   : > { %v2911_v22 = vmax.f32 %v2783_v60, %v8928_v10  ;;  %v3036_v39 = vmax.f32 %v2908_v44, %v8959_v2  ;;  %v4010_v1 = vmax.f32 %v8641_v30, %v8683_v12  ;;  %v3037_v29 = vmax.f32 %v2909_v36, %v8967_v48  ;;  %10273 = vst [vmem:[#allocation35_spill] sm:$0xff] %v8996_v33  ;;  %v9000_v62 = vpop.f32.mrb[19].mxu1  ;;  %v9002_v35 = vpop.f32.mrb[19].mxu0 }
 0x2ba   : > { %v3486_v58 = vmax.f32 %v3374_v26, %v3457_v16  ;;  %v3487_v3 = vmax.f32 %v3375_v56, %v3441_v7  ;;  %v3038_v53 = vmax.f32 %v2910_v61, %v8969_v43  ;;  %v4011_v30 = vmax.f32 %v8647_v28, %v8685_v40  ;;  %10274 = vst [vmem:[#allocation36_spill] sm:$0xff] %v9002_v35  ;;  %v9004_v60 = vpop.f32.mrb[20].mxu1  ;;  %v9006_v44 = vpop.f32.mrb[20].mxu0 }
 0x2bb   : > { %v3039_v11 = vmax.f32 %v2911_v22, %v8973_v14  ;;  %v3058_v23 = vrot.slane %v3036_v39, 7  ;;  %v3282_v21 = vrot.slane %v3036_v39, 6  ;;  %v3074_v57 = vrot.slane %v3037_v29, 7  ;;  %10275 = vst [vmem:[#allocation37_spill] sm:$0xff] %v9006_v44  ;;  %v9015_v22 = vpop.f32.mrb[21].mxu1  ;;  %v9017_v39 = vpop.f32.mrb[21].mxu0 }
 0x2bc   : > { %v3537_v47 = vpack.c.bf16 %v3487_v3, %v3486_v58  ;;  %v3090_v49 = vrot.slane %v3038_v53, 7  ;;  %v3170_v25 = vrot.slane %v3037_v29, 1  ;;  %3847 = vst.msk [vmem:[#allocation2 + $0x1e8] sm:$0xff] %vm226_vm3, %v3486_v58  ;;  %3848 = vst.msk [vmem:[#allocation2 + $0x1f0] sm:$0xff] %vm226_vm3, %v3487_v3  ;;  %v3186_v37 = vrot.slane %v3038_v53, 1  ;;  %v9021_v35 = vpop.f32.mrb[22].mxu1 }
 0x2bd   : > { %v3202_v7 = vrot.slane %v3039_v11, 1  ;;  %v3298_v16 = vrot.slane %v3037_v29, 6  ;;  %v3314_v28 = vrot.slane %v3038_v53, 6  ;;  %v3122_v56 = vsel %vm1703_vm4, %v3058_v23, %v3074_v57  ;;  %10276 = vst [vmem:[#allocation38_spill] sm:$0xff] %v9017_v39  ;;  %1012 = vst.msk [vmem:[#allocation3 + $0x18] sm:$0xff] %vm1008_vm8, %v8994_v38 }
 0x2be   : > { %5964 = vmatmul.mubr.msk.bf16.gmra.mrb[72].mxu1 %vm226_vm3, %v3537_v47  ;;  %v3106_v26 = vsel %vm1703_vm4, %v3074_v57, %v3090_v49  ;;  %v3410_v36 = vrot.slane %v3038_v53, 2  ;;  %v4012_v61 = vmax.f32 %v8807_v31, %v8819_v18  ;;  %v3152_v58 = vmax.f32 %v3037_v29, %v3122_v56  ;;  %v9023_v49 = vpop.f32.mrb[22].mxu0  ;;  %v9031_v56 = vpop.f32.mrb[23].mxu1  ;;  %1010 = vst.msk [vmem:[#allocation3 + $0x8] sm:$0xff] %vm1008_vm8, %v9000_v62 }
 0x2bf   : > { %v3153_v3 = vmax.f32 %v3038_v53, %v3106_v26  ;;  %v3234_v44 = vsel %vm1816_vm6, %v3170_v25, %v3186_v37  ;;  %v3394_v47 = vrot.slane %v3037_v29, 2  ;;  %10277 = vst [vmem:[#allocation39_spill] sm:$0xff] %v9023_v49  ;;  %v3218_v23 = vsel %vm1816_vm6, %v3186_v37, %v3202_v7  ;;  %v9033_v53 = vpop.f32.mrb[23].mxu0  ;;  %v9037_v33 = vpop.f32.mrb[24].mxu1  ;;  %1015 = vst.msk [vmem:[#allocation3 + $0x30] sm:$0xff] %vm1008_vm8, %v9004_v60 }
 0x2c0   : > { %v3330_v31 = vsel %vm1929_vm5, %v3298_v16, %v3314_v28  ;;  %v3346_v57 = vsel %vm1929_vm5, %v3282_v21, %v3298_v16  ;;  %v3426_v39 = vrot.slane %v3039_v11, 2  ;;  %10278 = vst [vmem:[#allocation40_spill] sm:$0xff] %v9033_v53  ;;  %v3264_v25 = vmax.f32 %v3152_v58, %v3234_v44  ;;  %10279 = vst [vmem:[#allocation41_spill] sm:$0xff] %v9037_v33  ;;  %v9039_v37 = vpop.f32.mrb[24].mxu0  ;;  %v9047_v28 = vpop.f32.mrb[25].mxu1 }
 0x2c1   : > { %v3265_v29 = vmax.f32 %v3153_v3, %v3218_v23  ;;  %v4137_v26 = vmax.f32 %v4009_v13, %v8825_v45  ;;  %v4138_v49 = vmax.f32 %v4010_v1, %v8827_v0  ;;  %10280 = vst [vmem:[#allocation5_spill] sm:$0xff] %v9039_v37  ;;  %v3458_v7 = vsel %vm2042_vm7, %v3394_v47, %v3410_v36  ;;  %v9049_v44 = vpop.f32.mrb[25].mxu0  ;;  %v9053_v23 = vpop.f32.mrb[26].mxu1  ;;  %v9061_v37 = vld [vmem:[#allocation2 + $0x160] sm:$0xff] }
 0x2c2   : > { %v4139_v21 = vmax.f32 %v4011_v30, %v8833_v46  ;;  %v4140_v11 = vmax.f32 %v4012_v61, %v8835_v24  ;;  %v4013_v16 = vmax.f32 %v8815_v51, %v8825_v45  ;;  %10281 = vst [vmem:[#allocation7_spill] sm:$0xff] %v9047_v28  ;;  %10282 = vst [vmem:[#allocation8_spill] sm:$0xff] %v9049_v44  ;;  %v9055_v47 = vpop.f32.mrb[26].mxu0  ;;  %v9063_v44 = vld [vmem:[#allocation2 + $0x168] sm:$0xff] }
 0x2c3   : > { %v3376_v13 = vmax.f32 %v3264_v25, %v3346_v57  ;;  %v3377_v1 = vmax.f32 %v3265_v29, %v3330_v31  ;;  %v4265_v58 = vmax.f32 %v4137_v26, %v8867_v32  ;;  %v4266_v3 = vmax.f32 %v4138_v49, %v8873_v55  ;;  %10283 = vst [vmem:[#allocation9_spill] sm:$0xff] %v9053_v23  ;;  %v9067_v57 = vpop.f32.mrb[27].mxu1  ;;  %v9069_v49 = vpop.f32.mrb[27].mxu0  ;;  %v9071_v26 = vld [vmem:[#allocation2 + $0x170] sm:$0xff]  ;;  %v10353_v34 = vld [vmem:[#allocation37_spill] sm:$0xff] }
 0x2c4   : > { %10284 = vst [vmem:[#allocation4_spill] sm:$0xff] %v9055_v47  ;;  %v3442_v30 = vsel %vm2042_vm7, %v3410_v36, %v3426_v39  ;;  %v4267_v61 = vmax.f32 %v4139_v21, %v8875_v8  ;;  %v4268_v51 = vmax.f32 %v4140_v11, %v8881_v63  ;;  %v4014_v31 = vmax.f32 %v8683_v12, %v8827_v0  ;;  %v9073_v36 = vld [vmem:[#allocation2 + $0x178] sm:$0xff]  ;;  %v9077_v11 = vpop.f32.mrb[28].mxu1  ;;  %v9079_v47 = vpop.f32.mrb[28].mxu0 }
 0x2c5   : > { %10285 = vst [vmem:[#allocation10_spill] sm:$0xff] %v9067_v57  ;;  %10286 = vst [vmem:[#allocation11_spill] sm:$0xff] %v9069_v49  ;;  %v3488_v25 = vmax.f32 %v3376_v13, %v3458_v7  ;;  %v3489_v29 = vmax.f32 %v3377_v1, %v3442_v30  ;;  %v4393_v39 = vmax.f32 %v4265_v58, %v9061_v37  ;;  %v9087_v1 = vpop.f32.mrb[29].mxu1  ;;  %v9089_v30 = vpop.f32.mrb[29].mxu0 }
 0x2c6   : > { %v4394_v21 = vmax.f32 %v4266_v3, %v9063_v44  ;;  %10287 = vst [vmem:[#allocation12_spill] sm:$0xff] %v9077_v11  ;;  %10288 = vst [vmem:[#allocation13_spill] sm:$0xff] %v9079_v47  ;;  %v4395_v12 = vmax.f32 %v4267_v61, %v9071_v26  ;;  %v4396_v53 = vmax.f32 %v4268_v51, %v9073_v36  ;;  %v9094_v51 = vpop.f32.mrb[30].mxu1  ;;  %v9096_v49 = vpop.f32.mrb[30].mxu0 }
 0x2c7   : > { %v4015_v7 = vmax.f32 %v8685_v40, %v8833_v46  ;;  %v4016_v13 = vmax.f32 %v8819_v18, %v8835_v24  ;;  %10289 = vst [vmem:[#allocation14_spill] sm:$0xff] %v9087_v1  ;;  %10290 = vst [vmem:[#allocation15_spill] sm:$0xff] %v9089_v30  ;;  %v3538_v58 = vpack.c.bf16 %v3489_v29, %v3488_v25  ;;  %v4436_v3 = vrot.slane %v4393_v39, 7  ;;  %v9098_v1 = vpop.f32.mrb[31].mxu1  ;;  %v9100_v30 = vpop.f32.mrb[31].mxu0  ;;  %v10331_v6 = vld [vmem:[#allocation41_spill] sm:$0xff] }
 0x2c8   : > { %3849 = vst.msk [vmem:[#allocation2 + $0x208] sm:$0xff] %vm226_vm3, %v3488_v25  ;;  %3850 = vst.msk [vmem:[#allocation2 + $0x210] sm:$0xff] %vm226_vm3, %v3489_v29  ;;  %v4452_v47 = vrot.slane %v4394_v21, 7  ;;  %v4141_v61 = vmax.f32 %v4013_v16, %v8867_v32  ;;  %v4468_v40 = vrot.slane %v4395_v12, 7  ;;  %v4548_v17 = vrot.slane %v4394_v21, 1  ;;  %v9105_v57 = vpop.f32.mrb[32].mxu1 }
 0x2c9   : > { %10291 = vst [vmem:[#allocation16_spill] sm:$0xff] %v9094_v51  ;;  %10292 = vst [vmem:[#allocation17_spill] sm:$0xff] %v9096_v49  ;;  %v4564_v18 = vrot.slane %v4395_v12, 1  ;;  %v4580_v42 = vrot.slane %v4396_v53, 1  ;;  %5967 = vmatprep.mubr.msk.bf16.mxu1 %vm226_vm3, %v3538_v58  ;;  %v4660_v29 = vrot.slane %v4393_v39, 6  ;;  %v4676_v11 = vrot.slane %v4394_v21, 6 }
 0x2ca   : > { %10293 = vst [vmem:[#allocation18_spill] sm:$0xff] %v9098_v1  ;;  %10294 = vst [vmem:[#allocation19_spill] sm:$0xff] %v9100_v30  ;;  %v4500_v25 = vsel %vm1703_vm4, %v4436_v3, %v4452_v47  ;;  %v4692_v16 = vrot.slane %v4395_v12, 6  ;;  %v9107_v51 = vpop.f32.mrb[32].mxu0  ;;  %v4484_v49 = vsel %vm1703_vm4, %v4452_v47, %v4468_v40  ;;  %v4772_v30 = vrot.slane %v4394_v21, 2  ;;  %v9113_v28 = vpop.f32.mrb[33].mxu1 }
 0x2cb   : > { %10295 = vst [vmem:[#allocation28_spill] sm:$0xff] %v9105_v57  ;;  %10296 = vst [vmem:[#allocation20_spill] sm:$0xff] %v9107_v51  ;;  %v4523_v23 = vmax.f32 %v4394_v21, %v4500_v25  ;;  %v4612_v1 = vsel %vm1816_vm6, %v4548_v17, %v4564_v18  ;;  %v9115_v58 = vpop.f32.mrb[33].mxu0  ;;  %v4524_v3 = vmax.f32 %v4395_v12, %v4484_v49  ;;  %v4788_v51 = vrot.slane %v4395_v12, 2  ;;  %v9121_v33 = vpop.f32.mrb[34].mxu1  ;;  %v10332_v19 = vld [vmem:[#allocation7_spill] sm:$0xff] }
 0x2cc   : > { %10297 = vst [vmem:[#allocation23_spill] sm:$0xff] %v9113_v28  ;;  %10298 = vst [vmem:[#allocation21_spill] sm:$0xff] %v9115_v58  ;;  %v4596_v39 = vsel %vm1816_vm6, %v4564_v18, %v4580_v42  ;;  %v4708_v57 = vsel %vm1929_vm5, %v4676_v11, %v4692_v16  ;;  %v9123_v47 = vpop.f32.mrb[34].mxu0  ;;  %v4804_v25 = vrot.slane %v4396_v53, 2  ;;  %v4142_v17 = vmax.f32 %v4014_v31, %v8873_v55  ;;  %v9127_v28 = vpop.f32.mrb[35].mxu1  ;;  %v10333_v38 = vld [vmem:[#allocation9_spill] sm:$0xff] }
 0x2cd   : > { %10299 = vst [vmem:[#allocation22_spill] sm:$0xff] %v9123_v47  ;;  %v4635_v40 = vmax.f32 %v4523_v23, %v4612_v1  ;;  %v4143_v21 = vmax.f32 %v4015_v7, %v8875_v8  ;;  %v9129_v49 = vpop.f32.mrb[35].mxu0  ;;  %v4636_v58 = vmax.f32 %v4524_v3, %v4596_v39  ;;  %v4724_v42 = vsel %vm1929_vm5, %v4660_v29, %v4676_v11  ;;  %v9135_v16 = vpop.f32.mrb[36].mxu1  ;;  %v9143_v3 = vld [vmem:[#allocation2 + $0x180] sm:$0xff]  ;;  %v10334_v62 = vld [vmem:[#allocation10_spill] sm:$0xff] }
 0x2ce   : > { %10300 = vst [vmem:[#allocation26_spill] sm:$0xff] %v9129_v49  ;;  %v4144_v12 = vmax.f32 %v4016_v13, %v8881_v63  ;;  %v4269_v18 = vmax.f32 %v4141_v61, %v9061_v37  ;;  %10301 = vst [vmem:[#allocation27_spill] sm:$0xff] %v9135_v16  ;;  %v9137_v23 = vpop.f32.mrb[36].mxu0  ;;  %v4836_v31 = vsel %vm2042_vm7, %v4772_v30, %v4788_v51  ;;  %v9145_v39 = vpop.f32.mrb[37].mxu1  ;;  %v9161_v49 = vld [vmem:[#allocation2 + $0x198] sm:$0xff]  ;;  %v10335_v60 = vld [vmem:[#allocation12_spill] sm:$0xff] }
 0x2cf   : > { %10302 = vst [vmem:[#allocation32_spill] sm:$0xff] %v9137_v23  ;;  %v4747_v53 = vmax.f32 %v4635_v40, %v4724_v42  ;;  %v4270_v7 = vmax.f32 %v4142_v17, %v9063_v44  ;;  %v4271_v1 = vmax.f32 %v4143_v21, %v9071_v26  ;;  %10303 = vst [vmem:[#allocation6_spill] sm:$0xff] %v9145_v39  ;;  %v9147_v11 = vpop.f32.mrb[37].mxu0  ;;  %v9152_v40 = vld [vmem:[#allocation2 + $0x188] sm:$0xff]  ;;  %v9154_v42 = vld [vmem:[#allocation2 + $0x190] sm:$0xff]  ;;  %v9157_v17 = vpop.f32.mrb[38].mxu1 }
 0x2d0   : > { %10304 = vst [vmem:[#allocation42_spill] sm:$0xff] %v9147_v11  ;;  %v4748_v13 = vmax.f32 %v4636_v58, %v4708_v57  ;;  %v4820_v61 = vsel %vm2042_vm7, %v4788_v51, %v4804_v25  ;;  %v4272_v29 = vmax.f32 %v4144_v12, %v9073_v36  ;;  %v4397_v30 = vmax.f32 %v4269_v18, %v9143_v3  ;;  %v9159_v21 = vpop.f32.mrb[38].mxu0  ;;  %v9167_v25 = vpop.f32.mrb[39].mxu1 }
 0x2d1   : > { %10305 = vst [vmem:[#allocation43_spill] sm:$0xff] %v9157_v17  ;;  %10306 = vst [vmem:[#allocation30_spill] sm:$0xff] %v9159_v21  ;;  %v4859_v23 = vmax.f32 %v4747_v53, %v4836_v31  ;;  %v4398_v57 = vmax.f32 %v4270_v7, %v9152_v40  ;;  %v4399_v58 = vmax.f32 %v4271_v1, %v9154_v42  ;;  %v9169_v12 = vpop.f32.mrb[39].mxu0  ;;  %v9174_v31 = vpop.f32.mrb[40].mxu1 }
 0x2d2   : > { %v2656_v51 = vmax.f32 %v8730_v27, %v8767_v15  ;;  %10307 = vst [vmem:[#allocation44_spill] sm:$0xff] %v9167_v25  ;;  %10308 = vst [vmem:[#allocation24_spill] sm:$0xff] %v9169_v12  ;;  %v4860_v11 = vmax.f32 %v4748_v13, %v4820_v61  ;;  %v4400_v18 = vmax.f32 %v4272_v29, %v9161_v49  ;;  %v4437_v47 = vrot.slane %v4397_v30, 7  ;;  %v9176_v21 = vpop.f32.mrb[40].mxu0  ;;  %v9178_v27 = vpop.f32.mrb[41].mxu1 }
 0x2d3   : > { %v2657_v53 = vmax.f32 %v8735_v54, %v8775_v4  ;;  %10309 = vst [vmem:[#allocation29_spill] sm:$0xff] %v9174_v31  ;;  %10310 = vst [vmem:[#allocation25_spill] sm:$0xff] %v9176_v21  ;;  %v4453_v7 = vrot.slane %v4398_v57, 7  ;;  %v4469_v1 = vrot.slane %v4399_v58, 7  ;;  %v4549_v17 = vrot.slane %v4398_v57, 1  ;;  %v9180_v15 = vpop.f32.mrb[41].mxu0 }
 0x2d4   : > { %v4565_v39 = vrot.slane %v4399_v58, 1  ;;  %10311 = vst [vmem:[#allocation31_spill] sm:$0xff] %v9178_v27  ;;  %10312 = vst [vmem:[#allocation45_spill] sm:$0xff] %v9180_v15  ;;  %v4916_v12 = vpack.c.bf16 %v4860_v11, %v4859_v23  ;;  %v4581_v13 = vrot.slane %v4400_v18, 1  ;;  %v4661_v61 = vrot.slane %v4397_v30, 6  ;;  %v9182_v25 = vpop.f32.mrb[42].mxu1 }
 0x2d5   : > { %v4693_v29 = vrot.slane %v4399_v58, 6  ;;  %10313 = vst [vmem:[#allocation46_spill] sm:$0xff] %v9182_v25  ;;  %v9184_v16 = vpop.f32.mrb[42].mxu0  ;;  %v4485_v54 = vsel %vm1703_vm4, %v4453_v7, %v4469_v1  ;;  %v4501_v4 = vsel %vm1703_vm4, %v4437_v47, %v4453_v7  ;;  %v4677_v27 = vrot.slane %v4398_v57, 6  ;;  %v9192_v31 = vpop.f32.mrb[43].mxu1  ;;  %1013 = vst.msk [vmem:[#allocation3 + $0x20] sm:$0xff] %vm1008_vm8, %v9015_v22 }
 0x2d6   : > { %10314 = vst [vmem:[#allocation47_spill] sm:$0xff] %v9184_v16  ;;  %v4613_v21 = vsel %vm1816_vm6, %v4549_v17, %v4565_v39  ;;  %10315 = vst [vmem:[#allocation48_spill] sm:$0xff] %v9192_v31  ;;  %v9194_v23 = vpop.f32.mrb[43].mxu0  ;;  %5986 = vmatmul.mubr.msk.bf16.gmra.mrb[60].mxu0 %vm226_vm3, %v4916_v12  ;;  %v4525_v11 = vmax.f32 %v4398_v57, %v4501_v4  ;;  %v4526_v30 = vmax.f32 %v4399_v58, %v4485_v54  ;;  %v9199_v1 = vpop.f32.mrb[44].mxu1  ;;  %v10336_v22 = vld [vmem:[#allocation14_spill] sm:$0xff] }
 0x2d7   : > { %10316 = vst [vmem:[#allocation49_spill] sm:$0xff] %v9194_v23  ;;  %v4597_v16 = vsel %vm1816_vm6, %v4565_v39, %v4581_v13  ;;  %v4773_v15 = vrot.slane %v4398_v57, 2  ;;  %v4709_v47 = vsel %vm1929_vm5, %v4677_v27, %v4693_v29  ;;  %v4789_v7 = vrot.slane %v4399_v58, 2  ;;  %v9205_v25 = vpop.f32.mrb[45].mxu1  ;;  %1016 = vst.msk [vmem:[#allocation3 + $0x38] sm:$0xff] %vm1008_vm8, %v9021_v35  ;;  %v10337_v35 = vld [vmem:[#allocation16_spill] sm:$0xff] }
 0x2d8   : > { %v4805_v17 = vrot.slane %v4400_v18, 2  ;;  %v2658_v31 = vmax.f32 %v8737_v41, %v8777_v52  ;;  %v4637_v23 = vmax.f32 %v4525_v11, %v4613_v21  ;;  %v4638_v12 = vmax.f32 %v4526_v30, %v4597_v16  ;;  %v9210_v57 = vpop.f32.mrb[46].mxu1  ;;  %v9218_v52 = vld [vmem:[#allocation2 + $0x260] sm:$0xff]  ;;  %1014 = vst.msk [vmem:[#allocation3 + $0x28] sm:$0xff] %vm1008_vm8, %v9031_v56  ;;  %1019 = vst.msk [vmem:[#allocation3 + $0x50] sm:$0xff] %vm1008_vm8, %v10331_v6  ;;  %v10338_v56 = vld [vmem:[#allocation18_spill] sm:$0xff] }
 0x2d9   : > { %v2659_v54 = vmax.f32 %v8740_v50, %v8781_v9  ;;  %v2784_v39 = vmax.f32 %v2656_v51, %v8916_v20  ;;  %v4725_v13 = vsel %vm1929_vm5, %v4661_v61, %v4677_v27  ;;  %v2785_v18 = vmax.f32 %v2657_v53, %v8920_v5  ;;  %v9220_v16 = vpop.f32.mrb[47].mxu1  ;;  %v9224_v51 = vld [vmem:[#allocation2 + $0x268] sm:$0xff]  ;;  %v9226_v27 = vld [vmem:[#allocation2 + $0x270] sm:$0xff]  ;;  %1017 = vst.msk [vmem:[#allocation3 + $0x40] sm:$0xff] %vm1008_vm8, %v10332_v19 }
 0x2da   : > { %v4821_v58 = vsel %vm2042_vm7, %v4789_v7, %v4805_v17  ;;  %v2786_v41 = vmax.f32 %v2658_v31, %v8922_v59  ;;  %v4749_v21 = vmax.f32 %v4637_v23, %v4725_v13  ;;  %v4750_v50 = vmax.f32 %v4638_v12, %v4709_v47  ;;  %v9228_v61 = vpop.f32.mrb[48].mxu1  ;;  %v9234_v31 = vld [vmem:[#allocation2 + $0x278] sm:$0xff]  ;;  %1020 = vst.msk [vmem:[#allocation3 + $0x58] sm:$0xff] %vm1008_vm8, %v10333_v38  ;;  %v2113_v6 = vld [vmem:[#allocation3 + $0x30] sm:$0xff] }
 0x2db   : > { %v2787_v9 = vmax.f32 %v2659_v54, %v8928_v10  ;;  %v2912_v20 = vmax.f32 %v2784_v39, %v8959_v2  ;;  %v4837_v5 = vsel %vm2042_vm7, %v4773_v15, %v4789_v7  ;;  %v2913_v59 = vmax.f32 %v2785_v18, %v8967_v48  ;;  %v9238_v29 = vpop.f32.mrb[49].mxu1  ;;  %1018 = vst.msk [vmem:[#allocation3 + $0x48] sm:$0xff] %vm1008_vm8, %v10334_v62 }
 0x2dc   : > { %v2914_v53 = vmax.f32 %v2786_v41, %v8969_v43  ;;  %v4017_v10 = vmax.f32 %v8825_v45, %v8867_v32  ;;  %v4861_v2 = vmax.f32 %v4749_v21, %v4837_v5  ;;  %v4862_v4 = vmax.f32 %v4750_v50, %v4821_v58  ;;  %v9242_v30 = vpop.f32.mrb[50].mxu1  ;;  %1023 = vst.msk [vmem:[#allocation3 + $0x70] sm:$0xff] %vm1008_vm8, %v10335_v60  ;;  %v2111_v19 = vld [vmem:[#allocation3 + $0x20] sm:$0xff]  ;;  %v10351_v60 = vld [vmem:[#allocation35_spill] sm:$0xff] }
 0x2dd   : > { %v2915_v23 = vmax.f32 %v2787_v9, %v8973_v14  ;;  %v3040_v11 = vmax.f32 %v2912_v20, %v9218_v52  ;;  %10317 = vst [vmem:[#allocation50_spill] sm:$0xff] %v9242_v30  ;;  %v3041_v15 = vmax.f32 %v2913_v59, %v9224_v51  ;;  %v4018_v43 = vmax.f32 %v8827_v0, %v8873_v55  ;;  %v9250_v47 = vpop.f32.mrb[51].mxu1 }
 0x2de   : > { %v3042_v48 = vmax.f32 %v2914_v53, %v9226_v27  ;;  %v4019_v45 = vmax.f32 %v8833_v46, %v8875_v8  ;;  %10318 = vst [vmem:[#allocation51_spill] sm:$0xff] %v9250_v47  ;;  %v4917_v7 = vpack.c.bf16 %v4862_v4, %v4861_v2  ;;  %v9253_v54 = vpop.f32.mrb[52].mxu1  ;;  %v4020_v50 = vmax.f32 %v8835_v24, %v8881_v63 }
 0x2df   : > { %v3043_v17 = vmax.f32 %v2915_v23, %v9234_v31  ;;  %v3059_v14 = vrot.slane %v3040_v11, 7  ;;  %v3283_v12 = vrot.slane %v3040_v11, 6  ;;  %10319 = vst [vmem:[#allocation52_spill] sm:$0xff] %v9253_v54  ;;  %v3075_v39 = vrot.slane %v3041_v15, 7  ;;  %v9255_v41 = vpop.f32.mrb[53].mxu1  ;;  %1021 = vst.msk [vmem:[#allocation3 + $0x60] sm:$0xff] %vm1008_vm8, %v10336_v22 }
 0x2e0   : > { %v3091_v13 = vrot.slane %v3042_v48, 7  ;;  %v3171_v58 = vrot.slane %v3041_v15, 1  ;;  %v3187_v18 = vrot.slane %v3042_v48, 1  ;;  %10320 = vst [vmem:[#allocation53_spill] sm:$0xff] %v9255_v41  ;;  %5989 = vmatprep.mubr.msk.bf16.mxu0 %vm226_vm3, %v4917_v7  ;;  %v3299_v21 = vrot.slane %v3041_v15, 6  ;;  %v9260_v9 = vpop.f32.mrb[54].mxu1 }
 0x2e1   : > { %v3203_v0 = vrot.slane %v3043_v17, 1  ;;  %v3315_v46 = vrot.slane %v3042_v48, 6  ;;  %10321 = vst [vmem:[#allocation54_spill] sm:$0xff] %v9260_v9  ;;  %v3123_v5 = vsel %vm1703_vm4, %v3059_v14, %v3075_v39  ;;  %v3411_v53 = vrot.slane %v3042_v48, 2  ;;  %v9268_v2 = vpop.f32.mrb[55].mxu1  ;;  %1024 = vst.msk [vmem:[#allocation3 + $0x78] sm:$0xff] %vm1008_vm8, %v10337_v35 }
 0x2e2   : > { %v3107_v20 = vsel %vm1703_vm4, %v3075_v39, %v3091_v13  ;;  %v3235_v59 = vsel %vm1816_vm6, %v3171_v58, %v3187_v18  ;;  %10322 = vst [vmem:[#allocation55_spill] sm:$0xff] %v9268_v2  ;;  %v3154_v4 = vmax.f32 %v3041_v15, %v3123_v5  ;;  %v3395_v24 = vrot.slane %v3041_v15, 2  ;;  %v9272_v7 = vpop.f32.mrb[56].mxu1  ;;  %1022 = vst.msk [vmem:[#allocation3 + $0x68] sm:$0xff] %vm1008_vm8, %v10338_v56  ;;  %v10352_v35 = vld [vmem:[#allocation36_spill] sm:$0xff] }
 0x2e3   : > { %v3155_v23 = vmax.f32 %v3042_v48, %v3107_v20  ;;  %v3219_v11 = vsel %vm1816_vm6, %v3187_v18, %v3203_v0  ;;  %10323 = vst [vmem:[#allocation56_spill] sm:$0xff] %v9272_v7  ;;  %v3331_v13 = vsel %vm1929_vm5, %v3299_v21, %v3315_v46  ;;  %v3347_v14 = vsel %vm1929_vm5, %v3283_v12, %v3299_v21  ;;  %v9279_v9 = vpop.f32.mrb[57].mxu1 }
 0x2e4   : > { %v3427_v39 = vrot.slane %v3043_v17, 2  ;;  %v4145_v58 = vmax.f32 %v4017_v10, %v9061_v37  ;;  %10324 = vst [vmem:[#allocation57_spill] sm:$0xff] %v9279_v9  ;;  %v3266_v2 = vmax.f32 %v3154_v4, %v3235_v59  ;;  %v4146_v48 = vmax.f32 %v4018_v43, %v9063_v44  ;;  %v9283_v15 = vpop.f32.mrb[58].mxu1  ;;  %v9295_v59 = vld [vmem:[#allocation2 + $0x1a0] sm:$0xff]  ;;  %1028 = vst.msk [vmem:[#allocation3 + $0x98] sm:$0xff] %vm1008_vm8, %v9121_v33  ;;  %v10347_v33 = vld [vmem:[#allocation46_spill] sm:$0xff] }
 0x2e5   : > { %v3267_v5 = vmax.f32 %v3155_v23, %v3219_v11  ;;  %v4147_v18 = vmax.f32 %v4019_v45, %v9071_v26  ;;  %10325 = vst [vmem:[#allocation58_spill] sm:$0xff] %v9283_v15  ;;  %v3459_v46 = vsel %vm2042_vm7, %v3395_v24, %v3411_v53  ;;  %v4148_v17 = vmax.f32 %v4020_v50, %v9073_v36  ;;  %v9291_v12 = vpop.f32.mrb[59].mxu1  ;;  %v9298_v23 = vld [vmem:[#allocation2 + $0x1a8] sm:$0xff]  ;;  %v9300_v11 = vld [vmem:[#allocation2 + $0x1b0] sm:$0xff] }
 0x2e6   : > { %v3443_v0 = vsel %vm2042_vm7, %v3411_v53, %v3427_v39  ;;  %v4273_v10 = vmax.f32 %v4145_v58, %v9143_v3  ;;  %10326 = vst [vmem:[#allocation59_spill] sm:$0xff] %v9291_v12  ;;  %v3378_v21 = vmax.f32 %v3266_v2, %v3347_v14  ;;  %v4274_v43 = vmax.f32 %v4146_v48, %v9152_v40  ;;  %v9307_v14 = vld [vmem:[#allocation2 + $0x1b8] sm:$0xff] }
 0x2e7   : > { %v3379_v20 = vmax.f32 %v3267_v5, %v3331_v13  ;;  %v4275_v45 = vmax.f32 %v4147_v18, %v9154_v42  ;;  %v4276_v4 = vmax.f32 %v4148_v17, %v9161_v49  ;;  %v4021_v53 = vmax.f32 %v8867_v32, %v9061_v37  ;;  %1026 = vst.msk [vmem:[#allocation3 + $0x88] sm:$0xff] %vm1008_vm8, %v9127_v28  ;;  %v10348_v28 = vld [vmem:[#allocation48_spill] sm:$0xff] }
 0x2e8   : > { %v4401_v50 = vmax.f32 %v4273_v10, %v9295_v59  ;;  %v4022_v2 = vmax.f32 %v8873_v55, %v9063_v44  ;;  %v3490_v24 = vmax.f32 %v3378_v21, %v3459_v46  ;;  %v4402_v39 = vmax.f32 %v4274_v43, %v9298_v23  ;;  %1036 = vst.msk [vmem:[#allocation3 + $0xd8] sm:$0xff] %vm1008_vm8, %v10347_v33  ;;  %v10356_v33 = vld [vmem:[#allocation40_spill] sm:$0xff] }
 0x2e9   : > { %v3491_v13 = vmax.f32 %v3379_v20, %v3443_v0  ;;  %v4403_v58 = vmax.f32 %v4275_v45, %v9300_v11  ;;  %v4404_v5 = vmax.f32 %v4276_v4, %v9307_v14  ;;  %v4023_v17 = vmax.f32 %v8875_v8, %v9071_v26  ;;  %1034 = vst.msk [vmem:[#allocation3 + $0xc8] sm:$0xff] %vm1008_vm8, %v10348_v28 }
 0x2ea   : > { %v4438_v48 = vrot.slane %v4401_v50, 7  ;;  %v4662_v18 = vrot.slane %v4401_v50, 6  ;;  %3851 = vst.msk [vmem:[#allocation2 + $0x228] sm:$0xff] %vm226_vm3, %v3490_v24  ;;  %v4454_v32 = vrot.slane %v4402_v39, 7  ;;  %v4550_v0 = vrot.slane %v4402_v39, 1 }
 0x2eb   : > { %v3539_v10 = vpack.c.bf16 %v3491_v13, %v3490_v24  ;;  %3852 = vst.msk [vmem:[#allocation2 + $0x230] sm:$0xff] %vm226_vm3, %v3491_v13  ;;  %v4470_v55 = vrot.slane %v4403_v58, 7  ;;  %v4566_v46 = vrot.slane %v4403_v58, 1  ;;  %v4582_v21 = vrot.slane %v4404_v5, 1 }
 0x2ec   : > { %v4678_v20 = vrot.slane %v4402_v39, 6  ;;  %v4694_v43 = vrot.slane %v4403_v58, 6  ;;  %v4502_v8 = vsel %vm1703_vm4, %v4438_v48, %v4454_v32  ;;  %v4790_v4 = vrot.slane %v4403_v58, 2  ;;  %1039 = vst.msk [vmem:[#allocation3 + $0xf0] sm:$0xff] %vm1008_vm8, %v9199_v1  ;;  %1037 = vst.msk [vmem:[#allocation3 + $0xe0] sm:$0xff] %vm1008_vm8, %v9205_v25 }
 0x2ed   : > { %5968 = vmatmul.mubr.msk.bf16.gmra.mrb[76].mxu1 %vm226_vm3, %v3539_v10  ;;  %v4486_v45 = vsel %vm1703_vm4, %v4454_v32, %v4470_v55  ;;  %v4024_v50 = vmax.f32 %v8881_v63, %v9073_v36  ;;  %v4527_v24 = vmax.f32 %v4402_v39, %v4502_v8  ;;  %v4614_v12 = vsel %vm1816_vm6, %v4550_v0, %v4566_v46  ;;  %v9353_v8 = vld [vmem:[#allocation2 + $0x1d8] sm:$0xff] }
 0x2ee   : > { %v4528_v13 = vmax.f32 %v4403_v58, %v4486_v45  ;;  %v4774_v15 = vrot.slane %v4402_v39, 2  ;;  %v4598_v9 = vsel %vm1816_vm6, %v4566_v46, %v4582_v21  ;;  %v4710_v10 = vsel %vm1929_vm5, %v4678_v20, %v4694_v43  ;;  %1040 = vst.msk [vmem:[#allocation3 + $0xf8] sm:$0xff] %vm1008_vm8, %v9210_v57  ;;  %1038 = vst.msk [vmem:[#allocation3 + $0xe8] sm:$0xff] %vm1008_vm8, %v9220_v16 }
 0x2ef   : > { %v4726_v55 = vsel %vm1929_vm5, %v4662_v18, %v4678_v20  ;;  %v4806_v48 = vrot.slane %v4404_v5, 2  ;;  %v4639_v32 = vmax.f32 %v4527_v24, %v4614_v12  ;;  %v4149_v63 = vmax.f32 %v4021_v53, %v9143_v3  ;;  %v9347_v18 = vld [vmem:[#allocation2 + $0x1c8] sm:$0xff]  ;;  %v9351_v20 = vld [vmem:[#allocation2 + $0x1d0] sm:$0xff] }
 0x2f0   : > { %v4640_v7 = vmax.f32 %v4528_v13, %v4598_v9  ;;  %v4150_v58 = vmax.f32 %v4022_v2, %v9152_v40  ;;  %v4838_v0 = vsel %vm2042_vm7, %v4774_v15, %v4790_v4  ;;  %v4151_v39 = vmax.f32 %v4023_v17, %v9154_v42  ;;  %v9345_v2 = vld [vmem:[#allocation2 + $0x1c0] sm:$0xff] }
 0x2f1   : > { %v4152_v46 = vmax.f32 %v4024_v50, %v9161_v49  ;;  %v4025_v21 = vmax.f32 %v9061_v37, %v9143_v3  ;;  %v4751_v43 = vmax.f32 %v4639_v32, %v4726_v55  ;;  %v4277_v5 = vmax.f32 %v4149_v63, %v9295_v59 }
 0x2f2   : > { %v4752_v45 = vmax.f32 %v4640_v7, %v4710_v10  ;;  %v4278_v9 = vmax.f32 %v4150_v58, %v9298_v23  ;;  %v4822_v12 = vsel %vm2042_vm7, %v4790_v4, %v4806_v48  ;;  %v4279_v53 = vmax.f32 %v4151_v39, %v9300_v11 }
 0x2f3   : > { %v4280_v15 = vmax.f32 %v4152_v46, %v9307_v14  ;;  %v4026_v37 = vmax.f32 %v9063_v44, %v9152_v40  ;;  %v4863_v17 = vmax.f32 %v4751_v43, %v4838_v0  ;;  %v4405_v50 = vmax.f32 %v4277_v5, %v9345_v2 }
 0x2f4   : > { %v4864_v7 = vmax.f32 %v4752_v45, %v4822_v12  ;;  %v4406_v4 = vmax.f32 %v4278_v9, %v9347_v18  ;;  %v4407_v24 = vmax.f32 %v4279_v53, %v9351_v20  ;;  %v4027_v10 = vmax.f32 %v9071_v26, %v9154_v42  ;;  %v9364_v58 = vpop.f32.mrb[44].mxu0 }
 0x2f5   : > { %v4408_v13 = vmax.f32 %v4280_v15, %v9353_v8  ;;  %v4028_v44 = vmax.f32 %v9073_v36, %v9161_v49  ;;  %v4439_v48 = vrot.slane %v4405_v50, 7  ;;  %v4153_v63 = vmax.f32 %v4025_v21, %v9295_v59  ;;  %v9366_v45 = vpop.f32.mrb[45].mxu0 }
 0x2f6   : > { %v4918_v55 = vpack.c.bf16 %v4864_v7, %v4863_v17  ;;  %v4455_v32 = vrot.slane %v4406_v4, 7  ;;  %v4471_v0 = vrot.slane %v4407_v24, 7  ;;  %v4551_v39 = vrot.slane %v4406_v4, 1  ;;  %v9371_v12 = vpop.f32.mrb[46].mxu0 }
 0x2f7   : > { %v4567_v46 = vrot.slane %v4407_v24, 1  ;;  %v4583_v43 = vrot.slane %v4408_v13, 1  ;;  %v4663_v5 = vrot.slane %v4405_v50, 6  ;;  %v4679_v36 = vrot.slane %v4406_v4, 6  ;;  %v9377_v7 = vpop.f32.mrb[47].mxu0 }
 0x2f8   : > { %5990 = vmatmul.mubr.msk.bf16.gmra.mrb[64].mxu0 %vm226_vm3, %v4918_v55  ;;  %v4503_v26 = vsel %vm1703_vm4, %v4439_v48, %v4455_v32  ;;  %v4695_v9 = vrot.slane %v4407_v24, 6  ;;  %v4487_v21 = vsel %vm1703_vm4, %v4455_v32, %v4471_v0  ;;  %v4775_v17 = vrot.slane %v4406_v4, 2  ;;  %10327 = vst [vmem:[#allocation60_spill] sm:$0xff] %v9377_v7 }
 0x2f9   : > { %v4529_v53 = vmax.f32 %v4406_v4, %v4503_v26  ;;  %v4615_v15 = vsel %vm1816_vm6, %v4551_v39, %v4567_v46  ;;  %v4530_v41 = vmax.f32 %v4407_v24, %v4487_v21  ;;  %v4599_v55 = vsel %vm1816_vm6, %v4567_v46, %v4583_v43  ;;  %v9393_v43 = vld [vmem:[#allocation2 + $0x1e0] sm:$0xff] }
 0x2fa   : > { %v4711_v50 = vsel %vm1929_vm5, %v4679_v36, %v4695_v9  ;;  %v4791_v48 = vrot.slane %v4407_v24, 2  ;;  %v4807_v47 = vrot.slane %v4408_v13, 2  ;;  %v4154_v30 = vmax.f32 %v4026_v37, %v9298_v23 }
 0x2fb   : > { %v4641_v54 = vmax.f32 %v4529_v53, %v4615_v15  ;;  %v4155_v32 = vmax.f32 %v4027_v10, %v9300_v11  ;;  %v4642_v0 = vmax.f32 %v4530_v41, %v4599_v55  ;;  %v4727_v4 = vsel %vm1929_vm5, %v4663_v5, %v4679_v36  ;;  %v9398_v5 = vld [vmem:[#allocation2 + $0x1e8] sm:$0xff]  ;;  %v9403_v36 = vld [vmem:[#allocation2 + $0x1f8] sm:$0xff] }
 0x2fc   : > { %v4156_v39 = vmax.f32 %v4028_v44, %v9307_v14  ;;  %v4281_v26 = vmax.f32 %v4153_v63, %v9345_v2  ;;  %v4839_v46 = vsel %vm2042_vm7, %v4775_v17, %v4791_v48  ;;  %v4282_v24 = vmax.f32 %v4154_v30, %v9347_v18  ;;  %v9400_v44 = vld [vmem:[#allocation2 + $0x1f0] sm:$0xff] }
 0x2fd   : > { %v4753_v21 = vmax.f32 %v4641_v54, %v4727_v4  ;;  %v4283_v13 = vmax.f32 %v4155_v32, %v9351_v20  ;;  %v4754_v37 = vmax.f32 %v4642_v0, %v4711_v50  ;;  %v4823_v41 = vsel %vm2042_vm7, %v4791_v48, %v4807_v47 }
 0x2fe   : > { %v4284_v10 = vmax.f32 %v4156_v39, %v9353_v8  ;;  %v4409_v54 = vmax.f32 %v4281_v26, %v9393_v43  ;;  %v4410_v30 = vmax.f32 %v4282_v24, %v9398_v5  ;;  %v4029_v53 = vmax.f32 %v9143_v3, %v9295_v59 }
 0x2ff   : > { %v4865_v63 = vmax.f32 %v4753_v21, %v4839_v46  ;;  %v4411_v9 = vmax.f32 %v4283_v13, %v9400_v44  ;;  %v4866_v15 = vmax.f32 %v4754_v37, %v4823_v41  ;;  %v4030_v55 = vmax.f32 %v9152_v40, %v9298_v23 }
 0x300   : > { %v4412_v47 = vmax.f32 %v4284_v10, %v9403_v36  ;;  %v4440_v17 = vrot.slane %v4409_v54, 7  ;;  %v4456_v50 = vrot.slane %v4410_v30, 7  ;;  %v4552_v32 = vrot.slane %v4410_v30, 1 }
 0x301   : > { %v4472_v48 = vrot.slane %v4411_v9, 7  ;;  %v4568_v0 = vrot.slane %v4411_v9, 1  ;;  %v4919_v4 = vpack.c.bf16 %v4866_v15, %v4865_v63  ;;  %v4664_v26 = vrot.slane %v4409_v54, 6 }
 0x302   : > { %v4584_v39 = vrot.slane %v4412_v47, 1  ;;  %v4696_v21 = vrot.slane %v4411_v9, 6  ;;  %v4504_v3 = vsel %vm1703_vm4, %v4440_v17, %v4456_v50  ;;  %v4680_v13 = vrot.slane %v4410_v30, 6 }
 0x303   : > { %v4488_v46 = vsel %vm1703_vm4, %v4456_v50, %v4472_v48  ;;  %v4616_v24 = vsel %vm1816_vm6, %v4552_v32, %v4568_v0  ;;  %5993 = vmatprep.mubr.msk.bf16.mxu0 %vm226_vm3, %v4919_v4  ;;  %v4531_v40 = vmax.f32 %v4410_v30, %v4504_v3  ;;  %v4776_v10 = vrot.slane %v4410_v30, 2  ;;  %v9440_v3 = vld [vmem:[#allocation2 + $0x200] sm:$0xff] }
 0x304   : > { %v4532_v37 = vmax.f32 %v4411_v9, %v4488_v46  ;;  %v4600_v41 = vsel %vm1816_vm6, %v4568_v0, %v4584_v39  ;;  %v4712_v54 = vsel %vm1929_vm5, %v4680_v13, %v4696_v21  ;;  %v4792_v63 = vrot.slane %v4411_v9, 2 }
 0x305   : > { %v4808_v15 = vrot.slane %v4412_v47, 2  ;;  %v4031_v17 = vmax.f32 %v9154_v42, %v9300_v11  ;;  %v4643_v50 = vmax.f32 %v4531_v40, %v4616_v24  ;;  %v4032_v32 = vmax.f32 %v9161_v49, %v9307_v14 }
 0x306   : > { %v4644_v48 = vmax.f32 %v4532_v37, %v4600_v41  ;;  %v4157_v4 = vmax.f32 %v4029_v53, %v9345_v2  ;;  %v4728_v46 = vsel %vm1929_vm5, %v4664_v26, %v4680_v13  ;;  %v4158_v0 = vmax.f32 %v4030_v55, %v9347_v18  ;;  %v9445_v37 = vld [vmem:[#allocation2 + $0x208] sm:$0xff]  ;;  %v9447_v41 = vld [vmem:[#allocation2 + $0x210] sm:$0xff] }
 0x307   : > { %v4824_v30 = vsel %vm2042_vm7, %v4792_v63, %v4808_v15  ;;  %v4159_v9 = vmax.f32 %v4031_v17, %v9351_v20  ;;  %v4755_v47 = vmax.f32 %v4643_v50, %v4728_v46  ;;  %v4160_v42 = vmax.f32 %v4032_v32, %v9353_v8 }
 0x308   : > { %v4756_v39 = vmax.f32 %v4644_v48, %v4712_v54  ;;  %v4285_v21 = vmax.f32 %v4157_v4, %v9393_v43  ;;  %v4840_v49 = vsel %vm2042_vm7, %v4776_v10, %v4792_v63  ;;  %v4286_v53 = vmax.f32 %v4158_v0, %v9398_v5  ;;  %v9450_v10 = vld [vmem:[#allocation2 + $0x218] sm:$0xff] }
 0x309   : > { %v4287_v26 = vmax.f32 %v4159_v9, %v9400_v44  ;;  %v4033_v55 = vmax.f32 %v9295_v59, %v9345_v2  ;;  %v4867_v24 = vmax.f32 %v4755_v47, %v4840_v49  ;;  %v4288_v40 = vmax.f32 %v4160_v42, %v9403_v36 }
 0x30a   : > { %v4868_v13 = vmax.f32 %v4756_v39, %v4824_v30  ;;  %v4413_v54 = vmax.f32 %v4285_v21, %v9440_v3  ;;  %v4414_v63 = vmax.f32 %v4286_v53, %v9445_v37  ;;  %v4034_v17 = vmax.f32 %v9298_v23, %v9347_v18  ;;  %v9459_v46 = vpop.f32.mrb[60].mxu1 }
 0x30b   : > { %v4415_v15 = vmax.f32 %v4287_v26, %v9447_v41  ;;  %v4035_v59 = vmax.f32 %v9300_v11, %v9351_v20  ;;  %v4416_v48 = vmax.f32 %v4288_v40, %v9450_v10  ;;  %10328 = vst [vmem:[#allocation61_spill] sm:$0xff] %v9459_v46  ;;  %v9461_v39 = vpop.f32.mrb[61].mxu1  ;;  %v4036_v11 = vmax.f32 %v9307_v14, %v9353_v8 }
 0x30c   : > { %v4920_v50 = vpack.c.bf16 %v4868_v13, %v4867_v24  ;;  %v4441_v32 = vrot.slane %v4413_v54, 7  ;;  %v4665_v4 = vrot.slane %v4413_v54, 6  ;;  %v4457_v30 = vrot.slane %v4414_v63, 7  ;;  %10329 = vst [vmem:[#allocation62_spill] sm:$0xff] %v9461_v39  ;;  %v9466_v49 = vpop.f32.mrb[62].mxu1 }
 0x30d   : > { %v4473_v0 = vrot.slane %v4415_v15, 7  ;;  %v4553_v9 = vrot.slane %v4414_v63, 1  ;;  %v4569_v47 = vrot.slane %v4415_v15, 1  ;;  %v4585_v42 = vrot.slane %v4416_v48, 1  ;;  %10330 = vst [vmem:[#allocation63_spill] sm:$0xff] %v9466_v49  ;;  %v9474_v40 = vpop.f32.mrb[63].mxu1 }
 0x30e   : > { %5994 = vmatmul.mubr.msk.bf16.gmra.mrb[68].mxu0 %vm226_vm3, %v4920_v50  ;;  %v4681_v23 = vrot.slane %v4414_v63, 6  ;;  %v4697_v21 = vrot.slane %v4415_v15, 6  ;;  %v4505_v26 = vsel %vm1703_vm4, %v4441_v32, %v4457_v30  ;;  %v4793_v13 = vrot.slane %v4415_v15, 2 }
 0x30f   : > { %v4489_v53 = vsel %vm1703_vm4, %v4457_v30, %v4473_v0  ;;  %v4617_v24 = vsel %vm1816_vm6, %v4553_v9, %v4569_v47  ;;  %v4533_v54 = vmax.f32 %v4414_v63, %v4505_v26  ;;  %v4601_v39 = vsel %vm1816_vm6, %v4569_v47, %v4585_v42 }
 0x310   : > { %v4534_v50 = vmax.f32 %v4415_v15, %v4489_v53  ;;  %v4777_v14 = vrot.slane %v4414_v63, 2  ;;  %v4713_v49 = vsel %vm1929_vm5, %v4681_v23, %v4697_v21  ;;  %v4729_v0 = vsel %vm1929_vm5, %v4665_v4, %v4681_v23  ;;  %v9493_v23 = vld [vmem:[#allocation2 + $0x220] sm:$0xff] }
 0x311   : > { %v4809_v46 = vrot.slane %v4416_v48, 2  ;;  %v4161_v32 = vmax.f32 %v4033_v55, %v9393_v43  ;;  %v4645_v30 = vmax.f32 %v4533_v54, %v4617_v24  ;;  %v4162_v7 = vmax.f32 %v4034_v17, %v9398_v5  ;;  %v9505_v24 = vld [vmem:[#allocation2 + $0x238] sm:$0xff] }
 0x312   : > { %v4646_v9 = vmax.f32 %v4534_v50, %v4601_v39  ;;  %v4163_v26 = vmax.f32 %v4035_v59, %v9400_v44  ;;  %v4841_v63 = vsel %vm2042_vm7, %v4777_v14, %v4793_v13  ;;  %v4164_v47 = vmax.f32 %v4036_v11, %v9403_v36  ;;  %v9496_v59 = vld [vmem:[#allocation2 + $0x228] sm:$0xff] }
 0x313   : > { %v4825_v15 = vsel %vm2042_vm7, %v4793_v13, %v4809_v46  ;;  %v4289_v42 = vmax.f32 %v4161_v32, %v9440_v3  ;;  %v4757_v4 = vmax.f32 %v4645_v30, %v4729_v0  ;;  %v4290_v55 = vmax.f32 %v4162_v7, %v9445_v37  ;;  %v9498_v46 = vld [vmem:[#allocation2 + $0x230] sm:$0xff] }
 0x314   : > { %v4758_v48 = vmax.f32 %v4646_v9, %v4713_v49  ;;  %v4291_v39 = vmax.f32 %v4163_v26, %v9447_v41  ;;  %v4292_v17 = vmax.f32 %v4164_v47, %v9450_v10  ;;  %v4037_v11 = vmax.f32 %v9345_v2, %v9393_v43 }
 0x315   : > { %v4417_v21 = vmax.f32 %v4289_v42, %v9493_v23  ;;  %v4038_v49 = vmax.f32 %v9347_v18, %v9398_v5  ;;  %v4869_v53 = vmax.f32 %v4757_v4, %v4841_v63  ;;  %v4418_v13 = vmax.f32 %v4290_v55, %v9496_v59 }
 0x316   : > { %v4870_v7 = vmax.f32 %v4758_v48, %v4825_v15  ;;  %v4419_v54 = vmax.f32 %v4291_v39, %v9498_v46  ;;  %v4420_v50 = vmax.f32 %v4292_v17, %v9505_v24  ;;  %v4039_v32 = vmax.f32 %v9351_v20, %v9400_v44 }
 0x317   : > { %v4442_v14 = vrot.slane %v4417_v21, 7  ;;  %v4666_v0 = vrot.slane %v4417_v21, 6  ;;  %v4458_v2 = vrot.slane %v4418_v13, 7  ;;  %v4554_v26 = vrot.slane %v4418_v13, 1 }
 0x318   : > { %v4921_v30 = vpack.c.bf16 %v4870_v7, %v4869_v53  ;;  %v4474_v9 = vrot.slane %v4419_v54, 7  ;;  %v4570_v18 = vrot.slane %v4419_v54, 1  ;;  %v4586_v63 = vrot.slane %v4420_v50, 1 }
 0x319   : > { %v4682_v15 = vrot.slane %v4418_v13, 6  ;;  %v4698_v47 = vrot.slane %v4419_v54, 6  ;;  %v4506_v4 = vsel %vm1703_vm4, %v4442_v14, %v4458_v2  ;;  %v4794_v48 = vrot.slane %v4419_v54, 2 }
 0x31a   : > { %5997 = vmatprep.mubr.msk.bf16.mxu0 %vm226_vm3, %v4921_v30  ;;  %v4490_v42 = vsel %vm1703_vm4, %v4458_v2, %v4474_v9  ;;  %v4040_v20 = vmax.f32 %v9353_v8, %v9403_v36  ;;  %v4535_v55 = vmax.f32 %v4418_v13, %v4506_v4  ;;  %v4618_v17 = vsel %vm1816_vm6, %v4554_v26, %v4570_v18  ;;  %v9539_v4 = vld [vmem:[#allocation2 + $0x258] sm:$0xff] }
 0x31b   : > { %v4536_v39 = vmax.f32 %v4419_v54, %v4490_v42  ;;  %v4778_v21 = vrot.slane %v4418_v13, 2  ;;  %v4602_v53 = vsel %vm1816_vm6, %v4570_v18, %v4586_v63  ;;  %v4714_v7 = vsel %vm1929_vm5, %v4682_v15, %v4698_v47  ;;  %v4357_v63 = vld [vmem:[#allocation2 + $0x240] sm:$0xff]  ;;  %v9533_v42 = vld [vmem:[#allocation2 + $0x248] sm:$0xff] }
 0x31c   : > { %v4730_v30 = vsel %vm1929_vm5, %v4666_v0, %v4682_v15  ;;  %v4810_v14 = vrot.slane %v4420_v50, 2  ;;  %v4647_v2 = vmax.f32 %v4535_v55, %v4618_v17  ;;  %v4165_v8 = vmax.f32 %v4037_v11, %v9440_v3 }
 0x31d   : > { %v4648_v9 = vmax.f32 %v4536_v39, %v4602_v53  ;;  %v4166_v54 = vmax.f32 %v4038_v49, %v9445_v37  ;;  %v4842_v26 = vsel %vm2042_vm7, %v4778_v21, %v4794_v48  ;;  %v4167_v13 = vmax.f32 %v4039_v32, %v9447_v41  ;;  %v4359_v49 = vld [vmem:[#allocation2 + $0x250] sm:$0xff] }
 0x31e   : > { %v4168_v18 = vmax.f32 %v4040_v20, %v9450_v10  ;;  %v4041_v0 = vmax.f32 %v9393_v43, %v9440_v3  ;;  %v4759_v50 = vmax.f32 %v4647_v2, %v4730_v30  ;;  %v4293_v47 = vmax.f32 %v4165_v8, %v9493_v23 }
 0x31f   : > { %v4760_v15 = vmax.f32 %v4648_v9, %v4714_v7  ;;  %v4294_v11 = vmax.f32 %v4166_v54, %v9496_v59  ;;  %v4826_v32 = vsel %vm2042_vm7, %v4794_v48, %v4810_v14  ;;  %v4295_v20 = vmax.f32 %v4167_v13, %v9498_v46 }
 0x320   : > { %v4296_v55 = vmax.f32 %v4168_v18, %v9505_v24  ;;  %v4042_v39 = vmax.f32 %v9398_v5, %v9445_v37  ;;  %v4871_v43 = vmax.f32 %v4759_v50, %v4842_v26  ;;  %v4421_v17 = vmax.f32 %v4293_v47, %v4357_v63 }
 0x321   : > { %v4872_v3 = vmax.f32 %v4760_v15, %v4826_v32  ;;  %v4422_v21 = vmax.f32 %v4294_v11, %v9533_v42  ;;  %v4423_v53 = vmax.f32 %v4295_v20, %v4359_v49  ;;  %v4043_v30 = vmax.f32 %v9400_v44, %v9447_v41  ;;  %v9554_v5 = vpop.f32.mrb[48].mxu0 }
 0x322   : > { %v4424_v7 = vmax.f32 %v4296_v55, %v9539_v4  ;;  %v4044_v48 = vmax.f32 %v9403_v36, %v9450_v10  ;;  %v4443_v2 = vrot.slane %v4421_v17, 7  ;;  %v4169_v8 = vmax.f32 %v4041_v0, %v9493_v23  ;;  %v9556_v18 = vpop.f32.mrb[49].mxu0 }
 0x323   : > { %v4922_v14 = vpack.c.bf16 %v4872_v3, %v4871_v43  ;;  %v4459_v9 = vrot.slane %v4422_v21, 7  ;;  %v4475_v37 = vrot.slane %v4423_v53, 7  ;;  %v4555_v54 = vrot.slane %v4422_v21, 1  ;;  %v9561_v50 = vpop.f32.mrb[50].mxu0 }
 0x324   : > { %v4571_v26 = vrot.slane %v4423_v53, 1  ;;  %v4587_v13 = vrot.slane %v4424_v7, 1  ;;  %v4667_v41 = vrot.slane %v4421_v17, 6  ;;  %v4683_v36 = vrot.slane %v4422_v21, 6  ;;  %v9567_v11 = vpop.f32.mrb[51].mxu0 }
 0x325   : > { %5998 = vmatmul.mubr.msk.bf16.gmra.mrb[72].mxu0 %vm226_vm3, %v4922_v14  ;;  %v4507_v44 = vsel %vm1703_vm4, %v4443_v2, %v4459_v9  ;;  %v4699_v10 = vrot.slane %v4423_v53, 6  ;;  %v4491_v23 = vsel %vm1703_vm4, %v4459_v9, %v4475_v37  ;;  %v4779_v47 = vrot.slane %v4422_v21, 2 }
 0x326   : > { %v4537_v0 = vmax.f32 %v4422_v21, %v4507_v44  ;;  %v4619_v15 = vsel %vm1816_vm6, %v4555_v54, %v4571_v26  ;;  %v4538_v32 = vmax.f32 %v4423_v53, %v4491_v23  ;;  %v4603_v20 = vsel %vm1816_vm6, %v4571_v26, %v4587_v13 }
 0x327   : > { %v4715_v55 = vsel %vm1929_vm5, %v4683_v36, %v4699_v10  ;;  %v4795_v43 = vrot.slane %v4423_v53, 2  ;;  %v4811_v17 = vrot.slane %v4424_v7, 2  ;;  %v4170_v14 = vmax.f32 %v4042_v39, %v9496_v59 }
 0x328   : > { %v4649_v3 = vmax.f32 %v4537_v0, %v4619_v15  ;;  %v4171_v2 = vmax.f32 %v4043_v30, %v9498_v46  ;;  %v4650_v9 = vmax.f32 %v4538_v32, %v4603_v20  ;;  %v4731_v21 = vsel %vm1929_vm5, %v4667_v41, %v4683_v36  ;;  %v10345_v30 = vld [vmem:[#allocation29_spill] sm:$0xff] }
 0x329   : > { %v4172_v37 = vmax.f32 %v4044_v48, %v9505_v24  ;;  %v4297_v54 = vmax.f32 %v4169_v8, %v4357_v63  ;;  %v4843_v26 = vsel %vm2042_vm7, %v4779_v47, %v4795_v43  ;;  %v4298_v13 = vmax.f32 %v4170_v14, %v9533_v42  ;;  %v10342_v42 = vld [vmem:[#allocation6_spill] sm:$0xff]  ;;  %1035 = vst.msk [vmem:[#allocation3 + $0xd0] sm:$0xff] %vm1008_vm8, %v10345_v30  ;;  %v10346_v48 = vld [vmem:[#allocation31_spill] sm:$0xff] }
 0x32a   : > { %v4761_v44 = vmax.f32 %v4649_v3, %v4731_v21  ;;  %v4299_v53 = vmax.f32 %v4171_v2, %v4359_v49  ;;  %v4762_v10 = vmax.f32 %v4650_v9, %v4715_v55  ;;  %v4827_v46 = vsel %vm2042_vm7, %v4795_v43, %v4811_v17  ;;  %1029 = vst.msk [vmem:[#allocation3 + $0xa0] sm:$0xff] %vm1008_vm8, %v10342_v42  ;;  %v10343_v49 = vld [vmem:[#allocation43_spill] sm:$0xff] }
 0x32b   : > { %v4300_v7 = vmax.f32 %v4172_v37, %v9539_v4  ;;  %v9583_v59 = vmax.f32 %v4297_v54, %v9218_v52  ;;  %v9588_v24 = vmax.f32 %v4298_v13, %v9224_v51  ;;  %v10339_v52 = vld [vmem:[#allocation28_spill] sm:$0xff]  ;;  %v10340_v51 = vld [vmem:[#allocation23_spill] sm:$0xff]  ;;  %1032 = vst.msk [vmem:[#allocation3 + $0xb8] sm:$0xff] %vm1008_vm8, %v10343_v49  ;;  %1033 = vst.msk [vmem:[#allocation3 + $0xc0] sm:$0xff] %vm1008_vm8, %v10346_v48 }
 0x32c   : > { %v4873_v39 = vmax.f32 %v4761_v44, %v4843_v26  ;;  %v9591_v63 = vmax.f32 %v4299_v53, %v9226_v27  ;;  %1027 = vst.msk [vmem:[#allocation3 + $0x90] sm:$0xff] %vm1008_vm8, %v10339_v52  ;;  %1025 = vst.msk [vmem:[#allocation3 + $0x80] sm:$0xff] %vm1008_vm8, %v10340_v51  ;;  %v10341_v27 = vld [vmem:[#allocation27_spill] sm:$0xff]  ;;  %v10344_v4 = vld [vmem:[#allocation44_spill] sm:$0xff]  ;;  %v4874_v8 = vmax.f32 %v4762_v10, %v4827_v46 }
 0x32d   : > { %1031 = vst.msk [vmem:[#allocation3 + $0xb0] sm:$0xff] %vm1008_vm8, %v10341_v27  ;;  %1030 = vst.msk [vmem:[#allocation3 + $0xa8] sm:$0xff] %vm1008_vm8, %v10344_v4  ;;  %v4428_v41 = vmax.f32 %v4300_v7, %v9234_v31  ;;  %v4444_v36 = vrot.slane %v9583_v59, 7  ;;  %v4668_v23 = vrot.slane %v9583_v59, 6  ;;  %v4460_v0 = vrot.slane %v9588_v24, 7  ;;  %v2109_v26 = vld [vmem:[#allocation3 + $0x10] sm:$0xff] }
 0x32e   : > { %v4476_v1 = vrot.slane %v9591_v63, 7  ;;  %v4556_v15 = vrot.slane %v9588_v24, 1  ;;  %v4572_v25 = vrot.slane %v9591_v63, 1  ;;  %v4923_v47 = vpack.c.bf16 %v4874_v8, %v4873_v39  ;;  %v2107_v13 = vld [vmem:[#allocation3] sm:$0xff]  ;;  %v2110_v53 = vld [vmem:[#allocation3 + $0x18] sm:$0xff]  ;;  %v10349_v59 = vld [vmem:[#allocation33_spill] sm:$0xff] }
 0x32f   : > { %v4588_v57 = vrot.slane %v4428_v41, 1  ;;  %v4684_v32 = vrot.slane %v9588_v24, 6  ;;  %v4700_v16 = vrot.slane %v9591_v63, 6  ;;  %v4508_v20 = vsel %vm1703_vm4, %v4444_v36, %v4460_v0  ;;  %v10350_v39 = vld [vmem:[#allocation34_spill] sm:$0xff]  ;;  %v2114_v52 = vld [vmem:[#allocation3 + $0x38] sm:$0xff]  ;;  %v2112_v51 = vld [vmem:[#allocation3 + $0x28] sm:$0xff] }
 0x330   : > { %v4492_v31 = vsel %vm1703_vm4, %v4460_v0, %v4476_v1  ;;  %v4620_v55 = vsel %vm1816_vm6, %v4556_v15, %v4572_v25  ;;  %6001 = vmatprep.mubr.msk.bf16.mxu0 %vm226_vm3, %v4923_v47  ;;  %v4539_v43 = vmax.f32 %v9588_v24, %v4508_v20  ;;  %v4780_v14 = vrot.slane %v9588_v24, 2  ;;  %v2117_v27 = vld [vmem:[#allocation3 + $0x50] sm:$0xff]  ;;  %v10355_v30 = vld [vmem:[#allocation39_spill] sm:$0xff]  ;;  %v2115_v8 = vld [vmem:[#allocation3 + $0x40] sm:$0xff] }
 0x331   : > { %v4540_v3 = vmax.f32 %v9591_v63, %v4492_v31  ;;  %v4604_v17 = vsel %vm1816_vm6, %v4572_v25, %v4588_v57  ;;  %v4796_v2 = vrot.slane %v9591_v63, 2  ;;  %v4812_v9 = vrot.slane %v4428_v41, 2  ;;  %v2108_v63 = vld [vmem:[#allocation3 + $0x8] sm:$0xff]  ;;  %v10354_v49 = vld [vmem:[#allocation38_spill] sm:$0xff]  ;;  %v2118_v41 = vld [vmem:[#allocation3 + $0x58] sm:$0xff] }
 0x332   : > { %v4651_v21 = vmax.f32 %v4539_v43, %v4620_v55  ;;  %v4716_v54 = vsel %vm1929_vm5, %v4684_v32, %v4700_v16  ;;  %v4732_v44 = vsel %vm1929_vm5, %v4668_v23, %v4684_v32  ;;  %v2374_v46 = vadd.f32 %v10349_v59, %v2109_v26  ;;  %v2116_v36 = vld [vmem:[#allocation3 + $0x48] sm:$0xff]  ;;  %v10358_v25 = vld [vmem:[#allocation8_spill] sm:$0xff]  ;;  %v2121_v57 = vld [vmem:[#allocation3 + $0x70] sm:$0xff] }
 0x333   : > { %v4652_v37 = vmax.f32 %v4540_v3, %v4604_v17  ;;  %v4828_v10 = vsel %vm2042_vm7, %v4796_v2, %v4812_v9  ;;  %v4844_v7 = vsel %vm2042_vm7, %v4780_v14, %v4796_v2  ;;  %v2372_v24 = vadd.f32 %v10350_v39, %v2107_v13  ;;  %v10357_v1 = vld [vmem:[#allocation5_spill] sm:$0xff]  ;;  %v2119_v32 = vld [vmem:[#allocation3 + $0x60] sm:$0xff]  ;;  %v2122_v16 = vld [vmem:[#allocation3 + $0x78] sm:$0xff] }
 0x334   : > { %v4763_v38 = vmax.f32 %v4651_v21, %v4732_v44  ;;  %v2375_v22 = vadd.f32 %v10351_v60, %v2110_v53  ;;  %v2373_v56 = vadd.f32 %v10352_v35, %v2108_v63  ;;  %2406 = vst.msk [vmem:[#allocation3 + $0x10] sm:$0xff] %vm1008_vm8, %v2374_v46  ;;  %v2378_v42 = vadd.f32 %v10353_v34, %v2113_v6  ;;  %v10359_v31 = vld [vmem:[#allocation4_spill] sm:$0xff]  ;;  %v10360_v55 = vld [vmem:[#allocation11_spill] sm:$0xff]  ;;  %v10361_v3 = vld [vmem:[#allocation13_spill] sm:$0xff] }
 0x335   : > { %v4764_v62 = vmax.f32 %v4652_v37, %v4716_v54  ;;  %2404 = vst.msk [vmem:[#allocation3] sm:$0xff] %vm1008_vm8, %v2372_v24  ;;  %v2376_v4 = vadd.f32 %v10354_v49, %v2111_v19  ;;  %v2379_v48 = vadd.f32 %v10355_v30, %v2114_v52  ;;  %v2377_v28 = vadd.f32 %v10356_v33, %v2112_v51  ;;  %v10362_v14 = vld [vmem:[#allocation15_spill] sm:$0xff]  ;;  %v2120_v9 = vld [vmem:[#allocation3 + $0x68] sm:$0xff]  ;;  %v2125_v21 = vld [vmem:[#allocation3 + $0x90] sm:$0xff] }
 0x336   : > { %v4875_v23 = vmax.f32 %v4763_v38, %v4844_v7  ;;  %2407 = vst.msk [vmem:[#allocation3 + $0x18] sm:$0xff] %vm1008_vm8, %v2375_v22  ;;  %2405 = vst.msk [vmem:[#allocation3 + $0x8] sm:$0xff] %vm1008_vm8, %v2373_v56  ;;  %v2382_v15 = vadd.f32 %v10357_v1, %v2117_v27  ;;  %v2380_v47 = vadd.f32 %v10358_v25, %v2115_v8  ;;  %v2123_v37 = vld [vmem:[#allocation3 + $0x80] sm:$0xff]  ;;  %v10363_v44 = vld [vmem:[#allocation17_spill] sm:$0xff] }
 0x337   : > { %v4876_v0 = vmax.f32 %v4764_v62, %v4828_v10  ;;  %2410 = vst.msk [vmem:[#allocation3 + $0x30] sm:$0xff] %vm1008_vm8, %v2378_v42  ;;  %2408 = vst.msk [vmem:[#allocation3 + $0x20] sm:$0xff] %vm1008_vm8, %v2376_v4  ;;  %v2383_v20 = vadd.f32 %v10359_v31, %v2118_v41  ;;  %v2381_v43 = vadd.f32 %v10360_v55, %v2116_v36  ;;  %v10364_v13 = vld [vmem:[#allocation19_spill] sm:$0xff]  ;;  %v10365_v10 = vld [vmem:[#allocation20_spill] sm:$0xff]  ;;  %v9714_v24 = vpop.f32.mrb[64].mxu1 }
 0x338   : > { %2411 = vst.msk [vmem:[#allocation3 + $0x38] sm:$0xff] %vm1008_vm8, %v2379_v48  ;;  %2409 = vst.msk [vmem:[#allocation3 + $0x28] sm:$0xff] %vm1008_vm8, %v2377_v28  ;;  %v2386_v17 = vadd.f32 %v10361_v3, %v2121_v57  ;;  %v2384_v2 = vadd.f32 %v10362_v14, %v2119_v32  ;;  %v2387_v26 = vadd.f32 %v10363_v44, %v2122_v16  ;;  %v2126_v59 = vld [vmem:[#allocation3 + $0x98] sm:$0xff]  ;;  %v2124_v46 = vld [vmem:[#allocation3 + $0x88] sm:$0xff]  ;;  %v9724_v27 = vpop.f32.mrb[65].mxu1 }
 0x339   : > { %v4924_v54 = vpack.c.bf16 %v4876_v0, %v4875_v23  ;;  %2414 = vst.msk [vmem:[#allocation3 + $0x50] sm:$0xff] %vm1008_vm8, %v2382_v15  ;;  %2412 = vst.msk [vmem:[#allocation3 + $0x40] sm:$0xff] %vm1008_vm8, %v2380_v47  ;;  %v2385_v53 = vadd.f32 %v10364_v13, %v2120_v9  ;;  %v2390_v7 = vadd.f32 %v10365_v10, %v2125_v21  ;;  %v2129_v39 = vld [vmem:[#allocation3 + $0xb0] sm:$0xff]  ;;  %v10366_v63 = vld [vmem:[#allocation21_spill] sm:$0xff]  ;;  %v9733_v41 = vpop.f32.mrb[66].mxu1 }
 0x33a   : > { %2415 = vst.msk [vmem:[#allocation3 + $0x58] sm:$0xff] %vm1008_vm8, %v2383_v20  ;;  %2413 = vst.msk [vmem:[#allocation3 + $0x48] sm:$0xff] %vm1008_vm8, %v2381_v43  ;;  %v2388_v6 = vadd.f32 %v10366_v63, %v2123_v37  ;;  %v10367_v19 = vld [vmem:[#allocation22_spill] sm:$0xff]  ;;  %v10369_v22 = vld [vmem:[#allocation32_spill] sm:$0xff]  ;;  %v9742_v16 = vpop.f32.mrb[67].mxu1 }
 0x33b   : > { %2418 = vst.msk [vmem:[#allocation3 + $0x70] sm:$0xff] %vm1008_vm8, %v2386_v17  ;;  %2416 = vst.msk [vmem:[#allocation3 + $0x60] sm:$0xff] %vm1008_vm8, %v2384_v2  ;;  %v2391_v38 = vadd.f32 %v10367_v19, %v2126_v59  ;;  %v10368_v62 = vld [vmem:[#allocation26_spill] sm:$0xff]  ;;  %v2394_v35 = vadd.f32 %v10369_v22, %v2129_v39  ;;  %v2127_v56 = vld [vmem:[#allocation3 + $0xa0] sm:$0xff]  ;;  %6002 = vmatmul.mubr.msk.bf16.gmra.mrb[76].mxu0 %vm226_vm3, %v4924_v54 }
 0x33c   : > { %v2389_v60 = vadd.f32 %v10368_v62, %v2124_v46  ;;  %v2130_v52 = vld [vmem:[#allocation3 + $0xb8] sm:$0xff]  ;;  %v2128_v51 = vld [vmem:[#allocation3 + $0xa8] sm:$0xff]  ;;  %2419 = vst.msk [vmem:[#allocation3 + $0x78] sm:$0xff] %vm1008_vm8, %v2387_v26  ;;  %2417 = vst.msk [vmem:[#allocation3 + $0x68] sm:$0xff] %vm1008_vm8, %v2385_v53 }
 0x33d   : > { %2422 = vst.msk [vmem:[#allocation3 + $0x90] sm:$0xff] %vm1008_vm8, %v2390_v7  ;;  %v10370_v34 = vld [vmem:[#allocation42_spill] sm:$0xff]  ;;  %v10372_v30 = vld [vmem:[#allocation24_spill] sm:$0xff]  ;;  %v2134_v8 = vld [vmem:[#allocation3 + $0xd8] sm:$0xff] }
 0x33e   : > { %v2392_v42 = vadd.f32 %v10370_v34, %v2127_v56  ;;  %v10371_v49 = vld [vmem:[#allocation30_spill] sm:$0xff]  ;;  %v2393_v48 = vadd.f32 %v10372_v30, %v2128_v51  ;;  %v2131_v28 = vld [vmem:[#allocation3 + $0xc0] sm:$0xff]  ;;  %2420 = vst.msk [vmem:[#allocation3 + $0x80] sm:$0xff] %vm1008_vm8, %v2388_v6  ;;  %2423 = vst.msk [vmem:[#allocation3 + $0x98] sm:$0xff] %vm1008_vm8, %v2391_v38 }
 0x33f   : > { %v2395_v4 = vadd.f32 %v10371_v49, %v2130_v52  ;;  %v2133_v33 = vld [vmem:[#allocation3 + $0xd0] sm:$0xff]  ;;  %2421 = vst.msk [vmem:[#allocation3 + $0x88] sm:$0xff] %vm1008_vm8, %v2389_v60  ;;  %2426 = vst.msk [vmem:[#allocation3 + $0xb0] sm:$0xff] %vm1008_vm8, %v2394_v35  ;;  %v10373_v36 = vld [vmem:[#allocation25_spill] sm:$0xff] }
 0x340   : > { %v2398_v23 = vadd.f32 %v10373_v36, %v2133_v33  ;;  %v10374_v0 = vld [vmem:[#allocation45_spill] sm:$0xff]  ;;  %v10375_v15 = vld [vmem:[#allocation47_spill] sm:$0xff]  ;;  %v2137_v57 = vld [vmem:[#allocation3 + $0xf0] sm:$0xff]  ;;  %2424 = vst.msk [vmem:[#allocation3 + $0xa0] sm:$0xff] %vm1008_vm8, %v2392_v42 }
 0x341   : > { %v2396_v1 = vadd.f32 %v10374_v0, %v2131_v28  ;;  %v2399_v25 = vadd.f32 %v10375_v15, %v2134_v8  ;;  %v2132_v47 = vld [vmem:[#allocation3 + $0xc8] sm:$0xff]  ;;  %v2135_v32 = vld [vmem:[#allocation3 + $0xe0] sm:$0xff]  ;;  %v3494_v31 = vld [vmem:[#allocation3 + $0x10] sm:$0xff]  ;;  %2427 = vst.msk [vmem:[#allocation3 + $0xb8] sm:$0xff] %vm1008_vm8, %v2395_v4  ;;  %v2402_v3 = vadd.f32 %v9364_v58, %v2137_v57 }
 0x342   : > { %v3492_v20 = vld [vmem:[#allocation3] sm:$0xff]  ;;  %2425 = vst.msk [vmem:[#allocation3 + $0xa8] sm:$0xff] %vm1008_vm8, %v2393_v48  ;;  %v10376_v55 = vld [vmem:[#allocation49_spill] sm:$0xff]  ;;  %v2400_v17 = vadd.f32 %v9366_v45, %v2135_v32  ;;  %v2138_v14 = vld [vmem:[#allocation3 + $0xf8] sm:$0xff]  ;;  %v3759_v2 = vadd.f32 %v9228_v61, %v3494_v31 }
 0x343   : > { %v2397_v43 = vadd.f32 %v10376_v55, %v2132_v47  ;;  %v3757_v9 = vadd.f32 %v9238_v29, %v3492_v20  ;;  %v3495_v21 = vld [vmem:[#allocation3 + $0x18] sm:$0xff]  ;;  %v3493_v37 = vld [vmem:[#allocation3 + $0x8] sm:$0xff]  ;;  %2430 = vst.msk [vmem:[#allocation3 + $0xd0] sm:$0xff] %vm1008_vm8, %v2398_v23  ;;  %2428 = vst.msk [vmem:[#allocation3 + $0xc0] sm:$0xff] %vm1008_vm8, %v2396_v1  ;;  %v2403_v54 = vadd.f32 %v9371_v12, %v2138_v14 }
 0x344   : > { %2431 = vst.msk [vmem:[#allocation3 + $0xd8] sm:$0xff] %vm1008_vm8, %v2399_v25  ;;  %v2136_v44 = vld [vmem:[#allocation3 + $0xe8] sm:$0xff]  ;;  %v10377_v26 = vld [vmem:[#allocation50_spill] sm:$0xff]  ;;  %v10378_v13 = vld [vmem:[#allocation51_spill] sm:$0xff] }
 0x345   : > { %v3760_v58 = vadd.f32 %v10377_v26, %v3495_v21  ;;  %v3758_v45 = vadd.f32 %v10378_v13, %v3493_v37  ;;  %v3498_v53 = vld [vmem:[#allocation3 + $0x30] sm:$0xff]  ;;  %v3496_v10 = vld [vmem:[#allocation3 + $0x20] sm:$0xff]  ;;  %v3499_v61 = vld [vmem:[#allocation3 + $0x38] sm:$0xff]  ;;  %2429 = vst.msk [vmem:[#allocation3 + $0xc8] sm:$0xff] %vm1008_vm8, %v2397_v43 }
 0x346   : > { %2434 = vst.msk [vmem:[#allocation3 + $0xf0] sm:$0xff] %vm1008_vm8, %v2402_v3  ;;  %2432 = vst.msk [vmem:[#allocation3 + $0xe0] sm:$0xff] %vm1008_vm8, %v2400_v17  ;;  %v10379_v29 = vld [vmem:[#allocation60_spill] sm:$0xff]  ;;  %v10381_v46 = vld [vmem:[#allocation53_spill] sm:$0xff] }
 0x347   : > { %v2401_v7 = vadd.f32 %v10379_v29, %v2136_v44  ;;  %3791 = vst.msk [vmem:[#allocation3 + $0x10] sm:$0xff] %vm1008_vm8, %v3759_v2  ;;  %3789 = vst.msk [vmem:[#allocation3] sm:$0xff] %vm1008_vm8, %v3757_v9  ;;  %v10380_v12 = vld [vmem:[#allocation52_spill] sm:$0xff]  ;;  %v3761_v39 = vadd.f32 %v10381_v46, %v3496_v10  ;;  %v10382_v63 = vld [vmem:[#allocation54_spill] sm:$0xff] }
 0x348   : > { %v3763_v59 = vadd.f32 %v10380_v12, %v3498_v53  ;;  %v3764_v6 = vadd.f32 %v10382_v63, %v3499_v61  ;;  %v3497_v19 = vld [vmem:[#allocation3 + $0x28] sm:$0xff]  ;;  %v3502_v38 = vld [vmem:[#allocation3 + $0x50] sm:$0xff]  ;;  %v3500_v62 = vld [vmem:[#allocation3 + $0x40] sm:$0xff]  ;;  %2435 = vst.msk [vmem:[#allocation3 + $0xf8] sm:$0xff] %vm1008_vm8, %v2403_v54 }
 0x349   : > { %3792 = vst.msk [vmem:[#allocation3 + $0x18] sm:$0xff] %vm1008_vm8, %v3760_v58  ;;  %3790 = vst.msk [vmem:[#allocation3 + $0x8] sm:$0xff] %vm1008_vm8, %v3758_v45  ;;  %v10383_v60 = vld [vmem:[#allocation55_spill] sm:$0xff]  ;;  %v10384_v35 = vld [vmem:[#allocation56_spill] sm:$0xff] }
 0x34a   : > { %v3762_v22 = vadd.f32 %v10383_v60, %v3497_v19  ;;  %v3767_v56 = vadd.f32 %v10384_v35, %v3502_v38  ;;  %v10385_v52 = vld [vmem:[#allocation57_spill] sm:$0xff]  ;;  %v3503_v34 = vld [vmem:[#allocation3 + $0x58] sm:$0xff]  ;;  %v3506_v49 = vld [vmem:[#allocation3 + $0x70] sm:$0xff]  ;;  %2433 = vst.msk [vmem:[#allocation3 + $0xe8] sm:$0xff] %vm1008_vm8, %v2401_v7 }
 0x34b   : > { %v3765_v51 = vadd.f32 %v10385_v52, %v3500_v62  ;;  %v3501_v42 = vld [vmem:[#allocation3 + $0x48] sm:$0xff]  ;;  %3795 = vst.msk [vmem:[#allocation3 + $0x30] sm:$0xff] %vm1008_vm8, %v3763_v59  ;;  %3793 = vst.msk [vmem:[#allocation3 + $0x20] sm:$0xff] %vm1008_vm8, %v3761_v39  ;;  %v10386_v4 = vld [vmem:[#allocation58_spill] sm:$0xff] }
 0x34c   : > { %3796 = vst.msk [vmem:[#allocation3 + $0x38] sm:$0xff] %vm1008_vm8, %v3764_v6  ;;  %v3768_v30 = vadd.f32 %v10386_v4, %v3503_v34  ;;  %v10387_v48 = vld [vmem:[#allocation59_spill] sm:$0xff]  ;;  %v10388_v28 = vld [vmem:[#allocation61_spill] sm:$0xff]  ;;  %v3504_v36 = vld [vmem:[#allocation3 + $0x60] sm:$0xff] }
 0x34d   : > { %v3766_v33 = vadd.f32 %v10387_v48, %v3501_v42  ;;  %v3771_v8 = vadd.f32 %v10388_v28, %v3506_v49  ;;  %v3507_v23 = vld [vmem:[#allocation3 + $0x78] sm:$0xff]  ;;  %v3505_v0 = vld [vmem:[#allocation3 + $0x68] sm:$0xff]  ;;  %3794 = vst.msk [vmem:[#allocation3 + $0x28] sm:$0xff] %vm1008_vm8, %v3762_v22  ;;  %3799 = vst.msk [vmem:[#allocation3 + $0x50] sm:$0xff] %vm1008_vm8, %v3767_v56 }
 0x34e   : > { %3797 = vst.msk [vmem:[#allocation3 + $0x40] sm:$0xff] %vm1008_vm8, %v3765_v51  ;;  %v10389_v1 = vld [vmem:[#allocation62_spill] sm:$0xff]  ;;  %v10390_v25 = vld [vmem:[#allocation63_spill] sm:$0xff]  ;;  %v3770_v57 = vadd.f32 %v9474_v40, %v3505_v0  ;;  %v3508_v31 = vld [vmem:[#allocation3 + $0x80] sm:$0xff]  ;;  %v5979_v37 = vpop.f32.mrb[52].mxu0 }
 0x34f   : > { %v3769_v15 = vadd.f32 %v10389_v1, %v3504_v36  ;;  %v3772_v47 = vadd.f32 %v10390_v25, %v3507_v23  ;;  %v3510_v32 = vld [vmem:[#allocation3 + $0x90] sm:$0xff]  ;;  %v3511_v20 = vld [vmem:[#allocation3 + $0x98] sm:$0xff]  ;;  %3800 = vst.msk [vmem:[#allocation3 + $0x58] sm:$0xff] %vm1008_vm8, %v3768_v30  ;;  %3798 = vst.msk [vmem:[#allocation3 + $0x48] sm:$0xff] %vm1008_vm8, %v3766_v33  ;;  %v3773_v43 = vadd.f32 %v9724_v27, %v3508_v31 }
 0x350   : > { %3803 = vst.msk [vmem:[#allocation3 + $0x70] sm:$0xff] %vm1008_vm8, %v3771_v8  ;;  %v3775_v55 = vadd.f32 %v9714_v24, %v3510_v32  ;;  %v3776_v3 = vadd.f32 %v9733_v41, %v3511_v20  ;;  %v3509_v17 = vld [vmem:[#allocation3 + $0x88] sm:$0xff]  ;;  %3802 = vst.msk [vmem:[#allocation3 + $0x68] sm:$0xff] %vm1008_vm8, %v3770_v57  ;;  %v4879_v24 = vld [vmem:[#allocation3 + $0x10] sm:$0xff] }
 0x351   : > { %3801 = vst.msk [vmem:[#allocation3 + $0x60] sm:$0xff] %vm1008_vm8, %v3769_v15  ;;  %3804 = vst.msk [vmem:[#allocation3 + $0x78] sm:$0xff] %vm1008_vm8, %v3772_v47  ;;  %v3774_v40 = vadd.f32 %v9742_v16, %v3509_v17  ;;  %v4877_v14 = vld [vmem:[#allocation3] sm:$0xff]  ;;  %v5144_v27 = vadd.f32 %v9554_v5, %v4879_v24  ;;  %v4880_v2 = vld [vmem:[#allocation3 + $0x18] sm:$0xff] }
 0x352   : > { %3807 = vst.msk [vmem:[#allocation3 + $0x90] sm:$0xff] %vm1008_vm8, %v3775_v55  ;;  %3805 = vst.msk [vmem:[#allocation3 + $0x80] sm:$0xff] %vm1008_vm8, %v3773_v43  ;;  %v5142_v41 = vadd.f32 %v9556_v18, %v4877_v14  ;;  %v4878_v9 = vld [vmem:[#allocation3 + $0x8] sm:$0xff]  ;;  %v5145_v21 = vadd.f32 %v9561_v50, %v4880_v2  ;;  %v9811_v5 = vld [vmem:[%s10027_s4] ss:$0 sm:$0xff] }
 0x353   : > { %3808 = vst.msk [vmem:[#allocation3 + $0x98] sm:$0xff] %vm1008_vm8, %v3776_v3  ;;  %3806 = vst.msk [vmem:[#allocation3 + $0x88] sm:$0xff] %vm1008_vm8, %v3774_v40  ;;  %v5143_v16 = vadd.f32 %v9567_v11, %v4878_v9  ;;  %v4883_v18 = vld [vmem:[#allocation3 + $0x30] sm:$0xff]  ;;  %v4881_v26 = vld [vmem:[#allocation3 + $0x20] sm:$0xff]  ;;  %v5031_v11 = vpop.f32.mrb[53].mxu0 }
 0x354   : > { %5176 = vst.msk [vmem:[#allocation3 + $0x10] sm:$0xff] %vm1008_vm8, %v5144_v27  ;;  %5174 = vst.msk [vmem:[#allocation3] sm:$0xff] %vm1008_vm8, %v5142_v41  ;;  %v5148_v50 = vadd.f32 %v5979_v37, %v4883_v18  ;;  %v5146_v10 = vadd.f32 %v5031_v11, %v4881_v26  ;;  %v4884_v61 = vld [vmem:[#allocation3 + $0x38] sm:$0xff]  ;;  %v5980_v29 = vpop.f32.mrb[54].mxu0  ;;  %v4882_v46 = vld [vmem:[#allocation3 + $0x28] sm:$0xff] }
 0x355   : > { %5177 = vst.msk [vmem:[#allocation3 + $0x18] sm:$0xff] %vm1008_vm8, %v5145_v21  ;;  %5175 = vst.msk [vmem:[#allocation3 + $0x8] sm:$0xff] %vm1008_vm8, %v5143_v16  ;;  %v5149_v59 = vadd.f32 %v5980_v29, %v4884_v61  ;;  %v5034_v39 = vpop.f32.mrb[55].mxu0  ;;  %v3514_v25 = vld [vmem:[#allocation3 + $0xb0] sm:$0xff]  ;;  %v3512_v32 = vld [vmem:[#allocation3 + $0xa0] sm:$0xff] }
 0x356   : > { %5180 = vst.msk [vmem:[#allocation3 + $0x30] sm:$0xff] %vm1008_vm8, %v5148_v50  ;;  %5178 = vst.msk [vmem:[#allocation3 + $0x20] sm:$0xff] %vm1008_vm8, %v5146_v10  ;;  %v5147_v19 = vadd.f32 %v5034_v39, %v4882_v46  ;;  %v3515_v55 = vld [vmem:[#allocation3 + $0xb8] sm:$0xff]  ;;  %v3513_v40 = vld [vmem:[#allocation3 + $0xa8] sm:$0xff] }
 0x357   : > { %5181 = vst.msk [vmem:[#allocation3 + $0x38] sm:$0xff] %vm1008_vm8, %v5149_v59  ;;  %v4887_v46 = vld [vmem:[#allocation3 + $0x50] sm:$0xff] }
 0x358   : > { %5179 = vst.msk [vmem:[#allocation3 + $0x28] sm:$0xff] %vm1008_vm8, %v5147_v19 }
 0x35b   : > { %v5208_v54 = vld [vmem:[#allocation3 + $0x10] sm:$0xff]  ;;  %v5206_v44 = vld [vmem:[#allocation3] sm:$0xff] }
 0x35c   : > { %v9814_v58 = vadd.f32 %v9811_v5, %v5208_v54  ;;  %v9817_v13 = vadd.f32 %v9811_v5, %v5206_v44  ;;  %v5209_v45 = vld [vmem:[#allocation3 + $0x18] sm:$0xff]  ;;  %v5207_v53 = vld [vmem:[#allocation3 + $0x8] sm:$0xff] }
 0x35d   : > { %v9820_v7 = vadd.f32 %v9811_v5, %v5209_v45  ;;  %v9823_v12 = vadd.f32 %v9811_v5, %v5207_v53  ;;  %v5212_v60 = vld [vmem:[#allocation3 + $0x30] sm:$0xff]  ;;  %v5210_v35 = vld [vmem:[#allocation3 + $0x20] sm:$0xff] }
 0x35e   : > { %v5716_v63 = vmul.f32 -1.442695, %v9814_v58  ;;  %v5714_v6 = vmul.f32 -1.442695, %v9817_v13  ;;  %v9834_v22 = vadd.f32 %v9811_v5, %v5212_v60  ;;  %v9837_v56 = vadd.f32 %v9811_v5, %v5210_v35  ;;  %v5213_v52 = vld [vmem:[#allocation3 + $0x38] sm:$0xff]  ;;  %v4886_v35 = vld [vmem:[#allocation3 + $0x48] sm:$0xff] }
 0x35f   : > { %v5717_v38 = vmul.f32 -1.442695, %v9820_v7  ;;  %v5715_v62 = vmul.f32 -1.442695, %v9823_v12  ;;  %v9841_v34 = vadd.f32 %v9811_v5, %v5213_v52  ;;  %v5211_v42 = vld [vmem:[#allocation3 + $0x28] sm:$0xff] }
 0x360   : > { %6153 = vpow2.f32 %v5716_v63  ;;  %v5720_v51 = vmul.f32 -1.442695, %v9834_v22  ;;  %v5718_v49 = vmul.f32 -1.442695, %v9837_v56  ;;  %v9845_v4 = vadd.f32 %v9811_v5, %v5211_v42 }
 0x361   : > { %6155 = vpow2.f32 %v5714_v6  ;;  %v5721_v30 = vmul.f32 -1.442695, %v9841_v34  ;;  %v4885_v6 = vld [vmem:[#allocation3 + $0x40] sm:$0xff] }
 0x362   : > { %6157 = vpow2.f32 %v5717_v38  ;;  %v5719_v33 = vmul.f32 -1.442695, %v9845_v4 }
 0x363   : > { %6159 = vpow2.f32 %v5715_v62  ;;  %v4888_v62 = vld [vmem:[#allocation3 + $0x58] sm:$0xff] }
 0x364   : > { %6161 = vpow2.f32 %v5720_v51  ;;  %v5961_v47 = vpop.f32.mrb[68].mxu1 }
 0x365   : > { %6163 = vpow2.f32 %v5718_v49  ;;  %v3779_v57 = vadd.f32 %v5961_v47, %v3514_v25  ;;  %v3710_v31 = vpop.f32.mrb[69].mxu1  ;;  %v3516_v25 = vld [vmem:[#allocation3 + $0xc0] sm:$0xff] }
 0x366   : > { %6165 = vpow2.f32 %v5721_v30  ;;  %v3777_v20 = vadd.f32 %v3710_v31, %v3512_v32  ;;  %v5962_v43 = vpop.f32.mrb[70].mxu1  ;;  %v3519_v32 = vld [vmem:[#allocation3 + $0xd8] sm:$0xff] }
 0x367   : > { %6167 = vpow2.f32 %v5719_v33  ;;  %3811 = vst.msk [vmem:[#allocation3 + $0xb0] sm:$0xff] %vm1008_vm8, %v3779_v57  ;;  %v3780_v17 = vadd.f32 %v5962_v43, %v3515_v55  ;;  %v3713_v24 = vpop.f32.mrb[71].mxu1  ;;  %v3517_v43 = vld [vmem:[#allocation3 + $0xc8] sm:$0xff] }
 0x368   : > { %3809 = vst.msk [vmem:[#allocation3 + $0xa0] sm:$0xff] %vm1008_vm8, %v3777_v20  ;;  %v3778_v41 = vadd.f32 %v3713_v24, %v3513_v40 }
 0x369   : > { %3812 = vst.msk [vmem:[#allocation3 + $0xb8] sm:$0xff] %vm1008_vm8, %v3780_v17 }
 0x36a   : > { %v6154_v48 = vpop.eup %6153  ;;  %3810 = vst.msk [vmem:[#allocation3 + $0xa8] sm:$0xff] %vm1008_vm8, %v3778_v41 }
 0x36b   : > { %v6156_v28 = vpop.eup %6155  ;;  %v5375_v8 = vadd.f32 1.0, %v6154_v48 }
 0x36c   : > { %v6158_v36 = vpop.eup %6157  ;;  %v5373_v23 = vadd.f32 1.0, %v6156_v28 }
 0x36d   : > { %v6160_v0 = vpop.eup %6159  ;;  %6169 = vrcp.f32 %v5375_v8  ;;  %v5376_v1 = vadd.f32 1.0, %v6158_v36 }
 0x36e   : > { %6171 = vrcp.f32 %v5373_v23  ;;  %v5374_v15 = vadd.f32 1.0, %v6160_v0  ;;  %v6162_v3 = vpop.eup %6161  ;;  %v3518_v0 = vld [vmem:[#allocation3 + $0xd0] sm:$0xff] }
 0x36f   : > { %6173 = vrcp.f32 %v5376_v1  ;;  %v6164_v14 = vpop.eup %6163  ;;  %v5379_v27 = vadd.f32 1.0, %v6162_v3 }
 0x370   : > { %6175 = vrcp.f32 %v5374_v15  ;;  %v6166_v2 = vpop.eup %6165  ;;  %v5377_v9 = vadd.f32 1.0, %v6164_v14 }
 0x371   : > { %v6168_v21 = vpop.eup %6167  ;;  %6177 = vrcp.f32 %v5379_v27  ;;  %v5380_v16 = vadd.f32 1.0, %v6166_v2 }
 0x372   : > { %6179 = vrcp.f32 %v5377_v9  ;;  %v5378_v37 = vadd.f32 1.0, %v6168_v21 }
 0x373   : > { %6181 = vrcp.f32 %v5380_v16 }
 0x374   : > { %6183 = vrcp.f32 %v5378_v37 }
 0x377   : > { %v6170_v18 = vpop.eup %6169 }
 0x378   : > { %v6172_v54 = vpop.eup %6171  ;;  %v5471_v44 = vmul.f32 %v6170_v18, %v9814_v58 }
 0x379   : > { %v6174_v50 = vpop.eup %6173  ;;  %v5469_v26 = vmul.f32 %v6172_v54, %v9817_v13 }
 0x37a   : > { %v6176_v11 = vpop.eup %6175  ;;  %5503 = vst.msk [vmem:[%s9858_s15 + $0x10] sm:$0xff] %vm1008_vm8, %v5471_v44  ;;  %v5472_v45 = vmul.f32 %v6174_v50, %v9820_v7 }
 0x37b   : > { %5501 = vst.msk [vmem:[%s9858_s15] sm:$0xff] %vm1008_vm8, %v5469_v26  ;;  %v5470_v53 = vmul.f32 %v6176_v11, %v9823_v12  ;;  %v6178_v58 = vpop.eup %6177  ;;  %v5983_v39 = vpop.f32.mrb[56].mxu0  ;;  %v4891_v11 = vld [vmem:[#allocation3 + $0x70] sm:$0xff] }
 0x37c   : > { %5504 = vst.msk [vmem:[%s9858_s15 + $0x18] sm:$0xff] %vm1008_vm8, %v5472_v45  ;;  %v6180_v10 = vpop.eup %6179  ;;  %v5475_v13 = vmul.f32 %v6178_v58, %v9834_v22  ;;  %v5152_v63 = vadd.f32 %v5983_v39, %v4887_v46  ;;  %v5047_v19 = vpop.f32.mrb[57].mxu0  ;;  %v4889_v58 = vld [vmem:[#allocation3 + $0x60] sm:$0xff] }
 0x37d   : > { %5502 = vst.msk [vmem:[%s9858_s15 + $0x8] sm:$0xff] %vm1008_vm8, %v5470_v53  ;;  %v6182_v61 = vpop.eup %6181  ;;  %v5473_v29 = vmul.f32 %v6180_v10, %v9837_v56  ;;  %v5150_v38 = vadd.f32 %v5047_v19, %v4885_v6  ;;  %v5984_v60 = vpop.f32.mrb[58].mxu0 }
 0x37e   : > { %v6184_v59 = vpop.eup %6183  ;;  %5507 = vst.msk [vmem:[%s9858_s15 + $0x30] sm:$0xff] %vm1008_vm8, %v5475_v13  ;;  %v5476_v7 = vmul.f32 %v6182_v61, %v9841_v34  ;;  %5184 = vst.msk [vmem:[#allocation3 + $0x50] sm:$0xff] %vm1008_vm8, %v5152_v63  ;;  %v5153_v22 = vadd.f32 %v5984_v60, %v4888_v62  ;;  %v5050_v56 = vpop.f32.mrb[59].mxu0  ;;  %v4892_v61 = vld [vmem:[#allocation3 + $0x78] sm:$0xff] }
 0x37f   : > { %5505 = vst.msk [vmem:[%s9858_s15 + $0x20] sm:$0xff] %vm1008_vm8, %v5473_v29  ;;  %v5474_v12 = vmul.f32 %v6184_v59, %v9845_v4  ;;  %5182 = vst.msk [vmem:[#allocation3 + $0x40] sm:$0xff] %vm1008_vm8, %v5150_v38  ;;  %v5151_v52 = vadd.f32 %v5050_v56, %v4886_v35 }
 0x380   : > { %5508 = vst.msk [vmem:[%s9858_s15 + $0x38] sm:$0xff] %vm1008_vm8, %v5476_v7  ;;  %5185 = vst.msk [vmem:[#allocation3 + $0x58] sm:$0xff] %vm1008_vm8, %v5153_v22  ;;  %v4890_v7 = vld [vmem:[#allocation3 + $0x68] sm:$0xff] }
 0x381   : > { %5506 = vst.msk [vmem:[%s9858_s15 + $0x28] sm:$0xff] %vm1008_vm8, %v5474_v12  ;;  %5183 = vst.msk [vmem:[#allocation3 + $0x48] sm:$0xff] %vm1008_vm8, %v5151_v52 }
 0x385   : > { %v5216_v51 = vld [vmem:[#allocation3 + $0x50] sm:$0xff] }
 0x386   : > { %v5255_v34 = vadd.f32 %v9811_v5, %v5216_v51  ;;  %v5214_v42 = vld [vmem:[#allocation3 + $0x40] sm:$0xff] }
 0x387   : > { %v5253_v49 = vadd.f32 %v9811_v5, %v5214_v42  ;;  %v5217_v4 = vld [vmem:[#allocation3 + $0x58] sm:$0xff] }
 0x388   : > { %v5724_v30 = vmul.f32 -1.442695, %v5255_v34  ;;  %v5256_v48 = vadd.f32 %v9811_v5, %v5217_v4  ;;  %v5215_v33 = vld [vmem:[#allocation3 + $0x48] sm:$0xff]  ;;  %v3520_v4 = vld [vmem:[#allocation3 + $0xe0] sm:$0xff] }
 0x389   : > { %v5722_v28 = vmul.f32 -1.442695, %v5253_v49  ;;  %v5254_v8 = vadd.f32 %v9811_v5, %v5215_v33  ;;  %v3523_v33 = vld [vmem:[#allocation3 + $0xf8] sm:$0xff] }
 0x38a   : > { %6185 = vpow2.f32 %v5724_v30  ;;  %v5725_v36 = vmul.f32 -1.442695, %v5256_v48 }
 0x38b   : > { %6187 = vpow2.f32 %v5722_v28  ;;  %v5723_v23 = vmul.f32 -1.442695, %v5254_v8 }
 0x38c   : > { %6189 = vpow2.f32 %v5725_v36 }
 0x38d   : > { %6191 = vpow2.f32 %v5723_v23  ;;  %v3521_v23 = vld [vmem:[#allocation3 + $0xe8] sm:$0xff] }
 0x391   : > { %v5965_v1 = vpop.f32.mrb[72].mxu1 }
 0x392   : > { %v3783_v15 = vadd.f32 %v5965_v1, %v3518_v0  ;;  %v3726_v47 = vpop.f32.mrb[73].mxu1 }
 0x393   : > { %v3781_v57 = vadd.f32 %v3726_v47, %v3516_v25  ;;  %v5966_v31 = vpop.f32.mrb[74].mxu1 }
 0x394   : > { %v6186_v20 = vpop.eup %6185  ;;  %3815 = vst.msk [vmem:[#allocation3 + $0xd0] sm:$0xff] %vm1008_vm8, %v3783_v15  ;;  %v3784_v55 = vadd.f32 %v5966_v31, %v3519_v32  ;;  %v3729_v3 = vpop.f32.mrb[75].mxu1 }
 0x395   : > { %v6188_v17 = vpop.eup %6187  ;;  %v5383_v40 = vadd.f32 1.0, %v6186_v20  ;;  %3813 = vst.msk [vmem:[#allocation3 + $0xc0] sm:$0xff] %vm1008_vm8, %v3781_v57  ;;  %v3782_v24 = vadd.f32 %v3729_v3, %v3517_v43 }
 0x396   : > { %v6190_v14 = vpop.eup %6189  ;;  %v5381_v27 = vadd.f32 1.0, %v6188_v17  ;;  %3816 = vst.msk [vmem:[#allocation3 + $0xd8] sm:$0xff] %vm1008_vm8, %v3784_v55  ;;  %v4895_v55 = vld [vmem:[#allocation3 + $0x90] sm:$0xff]  ;;  %v4893_v17 = vld [vmem:[#allocation3 + $0x80] sm:$0xff] }
 0x397   : > { %v6192_v41 = vpop.eup %6191  ;;  %6193 = vrcp.f32 %v5383_v40  ;;  %v5384_v2 = vadd.f32 1.0, %v6190_v14  ;;  %3814 = vst.msk [vmem:[#allocation3 + $0xc8] sm:$0xff] %vm1008_vm8, %v3782_v24  ;;  %v4896_v14 = vld [vmem:[#allocation3 + $0x98] sm:$0xff] }
 0x398   : > { %6195 = vrcp.f32 %v5381_v27  ;;  %v5382_v9 = vadd.f32 1.0, %v6192_v41 }
 0x399   : > { %6197 = vrcp.f32 %v5384_v2  ;;  %v4894_v2 = vld [vmem:[#allocation3 + $0x88] sm:$0xff] }
 0x39a   : > { %6199 = vrcp.f32 %v5382_v9 }
 0x3a1   : > { %v6194_v21 = vpop.eup %6193 }
 0x3a2   : > { %v6196_v16 = vpop.eup %6195  ;;  %v5479_v18 = vmul.f32 %v6194_v21, %v5255_v34  ;;  %v3522_v34 = vld [vmem:[#allocation3 + $0xf0] sm:$0xff] }
 0x3a3   : > { %v6198_v37 = vpop.eup %6197  ;;  %v5477_v54 = vmul.f32 %v6196_v16, %v5253_v49 }
 0x3a4   : > { %v6200_v44 = vpop.eup %6199  ;;  %5511 = vst.msk [vmem:[%s9858_s15 + $0x50] sm:$0xff] %vm1008_vm8, %v5479_v18  ;;  %v5480_v50 = vmul.f32 %v6198_v37, %v5256_v48 }
 0x3a5   : > { %5509 = vst.msk [vmem:[%s9858_s15 + $0x40] sm:$0xff] %vm1008_vm8, %v5477_v54  ;;  %v5478_v26 = vmul.f32 %v6200_v44, %v5254_v8 }
 0x3a6   : > { %5512 = vst.msk [vmem:[%s9858_s15 + $0x58] sm:$0xff] %vm1008_vm8, %v5480_v50 }
 0x3a7   : > { %5510 = vst.msk [vmem:[%s9858_s15 + $0x48] sm:$0xff] %vm1008_vm8, %v5478_v26 }
 0x3a9   : > { %v5987_v45 = vpop.f32.mrb[60].mxu0 }
 0x3aa   : > { %v5156_v53 = vadd.f32 %v5987_v45, %v4891_v11  ;;  %v5063_v10 = vpop.f32.mrb[61].mxu0 }
 0x3ab   : > { %v5154_v13 = vadd.f32 %v5063_v10, %v4889_v58  ;;  %v5988_v29 = vpop.f32.mrb[62].mxu0 }
 0x3ac   : > { %5188 = vst.msk [vmem:[#allocation3 + $0x70] sm:$0xff] %vm1008_vm8, %v5156_v53  ;;  %v5157_v59 = vadd.f32 %v5988_v29, %v4892_v61  ;;  %v5066_v12 = vpop.f32.mrb[63].mxu0 }
 0x3ad   : > { %5186 = vst.msk [vmem:[#allocation3 + $0x60] sm:$0xff] %vm1008_vm8, %v5154_v13  ;;  %v5155_v46 = vadd.f32 %v5066_v12, %v4890_v7 }
 0x3ae   : > { %5189 = vst.msk [vmem:[#allocation3 + $0x78] sm:$0xff] %vm1008_vm8, %v5157_v59 }
 0x3af   : > { %5187 = vst.msk [vmem:[#allocation3 + $0x68] sm:$0xff] %vm1008_vm8, %v5155_v46 }
 0x3b3   : > { %v5220_v39 = vld [vmem:[#allocation3 + $0x70] sm:$0xff] }
 0x3b4   : > { %v5259_v63 = vadd.f32 %v9811_v5, %v5220_v39  ;;  %v5218_v6 = vld [vmem:[#allocation3 + $0x60] sm:$0xff] }
 0x3b5   : > { %v5257_v19 = vadd.f32 %v9811_v5, %v5218_v6  ;;  %v5221_v38 = vld [vmem:[#allocation3 + $0x78] sm:$0xff] }
 0x3b6   : > { %v5728_v62 = vmul.f32 -1.442695, %v5259_v63  ;;  %v5260_v60 = vadd.f32 %v9811_v5, %v5221_v38  ;;  %v5219_v22 = vld [vmem:[#allocation3 + $0x68] sm:$0xff]  ;;  %v4897_v38 = vld [vmem:[#allocation3 + $0xa0] sm:$0xff] }
 0x3b7   : > { %v5726_v35 = vmul.f32 -1.442695, %v5257_v19  ;;  %v5258_v56 = vadd.f32 %v9811_v5, %v5219_v22  ;;  %v4900_v22 = vld [vmem:[#allocation3 + $0xb8] sm:$0xff] }
 0x3b8   : > { %6201 = vpow2.f32 %v5728_v62  ;;  %v5729_v52 = vmul.f32 -1.442695, %v5260_v60 }
 0x3b9   : > { %6203 = vpow2.f32 %v5726_v35  ;;  %v5727_v51 = vmul.f32 -1.442695, %v5258_v56 }
 0x3ba   : > { %6205 = vpow2.f32 %v5729_v52 }
 0x3bb   : > { %6207 = vpow2.f32 %v5727_v51  ;;  %v4898_v51 = vld [vmem:[#allocation3 + $0xa8] sm:$0xff] }
 0x3c0   : > { %v5969_v42 = vpop.f32.mrb[76].mxu1 }
 0x3c1   : > { %v3787_v49 = vadd.f32 %v5969_v42, %v3522_v34  ;;  %v3742_v30 = vpop.f32.mrb[77].mxu1 }
 0x3c2   : > { %v3785_v48 = vadd.f32 %v3742_v30, %v3520_v4  ;;  %v5970_v28 = vpop.f32.mrb[78].mxu1  ;;  %v6202_v8 = vpop.eup %6201 }
 0x3c3   : > { %3819 = vst.msk [vmem:[#allocation3 + $0xf0] sm:$0xff] %vm1008_vm8, %v3787_v49  ;;  %v3788_v36 = vadd.f32 %v5970_v28, %v3523_v33  ;;  %v3745_v0 = vpop.f32.mrb[79].mxu1  ;;  %v6204_v1 = vpop.eup %6203  ;;  %v5387_v15 = vadd.f32 1.0, %v6202_v8 }
 0x3c4   : > { %3817 = vst.msk [vmem:[#allocation3 + $0xe0] sm:$0xff] %vm1008_vm8, %v3785_v48  ;;  %v3786_v25 = vadd.f32 %v3745_v0, %v3521_v23  ;;  %v6206_v47 = vpop.eup %6205  ;;  %v5385_v57 = vadd.f32 1.0, %v6204_v1 }
 0x3c5   : > { %3820 = vst.msk [vmem:[#allocation3 + $0xf8] sm:$0xff] %vm1008_vm8, %v3788_v36  ;;  %v6208_v32 = vpop.eup %6207  ;;  %6209 = vrcp.f32 %v5387_v15  ;;  %v5388_v31 = vadd.f32 1.0, %v6206_v47 }
 0x3c6   : > { %3818 = vst.msk [vmem:[#allocation3 + $0xe8] sm:$0xff] %vm1008_vm8, %v3786_v25  ;;  %6211 = vrcp.f32 %v5385_v57  ;;  %v5386_v20 = vadd.f32 1.0, %v6208_v32 }
 0x3c7   : > { %6213 = vrcp.f32 %v5388_v31 }
 0x3c8   : > { %6215 = vrcp.f32 %v5386_v20 }
 0x3cb   : > { %v5991_v43 = vpop.f32.mrb[64].mxu0 }
 0x3cc   : > { %v5160_v3 = vadd.f32 %v5991_v43, %v4895_v55  ;;  %v5079_v40 = vpop.f32.mrb[65].mxu0 }
 0x3cd   : > { %v5158_v24 = vadd.f32 %v5079_v40, %v4893_v17  ;;  %v5992_v27 = vpop.f32.mrb[66].mxu0 }
 0x3ce   : > { %5192 = vst.msk [vmem:[#allocation3 + $0x90] sm:$0xff] %vm1008_vm8, %v5160_v3  ;;  %v5161_v41 = vadd.f32 %v5992_v27, %v4896_v14  ;;  %v5082_v9 = vpop.f32.mrb[67].mxu0 }
 0x3cf   : > { %5190 = vst.msk [vmem:[#allocation3 + $0x80] sm:$0xff] %vm1008_vm8, %v5158_v24  ;;  %v5159_v21 = vadd.f32 %v5082_v9, %v4894_v2  ;;  %v6210_v16 = vpop.eup %6209  ;;  %v4903_v2 = vld [vmem:[#allocation3 + $0xd0] sm:$0xff] }
 0x3d0   : > { %5193 = vst.msk [vmem:[#allocation3 + $0x98] sm:$0xff] %vm1008_vm8, %v5161_v41  ;;  %v6212_v18 = vpop.eup %6211  ;;  %v5483_v37 = vmul.f32 %v6210_v16, %v5259_v63  ;;  %v4899_v63 = vld [vmem:[#allocation3 + $0xb0] sm:$0xff]  ;;  %v4901_v16 = vld [vmem:[#allocation3 + $0xc0] sm:$0xff] }
 0x3d1   : > { %5191 = vst.msk [vmem:[#allocation3 + $0x88] sm:$0xff] %vm1008_vm8, %v5159_v21  ;;  %v6214_v54 = vpop.eup %6213  ;;  %v5481_v44 = vmul.f32 %v6212_v18, %v5257_v19 }
 0x3d2   : > { %v6216_v50 = vpop.eup %6215  ;;  %5515 = vst.msk [vmem:[%s9858_s15 + $0x70] sm:$0xff] %vm1008_vm8, %v5483_v37  ;;  %v5484_v26 = vmul.f32 %v6214_v54, %v5260_v60 }
 0x3d3   : > { %5513 = vst.msk [vmem:[%s9858_s15 + $0x60] sm:$0xff] %vm1008_vm8, %v5481_v44  ;;  %v5482_v11 = vmul.f32 %v6216_v50, %v5258_v56  ;;  %v4904_v44 = vld [vmem:[#allocation3 + $0xd8] sm:$0xff] }
 0x3d4   : > { %5516 = vst.msk [vmem:[%s9858_s15 + $0x78] sm:$0xff] %vm1008_vm8, %v5484_v26 }
 0x3d5   : > { %v5224_v45 = vld [vmem:[#allocation3 + $0x90] sm:$0xff]  ;;  %5514 = vst.msk [vmem:[%s9858_s15 + $0x68] sm:$0xff] %vm1008_vm8, %v5482_v11 }
 0x3d6   : > { %v5263_v53 = vadd.f32 %v9811_v5, %v5224_v45  ;;  %v5222_v58 = vld [vmem:[#allocation3 + $0x80] sm:$0xff] }
 0x3d7   : > { %v5261_v10 = vadd.f32 %v9811_v5, %v5222_v58  ;;  %v5225_v13 = vld [vmem:[#allocation3 + $0x98] sm:$0xff] }
 0x3d8   : > { %v5732_v61 = vmul.f32 -1.442695, %v5263_v53  ;;  %v5264_v29 = vadd.f32 %v9811_v5, %v5225_v13  ;;  %v5223_v59 = vld [vmem:[#allocation3 + $0x88] sm:$0xff] }
 0x3d9   : > { %v5730_v7 = vmul.f32 -1.442695, %v5261_v10  ;;  %v5262_v12 = vadd.f32 %v9811_v5, %v5223_v59 }
 0x3da   : > { %6217 = vpow2.f32 %v5732_v61  ;;  %v5733_v46 = vmul.f32 -1.442695, %v5264_v29 }
 0x3db   : > { %6219 = vpow2.f32 %v5730_v7  ;;  %v5731_v39 = vmul.f32 -1.442695, %v5262_v12 }
 0x3dc   : > { %6221 = vpow2.f32 %v5733_v46 }
 0x3dd   : > { %6223 = vpow2.f32 %v5731_v39 }
 0x3e1   : > { %v5995_v6 = vpop.f32.mrb[68].mxu0 }
 0x3e2   : > { %v5164_v19 = vadd.f32 %v5995_v6, %v4899_v63  ;;  %v5095_v62 = vpop.f32.mrb[69].mxu0 }
 0x3e3   : > { %v5162_v60 = vadd.f32 %v5095_v62, %v4897_v38  ;;  %v5996_v35 = vpop.f32.mrb[70].mxu0 }
 0x3e4   : > { %v6218_v56 = vpop.eup %6217  ;;  %5196 = vst.msk [vmem:[#allocation3 + $0xb0] sm:$0xff] %vm1008_vm8, %v5164_v19  ;;  %v5165_v52 = vadd.f32 %v5996_v35, %v4900_v22  ;;  %v5098_v34 = vpop.f32.mrb[71].mxu0 }
 0x3e5   : > { %v6220_v42 = vpop.eup %6219  ;;  %v5391_v49 = vadd.f32 1.0, %v6218_v56  ;;  %5194 = vst.msk [vmem:[#allocation3 + $0xa0] sm:$0xff] %vm1008_vm8, %v5162_v60  ;;  %v5163_v4 = vadd.f32 %v5098_v34, %v4898_v51 }
 0x3e6   : > { %v6222_v30 = vpop.eup %6221  ;;  %v5389_v48 = vadd.f32 1.0, %v6220_v42  ;;  %5197 = vst.msk [vmem:[#allocation3 + $0xb8] sm:$0xff] %vm1008_vm8, %v5165_v52 }
 0x3e7   : > { %v6224_v33 = vpop.eup %6223  ;;  %6225 = vrcp.f32 %v5391_v49  ;;  %v5392_v28 = vadd.f32 1.0, %v6222_v30  ;;  %5195 = vst.msk [vmem:[#allocation3 + $0xa8] sm:$0xff] %vm1008_vm8, %v5163_v4 }
 0x3e8   : > { %6227 = vrcp.f32 %v5389_v48  ;;  %v5390_v8 = vadd.f32 1.0, %v6224_v33  ;;  %v4907_v33 = vld [vmem:[#allocation3 + $0xf0] sm:$0xff] }
 0x3e9   : > { %6229 = vrcp.f32 %v5392_v28 }
 0x3ea   : > { %6231 = vrcp.f32 %v5390_v8 }
 0x3eb   : > { %v5228_v36 = vld [vmem:[#allocation3 + $0xb0] sm:$0xff] }
 0x3ec   : > { %v9937_v23 = vadd.f32 %v9811_v5, %v5228_v36  ;;  %v5226_v0 = vld [vmem:[#allocation3 + $0xa0] sm:$0xff] }
 0x3ed   : > { %v9940_v1 = vadd.f32 %v9811_v5, %v5226_v0  ;;  %v5229_v15 = vld [vmem:[#allocation3 + $0xb8] sm:$0xff]  ;;  %v4905_v36 = vld [vmem:[#allocation3 + $0xe0] sm:$0xff] }
 0x3ee   : > { %v5736_v25 = vmul.f32 -1.442695, %v9937_v23  ;;  %v9944_v47 = vadd.f32 %v9811_v5, %v5229_v15  ;;  %v5227_v57 = vld [vmem:[#allocation3 + $0xa8] sm:$0xff] }
 0x3ef   : > { %v5734_v32 = vmul.f32 -1.442695, %v9940_v1  ;;  %v9948_v31 = vadd.f32 %v9811_v5, %v5227_v57  ;;  %v4906_v57 = vld [vmem:[#allocation3 + $0xe8] sm:$0xff] }
 0x3f0   : > { %6233 = vpow2.f32 %v5736_v25  ;;  %v5737_v20 = vmul.f32 -1.442695, %v9944_v47 }
 0x3f1   : > { %v6226_v55 = vpop.eup %6225  ;;  %6235 = vpow2.f32 %v5734_v32  ;;  %v5735_v43 = vmul.f32 -1.442695, %v9948_v31 }
 0x3f2   : > { %v6228_v3 = vpop.eup %6227  ;;  %v5487_v17 = vmul.f32 %v6226_v55, %v5263_v53  ;;  %6237 = vpow2.f32 %v5737_v20  ;;  %v4902_v53 = vld [vmem:[#allocation3 + $0xc8] sm:$0xff] }
 0x3f3   : > { %v6230_v40 = vpop.eup %6229  ;;  %v5485_v24 = vmul.f32 %v6228_v3, %v5261_v10  ;;  %6239 = vpow2.f32 %v5735_v43 }
 0x3f4   : > { %v6232_v14 = vpop.eup %6231  ;;  %5519 = vst.msk [vmem:[%s9858_s15 + $0x90] sm:$0xff] %vm1008_vm8, %v5487_v17  ;;  %v5488_v27 = vmul.f32 %v6230_v40, %v5264_v29 }
 0x3f5   : > { %5517 = vst.msk [vmem:[%s9858_s15 + $0x80] sm:$0xff] %vm1008_vm8, %v5485_v24  ;;  %v5486_v41 = vmul.f32 %v6232_v14, %v5262_v12 }
 0x3f6   : > { %5520 = vst.msk [vmem:[%s9858_s15 + $0x98] sm:$0xff] %vm1008_vm8, %v5488_v27 }
 0x3f7   : > { %5518 = vst.msk [vmem:[%s9858_s15 + $0x88] sm:$0xff] %vm1008_vm8, %v5486_v41 }
 0x3f8   : > { %v5999_v9 = vpop.f32.mrb[72].mxu0 }
 0x3f9   : > { %v5168_v21 = vadd.f32 %v5999_v9, %v4903_v2  ;;  %v5111_v18 = vpop.f32.mrb[73].mxu0 }
 0x3fa   : > { %v6234_v37 = vpop.eup %6233  ;;  %v5166_v54 = vadd.f32 %v5111_v18, %v4901_v16  ;;  %v6000_v50 = vpop.f32.mrb[74].mxu0 }
 0x3fb   : > { %v6236_v26 = vpop.eup %6235  ;;  %v5395_v11 = vadd.f32 1.0, %v6234_v37  ;;  %5200 = vst.msk [vmem:[#allocation3 + $0xd0] sm:$0xff] %vm1008_vm8, %v5168_v21  ;;  %v5169_v45 = vadd.f32 %v6000_v50, %v4904_v44  ;;  %v5114_v58 = vpop.f32.mrb[75].mxu0 }
 0x3fc   : > { %v6238_v10 = vpop.eup %6237  ;;  %v5393_v13 = vadd.f32 1.0, %v6236_v26  ;;  %5198 = vst.msk [vmem:[#allocation3 + $0xc0] sm:$0xff] %vm1008_vm8, %v5166_v54  ;;  %v5167_v61 = vadd.f32 %v5114_v58, %v4902_v53 }
 0x3fd   : > { %v6240_v29 = vpop.eup %6239  ;;  %6241 = vrcp.f32 %v5395_v11  ;;  %v5396_v59 = vadd.f32 1.0, %v6238_v10  ;;  %5201 = vst.msk [vmem:[#allocation3 + $0xd8] sm:$0xff] %vm1008_vm8, %v5169_v45 }
 0x3fe   : > { %6243 = vrcp.f32 %v5393_v13  ;;  %v5394_v7 = vadd.f32 1.0, %v6240_v29  ;;  %5199 = vst.msk [vmem:[#allocation3 + $0xc8] sm:$0xff] %vm1008_vm8, %v5167_v61 }
 0x3ff   : > { %6245 = vrcp.f32 %v5396_v59 }
 0x400   : > { %6247 = vrcp.f32 %v5394_v7 }
 0x402   : > { %v5232_v12 = vld [vmem:[#allocation3 + $0xd0] sm:$0xff] }
 0x403   : > { %v9965_v46 = vadd.f32 %v9811_v5, %v5232_v12  ;;  %v5230_v39 = vld [vmem:[#allocation3 + $0xc0] sm:$0xff] }
 0x404   : > { %v9968_v63 = vadd.f32 %v9811_v5, %v5230_v39  ;;  %v5233_v6 = vld [vmem:[#allocation3 + $0xd8] sm:$0xff] }
 0x405   : > { %v5740_v19 = vmul.f32 -1.442695, %v9965_v46  ;;  %v9972_v38 = vadd.f32 %v9811_v5, %v5233_v6  ;;  %v5231_v62 = vld [vmem:[#allocation3 + $0xc8] sm:$0xff] }
 0x406   : > { %v5738_v60 = vmul.f32 -1.442695, %v9968_v63  ;;  %v9976_v22 = vadd.f32 %v9811_v5, %v5231_v62 }
 0x407   : > { %v6242_v35 = vpop.eup %6241  ;;  %6249 = vpow2.f32 %v5740_v19  ;;  %v5741_v56 = vmul.f32 -1.442695, %v9972_v38 }
 0x408   : > { %v6244_v52 = vpop.eup %6243  ;;  %v5491_v51 = vmul.f32 %v6242_v35, %v9937_v23  ;;  %6251 = vpow2.f32 %v5738_v60  ;;  %v5739_v34 = vmul.f32 -1.442695, %v9976_v22 }
 0x409   : > { %v6246_v42 = vpop.eup %6245  ;;  %v5489_v49 = vmul.f32 %v6244_v52, %v9940_v1  ;;  %6253 = vpow2.f32 %v5741_v56  ;;  %v4908_v1 = vld [vmem:[#allocation3 + $0xf8] sm:$0xff] }
 0x40a   : > { %v6248_v4 = vpop.eup %6247  ;;  %5523 = vst.msk [vmem:[%s9858_s15 + $0xb0] sm:$0xff] %vm1008_vm8, %v5491_v51  ;;  %v5492_v30 = vmul.f32 %v6246_v42, %v9944_v47  ;;  %6255 = vpow2.f32 %v5739_v34 }
 0x40b   : > { %5521 = vst.msk [vmem:[%s9858_s15 + $0xa0] sm:$0xff] %vm1008_vm8, %v5489_v49  ;;  %v5490_v48 = vmul.f32 %v6248_v4, %v9948_v31 }
 0x40c   : > { %5524 = vst.msk [vmem:[%s9858_s15 + $0xb8] sm:$0xff] %vm1008_vm8, %v5492_v30 }
 0x40d   : > { %5522 = vst.msk [vmem:[%s9858_s15 + $0xa8] sm:$0xff] %vm1008_vm8, %v5490_v48 }
 0x40e   : > { %v6003_v28 = vpop.f32.mrb[76].mxu0 }
 0x40f   : > { %v5172_v8 = vadd.f32 %v6003_v28, %v4907_v33  ;;  %v5127_v23 = vpop.f32.mrb[77].mxu0 }
 0x410   : > { %v5170_v0 = vadd.f32 %v5127_v23, %v4905_v36  ;;  %v6004_v15 = vpop.f32.mrb[78].mxu0 }
 0x411   : > { %v6250_v25 = vpop.eup %6249  ;;  %5204 = vst.msk [vmem:[#allocation3 + $0xf0] sm:$0xff] %vm1008_vm8, %v5172_v8  ;;  %v5173_v47 = vadd.f32 %v6004_v15, %v4908_v1  ;;  %v5130_v32 = vpop.f32.mrb[79].mxu0 }
 0x412   : > { %v6252_v20 = vpop.eup %6251  ;;  %v5399_v31 = vadd.f32 1.0, %v6250_v25  ;;  %5202 = vst.msk [vmem:[#allocation3 + $0xe0] sm:$0xff] %vm1008_vm8, %v5170_v0  ;;  %v5171_v55 = vadd.f32 %v5130_v32, %v4906_v57 }
 0x413   : > { %v6254_v43 = vpop.eup %6253  ;;  %v5397_v3 = vadd.f32 1.0, %v6252_v20  ;;  %5205 = vst.msk [vmem:[#allocation3 + $0xf8] sm:$0xff] %vm1008_vm8, %v5173_v47 }
 0x414   : > { %v6256_v17 = vpop.eup %6255  ;;  %6257 = vrcp.f32 %v5399_v31  ;;  %v5400_v40 = vadd.f32 1.0, %v6254_v43  ;;  %5203 = vst.msk [vmem:[#allocation3 + $0xe8] sm:$0xff] %vm1008_vm8, %v5171_v55 }
 0x415   : > { %6259 = vrcp.f32 %v5397_v3  ;;  %v5398_v24 = vadd.f32 1.0, %v6256_v17 }
 0x416   : > { %6261 = vrcp.f32 %v5400_v40 }
 0x417   : > { %6263 = vrcp.f32 %v5398_v24 }
 0x418   : > { %v5236_v14 = vld [vmem:[#allocation3 + $0xf0] sm:$0xff] }
 0x419   : > { %v5275_v27 = vadd.f32 %v9811_v5, %v5236_v14  ;;  %v5234_v41 = vld [vmem:[#allocation3 + $0xe0] sm:$0xff] }
 0x41a   : > { %v5273_v2 = vadd.f32 %v9811_v5, %v5234_v41  ;;  %v5237_v9 = vld [vmem:[#allocation3 + $0xf8] sm:$0xff] }
 0x41b   : > { %v5744_v21 = vmul.f32 -1.442695, %v5275_v27  ;;  %v5276_v16 = vadd.f32 %v9811_v5, %v5237_v9  ;;  %v5235_v18 = vld [vmem:[#allocation3 + $0xe8] sm:$0xff] }
 0x41c   : > { %v5742_v37 = vmul.f32 -1.442695, %v5273_v2  ;;  %v5274_v54 = vadd.f32 %v9811_v5, %v5235_v18 }
 0x41d   : > { %6265 = vpow2.f32 %v5744_v21  ;;  %v5745_v44 = vmul.f32 -1.442695, %v5276_v16 }
 0x41e   : > { %v6258_v50 = vpop.eup %6257  ;;  %6267 = vpow2.f32 %v5742_v37  ;;  %v5743_v26 = vmul.f32 -1.442695, %v5274_v54 }
 0x41f   : > { %v6260_v11 = vpop.eup %6259  ;;  %v5495_v45 = vmul.f32 %v6258_v50, %v9965_v46  ;;  %6269 = vpow2.f32 %v5745_v44 }
 0x420   : > { %v6262_v53 = vpop.eup %6261  ;;  %v5493_v58 = vmul.f32 %v6260_v11, %v9968_v63  ;;  %6271 = vpow2.f32 %v5743_v26 }
 0x421   : > { %v6264_v10 = vpop.eup %6263  ;;  %5527 = vst.msk [vmem:[%s9858_s15 + $0xd0] sm:$0xff] %vm1008_vm8, %v5495_v45  ;;  %v5496_v5 = vmul.f32 %v6262_v53, %v9972_v38 }
 0x422   : > { %5525 = vst.msk [vmem:[%s9858_s15 + $0xc0] sm:$0xff] %vm1008_vm8, %v5493_v58  ;;  %v5494_v13 = vmul.f32 %v6264_v10, %v9976_v22 }
 0x423   : > { %5528 = vst.msk [vmem:[%s9858_s15 + $0xd8] sm:$0xff] %vm1008_vm8, %v5496_v5 }
 0x424   : > { %5526 = vst.msk [vmem:[%s9858_s15 + $0xc8] sm:$0xff] %vm1008_vm8, %v5494_v13 }
 0x427   : > { %v6266_v61 = vpop.eup %6265 }
 0x428   : > { %v6268_v29 = vpop.eup %6267  ;;  %v5403_v59 = vadd.f32 1.0, %v6266_v61 }
 0x429   : > { %v6270_v7 = vpop.eup %6269  ;;  %v5401_v12 = vadd.f32 1.0, %v6268_v29 }
 0x42a   : > { %v6272_v46 = vpop.eup %6271  ;;  %6273 = vrcp.f32 %v5403_v59  ;;  %v5404_v39 = vadd.f32 1.0, %v6270_v7 }
 0x42b   : > { %6275 = vrcp.f32 %v5401_v12  ;;  %v5402_v63 = vadd.f32 1.0, %v6272_v46 }
 0x42c   : > { %6277 = vrcp.f32 %v5404_v39 }
 0x42d   : > { %6279 = vrcp.f32 %v5402_v63 }
 0x434   : > { %v6274_v6 = vpop.eup %6273 }
 0x435   : > { %v6276_v19 = vpop.eup %6275  ;;  %v5499_v38 = vmul.f32 %v6274_v6, %v5275_v27 }
 0x436   : > { %v6278_v62 = vpop.eup %6277  ;;  %v5497_v60 = vmul.f32 %v6276_v19, %v5273_v2 }
 0x437   : > { %v6280_v22 = vpop.eup %6279  ;;  %5531 = vst.msk [vmem:[%s9858_s15 + $0xf0] sm:$0xff] %vm1008_vm8, %v5499_v38  ;;  %v5500_v35 = vmul.f32 %v6278_v62, %v5276_v16 }
 0x438   : > { %5529 = vst.msk [vmem:[%s9858_s15 + $0xe0] sm:$0xff] %vm1008_vm8, %v5497_v60  ;;  %v5498_v56 = vmul.f32 %v6280_v22, %v5274_v54 }
 0x439   : > { %5532 = vst.msk [vmem:[%s9858_s15 + $0xf8] sm:$0xff] %vm1008_vm8, %v5500_v35 }
 0x43a   : > { %5530 = vst.msk [vmem:[%s9858_s15 + $0xe8] sm:$0xff] %vm1008_vm8, %v5498_v56 }
 0x43b PF: > { %s15_s18 = sadd.s32 1, %s6301_s18  }
 0x43c   : > { %p12_p4 = scmp.ge.s32.totalorder %s15_s18, 4  }
 0x43e   :  { %14 = sbr.rel (!%p12_p4) target bundleno = 1 (0x1), region = 75 }

</bundles_post_ra>
